<compile_context>
chip_gen: v6e
topology: v6e:2x2x1
jax: 0.10.0
libtpu: 0.0.40
codegen_flags: <defaults>
</compile_context>

<pallas_src>
import jax
import jax.numpy as jnp
from jax.experimental import pallas as pl
from jax.experimental.pallas import tpu as pltpu

# `words = dict()` in the reference module gives vocab size 0 (degenerate);
# we pick a small synthetic vocabulary instead.
VOCAB = 32
EMB = 10
HID = 20

# Lane-aligned padded sizes (TPU vreg lane width = 128).
EMBP = 128              # padded embedding width (K of the batched input matmul)
HIDP = 128              # padded hidden width -> gate slices are lane-aligned
GATES = 4 * HIDP        # 512: i/f/g/o each owns its own 128-lane block

# TODO(synk): nn.LSTM dropout=0.5 between layers is train-time-only / stochastic;
# this kernel implements eval-mode semantics (no dropout).


def botbrain_kernel(x_ref,       # (T, EMBP)         padded embedded tokens
                    wih0_ref,    # (EMBP, GATES)     layer-0 input weights (gate-blocked)
                    b0_ref,      # (1, GATES)        b_ih0 + b_hh0 (gate-blocked)
                    wih1_ref,    # (HIDP, GATES)     layer-1 input weights (gate-blocked)
                    b1_ref,      # (1, GATES)        b_ih1 + b_hh1 (gate-blocked)
                    wrec_ref,    # (2*HIDP, 2*GATES) block-diag fused [whh0 | whh1]
                    wout_ref,    # (HIDP, VOCAB)     output projection
                    bout_ref,    # (1, VOCAB)
                    out_ref,     # (T, VOCAB)        log-probs
                    xg0_ref,     # VMEM scratch (T, GATES)
                    h1s_ref):    # VMEM scratch (T, HIDP)
    T = x_ref.shape[0]

    wih1 = wih1_ref[...]
    b1 = b1_ref[...]
    wrec = wrec_ref[...]

    # ---- hoisted: layer-0 input gate pre-activations for ALL timesteps ------
    xg0_ref[...] = (jnp.dot(x_ref[...], wih0_ref[...],
                            preferred_element_type=jnp.float32) + b0_ref[...])

    def cell(gates, c):
        # each gate lives in its own 128-lane block -> pure lane-block slices
        i = jax.nn.sigmoid(gates[:, 0 * HIDP:1 * HIDP])
        f = jax.nn.sigmoid(gates[:, 1 * HIDP:2 * HIDP])
        g = jnp.tanh(gates[:, 2 * HIDP:3 * HIDP])
        o = jax.nn.sigmoid(gates[:, 3 * HIDP:4 * HIDP])
        c_new = f * c + i * g
        return o * jnp.tanh(c_new), c_new

    zeros = jnp.zeros((1, HIDP), jnp.float32)
    h0, c0, h1, c1 = zeros, zeros, zeros, zeros

    # ---- serial recurrence, fully unrolled (T static & small) ---------------
    for t in range(T):
        hh = jnp.concatenate([h0, h1], axis=1)                       # (1, 2*HIDP)
        # ONE fused recurrent matmul for both layers (block-diagonal weights)
        rg = jnp.dot(hh, wrec, preferred_element_type=jnp.float32)   # (1, 2*GATES)

        g0 = xg0_ref[pl.ds(t, 1), :] + rg[:, 0:GATES]
        h0, c0 = cell(g0, c0)

        g1 = (jnp.dot(h0, wih1, preferred_element_type=jnp.float32)
              + rg[:, GATES:2 * GATES] + b1)
        h1, c1 = cell(g1, c1)

        h1s_ref[pl.ds(t, 1), :] = h1

    # ---- hoisted: output projection + log_softmax, one batched store --------
    logits = (jnp.dot(h1s_ref[...], wout_ref[...],
                      preferred_element_type=jnp.float32) + bout_ref[...])
    z = logits - jnp.max(logits, axis=-1, keepdims=True)
    out_ref[...] = z - jnp.log(jnp.sum(jnp.exp(z), axis=-1, keepdims=True))


# ----------------------------- wrapper / glue ---------------------------------

def _gate_block_cols(w_t):
    """(in, 4*HID) -> (in, GATES): gate k's HID columns at lane offset k*HIDP."""
    blocks = []
    for k in range(4):
        blk = w_t[:, k * HID:(k + 1) * HID]
        blocks.append(jnp.pad(blk, ((0, 0), (0, HIDP - HID))))
    return jnp.concatenate(blocks, axis=1)


def _gate_block_bias(b):
    """(4*HID,) -> (1, GATES) with the same per-gate 128-lane blocking."""
    blocks = [jnp.pad(b[k * HID:(k + 1) * HID], (0, HIDP - HID)) for k in range(4)]
    return jnp.concatenate(blocks).reshape(1, GATES)


def botbrain_forward(cs, params):
    """cs: int32 token ids (T,). Returns (T, VOCAB) log-probs (PyTorch eval semantics)."""
    # glue: embedding gather, pad to lane-aligned width
    x_emb = jnp.take(params["emb"], cs, axis=0).astype(jnp.float32)      # (T, EMB)
    T = x_emb.shape[0]
    x_p = jnp.pad(x_emb, ((0, 0), (0, EMBP - EMB)))                      # (T, EMBP)

    # glue: pad / gate-block / fuse weights (all zero-padded -> exact math)
    wih0_p = jnp.zeros((EMBP, GATES), jnp.float32)
    wih0_p = wih0_p.at[:EMB].set(_gate_block_cols(params["w_ih0"].T))
    b0_p = _gate_block_bias(params["b_ih0"] + params["b_hh0"])

    wih1_p = jnp.zeros((HIDP, GATES), jnp.float32)
    wih1_p = wih1_p.at[:HID].set(_gate_block_cols(params["w_ih1"].T))
    b1_p = _gate_block_bias(params["b_ih1"] + params["b_hh1"])

    # block-diagonal fused recurrent weight: [h0 | h1] @ w_rec -> [gates0 | gates1]
    w_rec = jnp.zeros((2 * HIDP, 2 * GATES), jnp.float32)
    w_rec = w_rec.at[0:HID, 0:GATES].set(_gate_block_cols(params["w_hh0"].T))
    w_rec = w_rec.at[HIDP:HIDP + HID, GATES:2 * GATES].set(
        _gate_block_cols(params["w_hh1"].T))

    wout_p = jnp.zeros((HIDP, VOCAB), jnp.float32)
    wout_p = wout_p.at[:HID].set(params["w_out"].T)
    bout_p = params["b_out"].reshape(1, VOCAB)

    vmem = pl.BlockSpec(memory_space=pltpu.MemorySpace.VMEM)
    return pl.pallas_call(
        botbrain_kernel,
        out_shape=jax.ShapeDtypeStruct((T, VOCAB), jnp.float32),
        in_specs=[vmem] * 8,
        out_specs=vmem,
        scratch_shapes=[pltpu.VMEM((T, GATES), jnp.float32),   # xg0 (input gates)
                        pltpu.VMEM((T, HIDP), jnp.float32)],   # h1 history
    )(x_p, wih0_p, b0_p, wih1_p, b1_p, w_rec, wout_p, bout_p)


# ----------------------------- reference & test --------------------------------

def botbrain_reference(cs, params):
    """Pure-JAX reference of the eval-mode forward (high-precision matmuls)."""
    hp = jax.lax.Precision.HIGHEST
    x = jnp.take(params["emb"], cs, axis=0).astype(jnp.float32)
    T = x.shape[0]

    def cell(x_t, h, c, w_ih, w_hh, b_ih, b_hh):
        g = (jnp.dot(x_t, w_ih.T, precision=hp)
             + jnp.dot(h, w_hh.T, precision=hp) + b_ih + b_hh)
        i = jax.nn.sigmoid(g[0 * HID:1 * HID])
        f = jax.nn.sigmoid(g[1 * HID:2 * HID])
        gg = jnp.tanh(g[2 * HID:3 * HID])
        o = jax.nn.sigmoid(g[3 * HID:4 * HID])
        c = f * c + i * gg
        return o * jnp.tanh(c), c

    h0 = c0 = h1 = c1 = jnp.zeros((HID,), jnp.float32)
    hs = []
    for t in range(T):
        h0, c0 = cell(x[t], h0, c0, params["w_ih0"], params["w_hh0"],
                      params["b_ih0"], params["b_hh0"])
        h1, c1 = cell(h0, h1, c1, params["w_ih1"], params["w_hh1"],
                      params["b_ih1"], params["b_hh1"])
        hs.append(h1)
    h1s = jnp.stack(hs)                                                 # (T, HID)
    logits = jnp.dot(h1s, params["w_out"].T, precision=hp) + params["b_out"]
    return jax.nn.log_softmax(logits, axis=-1)


def init_params(key):
    """Deterministic synthetic parameters matching the PyTorch shapes."""
    ks = jax.random.split(key, 12)
    u = lambda k, shape, s: jax.random.uniform(k, shape, jnp.float32, -s, s)
    s_lstm = 1.0 / jnp.sqrt(HID)
    return {
        "emb":   jax.random.normal(ks[0], (VOCAB, EMB), jnp.float32),
        # layer 0: input size EMB
        "w_ih0": u(ks[1], (4 * HID, EMB), s_lstm),
        "w_hh0": u(ks[2], (4 * HID, HID), s_lstm),
        "b_ih0": u(ks[3], (4 * HID,), s_lstm),
        "b_hh0": u(ks[4], (4 * HID,), s_lstm),
        # layer 1: input size HID
        "w_ih1": u(ks[5], (4 * HID, HID), s_lstm),
        "w_hh1": u(ks[6], (4 * HID, HID), s_lstm),
        "b_ih1": u(ks[7], (4 * HID,), s_lstm),
        "b_hh1": u(ks[8], (4 * HID,), s_lstm),
        # output linear: (VOCAB, HID)
        "w_out": u(ks[9], (VOCAB, HID), 1.0 / jnp.sqrt(HID)),
        "b_out": u(ks[10], (VOCAB,), 1.0 / jnp.sqrt(HID)),
    }


if __name__ == "__main__":
    key = jax.random.PRNGKey(0)
    pkey, tkey = jax.random.split(key)
    params = init_params(pkey)

    T = 8  # sequence length
    cs = jax.random.randint(tkey, (T,), 0, VOCAB, dtype=jnp.int32)

    out = jax.block_until_ready(botbrain_forward(cs, params))
    assert out.shape == (T, VOCAB)
    # log_softmax rows should sum (in prob space) to ~1
    assert bool(jnp.all(jnp.abs(jnp.sum(jnp.exp(out), axis=-1) - 1.0) < 1e-4))
    # matches the pure-JAX reference LSTM
    ref = jax.block_until_ready(botbrain_reference(cs, params))
    max_err = float(jnp.max(jnp.abs(out - ref)))
    assert max_err < 2e-3, max_err
    print("KERNEL_OK")
</pallas_src>

<mosaic_0001>
module attributes {stable_mosaic.version = 11 : i64} {
  func.func @botbrain_kernel(%arg0: memref<8x128xf32, #tpu.memory_space<vmem>>, %arg1: memref<128x512xf32, #tpu.memory_space<vmem>>, %arg2: memref<1x512xf32, #tpu.memory_space<vmem>>, %arg3: memref<128x512xf32, #tpu.memory_space<vmem>>, %arg4: memref<1x512xf32, #tpu.memory_space<vmem>>, %arg5: memref<256x1024xf32, #tpu.memory_space<vmem>>, %arg6: memref<128x32xf32, #tpu.memory_space<vmem>>, %arg7: memref<1x32xf32, #tpu.memory_space<vmem>>, %arg8: memref<8x32xf32, #tpu.memory_space<vmem>>, %arg9: memref<8x512xf32, #tpu.memory_space<vmem>>, %arg10: memref<8x128xf32, #tpu.memory_space<vmem>>) attributes {dimension_semantics = [], scalar_prefetch = 0 : i64, scratch_operands = 2 : i64, tpu.core_type = #tpu.core_type<tc>} {
    %c0 = arith.constant 0 : index
    %c0_0 = arith.constant 0 : index
    %0 = vector.load %arg3[%c0, %c0_0] : memref<128x512xf32, #tpu.memory_space<vmem>>, vector<128x512xf32>
    %c0_1 = arith.constant 0 : index
    %c0_2 = arith.constant 0 : index
    %1 = vector.load %arg4[%c0_1, %c0_2] : memref<1x512xf32, #tpu.memory_space<vmem>>, vector<1x512xf32>
    %c0_3 = arith.constant 0 : index
    %c0_4 = arith.constant 0 : index
    %2 = vector.load %arg5[%c0_3, %c0_4] : memref<256x1024xf32, #tpu.memory_space<vmem>>, vector<256x1024xf32>
    %c0_5 = arith.constant 0 : index
    %c0_6 = arith.constant 0 : index
    %3 = vector.load %arg0[%c0_5, %c0_6] : memref<8x128xf32, #tpu.memory_space<vmem>>, vector<8x128xf32>
    %c0_7 = arith.constant 0 : index
    %c0_8 = arith.constant 0 : index
    %4 = vector.load %arg1[%c0_7, %c0_8] : memref<128x512xf32, #tpu.memory_space<vmem>>, vector<128x512xf32>
    %cst = arith.constant dense<0.000000e+00> : vector<8x512xf32>
    %5 = tpu.matmul %3, %4, %cst {dimension_numbers = #tpu.dot_dimension_numbers<[1], [0], [0], [1], [0, 0, 1, 1], [], []>} : vector<8x128xf32>, vector<128x512xf32>, vector<8x512xf32> -> vector<8x512xf32>
    %c0_9 = arith.constant 0 : index
    %c0_10 = arith.constant 0 : index
    %6 = vector.load %arg2[%c0_9, %c0_10] : memref<1x512xf32, #tpu.memory_space<vmem>>, vector<1x512xf32>
    %7 = vector.broadcast %6 : vector<1x512xf32> to vector<8x512xf32>
    %8 = arith.addf %5, %7 : vector<8x512xf32>
    %c0_11 = arith.constant 0 : index
    %c0_12 = arith.constant 0 : index
    %9 = vector.load %arg9[%c0_11, %c0_12] : memref<8x512xf32, #tpu.memory_space<vmem>>, vector<8x512xf32>
    tpu.vector_store %arg9[%c0_11, %c0_12], %8 {strides = array<i32>} : memref<8x512xf32, #tpu.memory_space<vmem>>, vector<8x512xf32>,
    %cst_13 = arith.constant 0.000000e+00 : f32
    %10 = vector.broadcast %cst_13 : f32 to vector<1x128xf32>
    %11 = tpu.concatenate %10, %10 in 1 : vector<1x128xf32>, vector<1x128xf32> -> vector<1x256xf32>
    %cst_14 = arith.constant dense<0.000000e+00> : vector<1x1024xf32>
    %12 = tpu.matmul %11, %2, %cst_14 {dimension_numbers = #tpu.dot_dimension_numbers<[1], [0], [0], [1], [0, 0, 1, 1], [], []>} : vector<1x256xf32>, vector<256x1024xf32>, vector<1x1024xf32> -> vector<1x1024xf32>
    %c0_15 = arith.constant 0 : index
    %c0_16 = arith.constant 0 : index
    %13 = vector.load %arg9[%c0_15, %c0_16] : memref<8x512xf32, #tpu.memory_space<vmem>>, vector<1x512xf32>
    %14 = vector.extract_strided_slice %12 {offsets = [0, 0], sizes = [1, 512], strides = [1, 1]} : vector<1x1024xf32> to vector<1x512xf32>
    %15 = arith.addf %13, %14 : vector<1x512xf32>
    %16 = vector.extract_strided_slice %15 {offsets = [0, 0], sizes = [1, 128], strides = [1, 1]} : vector<1x512xf32> to vector<1x128xf32>
    %17 = arith.negf %16 : vector<1x128xf32>
    %18 = math.exp %17 : vector<1x128xf32>
    %cst_17 = arith.constant 1.000000e+00 : f32
    %19 = vector.broadcast %cst_17 : f32 to vector<1x128xf32>
    %20 = arith.addf %19, %18 : vector<1x128xf32>
    %21 = arith.divf %19, %20 : vector<1x128xf32>
    %22 = vector.extract_strided_slice %15 {offsets = [0, 128], sizes = [1, 128], strides = [1, 1]} : vector<1x512xf32> to vector<1x128xf32>
    %23 = arith.negf %22 : vector<1x128xf32>
    %24 = math.exp %23 : vector<1x128xf32>
    %cst_18 = arith.constant 1.000000e+00 : f32
    %25 = vector.broadcast %cst_18 : f32 to vector<1x128xf32>
    %26 = arith.addf %25, %24 : vector<1x128xf32>
    %27 = arith.divf %25, %26 : vector<1x128xf32>
    %28 = vector.extract_strided_slice %15 {offsets = [0, 256], sizes = [1, 128], strides = [1, 1]} : vector<1x512xf32> to vector<1x128xf32>
    %29 = math.tanh %28 : vector<1x128xf32>
    %30 = vector.extract_strided_slice %15 {offsets = [0, 384], sizes = [1, 128], strides = [1, 1]} : vector<1x512xf32> to vector<1x128xf32>
    %31 = arith.negf %30 : vector<1x128xf32>
    %32 = math.exp %31 : vector<1x128xf32>
    %cst_19 = arith.constant 1.000000e+00 : f32
    %33 = vector.broadcast %cst_19 : f32 to vector<1x128xf32>
    %34 = arith.addf %33, %32 : vector<1x128xf32>
    %35 = arith.divf %33, %34 : vector<1x128xf32>
    %36 = arith.mulf %27, %10 : vector<1x128xf32>
    %37 = arith.mulf %21, %29 : vector<1x128xf32>
    %38 = arith.addf %36, %37 : vector<1x128xf32>
    %39 = math.tanh %38 : vector<1x128xf32>
    %40 = arith.mulf %35, %39 : vector<1x128xf32>
    %cst_20 = arith.constant dense<0.000000e+00> : vector<1x512xf32>
    %41 = tpu.matmul %40, %0, %cst_20 {dimension_numbers = #tpu.dot_dimension_numbers<[1], [0], [0], [1], [0, 0, 1, 1], [], []>} : vector<1x128xf32>, vector<128x512xf32>, vector<1x512xf32> -> vector<1x512xf32>
    %42 = vector.extract_strided_slice %12 {offsets = [0, 512], sizes = [1, 512], strides = [1, 1]} : vector<1x1024xf32> to vector<1x512xf32>
    %43 = arith.addf %41, %42 : vector<1x512xf32>
    %44 = arith.addf %43, %1 : vector<1x512xf32>
    %45 = vector.extract_strided_slice %44 {offsets = [0, 0], sizes = [1, 128], strides = [1, 1]} : vector<1x512xf32> to vector<1x128xf32>
    %46 = arith.negf %45 : vector<1x128xf32>
    %47 = math.exp %46 : vector<1x128xf32>
    %cst_21 = arith.constant 1.000000e+00 : f32
    %48 = vector.broadcast %cst_21 : f32 to vector<1x128xf32>
    %49 = arith.addf %48, %47 : vector<1x128xf32>
    %50 = arith.divf %48, %49 : vector<1x128xf32>
    %51 = vector.extract_strided_slice %44 {offsets = [0, 128], sizes = [1, 128], strides = [1, 1]} : vector<1x512xf32> to vector<1x128xf32>
    %52 = arith.negf %51 : vector<1x128xf32>
    %53 = math.exp %52 : vector<1x128xf32>
    %cst_22 = arith.constant 1.000000e+00 : f32
    %54 = vector.broadcast %cst_22 : f32 to vector<1x128xf32>
    %55 = arith.addf %54, %53 : vector<1x128xf32>
    %56 = arith.divf %54, %55 : vector<1x128xf32>
    %57 = vector.extract_strided_slice %44 {offsets = [0, 256], sizes = [1, 128], strides = [1, 1]} : vector<1x512xf32> to vector<1x128xf32>
    %58 = math.tanh %57 : vector<1x128xf32>
    %59 = vector.extract_strided_slice %44 {offsets = [0, 384], sizes = [1, 128], strides = [1, 1]} : vector<1x512xf32> to vector<1x128xf32>
    %60 = arith.negf %59 : vector<1x128xf32>
    %61 = math.exp %60 : vector<1x128xf32>
    %cst_23 = arith.constant 1.000000e+00 : f32
    %62 = vector.broadcast %cst_23 : f32 to vector<1x128xf32>
    %63 = arith.addf %62, %61 : vector<1x128xf32>
    %64 = arith.divf %62, %63 : vector<1x128xf32>
    %65 = arith.mulf %56, %10 : vector<1x128xf32>
    %66 = arith.mulf %50, %58 : vector<1x128xf32>
    %67 = arith.addf %65, %66 : vector<1x128xf32>
    %68 = math.tanh %67 : vector<1x128xf32>
    %69 = arith.mulf %64, %68 : vector<1x128xf32>
    %c0_24 = arith.constant 0 : index
    %c0_25 = arith.constant 0 : index
    %70 = vector.load %arg10[%c0_24, %c0_25] : memref<8x128xf32, #tpu.memory_space<vmem>>, vector<1x128xf32>
    tpu.vector_store %arg10[%c0_24, %c0_25], %69 {strides = array<i32>} : memref<8x128xf32, #tpu.memory_space<vmem>>, vector<1x128xf32>,
    %71 = tpu.concatenate %40, %69 in 1 : vector<1x128xf32>, vector<1x128xf32> -> vector<1x256xf32>
    %cst_26 = arith.constant dense<0.000000e+00> : vector<1x1024xf32>
    %72 = tpu.matmul %71, %2, %cst_26 {dimension_numbers = #tpu.dot_dimension_numbers<[1], [0], [0], [1], [0, 0, 1, 1], [], []>} : vector<1x256xf32>, vector<256x1024xf32>, vector<1x1024xf32> -> vector<1x1024xf32>
    %c1 = arith.constant 1 : index
    %c0_27 = arith.constant 0 : index
    %73 = vector.load %arg9[%c1, %c0_27] : memref<8x512xf32, #tpu.memory_space<vmem>>, vector<1x512xf32>
    %74 = vector.extract_strided_slice %72 {offsets = [0, 0], sizes = [1, 512], strides = [1, 1]} : vector<1x1024xf32> to vector<1x512xf32>
    %75 = arith.addf %73, %74 : vector<1x512xf32>
    %76 = vector.extract_strided_slice %75 {offsets = [0, 0], sizes = [1, 128], strides = [1, 1]} : vector<1x512xf32> to vector<1x128xf32>
    %77 = arith.negf %76 : vector<1x128xf32>
    %78 = math.exp %77 : vector<1x128xf32>
    %cst_28 = arith.constant 1.000000e+00 : f32
    %79 = vector.broadcast %cst_28 : f32 to vector<1x128xf32>
    %80 = arith.addf %79, %78 : vector<1x128xf32>
    %81 = arith.divf %79, %80 : vector<1x128xf32>
    %82 = vector.extract_strided_slice %75 {offsets = [0, 128], sizes = [1, 128], strides = [1, 1]} : vector<1x512xf32> to vector<1x128xf32>
    %83 = arith.negf %82 : vector<1x128xf32>
    %84 = math.exp %83 : vector<1x128xf32>
    %cst_29 = arith.constant 1.000000e+00 : f32
    %85 = vector.broadcast %cst_29 : f32 to vector<1x128xf32>
    %86 = arith.addf %85, %84 : vector<1x128xf32>
    %87 = arith.divf %85, %86 : vector<1x128xf32>
    %88 = vector.extract_strided_slice %75 {offsets = [0, 256], sizes = [1, 128], strides = [1, 1]} : vector<1x512xf32> to vector<1x128xf32>
    %89 = math.tanh %88 : vector<1x128xf32>
    %90 = vector.extract_strided_slice %75 {offsets = [0, 384], sizes = [1, 128], strides = [1, 1]} : vector<1x512xf32> to vector<1x128xf32>
    %91 = arith.negf %90 : vector<1x128xf32>
    %92 = math.exp %91 : vector<1x128xf32>
    %cst_30 = arith.constant 1.000000e+00 : f32
    %93 = vector.broadcast %cst_30 : f32 to vector<1x128xf32>
    %94 = arith.addf %93, %92 : vector<1x128xf32>
    %95 = arith.divf %93, %94 : vector<1x128xf32>
    %96 = arith.mulf %87, %38 : vector<1x128xf32>
    %97 = arith.mulf %81, %89 : vector<1x128xf32>
    %98 = arith.addf %96, %97 : vector<1x128xf32>
    %99 = math.tanh %98 : vector<1x128xf32>
    %100 = arith.mulf %95, %99 : vector<1x128xf32>
    %cst_31 = arith.constant dense<0.000000e+00> : vector<1x512xf32>
    %101 = tpu.matmul %100, %0, %cst_31 {dimension_numbers = #tpu.dot_dimension_numbers<[1], [0], [0], [1], [0, 0, 1, 1], [], []>} : vector<1x128xf32>, vector<128x512xf32>, vector<1x512xf32> -> vector<1x512xf32>
    %102 = vector.extract_strided_slice %72 {offsets = [0, 512], sizes = [1, 512], strides = [1, 1]} : vector<1x1024xf32> to vector<1x512xf32>
    %103 = arith.addf %101, %102 : vector<1x512xf32>
    %104 = arith.addf %103, %1 : vector<1x512xf32>
    %105 = vector.extract_strided_slice %104 {offsets = [0, 0], sizes = [1, 128], strides = [1, 1]} : vector<1x512xf32> to vector<1x128xf32>
    %106 = arith.negf %105 : vector<1x128xf32>
    %107 = math.exp %106 : vector<1x128xf32>
    %cst_32 = arith.constant 1.000000e+00 : f32
    %108 = vector.broadcast %cst_32 : f32 to vector<1x128xf32>
    %109 = arith.addf %108, %107 : vector<1x128xf32>
    %110 = arith.divf %108, %109 : vector<1x128xf32>
    %111 = vector.extract_strided_slice %104 {offsets = [0, 128], sizes = [1, 128], strides = [1, 1]} : vector<1x512xf32> to vector<1x128xf32>
    %112 = arith.negf %111 : vector<1x128xf32>
    %113 = math.exp %112 : vector<1x128xf32>
    %cst_33 = arith.constant 1.000000e+00 : f32
    %114 = vector.broadcast %cst_33 : f32 to vector<1x128xf32>
    %115 = arith.addf %114, %113 : vector<1x128xf32>
    %116 = arith.divf %114, %115 : vector<1x128xf32>
    %117 = vector.extract_strided_slice %104 {offsets = [0, 256], sizes = [1, 128], strides = [1, 1]} : vector<1x512xf32> to vector<1x128xf32>
    %118 = math.tanh %117 : vector<1x128xf32>
    %119 = vector.extract_strided_slice %104 {offsets = [0, 384], sizes = [1, 128], strides = [1, 1]} : vector<1x512xf32> to vector<1x128xf32>
    %120 = arith.negf %119 : vector<1x128xf32>
    %121 = math.exp %120 : vector<1x128xf32>
    %cst_34 = arith.constant 1.000000e+00 : f32
    %122 = vector.broadcast %cst_34 : f32 to vector<1x128xf32>
    %123 = arith.addf %122, %121 : vector<1x128xf32>
    %124 = arith.divf %122, %123 : vector<1x128xf32>
    %125 = arith.mulf %116, %67 : vector<1x128xf32>
    %126 = arith.mulf %110, %118 : vector<1x128xf32>
    %127 = arith.addf %125, %126 : vector<1x128xf32>
    %128 = math.tanh %127 : vector<1x128xf32>
    %129 = arith.mulf %124, %128 : vector<1x128xf32>
    %c1_35 = arith.constant 1 : index
    %c0_36 = arith.constant 0 : index
    %130 = vector.load %arg10[%c1_35, %c0_36] : memref<8x128xf32, #tpu.memory_space<vmem>>, vector<1x128xf32>
    tpu.vector_store %arg10[%c1_35, %c0_36], %129 {strides = array<i32>} : memref<8x128xf32, #tpu.memory_space<vmem>>, vector<1x128xf32>,
    %131 = tpu.concatenate %100, %129 in 1 : vector<1x128xf32>, vector<1x128xf32> -> vector<1x256xf32>
    %cst_37 = arith.constant dense<0.000000e+00> : vector<1x1024xf32>
    %132 = tpu.matmul %131, %2, %cst_37 {dimension_numbers = #tpu.dot_dimension_numbers<[1], [0], [0], [1], [0, 0, 1, 1], [], []>} : vector<1x256xf32>, vector<256x1024xf32>, vector<1x1024xf32> -> vector<1x1024xf32>
    %c2 = arith.constant 2 : index
    %c0_38 = arith.constant 0 : index
    %133 = vector.load %arg9[%c2, %c0_38] : memref<8x512xf32, #tpu.memory_space<vmem>>, vector<1x512xf32>
    %134 = vector.extract_strided_slice %132 {offsets = [0, 0], sizes = [1, 512], strides = [1, 1]} : vector<1x1024xf32> to vector<1x512xf32>
    %135 = arith.addf %133, %134 : vector<1x512xf32>
    %136 = vector.extract_strided_slice %135 {offsets = [0, 0], sizes = [1, 128], strides = [1, 1]} : vector<1x512xf32> to vector<1x128xf32>
    %137 = arith.negf %136 : vector<1x128xf32>
    %138 = math.exp %137 : vector<1x128xf32>
    %cst_39 = arith.constant 1.000000e+00 : f32
    %139 = vector.broadcast %cst_39 : f32 to vector<1x128xf32>
    %140 = arith.addf %139, %138 : vector<1x128xf32>
    %141 = arith.divf %139, %140 : vector<1x128xf32>
    %142 = vector.extract_strided_slice %135 {offsets = [0, 128], sizes = [1, 128], strides = [1, 1]} : vector<1x512xf32> to vector<1x128xf32>
    %143 = arith.negf %142 : vector<1x128xf32>
    %144 = math.exp %143 : vector<1x128xf32>
    %cst_40 = arith.constant 1.000000e+00 : f32
    %145 = vector.broadcast %cst_40 : f32 to vector<1x128xf32>
    %146 = arith.addf %145, %144 : vector<1x128xf32>
    %147 = arith.divf %145, %146 : vector<1x128xf32>
    %148 = vector.extract_strided_slice %135 {offsets = [0, 256], sizes = [1, 128], strides = [1, 1]} : vector<1x512xf32> to vector<1x128xf32>
    %149 = math.tanh %148 : vector<1x128xf32>
    %150 = vector.extract_strided_slice %135 {offsets = [0, 384], sizes = [1, 128], strides = [1, 1]} : vector<1x512xf32> to vector<1x128xf32>
    %151 = arith.negf %150 : vector<1x128xf32>
    %152 = math.exp %151 : vector<1x128xf32>
    %cst_41 = arith.constant 1.000000e+00 : f32
    %153 = vector.broadcast %cst_41 : f32 to vector<1x128xf32>
    %154 = arith.addf %153, %152 : vector<1x128xf32>
    %155 = arith.divf %153, %154 : vector<1x128xf32>
    %156 = arith.mulf %147, %98 : vector<1x128xf32>
    %157 = arith.mulf %141, %149 : vector<1x128xf32>
    %158 = arith.addf %156, %157 : vector<1x128xf32>
    %159 = math.tanh %158 : vector<1x128xf32>
    %160 = arith.mulf %155, %159 : vector<1x128xf32>
    %cst_42 = arith.constant dense<0.000000e+00> : vector<1x512xf32>
    %161 = tpu.matmul %160, %0, %cst_42 {dimension_numbers = #tpu.dot_dimension_numbers<[1], [0], [0], [1], [0, 0, 1, 1], [], []>} : vector<1x128xf32>, vector<128x512xf32>, vector<1x512xf32> -> vector<1x512xf32>
    %162 = vector.extract_strided_slice %132 {offsets = [0, 512], sizes = [1, 512], strides = [1, 1]} : vector<1x1024xf32> to vector<1x512xf32>
    %163 = arith.addf %161, %162 : vector<1x512xf32>
    %164 = arith.addf %163, %1 : vector<1x512xf32>
    %165 = vector.extract_strided_slice %164 {offsets = [0, 0], sizes = [1, 128], strides = [1, 1]} : vector<1x512xf32> to vector<1x128xf32>
    %166 = arith.negf %165 : vector<1x128xf32>
    %167 = math.exp %166 : vector<1x128xf32>
    %cst_43 = arith.constant 1.000000e+00 : f32
    %168 = vector.broadcast %cst_43 : f32 to vector<1x128xf32>
    %169 = arith.addf %168, %167 : vector<1x128xf32>
    %170 = arith.divf %168, %169 : vector<1x128xf32>
    %171 = vector.extract_strided_slice %164 {offsets = [0, 128], sizes = [1, 128], strides = [1, 1]} : vector<1x512xf32> to vector<1x128xf32>
    %172 = arith.negf %171 : vector<1x128xf32>
    %173 = math.exp %172 : vector<1x128xf32>
    %cst_44 = arith.constant 1.000000e+00 : f32
    %174 = vector.broadcast %cst_44 : f32 to vector<1x128xf32>
    %175 = arith.addf %174, %173 : vector<1x128xf32>
    %176 = arith.divf %174, %175 : vector<1x128xf32>
    %177 = vector.extract_strided_slice %164 {offsets = [0, 256], sizes = [1, 128], strides = [1, 1]} : vector<1x512xf32> to vector<1x128xf32>
    %178 = math.tanh %177 : vector<1x128xf32>
    %179 = vector.extract_strided_slice %164 {offsets = [0, 384], sizes = [1, 128], strides = [1, 1]} : vector<1x512xf32> to vector<1x128xf32>
    %180 = arith.negf %179 : vector<1x128xf32>
    %181 = math.exp %180 : vector<1x128xf32>
    %cst_45 = arith.constant 1.000000e+00 : f32
    %182 = vector.broadcast %cst_45 : f32 to vector<1x128xf32>
    %183 = arith.addf %182, %181 : vector<1x128xf32>
    %184 = arith.divf %182, %183 : vector<1x128xf32>
    %185 = arith.mulf %176, %127 : vector<1x128xf32>
    %186 = arith.mulf %170, %178 : vector<1x128xf32>
    %187 = arith.addf %185, %186 : vector<1x128xf32>
    %188 = math.tanh %187 : vector<1x128xf32>
    %189 = arith.mulf %184, %188 : vector<1x128xf32>
    %c2_46 = arith.constant 2 : index
    %c0_47 = arith.constant 0 : index
    %190 = vector.load %arg10[%c2_46, %c0_47] : memref<8x128xf32, #tpu.memory_space<vmem>>, vector<1x128xf32>
    tpu.vector_store %arg10[%c2_46, %c0_47], %189 {strides = array<i32>} : memref<8x128xf32, #tpu.memory_space<vmem>>, vector<1x128xf32>,
    %191 = tpu.concatenate %160, %189 in 1 : vector<1x128xf32>, vector<1x128xf32> -> vector<1x256xf32>
    %cst_48 = arith.constant dense<0.000000e+00> : vector<1x1024xf32>
    %192 = tpu.matmul %191, %2, %cst_48 {dimension_numbers = #tpu.dot_dimension_numbers<[1], [0], [0], [1], [0, 0, 1, 1], [], []>} : vector<1x256xf32>, vector<256x1024xf32>, vector<1x1024xf32> -> vector<1x1024xf32>
    %c3 = arith.constant 3 : index
    %c0_49 = arith.constant 0 : index
    %193 = vector.load %arg9[%c3, %c0_49] : memref<8x512xf32, #tpu.memory_space<vmem>>, vector<1x512xf32>
    %194 = vector.extract_strided_slice %192 {offsets = [0, 0], sizes = [1, 512], strides = [1, 1]} : vector<1x1024xf32> to vector<1x512xf32>
    %195 = arith.addf %193, %194 : vector<1x512xf32>
    %196 = vector.extract_strided_slice %195 {offsets = [0, 0], sizes = [1, 128], strides = [1, 1]} : vector<1x512xf32> to vector<1x128xf32>
    %197 = arith.negf %196 : vector<1x128xf32>
    %198 = math.exp %197 : vector<1x128xf32>
    %cst_50 = arith.constant 1.000000e+00 : f32
    %199 = vector.broadcast %cst_50 : f32 to vector<1x128xf32>
    %200 = arith.addf %199, %198 : vector<1x128xf32>
    %201 = arith.divf %199, %200 : vector<1x128xf32>
    %202 = vector.extract_strided_slice %195 {offsets = [0, 128], sizes = [1, 128], strides = [1, 1]} : vector<1x512xf32> to vector<1x128xf32>
    %203 = arith.negf %202 : vector<1x128xf32>
    %204 = math.exp %203 : vector<1x128xf32>
    %cst_51 = arith.constant 1.000000e+00 : f32
    %205 = vector.broadcast %cst_51 : f32 to vector<1x128xf32>
    %206 = arith.addf %205, %204 : vector<1x128xf32>
    %207 = arith.divf %205, %206 : vector<1x128xf32>
    %208 = vector.extract_strided_slice %195 {offsets = [0, 256], sizes = [1, 128], strides = [1, 1]} : vector<1x512xf32> to vector<1x128xf32>
    %209 = math.tanh %208 : vector<1x128xf32>
    %210 = vector.extract_strided_slice %195 {offsets = [0, 384], sizes = [1, 128], strides = [1, 1]} : vector<1x512xf32> to vector<1x128xf32>
    %211 = arith.negf %210 : vector<1x128xf32>
    %212 = math.exp %211 : vector<1x128xf32>
    %cst_52 = arith.constant 1.000000e+00 : f32
    %213 = vector.broadcast %cst_52 : f32 to vector<1x128xf32>
    %214 = arith.addf %213, %212 : vector<1x128xf32>
    %215 = arith.divf %213, %214 : vector<1x128xf32>
    %216 = arith.mulf %207, %158 : vector<1x128xf32>
    %217 = arith.mulf %201, %209 : vector<1x128xf32>
    %218 = arith.addf %216, %217 : vector<1x128xf32>
    %219 = math.tanh %218 : vector<1x128xf32>
    %220 = arith.mulf %215, %219 : vector<1x128xf32>
    %cst_53 = arith.constant dense<0.000000e+00> : vector<1x512xf32>
    %221 = tpu.matmul %220, %0, %cst_53 {dimension_numbers = #tpu.dot_dimension_numbers<[1], [0], [0], [1], [0, 0, 1, 1], [], []>} : vector<1x128xf32>, vector<128x512xf32>, vector<1x512xf32> -> vector<1x512xf32>
    %222 = vector.extract_strided_slice %192 {offsets = [0, 512], sizes = [1, 512], strides = [1, 1]} : vector<1x1024xf32> to vector<1x512xf32>
    %223 = arith.addf %221, %222 : vector<1x512xf32>
    %224 = arith.addf %223, %1 : vector<1x512xf32>
    %225 = vector.extract_strided_slice %224 {offsets = [0, 0], sizes = [1, 128], strides = [1, 1]} : vector<1x512xf32> to vector<1x128xf32>
    %226 = arith.negf %225 : vector<1x128xf32>
    %227 = math.exp %226 : vector<1x128xf32>
    %cst_54 = arith.constant 1.000000e+00 : f32
    %228 = vector.broadcast %cst_54 : f32 to vector<1x128xf32>
    %229 = arith.addf %228, %227 : vector<1x128xf32>
    %230 = arith.divf %228, %229 : vector<1x128xf32>
    %231 = vector.extract_strided_slice %224 {offsets = [0, 128], sizes = [1, 128], strides = [1, 1]} : vector<1x512xf32> to vector<1x128xf32>
    %232 = arith.negf %231 : vector<1x128xf32>
    %233 = math.exp %232 : vector<1x128xf32>
    %cst_55 = arith.constant 1.000000e+00 : f32
    %234 = vector.broadcast %cst_55 : f32 to vector<1x128xf32>
    %235 = arith.addf %234, %233 : vector<1x128xf32>
    %236 = arith.divf %234, %235 : vector<1x128xf32>
    %237 = vector.extract_strided_slice %224 {offsets = [0, 256], sizes = [1, 128], strides = [1, 1]} : vector<1x512xf32> to vector<1x128xf32>
    %238 = math.tanh %237 : vector<1x128xf32>
    %239 = vector.extract_strided_slice %224 {offsets = [0, 384], sizes = [1, 128], strides = [1, 1]} : vector<1x512xf32> to vector<1x128xf32>
    %240 = arith.negf %239 : vector<1x128xf32>
    %241 = math.exp %240 : vector<1x128xf32>
    %cst_56 = arith.constant 1.000000e+00 : f32
    %242 = vector.broadcast %cst_56 : f32 to vector<1x128xf32>
    %243 = arith.addf %242, %241 : vector<1x128xf32>
    %244 = arith.divf %242, %243 : vector<1x128xf32>
    %245 = arith.mulf %236, %187 : vector<1x128xf32>
    %246 = arith.mulf %230, %238 : vector<1x128xf32>
    %247 = arith.addf %245, %246 : vector<1x128xf32>
    %248 = math.tanh %247 : vector<1x128xf32>
    %249 = arith.mulf %244, %248 : vector<1x128xf32>
    %c3_57 = arith.constant 3 : index
    %c0_58 = arith.constant 0 : index
    %250 = vector.load %arg10[%c3_57, %c0_58] : memref<8x128xf32, #tpu.memory_space<vmem>>, vector<1x128xf32>
    tpu.vector_store %arg10[%c3_57, %c0_58], %249 {strides = array<i32>} : memref<8x128xf32, #tpu.memory_space<vmem>>, vector<1x128xf32>,
    %251 = tpu.concatenate %220, %249 in 1 : vector<1x128xf32>, vector<1x128xf32> -> vector<1x256xf32>
    %cst_59 = arith.constant dense<0.000000e+00> : vector<1x1024xf32>
    %252 = tpu.matmul %251, %2, %cst_59 {dimension_numbers = #tpu.dot_dimension_numbers<[1], [0], [0], [1], [0, 0, 1, 1], [], []>} : vector<1x256xf32>, vector<256x1024xf32>, vector<1x1024xf32> -> vector<1x1024xf32>
    %c4 = arith.constant 4 : index
    %c0_60 = arith.constant 0 : index
    %253 = vector.load %arg9[%c4, %c0_60] : memref<8x512xf32, #tpu.memory_space<vmem>>, vector<1x512xf32>
    %254 = vector.extract_strided_slice %252 {offsets = [0, 0], sizes = [1, 512], strides = [1, 1]} : vector<1x1024xf32> to vector<1x512xf32>
    %255 = arith.addf %253, %254 : vector<1x512xf32>
    %256 = vector.extract_strided_slice %255 {offsets = [0, 0], sizes = [1, 128], strides = [1, 1]} : vector<1x512xf32> to vector<1x128xf32>
    %257 = arith.negf %256 : vector<1x128xf32>
    %258 = math.exp %257 : vector<1x128xf32>
    %cst_61 = arith.constant 1.000000e+00 : f32
    %259 = vector.broadcast %cst_61 : f32 to vector<1x128xf32>
    %260 = arith.addf %259, %258 : vector<1x128xf32>
    %261 = arith.divf %259, %260 : vector<1x128xf32>
    %262 = vector.extract_strided_slice %255 {offsets = [0, 128], sizes = [1, 128], strides = [1, 1]} : vector<1x512xf32> to vector<1x128xf32>
    %263 = arith.negf %262 : vector<1x128xf32>
    %264 = math.exp %263 : vector<1x128xf32>
    %cst_62 = arith.constant 1.000000e+00 : f32
    %265 = vector.broadcast %cst_62 : f32 to vector<1x128xf32>
    %266 = arith.addf %265, %264 : vector<1x128xf32>
    %267 = arith.divf %265, %266 : vector<1x128xf32>
    %268 = vector.extract_strided_slice %255 {offsets = [0, 256], sizes = [1, 128], strides = [1, 1]} : vector<1x512xf32> to vector<1x128xf32>
    %269 = math.tanh %268 : vector<1x128xf32>
    %270 = vector.extract_strided_slice %255 {offsets = [0, 384], sizes = [1, 128], strides = [1, 1]} : vector<1x512xf32> to vector<1x128xf32>
    %271 = arith.negf %270 : vector<1x128xf32>
    %272 = math.exp %271 : vector<1x128xf32>
    %cst_63 = arith.constant 1.000000e+00 : f32
    %273 = vector.broadcast %cst_63 : f32 to vector<1x128xf32>
    %274 = arith.addf %273, %272 : vector<1x128xf32>
    %275 = arith.divf %273, %274 : vector<1x128xf32>
    %276 = arith.mulf %267, %218 : vector<1x128xf32>
    %277 = arith.mulf %261, %269 : vector<1x128xf32>
    %278 = arith.addf %276, %277 : vector<1x128xf32>
    %279 = math.tanh %278 : vector<1x128xf32>
    %280 = arith.mulf %275, %279 : vector<1x128xf32>
    %cst_64 = arith.constant dense<0.000000e+00> : vector<1x512xf32>
    %281 = tpu.matmul %280, %0, %cst_64 {dimension_numbers = #tpu.dot_dimension_numbers<[1], [0], [0], [1], [0, 0, 1, 1], [], []>} : vector<1x128xf32>, vector<128x512xf32>, vector<1x512xf32> -> vector<1x512xf32>
    %282 = vector.extract_strided_slice %252 {offsets = [0, 512], sizes = [1, 512], strides = [1, 1]} : vector<1x1024xf32> to vector<1x512xf32>
    %283 = arith.addf %281, %282 : vector<1x512xf32>
    %284 = arith.addf %283, %1 : vector<1x512xf32>
    %285 = vector.extract_strided_slice %284 {offsets = [0, 0], sizes = [1, 128], strides = [1, 1]} : vector<1x512xf32> to vector<1x128xf32>
    %286 = arith.negf %285 : vector<1x128xf32>
    %287 = math.exp %286 : vector<1x128xf32>
    %cst_65 = arith.constant 1.000000e+00 : f32
    %288 = vector.broadcast %cst_65 : f32 to vector<1x128xf32>
    %289 = arith.addf %288, %287 : vector<1x128xf32>
    %290 = arith.divf %288, %289 : vector<1x128xf32>
    %291 = vector.extract_strided_slice %284 {offsets = [0, 128], sizes = [1, 128], strides = [1, 1]} : vector<1x512xf32> to vector<1x128xf32>
    %292 = arith.negf %291 : vector<1x128xf32>
    %293 = math.exp %292 : vector<1x128xf32>
    %cst_66 = arith.constant 1.000000e+00 : f32
    %294 = vector.broadcast %cst_66 : f32 to vector<1x128xf32>
    %295 = arith.addf %294, %293 : vector<1x128xf32>
    %296 = arith.divf %294, %295 : vector<1x128xf32>
    %297 = vector.extract_strided_slice %284 {offsets = [0, 256], sizes = [1, 128], strides = [1, 1]} : vector<1x512xf32> to vector<1x128xf32>
    %298 = math.tanh %297 : vector<1x128xf32>
    %299 = vector.extract_strided_slice %284 {offsets = [0, 384], sizes = [1, 128], strides = [1, 1]} : vector<1x512xf32> to vector<1x128xf32>
    %300 = arith.negf %299 : vector<1x128xf32>
    %301 = math.exp %300 : vector<1x128xf32>
    %cst_67 = arith.constant 1.000000e+00 : f32
    %302 = vector.broadcast %cst_67 : f32 to vector<1x128xf32>
    %303 = arith.addf %302, %301 : vector<1x128xf32>
    %304 = arith.divf %302, %303 : vector<1x128xf32>
    %305 = arith.mulf %296, %247 : vector<1x128xf32>
    %306 = arith.mulf %290, %298 : vector<1x128xf32>
    %307 = arith.addf %305, %306 : vector<1x128xf32>
    %308 = math.tanh %307 : vector<1x128xf32>
    %309 = arith.mulf %304, %308 : vector<1x128xf32>
    %c4_68 = arith.constant 4 : index
    %c0_69 = arith.constant 0 : index
    %310 = vector.load %arg10[%c4_68, %c0_69] : memref<8x128xf32, #tpu.memory_space<vmem>>, vector<1x128xf32>
    tpu.vector_store %arg10[%c4_68, %c0_69], %309 {strides = array<i32>} : memref<8x128xf32, #tpu.memory_space<vmem>>, vector<1x128xf32>,
    %311 = tpu.concatenate %280, %309 in 1 : vector<1x128xf32>, vector<1x128xf32> -> vector<1x256xf32>
    %cst_70 = arith.constant dense<0.000000e+00> : vector<1x1024xf32>
    %312 = tpu.matmul %311, %2, %cst_70 {dimension_numbers = #tpu.dot_dimension_numbers<[1], [0], [0], [1], [0, 0, 1, 1], [], []>} : vector<1x256xf32>, vector<256x1024xf32>, vector<1x1024xf32> -> vector<1x1024xf32>
    %c5 = arith.constant 5 : index
    %c0_71 = arith.constant 0 : index
    %313 = vector.load %arg9[%c5, %c0_71] : memref<8x512xf32, #tpu.memory_space<vmem>>, vector<1x512xf32>
    %314 = vector.extract_strided_slice %312 {offsets = [0, 0], sizes = [1, 512], strides = [1, 1]} : vector<1x1024xf32> to vector<1x512xf32>
    %315 = arith.addf %313, %314 : vector<1x512xf32>
    %316 = vector.extract_strided_slice %315 {offsets = [0, 0], sizes = [1, 128], strides = [1, 1]} : vector<1x512xf32> to vector<1x128xf32>
    %317 = arith.negf %316 : vector<1x128xf32>
    %318 = math.exp %317 : vector<1x128xf32>
    %cst_72 = arith.constant 1.000000e+00 : f32
    %319 = vector.broadcast %cst_72 : f32 to vector<1x128xf32>
    %320 = arith.addf %319, %318 : vector<1x128xf32>
    %321 = arith.divf %319, %320 : vector<1x128xf32>
    %322 = vector.extract_strided_slice %315 {offsets = [0, 128], sizes = [1, 128], strides = [1, 1]} : vector<1x512xf32> to vector<1x128xf32>
    %323 = arith.negf %322 : vector<1x128xf32>
    %324 = math.exp %323 : vector<1x128xf32>
    %cst_73 = arith.constant 1.000000e+00 : f32
    %325 = vector.broadcast %cst_73 : f32 to vector<1x128xf32>
    %326 = arith.addf %325, %324 : vector<1x128xf32>
    %327 = arith.divf %325, %326 : vector<1x128xf32>
    %328 = vector.extract_strided_slice %315 {offsets = [0, 256], sizes = [1, 128], strides = [1, 1]} : vector<1x512xf32> to vector<1x128xf32>
    %329 = math.tanh %328 : vector<1x128xf32>
    %330 = vector.extract_strided_slice %315 {offsets = [0, 384], sizes = [1, 128], strides = [1, 1]} : vector<1x512xf32> to vector<1x128xf32>
    %331 = arith.negf %330 : vector<1x128xf32>
    %332 = math.exp %331 : vector<1x128xf32>
    %cst_74 = arith.constant 1.000000e+00 : f32
    %333 = vector.broadcast %cst_74 : f32 to vector<1x128xf32>
    %334 = arith.addf %333, %332 : vector<1x128xf32>
    %335 = arith.divf %333, %334 : vector<1x128xf32>
    %336 = arith.mulf %327, %278 : vector<1x128xf32>
    %337 = arith.mulf %321, %329 : vector<1x128xf32>
    %338 = arith.addf %336, %337 : vector<1x128xf32>
    %339 = math.tanh %338 : vector<1x128xf32>
    %340 = arith.mulf %335, %339 : vector<1x128xf32>
    %cst_75 = arith.constant dense<0.000000e+00> : vector<1x512xf32>
    %341 = tpu.matmul %340, %0, %cst_75 {dimension_numbers = #tpu.dot_dimension_numbers<[1], [0], [0], [1], [0, 0, 1, 1], [], []>} : vector<1x128xf32>, vector<128x512xf32>, vector<1x512xf32> -> vector<1x512xf32>
    %342 = vector.extract_strided_slice %312 {offsets = [0, 512], sizes = [1, 512], strides = [1, 1]} : vector<1x1024xf32> to vector<1x512xf32>
    %343 = arith.addf %341, %342 : vector<1x512xf32>
    %344 = arith.addf %343, %1 : vector<1x512xf32>
    %345 = vector.extract_strided_slice %344 {offsets = [0, 0], sizes = [1, 128], strides = [1, 1]} : vector<1x512xf32> to vector<1x128xf32>
    %346 = arith.negf %345 : vector<1x128xf32>
    %347 = math.exp %346 : vector<1x128xf32>
    %cst_76 = arith.constant 1.000000e+00 : f32
    %348 = vector.broadcast %cst_76 : f32 to vector<1x128xf32>
    %349 = arith.addf %348, %347 : vector<1x128xf32>
    %350 = arith.divf %348, %349 : vector<1x128xf32>
    %351 = vector.extract_strided_slice %344 {offsets = [0, 128], sizes = [1, 128], strides = [1, 1]} : vector<1x512xf32> to vector<1x128xf32>
    %352 = arith.negf %351 : vector<1x128xf32>
    %353 = math.exp %352 : vector<1x128xf32>
    %cst_77 = arith.constant 1.000000e+00 : f32
    %354 = vector.broadcast %cst_77 : f32 to vector<1x128xf32>
    %355 = arith.addf %354, %353 : vector<1x128xf32>
    %356 = arith.divf %354, %355 : vector<1x128xf32>
    %357 = vector.extract_strided_slice %344 {offsets = [0, 256], sizes = [1, 128], strides = [1, 1]} : vector<1x512xf32> to vector<1x128xf32>
    %358 = math.tanh %357 : vector<1x128xf32>
    %359 = vector.extract_strided_slice %344 {offsets = [0, 384], sizes = [1, 128], strides = [1, 1]} : vector<1x512xf32> to vector<1x128xf32>
    %360 = arith.negf %359 : vector<1x128xf32>
    %361 = math.exp %360 : vector<1x128xf32>
    %cst_78 = arith.constant 1.000000e+00 : f32
    %362 = vector.broadcast %cst_78 : f32 to vector<1x128xf32>
    %363 = arith.addf %362, %361 : vector<1x128xf32>
    %364 = arith.divf %362, %363 : vector<1x128xf32>
    %365 = arith.mulf %356, %307 : vector<1x128xf32>
    %366 = arith.mulf %350, %358 : vector<1x128xf32>
    %367 = arith.addf %365, %366 : vector<1x128xf32>
    %368 = math.tanh %367 : vector<1x128xf32>
    %369 = arith.mulf %364, %368 : vector<1x128xf32>
    %c5_79 = arith.constant 5 : index
    %c0_80 = arith.constant 0 : index
    %370 = vector.load %arg10[%c5_79, %c0_80] : memref<8x128xf32, #tpu.memory_space<vmem>>, vector<1x128xf32>
    tpu.vector_store %arg10[%c5_79, %c0_80], %369 {strides = array<i32>} : memref<8x128xf32, #tpu.memory_space<vmem>>, vector<1x128xf32>,
    %371 = tpu.concatenate %340, %369 in 1 : vector<1x128xf32>, vector<1x128xf32> -> vector<1x256xf32>
    %cst_81 = arith.constant dense<0.000000e+00> : vector<1x1024xf32>
    %372 = tpu.matmul %371, %2, %cst_81 {dimension_numbers = #tpu.dot_dimension_numbers<[1], [0], [0], [1], [0, 0, 1, 1], [], []>} : vector<1x256xf32>, vector<256x1024xf32>, vector<1x1024xf32> -> vector<1x1024xf32>
    %c6 = arith.constant 6 : index
    %c0_82 = arith.constant 0 : index
    %373 = vector.load %arg9[%c6, %c0_82] : memref<8x512xf32, #tpu.memory_space<vmem>>, vector<1x512xf32>
    %374 = vector.extract_strided_slice %372 {offsets = [0, 0], sizes = [1, 512], strides = [1, 1]} : vector<1x1024xf32> to vector<1x512xf32>
    %375 = arith.addf %373, %374 : vector<1x512xf32>
    %376 = vector.extract_strided_slice %375 {offsets = [0, 0], sizes = [1, 128], strides = [1, 1]} : vector<1x512xf32> to vector<1x128xf32>
    %377 = arith.negf %376 : vector<1x128xf32>
    %378 = math.exp %377 : vector<1x128xf32>
    %cst_83 = arith.constant 1.000000e+00 : f32
    %379 = vector.broadcast %cst_83 : f32 to vector<1x128xf32>
    %380 = arith.addf %379, %378 : vector<1x128xf32>
    %381 = arith.divf %379, %380 : vector<1x128xf32>
    %382 = vector.extract_strided_slice %375 {offsets = [0, 128], sizes = [1, 128], strides = [1, 1]} : vector<1x512xf32> to vector<1x128xf32>
    %383 = arith.negf %382 : vector<1x128xf32>
    %384 = math.exp %383 : vector<1x128xf32>
    %cst_84 = arith.constant 1.000000e+00 : f32
    %385 = vector.broadcast %cst_84 : f32 to vector<1x128xf32>
    %386 = arith.addf %385, %384 : vector<1x128xf32>
    %387 = arith.divf %385, %386 : vector<1x128xf32>
    %388 = vector.extract_strided_slice %375 {offsets = [0, 256], sizes = [1, 128], strides = [1, 1]} : vector<1x512xf32> to vector<1x128xf32>
    %389 = math.tanh %388 : vector<1x128xf32>
    %390 = vector.extract_strided_slice %375 {offsets = [0, 384], sizes = [1, 128], strides = [1, 1]} : vector<1x512xf32> to vector<1x128xf32>
    %391 = arith.negf %390 : vector<1x128xf32>
    %392 = math.exp %391 : vector<1x128xf32>
    %cst_85 = arith.constant 1.000000e+00 : f32
    %393 = vector.broadcast %cst_85 : f32 to vector<1x128xf32>
    %394 = arith.addf %393, %392 : vector<1x128xf32>
    %395 = arith.divf %393, %394 : vector<1x128xf32>
    %396 = arith.mulf %387, %338 : vector<1x128xf32>
    %397 = arith.mulf %381, %389 : vector<1x128xf32>
    %398 = arith.addf %396, %397 : vector<1x128xf32>
    %399 = math.tanh %398 : vector<1x128xf32>
    %400 = arith.mulf %395, %399 : vector<1x128xf32>
    %cst_86 = arith.constant dense<0.000000e+00> : vector<1x512xf32>
    %401 = tpu.matmul %400, %0, %cst_86 {dimension_numbers = #tpu.dot_dimension_numbers<[1], [0], [0], [1], [0, 0, 1, 1], [], []>} : vector<1x128xf32>, vector<128x512xf32>, vector<1x512xf32> -> vector<1x512xf32>
    %402 = vector.extract_strided_slice %372 {offsets = [0, 512], sizes = [1, 512], strides = [1, 1]} : vector<1x1024xf32> to vector<1x512xf32>
    %403 = arith.addf %401, %402 : vector<1x512xf32>
    %404 = arith.addf %403, %1 : vector<1x512xf32>
    %405 = vector.extract_strided_slice %404 {offsets = [0, 0], sizes = [1, 128], strides = [1, 1]} : vector<1x512xf32> to vector<1x128xf32>
    %406 = arith.negf %405 : vector<1x128xf32>
    %407 = math.exp %406 : vector<1x128xf32>
    %cst_87 = arith.constant 1.000000e+00 : f32
    %408 = vector.broadcast %cst_87 : f32 to vector<1x128xf32>
    %409 = arith.addf %408, %407 : vector<1x128xf32>
    %410 = arith.divf %408, %409 : vector<1x128xf32>
    %411 = vector.extract_strided_slice %404 {offsets = [0, 128], sizes = [1, 128], strides = [1, 1]} : vector<1x512xf32> to vector<1x128xf32>
    %412 = arith.negf %411 : vector<1x128xf32>
    %413 = math.exp %412 : vector<1x128xf32>
    %cst_88 = arith.constant 1.000000e+00 : f32
    %414 = vector.broadcast %cst_88 : f32 to vector<1x128xf32>
    %415 = arith.addf %414, %413 : vector<1x128xf32>
    %416 = arith.divf %414, %415 : vector<1x128xf32>
    %417 = vector.extract_strided_slice %404 {offsets = [0, 256], sizes = [1, 128], strides = [1, 1]} : vector<1x512xf32> to vector<1x128xf32>
    %418 = math.tanh %417 : vector<1x128xf32>
    %419 = vector.extract_strided_slice %404 {offsets = [0, 384], sizes = [1, 128], strides = [1, 1]} : vector<1x512xf32> to vector<1x128xf32>
    %420 = arith.negf %419 : vector<1x128xf32>
    %421 = math.exp %420 : vector<1x128xf32>
    %cst_89 = arith.constant 1.000000e+00 : f32
    %422 = vector.broadcast %cst_89 : f32 to vector<1x128xf32>
    %423 = arith.addf %422, %421 : vector<1x128xf32>
    %424 = arith.divf %422, %423 : vector<1x128xf32>
    %425 = arith.mulf %416, %367 : vector<1x128xf32>
    %426 = arith.mulf %410, %418 : vector<1x128xf32>
    %427 = arith.addf %425, %426 : vector<1x128xf32>
    %428 = math.tanh %427 : vector<1x128xf32>
    %429 = arith.mulf %424, %428 : vector<1x128xf32>
    %c6_90 = arith.constant 6 : index
    %c0_91 = arith.constant 0 : index
    %430 = vector.load %arg10[%c6_90, %c0_91] : memref<8x128xf32, #tpu.memory_space<vmem>>, vector<1x128xf32>
    tpu.vector_store %arg10[%c6_90, %c0_91], %429 {strides = array<i32>} : memref<8x128xf32, #tpu.memory_space<vmem>>, vector<1x128xf32>,
    %431 = tpu.concatenate %400, %429 in 1 : vector<1x128xf32>, vector<1x128xf32> -> vector<1x256xf32>
    %cst_92 = arith.constant dense<0.000000e+00> : vector<1x1024xf32>
    %432 = tpu.matmul %431, %2, %cst_92 {dimension_numbers = #tpu.dot_dimension_numbers<[1], [0], [0], [1], [0, 0, 1, 1], [], []>} : vector<1x256xf32>, vector<256x1024xf32>, vector<1x1024xf32> -> vector<1x1024xf32>
    %c7 = arith.constant 7 : index
    %c0_93 = arith.constant 0 : index
    %433 = vector.load %arg9[%c7, %c0_93] : memref<8x512xf32, #tpu.memory_space<vmem>>, vector<1x512xf32>
    %434 = vector.extract_strided_slice %432 {offsets = [0, 0], sizes = [1, 512], strides = [1, 1]} : vector<1x1024xf32> to vector<1x512xf32>
    %435 = arith.addf %433, %434 : vector<1x512xf32>
    %436 = vector.extract_strided_slice %435 {offsets = [0, 0], sizes = [1, 128], strides = [1, 1]} : vector<1x512xf32> to vector<1x128xf32>
    %437 = arith.negf %436 : vector<1x128xf32>
    %438 = math.exp %437 : vector<1x128xf32>
    %cst_94 = arith.constant 1.000000e+00 : f32
    %439 = vector.broadcast %cst_94 : f32 to vector<1x128xf32>
    %440 = arith.addf %439, %438 : vector<1x128xf32>
    %441 = arith.divf %439, %440 : vector<1x128xf32>
    %442 = vector.extract_strided_slice %435 {offsets = [0, 128], sizes = [1, 128], strides = [1, 1]} : vector<1x512xf32> to vector<1x128xf32>
    %443 = arith.negf %442 : vector<1x128xf32>
    %444 = math.exp %443 : vector<1x128xf32>
    %cst_95 = arith.constant 1.000000e+00 : f32
    %445 = vector.broadcast %cst_95 : f32 to vector<1x128xf32>
    %446 = arith.addf %445, %444 : vector<1x128xf32>
    %447 = arith.divf %445, %446 : vector<1x128xf32>
    %448 = vector.extract_strided_slice %435 {offsets = [0, 256], sizes = [1, 128], strides = [1, 1]} : vector<1x512xf32> to vector<1x128xf32>
    %449 = math.tanh %448 : vector<1x128xf32>
    %450 = vector.extract_strided_slice %435 {offsets = [0, 384], sizes = [1, 128], strides = [1, 1]} : vector<1x512xf32> to vector<1x128xf32>
    %451 = arith.negf %450 : vector<1x128xf32>
    %452 = math.exp %451 : vector<1x128xf32>
    %cst_96 = arith.constant 1.000000e+00 : f32
    %453 = vector.broadcast %cst_96 : f32 to vector<1x128xf32>
    %454 = arith.addf %453, %452 : vector<1x128xf32>
    %455 = arith.divf %453, %454 : vector<1x128xf32>
    %456 = arith.mulf %447, %398 : vector<1x128xf32>
    %457 = arith.mulf %441, %449 : vector<1x128xf32>
    %458 = arith.addf %456, %457 : vector<1x128xf32>
    %459 = math.tanh %458 : vector<1x128xf32>
    %460 = arith.mulf %455, %459 : vector<1x128xf32>
    %cst_97 = arith.constant dense<0.000000e+00> : vector<1x512xf32>
    %461 = tpu.matmul %460, %0, %cst_97 {dimension_numbers = #tpu.dot_dimension_numbers<[1], [0], [0], [1], [0, 0, 1, 1], [], []>} : vector<1x128xf32>, vector<128x512xf32>, vector<1x512xf32> -> vector<1x512xf32>
    %462 = vector.extract_strided_slice %432 {offsets = [0, 512], sizes = [1, 512], strides = [1, 1]} : vector<1x1024xf32> to vector<1x512xf32>
    %463 = arith.addf %461, %462 : vector<1x512xf32>
    %464 = arith.addf %463, %1 : vector<1x512xf32>
    %465 = vector.extract_strided_slice %464 {offsets = [0, 0], sizes = [1, 128], strides = [1, 1]} : vector<1x512xf32> to vector<1x128xf32>
    %466 = arith.negf %465 : vector<1x128xf32>
    %467 = math.exp %466 : vector<1x128xf32>
    %cst_98 = arith.constant 1.000000e+00 : f32
    %468 = vector.broadcast %cst_98 : f32 to vector<1x128xf32>
    %469 = arith.addf %468, %467 : vector<1x128xf32>
    %470 = arith.divf %468, %469 : vector<1x128xf32>
    %471 = vector.extract_strided_slice %464 {offsets = [0, 128], sizes = [1, 128], strides = [1, 1]} : vector<1x512xf32> to vector<1x128xf32>
    %472 = arith.negf %471 : vector<1x128xf32>
    %473 = math.exp %472 : vector<1x128xf32>
    %cst_99 = arith.constant 1.000000e+00 : f32
    %474 = vector.broadcast %cst_99 : f32 to vector<1x128xf32>
    %475 = arith.addf %474, %473 : vector<1x128xf32>
    %476 = arith.divf %474, %475 : vector<1x128xf32>
    %477 = vector.extract_strided_slice %464 {offsets = [0, 256], sizes = [1, 128], strides = [1, 1]} : vector<1x512xf32> to vector<1x128xf32>
    %478 = math.tanh %477 : vector<1x128xf32>
    %479 = vector.extract_strided_slice %464 {offsets = [0, 384], sizes = [1, 128], strides = [1, 1]} : vector<1x512xf32> to vector<1x128xf32>
    %480 = arith.negf %479 : vector<1x128xf32>
    %481 = math.exp %480 : vector<1x128xf32>
    %cst_100 = arith.constant 1.000000e+00 : f32
    %482 = vector.broadcast %cst_100 : f32 to vector<1x128xf32>
    %483 = arith.addf %482, %481 : vector<1x128xf32>
    %484 = arith.divf %482, %483 : vector<1x128xf32>
    %485 = arith.mulf %476, %427 : vector<1x128xf32>
    %486 = arith.mulf %470, %478 : vector<1x128xf32>
    %487 = arith.addf %485, %486 : vector<1x128xf32>
    %488 = math.tanh %487 : vector<1x128xf32>
    %489 = arith.mulf %484, %488 : vector<1x128xf32>
    %c7_101 = arith.constant 7 : index
    %c0_102 = arith.constant 0 : index
    %490 = vector.load %arg10[%c7_101, %c0_102] : memref<8x128xf32, #tpu.memory_space<vmem>>, vector<1x128xf32>
    tpu.vector_store %arg10[%c7_101, %c0_102], %489 {strides = array<i32>} : memref<8x128xf32, #tpu.memory_space<vmem>>, vector<1x128xf32>,
    %c0_103 = arith.constant 0 : index
    %c0_104 = arith.constant 0 : index
    %491 = vector.load %arg10[%c0_103, %c0_104] : memref<8x128xf32, #tpu.memory_space<vmem>>, vector<8x128xf32>
    %c0_105 = arith.constant 0 : index
    %c0_106 = arith.constant 0 : index
    %492 = vector.load %arg6[%c0_105, %c0_106] : memref<128x32xf32, #tpu.memory_space<vmem>>, vector<128x32xf32>
    %cst_107 = arith.constant dense<0.000000e+00> : vector<8x32xf32>
    %493 = tpu.matmul %491, %492, %cst_107 {dimension_numbers = #tpu.dot_dimension_numbers<[1], [0], [0], [1], [0, 0, 1, 1], [], []>} : vector<8x128xf32>, vector<128x32xf32>, vector<8x32xf32> -> vector<8x32xf32>
    %c0_108 = arith.constant 0 : index
    %c0_109 = arith.constant 0 : index
    %494 = vector.load %arg7[%c0_108, %c0_109] : memref<1x32xf32, #tpu.memory_space<vmem>>, vector<1x32xf32>
    %495 = vector.broadcast %494 : vector<1x32xf32> to vector<8x32xf32>
    %496 = arith.addf %493, %495 : vector<8x32xf32>
    %cst_110 = arith.constant dense<0xFF800000> : vector<8xf32>
    %497 = vector.multi_reduction <maximumf>, %496, %cst_110 [1] : vector<8x32xf32> to vector<8xf32>
    %498 = vector.shape_cast %497 : vector<8xf32> to vector<8x1xf32>
    %499 = vector.broadcast %498 : vector<8x1xf32> to vector<8x32xf32>
    %500 = arith.subf %496, %499 : vector<8x32xf32>
    %501 = math.exp %500 : vector<8x32xf32>
    %cst_111 = arith.constant dense<0.000000e+00> : vector<8xf32>
    %502 = vector.multi_reduction <add>, %501, %cst_111 [1] : vector<8x32xf32> to vector<8xf32>
    %503 = vector.shape_cast %502 : vector<8xf32> to vector<8x1xf32>
    %504 = math.log %503 : vector<8x1xf32>
    %505 = vector.broadcast %504 : vector<8x1xf32> to vector<8x32xf32>
    %506 = arith.subf %500, %505 : vector<8x32xf32>
    %c0_112 = arith.constant 0 : index
    %c0_113 = arith.constant 0 : index
    %507 = vector.load %arg8[%c0_112, %c0_113] : memref<8x32xf32, #tpu.memory_space<vmem>>, vector<8x32xf32>
    tpu.vector_store %arg8[%c0_112, %c0_113], %506 {strides = array<i32>} : memref<8x32xf32, #tpu.memory_space<vmem>>, vector<8x32xf32>,
    return
  }
}

</mosaic_0001>

<bundles_post_ra>
// kernel: tpu_custom_call.1
= control target key start
LH: loop header
LB: loop body
LE: loop exit
PB: predicated region body
PF: predicated region fallthrough
CT: control target
= control target key end

     0   :  { %13 = vsyncpa [#allocation5], 0  ;;  %s11052_s0 = inlined_call_operand.vmem [shape: f32[8,128], index: 0, kind: input, shape index: {}]   ;;  %s11053_s1 = inlined_call_operand.hbm [shape: f32[128,512], index: 1, kind: input, shape index: {}]   ;;  %s11054_s2 = inlined_call_operand.vmem [shape: f32[1,512], index: 2, kind: input, shape index: {}]   ;;  %s11055_s3 = inlined_call_operand.hbm [shape: f32[128,512], index: 3, kind: input, shape index: {}]   ;;  %s11056_s4 = inlined_call_operand.vmem [shape: f32[1,512], index: 4, kind: input, shape index: {}]   ;;  %s11057_s5 = inlined_call_operand.hbm [shape: f32[256,1024], index: 5, kind: input, shape index: {}]   ;;  %s11058_s6 = inlined_call_operand.vmem [shape: f32[128,32], index: 6, kind: input, shape index: {}]   ;;  %s11059_s7 = inlined_call_operand.vmem [shape: f32[1,32], index: 7, kind: input, shape index: {}]   ;;  %s11060_s8 = inlined_call_operand.hbm [shape: f32[8,32], index: 8, kind: output, shape index: {}]  }
   0x1   :  { %14 = vsyncpa [#allocation8], 0 }
   0x2   :  { %15 = vsyncpa [#allocation6], 0  ;;  %s6589_s27 = smov [#allocation7]   ;;  %s6590_s29 = smov [#allocation4]  }
   0x3   :  { %s37_s28 = sshll.u32 %s6589_s27, 4  ;;  %s23_s30 = sshll.u32 %s6590_s29, 4  ;;  %s38_s28 = int_to_ptr.vmem [resolvable:$true] %s37_s28  ;;  %s24_s30 = int_to_ptr.vmem [resolvable:$true] %s23_s30 }
   0x4   :  { %s6511_s9 = scalar_lea.vmem %s38_s28, 8192  ;;  %p6516_p1 = scmp.lt.s32.totalorder %s38_s28, %s38_s28 }
   0x5   :  { %p6512_p0 = scmp.ne.s32.totalorder %s38_s28, %s6511_s9  ;;  %p6517_p2 = scmp.lt.s32.totalorder %s6511_s9, %s6511_s9 }
   0x7   :  { %p6518_p3 = por %p6517_p2, %p6516_p1 }
   0x9   :  { %p6519_p4 = pnand %p6518_p3, %p6512_p0 }
   0xb   :  { %6522 = shalt.err (!%p6519_p4)
}
   0xc   :  { %s6591_s10 = smov 512   ;;  %s6592_s11 = smov 32  }
   0xd   :  { %43 = dma.hbm_to_vmem [thread:$0]  %s11055_s3, 8192, %s38_s28, [#allocation8], %s6591_s10, %s6591_s10, %s6592_s11  }
   0xe   :  { %s6531_s14 = scalar_lea.vmem %s24_s30, 8192  ;;  %p6536_p6 = scmp.lt.s32.totalorder %s24_s30, %s24_s30 }
   0xf   :  { %p6532_p5 = scmp.ne.s32.totalorder %s24_s30, %s6531_s14  ;;  %p6537_p7 = scmp.lt.s32.totalorder %s6531_s14, %s6531_s14 }
  0x11   :  { %p6538_p8 = por %p6537_p7, %p6536_p6 }
  0x13   :  { %p6539_p9 = pnand %p6538_p8, %p6532_p5 }
  0x15   :  { %6542 = shalt.err (!%p6539_p9)
}
  0x16   :  { %29 = dma.hbm_to_vmem [thread:$0]  %s11053_s1, 8192, %s24_s30, [#allocation5], %s6591_s10, %s6591_s10, %s6592_s11  }
  0x17   :  { %s6593_s17 = smov [#allocation9]  }
  0x18   :  { %s51_s18 = sshll.u32 %s6593_s17, 4  ;;  %s52_s18 = int_to_ptr.vmem [resolvable:$true] %s51_s18 }
  0x19   :  { %s6551_s19 = scalar_lea.vmem %s52_s18, 32768  ;;  %p6556_p11 = scmp.lt.s32.totalorder %s52_s18, %s52_s18 }
  0x1a   :  { %p6552_p10 = scmp.ne.s32.totalorder %s52_s18, %s6551_s19  ;;  %p6557_p12 = scmp.lt.s32.totalorder %s6551_s19, %s6551_s19 }
  0x1c   :  { %p6558_p13 = por %p6557_p12, %p6556_p11 }
  0x1e   :  { %p6559_p0 = pnand %p6558_p13, %p6552_p10 }
  0x20   :  { %6562 = shalt.err (!%p6559_p0)
}
  0x21   :  { %s6594_s3 = smov 1024   ;;  %s6595_s20 = smov 64  }
  0x22   :  { %57 = dma.hbm_to_vmem [thread:$0]  %s11057_s5, 32768, %s52_s18, [#allocation8], %s6594_s3, %s6594_s3, %s6595_s20  }
  0x23   :  { %6583 = dma.done.wait [#allocation5], 8192  }
  0x24   :  { %6584 = vsyncadd [#allocation5], 4294959104 }
  0x25   :  { %6585 = dma.done.wait [#allocation8], 40960  }
  0x26   :  { %6586 = vsyncadd [#allocation8], 4294926336  ;;  %v11063_v0 = vmov 0.0   ;;  %v454_v1 = vld [vmem:[#allocation4 + $0x1e8] sm:$0xff]  ;;  %v456_v2 = vld [vmem:[#allocation4 + $0x1f8] sm:$0xff]  ;;  %vm6598_vm0 = vmmov 0  }
  0x27   :  { %543 = vmatprep.mubr.f32.mxu0 %v11063_v0  ;;  %614 = vmatprep.mubr.f32.mxu1 %v11063_v0  ;;  %v453_v3 = vld [vmem:[#allocation4 + $0x1e0] sm:$0xff]  ;;  %v455_v4 = vld [vmem:[#allocation4 + $0x1f0] sm:$0xff]  ;;  %v450_v5 = vld [vmem:[#allocation4 + $0x1c8] sm:$0xff]  ;;  %vm4883_vm1 = vcmask 261120   ;;  %s6599_s29 = smov [#allocation10]  }
  0x28   :  { %479 = vmatprep.subr.mxu0 %v454_v1  ;;  %550 = vmatprep.subr.mxu1 %v456_v2  ;;  %v452_v6 = vld [vmem:[#allocation4 + $0x1d8] sm:$0xff]  ;;  %v449_v7 = vld [vmem:[#allocation4 + $0x1c0] sm:$0xff]  ;;  %v451_v8 = vld [vmem:[#allocation4 + $0x1d0] sm:$0xff] }
  0x29   :  { %480 = vmatpush1.msra.mxu0 %v453_v3  ;;  %551 = vmatpush1.msra.mxu1 %v455_v4  ;;  %v446_v9 = vld [vmem:[#allocation4 + $0x1a8] sm:$0xff]  ;;  %v448_v10 = vld [vmem:[#allocation4 + $0x1b8] sm:$0xff]  ;;  %v445_v11 = vld [vmem:[#allocation4 + $0x1a0] sm:$0xff] }
  0x2a   :  { %481 = vmatprep.subr.mxu0 %v450_v5  ;;  %552 = vmatprep.subr.mxu1 %v452_v6  ;;  %v447_v12 = vld [vmem:[#allocation4 + $0x1b0] sm:$0xff]  ;;  %v442_v13 = vld [vmem:[#allocation4 + $0x188] sm:$0xff]  ;;  %v444_v14 = vld [vmem:[#allocation4 + $0x198] sm:$0xff] }
  0x2b   :  { %482 = vmatpush1.msra.mxu0 %v449_v7  ;;  %553 = vmatpush1.msra.mxu1 %v451_v8  ;;  %v441_v15 = vld [vmem:[#allocation4 + $0x180] sm:$0xff]  ;;  %v443_v16 = vld [vmem:[#allocation4 + $0x190] sm:$0xff]  ;;  %v438_v17 = vld [vmem:[#allocation4 + $0x168] sm:$0xff] }
  0x2c   :  { %483 = vmatprep.subr.mxu0 %v446_v9  ;;  %554 = vmatprep.subr.mxu1 %v448_v10  ;;  %v440_v18 = vld [vmem:[#allocation4 + $0x178] sm:$0xff]  ;;  %v437_v19 = vld [vmem:[#allocation4 + $0x160] sm:$0xff]  ;;  %v439_v20 = vld [vmem:[#allocation4 + $0x170] sm:$0xff] }
  0x2d   :  { %484 = vmatpush1.msra.mxu0 %v445_v11  ;;  %555 = vmatpush1.msra.mxu1 %v447_v12  ;;  %v434_v21 = vld [vmem:[#allocation4 + $0x148] sm:$0xff]  ;;  %v436_v22 = vld [vmem:[#allocation4 + $0x158] sm:$0xff]  ;;  %v433_v23 = vld [vmem:[#allocation4 + $0x140] sm:$0xff] }
  0x2e   :  { %485 = vmatprep.subr.mxu0 %v442_v13  ;;  %556 = vmatprep.subr.mxu1 %v444_v14  ;;  %v435_v24 = vld [vmem:[#allocation4 + $0x150] sm:$0xff]  ;;  %v430_v25 = vld [vmem:[#allocation4 + $0x128] sm:$0xff]  ;;  %v432_v26 = vld [vmem:[#allocation4 + $0x138] sm:$0xff] }
  0x2f   :  { %486 = vmatpush1.msra.mxu0 %v441_v15  ;;  %557 = vmatpush1.msra.mxu1 %v443_v16  ;;  %v429_v27 = vld [vmem:[#allocation4 + $0x120] sm:$0xff]  ;;  %v431_v28 = vld [vmem:[#allocation4 + $0x130] sm:$0xff]  ;;  %v426_v29 = vld [vmem:[#allocation4 + $0x108] sm:$0xff] }
  0x30   :  { %487 = vmatprep.subr.mxu0 %v438_v17  ;;  %558 = vmatprep.subr.mxu1 %v440_v18  ;;  %v428_v30 = vld [vmem:[#allocation4 + $0x118] sm:$0xff]  ;;  %v425_v31 = vld [vmem:[#allocation4 + $0x100] sm:$0xff]  ;;  %v427_v32 = vld [vmem:[#allocation4 + $0x110] sm:$0xff] }
  0x31   :  { %488 = vmatpush1.msra.mxu0 %v437_v19  ;;  %559 = vmatpush1.msra.mxu1 %v439_v20  ;;  %v422_v33 = vld [vmem:[#allocation4 + $0xe8] sm:$0xff]  ;;  %v424_v34 = vld [vmem:[#allocation4 + $0xf8] sm:$0xff]  ;;  %v421_v35 = vld [vmem:[#allocation4 + $0xe0] sm:$0xff] }
  0x32   :  { %489 = vmatprep.subr.mxu0 %v434_v21  ;;  %560 = vmatprep.subr.mxu1 %v436_v22  ;;  %v423_v36 = vld [vmem:[#allocation4 + $0xf0] sm:$0xff]  ;;  %v418_v37 = vld [vmem:[#allocation4 + $0xc8] sm:$0xff]  ;;  %v420_v38 = vld [vmem:[#allocation4 + $0xd8] sm:$0xff] }
  0x33   :  { %490 = vmatpush1.msra.mxu0 %v433_v23  ;;  %561 = vmatpush1.msra.mxu1 %v435_v24  ;;  %v417_v39 = vld [vmem:[#allocation4 + $0xc0] sm:$0xff]  ;;  %v419_v40 = vld [vmem:[#allocation4 + $0xd0] sm:$0xff]  ;;  %v414_v41 = vld [vmem:[#allocation4 + $0xa8] sm:$0xff] }
  0x34   :  { %491 = vmatprep.subr.mxu0 %v430_v25  ;;  %562 = vmatprep.subr.mxu1 %v432_v26  ;;  %v416_v42 = vld [vmem:[#allocation4 + $0xb8] sm:$0xff]  ;;  %v413_v43 = vld [vmem:[#allocation4 + $0xa0] sm:$0xff]  ;;  %v415_v44 = vld [vmem:[#allocation4 + $0xb0] sm:$0xff] }
  0x35   :  { %492 = vmatpush1.msra.mxu0 %v429_v27  ;;  %563 = vmatpush1.msra.mxu1 %v431_v28  ;;  %v410_v45 = vld [vmem:[#allocation4 + $0x88] sm:$0xff]  ;;  %v412_v46 = vld [vmem:[#allocation4 + $0x98] sm:$0xff]  ;;  %v409_v47 = vld [vmem:[#allocation4 + $0x80] sm:$0xff] }
  0x36   :  { %493 = vmatprep.subr.mxu0 %v426_v29  ;;  %564 = vmatprep.subr.mxu1 %v428_v30  ;;  %v411_v48 = vld [vmem:[#allocation4 + $0x90] sm:$0xff]  ;;  %v406_v49 = vld [vmem:[#allocation4 + $0x68] sm:$0xff]  ;;  %v408_v50 = vld [vmem:[#allocation4 + $0x78] sm:$0xff] }
  0x37   :  { %494 = vmatpush1.msra.mxu0 %v425_v31  ;;  %565 = vmatpush1.msra.mxu1 %v427_v32  ;;  %v405_v51 = vld [vmem:[#allocation4 + $0x60] sm:$0xff]  ;;  %v407_v52 = vld [vmem:[#allocation4 + $0x70] sm:$0xff]  ;;  %v402_v53 = vld [vmem:[#allocation4 + $0x48] sm:$0xff] }
  0x38   :  { %495 = vmatprep.subr.mxu0 %v422_v33  ;;  %566 = vmatprep.subr.mxu1 %v424_v34  ;;  %v404_v54 = vld [vmem:[#allocation4 + $0x58] sm:$0xff]  ;;  %v401_v55 = vld [vmem:[#allocation4 + $0x40] sm:$0xff]  ;;  %v403_v56 = vld [vmem:[#allocation4 + $0x50] sm:$0xff] }
  0x39   :  { %496 = vmatpush1.msra.mxu0 %v421_v35  ;;  %567 = vmatpush1.msra.mxu1 %v423_v36  ;;  %v398_v57 = vld [vmem:[#allocation4 + $0x28] sm:$0xff]  ;;  %v400_v58 = vld [vmem:[#allocation4 + $0x38] sm:$0xff]  ;;  %v397_v59 = vld [vmem:[#allocation4 + $0x20] sm:$0xff] }
  0x3a   :  { %497 = vmatprep.subr.mxu0 %v418_v37  ;;  %568 = vmatprep.subr.mxu1 %v420_v38  ;;  %v399_v60 = vld [vmem:[#allocation4 + $0x30] sm:$0xff]  ;;  %v394_v61 = vld [vmem:[#allocation4 + $0x8] sm:$0xff]  ;;  %v396_v62 = vld [vmem:[#allocation4 + $0x18] sm:$0xff] }
  0x3b   :  { %498 = vmatpush1.msra.mxu0 %v417_v39  ;;  %569 = vmatpush1.msra.mxu1 %v419_v40  ;;  %v393_v63 = vld [vmem:[#allocation4] sm:$0xff]  ;;  %v395_v1 = vld [vmem:[#allocation4 + $0x10] sm:$0xff]  ;;  %v392_v2 = vld [vmem:[%s11052_s0] sm:$0xff] }
  0x3c   :  { %499 = vmatprep.subr.mxu0 %v414_v41  ;;  %570 = vmatprep.subr.mxu1 %v416_v42  ;;  %v257_v3 = vld [vmem:[#allocation9 + $0x3c8] sm:$0xff]  ;;  %v259_v4 = vld [vmem:[#allocation9 + $0x3d8] sm:$0xff]  ;;  %v256_v5 = vld [vmem:[#allocation9 + $0x3c0] sm:$0xff] }
  0x3d   :  { %500 = vmatpush1.msra.mxu0 %v413_v43  ;;  %571 = vmatpush1.msra.mxu1 %v415_v44  ;;  %v258_v6 = vld [vmem:[#allocation9 + $0x3d0] sm:$0xff]  ;;  %v249_v7 = vld [vmem:[#allocation9 + $0x388] sm:$0xff]  ;;  %v251_v8 = vld [vmem:[#allocation9 + $0x398] sm:$0xff] }
  0x3e   :  { %501 = vmatprep.subr.mxu0 %v410_v45  ;;  %572 = vmatprep.subr.mxu1 %v412_v46  ;;  %v248_v9 = vld [vmem:[#allocation9 + $0x380] sm:$0xff]  ;;  %v250_v10 = vld [vmem:[#allocation9 + $0x390] sm:$0xff]  ;;  %v241_v11 = vld [vmem:[#allocation9 + $0x348] sm:$0xff] }
  0x3f   :  { %502 = vmatpush1.msra.mxu0 %v409_v47  ;;  %573 = vmatpush1.msra.mxu1 %v411_v48  ;;  %v243_v12 = vld [vmem:[#allocation9 + $0x358] sm:$0xff]  ;;  %v240_v13 = vld [vmem:[#allocation9 + $0x340] sm:$0xff]  ;;  %v242_v14 = vld [vmem:[#allocation9 + $0x350] sm:$0xff] }
  0x40   :  { %503 = vmatprep.subr.mxu0 %v406_v49  ;;  %574 = vmatprep.subr.mxu1 %v408_v50  ;;  %v233_v15 = vld [vmem:[#allocation9 + $0x308] sm:$0xff]  ;;  %v235_v16 = vld [vmem:[#allocation9 + $0x318] sm:$0xff]  ;;  %v232_v17 = vld [vmem:[#allocation9 + $0x300] sm:$0xff] }
  0x41   :  { %504 = vmatpush1.msra.mxu0 %v405_v51  ;;  %575 = vmatpush1.msra.mxu1 %v407_v52  ;;  %v234_v18 = vld [vmem:[#allocation9 + $0x310] sm:$0xff]  ;;  %v225_v19 = vld [vmem:[#allocation9 + $0x2c8] sm:$0xff]  ;;  %v227_v20 = vld [vmem:[#allocation9 + $0x2d8] sm:$0xff] }
  0x42   :  { %505 = vmatprep.subr.mxu0 %v402_v53  ;;  %576 = vmatprep.subr.mxu1 %v404_v54  ;;  %v224_v21 = vld [vmem:[#allocation9 + $0x2c0] sm:$0xff]  ;;  %v226_v22 = vld [vmem:[#allocation9 + $0x2d0] sm:$0xff]  ;;  %v217_v23 = vld [vmem:[#allocation9 + $0x288] sm:$0xff] }
  0x43   :  { %506 = vmatpush1.msra.mxu0 %v401_v55  ;;  %577 = vmatpush1.msra.mxu1 %v403_v56  ;;  %v219_v24 = vld [vmem:[#allocation9 + $0x298] sm:$0xff]  ;;  %v216_v25 = vld [vmem:[#allocation9 + $0x280] sm:$0xff]  ;;  %v218_v26 = vld [vmem:[#allocation9 + $0x290] sm:$0xff] }
  0x44   :  { %507 = vmatprep.subr.mxu0 %v398_v57  ;;  %578 = vmatprep.subr.mxu1 %v400_v58  ;;  %v209_v27 = vld [vmem:[#allocation9 + $0x248] sm:$0xff]  ;;  %v211_v28 = vld [vmem:[#allocation9 + $0x258] sm:$0xff]  ;;  %v208_v29 = vld [vmem:[#allocation9 + $0x240] sm:$0xff] }
  0x45   :  { %508 = vmatpush1.msra.mxu0 %v397_v59  ;;  %579 = vmatpush1.msra.mxu1 %v399_v60  ;;  %v210_v30 = vld [vmem:[#allocation9 + $0x250] sm:$0xff]  ;;  %v201_v31 = vld [vmem:[#allocation9 + $0x208] sm:$0xff]  ;;  %v203_v32 = vld [vmem:[#allocation9 + $0x218] sm:$0xff] }
  0x46   :  { %509 = vmatprep.subr.mxu0 %v394_v61  ;;  %580 = vmatprep.subr.mxu1 %v396_v62  ;;  %v200_v33 = vld [vmem:[#allocation9 + $0x200] sm:$0xff]  ;;  %v202_v34 = vld [vmem:[#allocation9 + $0x210] sm:$0xff]  ;;  %v193_v35 = vld [vmem:[#allocation9 + $0x1c8] sm:$0xff] }
  0x47   :  { %510 = vmatpush1.msra.mxu0 %v393_v63  ;;  %581 = vmatpush1.msra.mxu1 %v395_v1  ;;  %v195_v36 = vld [vmem:[#allocation9 + $0x1d8] sm:$0xff]  ;;  %v192_v37 = vld [vmem:[#allocation9 + $0x1c0] sm:$0xff]  ;;  %v194_v38 = vld [vmem:[#allocation9 + $0x1d0] sm:$0xff] }
  0x48   :  { %544 = vmatmul.mubr.f32.vlgmr.msra.gmra.mxu0 %v392_v2  ;;  %615 = vmatmul.mubr.f32.vlgmr.msra.gmra.mxu1 %v392_v2  ;;  %v185_v39 = vld [vmem:[#allocation9 + $0x188] sm:$0xff]  ;;  %v187_v40 = vld [vmem:[#allocation9 + $0x198] sm:$0xff]  ;;  %v184_v41 = vld [vmem:[#allocation9 + $0x180] sm:$0xff] }
  0x49   :  { %625 = vmatprep.subr.mxu0 %v257_v3  ;;  %696 = vmatprep.subr.mxu1 %v259_v4  ;;  %v186_v42 = vld [vmem:[#allocation9 + $0x190] sm:$0xff]  ;;  %v177_v43 = vld [vmem:[#allocation9 + $0x148] sm:$0xff]  ;;  %v179_v44 = vld [vmem:[#allocation9 + $0x158] sm:$0xff] }
  0x4a   :  { %626 = vmatpush1.msra.mxu0 %v256_v5  ;;  %697 = vmatpush1.msra.mxu1 %v258_v6  ;;  %v176_v45 = vld [vmem:[#allocation9 + $0x140] sm:$0xff]  ;;  %v178_v46 = vld [vmem:[#allocation9 + $0x150] sm:$0xff]  ;;  %v169_v47 = vld [vmem:[#allocation9 + $0x108] sm:$0xff] }
  0x4b   :  { %627 = vmatprep.subr.mxu0 %v249_v7  ;;  %698 = vmatprep.subr.mxu1 %v251_v8  ;;  %v171_v48 = vld [vmem:[#allocation9 + $0x118] sm:$0xff]  ;;  %v168_v49 = vld [vmem:[#allocation9 + $0x100] sm:$0xff]  ;;  %v170_v50 = vld [vmem:[#allocation9 + $0x110] sm:$0xff] }
  0x4c   :  { %628 = vmatpush1.msra.mxu0 %v248_v9  ;;  %699 = vmatpush1.msra.mxu1 %v250_v10  ;;  %v161_v51 = vld [vmem:[#allocation9 + $0xc8] sm:$0xff]  ;;  %v163_v52 = vld [vmem:[#allocation9 + $0xd8] sm:$0xff]  ;;  %v160_v53 = vld [vmem:[#allocation9 + $0xc0] sm:$0xff] }
  0x4d   :  { %629 = vmatprep.subr.mxu0 %v241_v11  ;;  %700 = vmatprep.subr.mxu1 %v243_v12  ;;  %v162_v54 = vld [vmem:[#allocation9 + $0xd0] sm:$0xff]  ;;  %v153_v55 = vld [vmem:[#allocation9 + $0x88] sm:$0xff]  ;;  %v155_v56 = vld [vmem:[#allocation9 + $0x98] sm:$0xff] }
  0x4e   :  { %630 = vmatpush1.msra.mxu0 %v240_v13  ;;  %701 = vmatpush1.msra.mxu1 %v242_v14  ;;  %v152_v57 = vld [vmem:[#allocation9 + $0x80] sm:$0xff]  ;;  %v154_v58 = vld [vmem:[#allocation9 + $0x90] sm:$0xff]  ;;  %v145_v59 = vld [vmem:[#allocation9 + $0x48] sm:$0xff] }
  0x4f   :  { %631 = vmatprep.subr.mxu0 %v233_v15  ;;  %702 = vmatprep.subr.mxu1 %v235_v16  ;;  %v147_v60 = vld [vmem:[#allocation9 + $0x58] sm:$0xff]  ;;  %v144_v61 = vld [vmem:[#allocation9 + $0x40] sm:$0xff]  ;;  %v146_v62 = vld [vmem:[#allocation9 + $0x50] sm:$0xff] }
  0x50   :  { %632 = vmatpush1.msra.mxu0 %v232_v17  ;;  %703 = vmatpush1.msra.mxu1 %v234_v18  ;;  %v137_v63 = vld [vmem:[#allocation9 + $0x8] sm:$0xff]  ;;  %v139_v1 = vld [vmem:[#allocation9 + $0x18] sm:$0xff]  ;;  %v136_v2 = vld [vmem:[#allocation9] sm:$0xff] }
  0x51   :  { %633 = vmatprep.subr.mxu0 %v225_v19  ;;  %704 = vmatprep.subr.mxu1 %v227_v20  ;;  %v138_v3 = vld [vmem:[#allocation9 + $0x10] sm:$0xff]  ;;  %v385_v4 = vld [vmem:[#allocation9 + $0x7c8] sm:$0xff]  ;;  %v387_v5 = vld [vmem:[#allocation9 + $0x7d8] sm:$0xff] }
  0x52   :  { %634 = vmatpush1.msra.mxu0 %v224_v21  ;;  %705 = vmatpush1.msra.mxu1 %v226_v22  ;;  %v384_v6 = vld [vmem:[#allocation9 + $0x7c0] sm:$0xff]  ;;  %v386_v7 = vld [vmem:[#allocation9 + $0x7d0] sm:$0xff]  ;;  %v377_v8 = vld [vmem:[#allocation9 + $0x788] sm:$0xff] }
  0x53   :  { %635 = vmatprep.subr.mxu0 %v217_v23  ;;  %706 = vmatprep.subr.mxu1 %v219_v24  ;;  %v379_v9 = vld [vmem:[#allocation9 + $0x798] sm:$0xff]  ;;  %v376_v10 = vld [vmem:[#allocation9 + $0x780] sm:$0xff]  ;;  %v378_v11 = vld [vmem:[#allocation9 + $0x790] sm:$0xff] }
  0x54   :  { %636 = vmatpush1.msra.mxu0 %v216_v25  ;;  %707 = vmatpush1.msra.mxu1 %v218_v26  ;;  %v369_v12 = vld [vmem:[#allocation9 + $0x748] sm:$0xff]  ;;  %v371_v13 = vld [vmem:[#allocation9 + $0x758] sm:$0xff]  ;;  %v368_v14 = vld [vmem:[#allocation9 + $0x740] sm:$0xff] }
  0x55   :  { %637 = vmatprep.subr.mxu0 %v209_v27  ;;  %708 = vmatprep.subr.mxu1 %v211_v28  ;;  %v370_v15 = vld [vmem:[#allocation9 + $0x750] sm:$0xff]  ;;  %v361_v16 = vld [vmem:[#allocation9 + $0x708] sm:$0xff]  ;;  %v363_v17 = vld [vmem:[#allocation9 + $0x718] sm:$0xff] }
  0x56   :  { %638 = vmatpush1.msra.mxu0 %v208_v29  ;;  %709 = vmatpush1.msra.mxu1 %v210_v30  ;;  %v360_v18 = vld [vmem:[#allocation9 + $0x700] sm:$0xff]  ;;  %v362_v19 = vld [vmem:[#allocation9 + $0x710] sm:$0xff]  ;;  %v353_v20 = vld [vmem:[#allocation9 + $0x6c8] sm:$0xff] }
  0x57   :  { %639 = vmatprep.subr.mxu0 %v201_v31  ;;  %710 = vmatprep.subr.mxu1 %v203_v32  ;;  %v355_v21 = vld [vmem:[#allocation9 + $0x6d8] sm:$0xff]  ;;  %v352_v22 = vld [vmem:[#allocation9 + $0x6c0] sm:$0xff]  ;;  %v354_v23 = vld [vmem:[#allocation9 + $0x6d0] sm:$0xff] }
  0x58   :  { %640 = vmatpush1.msra.mxu0 %v200_v33  ;;  %711 = vmatpush1.msra.mxu1 %v202_v34  ;;  %v345_v24 = vld [vmem:[#allocation9 + $0x688] sm:$0xff]  ;;  %v347_v25 = vld [vmem:[#allocation9 + $0x698] sm:$0xff]  ;;  %v344_v26 = vld [vmem:[#allocation9 + $0x680] sm:$0xff] }
  0x59   :  { %641 = vmatprep.subr.mxu0 %v193_v35  ;;  %712 = vmatprep.subr.mxu1 %v195_v36  ;;  %v346_v27 = vld [vmem:[#allocation9 + $0x690] sm:$0xff]  ;;  %v337_v28 = vld [vmem:[#allocation9 + $0x648] sm:$0xff]  ;;  %v339_v29 = vld [vmem:[#allocation9 + $0x658] sm:$0xff] }
  0x5a   :  { %642 = vmatpush1.msra.mxu0 %v192_v37  ;;  %713 = vmatpush1.msra.mxu1 %v194_v38  ;;  %v336_v30 = vld [vmem:[#allocation9 + $0x640] sm:$0xff]  ;;  %v338_v31 = vld [vmem:[#allocation9 + $0x650] sm:$0xff]  ;;  %v329_v32 = vld [vmem:[#allocation9 + $0x608] sm:$0xff] }
  0x5b   :  { %643 = vmatprep.subr.mxu0 %v185_v39  ;;  %714 = vmatprep.subr.mxu1 %v187_v40  ;;  %v331_v33 = vld [vmem:[#allocation9 + $0x618] sm:$0xff]  ;;  %v328_v34 = vld [vmem:[#allocation9 + $0x600] sm:$0xff]  ;;  %v330_v35 = vld [vmem:[#allocation9 + $0x610] sm:$0xff] }
  0x5c   :  { %644 = vmatpush1.msra.mxu0 %v184_v41  ;;  %715 = vmatpush1.msra.mxu1 %v186_v42  ;;  %v321_v36 = vld [vmem:[#allocation9 + $0x5c8] sm:$0xff]  ;;  %v323_v37 = vld [vmem:[#allocation9 + $0x5d8] sm:$0xff]  ;;  %v320_v38 = vld [vmem:[#allocation9 + $0x5c0] sm:$0xff] }
  0x5d   :  { %645 = vmatprep.subr.mxu0 %v177_v43  ;;  %716 = vmatprep.subr.mxu1 %v179_v44  ;;  %v322_v39 = vld [vmem:[#allocation9 + $0x5d0] sm:$0xff]  ;;  %v313_v40 = vld [vmem:[#allocation9 + $0x588] sm:$0xff]  ;;  %v315_v41 = vld [vmem:[#allocation9 + $0x598] sm:$0xff] }
  0x5e   :  { %646 = vmatpush1.msra.mxu0 %v176_v45  ;;  %717 = vmatpush1.msra.mxu1 %v178_v46  ;;  %v312_v42 = vld [vmem:[#allocation9 + $0x580] sm:$0xff]  ;;  %v314_v43 = vld [vmem:[#allocation9 + $0x590] sm:$0xff]  ;;  %v305_v44 = vld [vmem:[#allocation9 + $0x548] sm:$0xff] }
  0x5f   :  { %647 = vmatprep.subr.mxu0 %v169_v47  ;;  %718 = vmatprep.subr.mxu1 %v171_v48  ;;  %v307_v45 = vld [vmem:[#allocation9 + $0x558] sm:$0xff]  ;;  %v304_v46 = vld [vmem:[#allocation9 + $0x540] sm:$0xff]  ;;  %v306_v47 = vld [vmem:[#allocation9 + $0x550] sm:$0xff] }
  0x60   :  { %648 = vmatpush1.msra.mxu0 %v168_v49  ;;  %719 = vmatpush1.msra.mxu1 %v170_v50  ;;  %v297_v48 = vld [vmem:[#allocation9 + $0x508] sm:$0xff]  ;;  %v299_v49 = vld [vmem:[#allocation9 + $0x518] sm:$0xff]  ;;  %v296_v50 = vld [vmem:[#allocation9 + $0x500] sm:$0xff] }
  0x61   :  { %649 = vmatprep.subr.mxu0 %v161_v51  ;;  %720 = vmatprep.subr.mxu1 %v163_v52  ;;  %v298_v51 = vld [vmem:[#allocation9 + $0x510] sm:$0xff]  ;;  %v289_v52 = vld [vmem:[#allocation9 + $0x4c8] sm:$0xff] }
  0x62   :  { %650 = vmatpush1.msra.mxu0 %v160_v53  ;;  %721 = vmatpush1.msra.mxu1 %v162_v54  ;;  %v291_v53 = vld [vmem:[#allocation9 + $0x4d8] sm:$0xff]  ;;  %v288_v54 = vld [vmem:[#allocation9 + $0x4c0] sm:$0xff] }
  0x63   :  { %651 = vmatprep.subr.mxu0 %v153_v55  ;;  %722 = vmatprep.subr.mxu1 %v155_v56  ;;  %v290_v55 = vld [vmem:[#allocation9 + $0x4d0] sm:$0xff]  ;;  %v281_v56 = vld [vmem:[#allocation9 + $0x488] sm:$0xff] }
  0x64   :  { %652 = vmatpush1.msra.mxu0 %v152_v57  ;;  %723 = vmatpush1.msra.mxu1 %v154_v58  ;;  %v283_v57 = vld [vmem:[#allocation9 + $0x498] sm:$0xff]  ;;  %v280_v58 = vld [vmem:[#allocation9 + $0x480] sm:$0xff] }
  0x65   :  { %653 = vmatprep.subr.mxu0 %v145_v59  ;;  %724 = vmatprep.subr.mxu1 %v147_v60  ;;  %v282_v59 = vld [vmem:[#allocation9 + $0x490] sm:$0xff]  ;;  %v273_v60 = vld [vmem:[#allocation9 + $0x448] sm:$0xff] }
  0x66   :  { %654 = vmatpush1.msra.mxu0 %v144_v61  ;;  %725 = vmatpush1.msra.mxu1 %v146_v62  ;;  %v275_v61 = vld [vmem:[#allocation9 + $0x458] sm:$0xff]  ;;  %v272_v62 = vld [vmem:[#allocation9 + $0x440] sm:$0xff] }
  0x67   :  { %655 = vmatprep.subr.mxu0 %v137_v63  ;;  %726 = vmatprep.subr.mxu1 %v139_v1  ;;  %v274_v63 = vld [vmem:[#allocation9 + $0x450] sm:$0xff]  ;;  %v265_v1 = vld [vmem:[#allocation9 + $0x408] sm:$0xff] }
  0x68   :  { %656 = vmatpush1.msra.mxu0 %v136_v2  ;;  %727 = vmatpush1.msra.mxu1 %v138_v3  ;;  %v267_v2 = vld [vmem:[#allocation9 + $0x418] sm:$0xff]  ;;  %v264_v3 = vld [vmem:[#allocation9 + $0x400] sm:$0xff] }
  0x69   :  { %657 = vmatprep.subr.mxu0 %v385_v4  ;;  %728 = vmatprep.subr.mxu1 %v387_v5  ;;  %v266_v4 = vld [vmem:[#allocation9 + $0x410] sm:$0xff]  ;;  %v261_v5 = vld [vmem:[#allocation9 + $0x3e8] sm:$0xff] }
  0x6a   :  { %658 = vmatpush2.msra.mxu0 %v384_v6  ;;  %729 = vmatpush2.msra.mxu1 %v386_v7  ;;  %v260_v6 = vld [vmem:[#allocation9 + $0x3e0] sm:$0xff]  ;;  %v263_v7 = vld [vmem:[#allocation9 + $0x3f8] sm:$0xff] }
  0x6b   :  { %659 = vmatprep.subr.mxu0 %v377_v8  ;;  %730 = vmatprep.subr.mxu1 %v379_v9  ;;  %v253_v8 = vld [vmem:[#allocation9 + $0x3a8] sm:$0xff]  ;;  %v262_v9 = vld [vmem:[#allocation9 + $0x3f0] sm:$0xff] }
  0x6c   :  { %660 = vmatpush2.msra.mxu0 %v376_v10  ;;  %731 = vmatpush2.msra.mxu1 %v378_v11  ;;  %v252_v10 = vld [vmem:[#allocation9 + $0x3a0] sm:$0xff]  ;;  %v255_v11 = vld [vmem:[#allocation9 + $0x3b8] sm:$0xff] }
  0x6d   :  { %661 = vmatprep.subr.mxu0 %v369_v12  ;;  %732 = vmatprep.subr.mxu1 %v371_v13  ;;  %v245_v12 = vld [vmem:[#allocation9 + $0x368] sm:$0xff]  ;;  %v254_v13 = vld [vmem:[#allocation9 + $0x3b0] sm:$0xff] }
  0x6e   :  { %662 = vmatpush2.msra.mxu0 %v368_v14  ;;  %733 = vmatpush2.msra.mxu1 %v370_v15  ;;  %v244_v14 = vld [vmem:[#allocation9 + $0x360] sm:$0xff]  ;;  %v247_v15 = vld [vmem:[#allocation9 + $0x378] sm:$0xff] }
  0x6f   :  { %663 = vmatprep.subr.mxu0 %v361_v16  ;;  %734 = vmatprep.subr.mxu1 %v363_v17  ;;  %v237_v16 = vld [vmem:[#allocation9 + $0x328] sm:$0xff]  ;;  %v246_v17 = vld [vmem:[#allocation9 + $0x370] sm:$0xff] }
  0x70   :  { %664 = vmatpush2.msra.mxu0 %v360_v18  ;;  %735 = vmatpush2.msra.mxu1 %v362_v19  ;;  %v239_v18 = vld [vmem:[#allocation9 + $0x338] sm:$0xff]  ;;  %v236_v19 = vld [vmem:[#allocation9 + $0x320] sm:$0xff] }
  0x71   :  { %665 = vmatprep.subr.mxu0 %v353_v20  ;;  %736 = vmatprep.subr.mxu1 %v355_v21  ;;  %v238_v20 = vld [vmem:[#allocation9 + $0x330] sm:$0xff]  ;;  %v229_v21 = vld [vmem:[#allocation9 + $0x2e8] sm:$0xff] }
  0x72   :  { %666 = vmatpush2.msra.mxu0 %v352_v22  ;;  %737 = vmatpush2.msra.mxu1 %v354_v23  ;;  %v231_v22 = vld [vmem:[#allocation9 + $0x2f8] sm:$0xff]  ;;  %v228_v23 = vld [vmem:[#allocation9 + $0x2e0] sm:$0xff] }
  0x73   :  { %667 = vmatprep.subr.mxu0 %v345_v24  ;;  %738 = vmatprep.subr.mxu1 %v347_v25  ;;  %v230_v24 = vld [vmem:[#allocation9 + $0x2f0] sm:$0xff]  ;;  %v221_v25 = vld [vmem:[#allocation9 + $0x2a8] sm:$0xff] }
  0x74   :  { %668 = vmatpush2.msra.mxu0 %v344_v26  ;;  %739 = vmatpush2.msra.mxu1 %v346_v27  ;;  %v223_v26 = vld [vmem:[#allocation9 + $0x2b8] sm:$0xff]  ;;  %v220_v27 = vld [vmem:[#allocation9 + $0x2a0] sm:$0xff] }
  0x75   :  { %669 = vmatprep.subr.mxu0 %v337_v28  ;;  %740 = vmatprep.subr.mxu1 %v339_v29  ;;  %v222_v28 = vld [vmem:[#allocation9 + $0x2b0] sm:$0xff]  ;;  %v213_v29 = vld [vmem:[#allocation9 + $0x268] sm:$0xff] }
  0x76   :  { %670 = vmatpush2.msra.mxu0 %v336_v30  ;;  %741 = vmatpush2.msra.mxu1 %v338_v31  ;;  %v215_v30 = vld [vmem:[#allocation9 + $0x278] sm:$0xff]  ;;  %v212_v31 = vld [vmem:[#allocation9 + $0x260] sm:$0xff] }
  0x77   :  { %671 = vmatprep.subr.mxu0 %v329_v32  ;;  %742 = vmatprep.subr.mxu1 %v331_v33  ;;  %v214_v32 = vld [vmem:[#allocation9 + $0x270] sm:$0xff]  ;;  %v205_v33 = vld [vmem:[#allocation9 + $0x228] sm:$0xff] }
  0x78   :  { %672 = vmatpush2.msra.mxu0 %v328_v34  ;;  %743 = vmatpush2.msra.mxu1 %v330_v35  ;;  %v207_v34 = vld [vmem:[#allocation9 + $0x238] sm:$0xff]  ;;  %v204_v35 = vld [vmem:[#allocation9 + $0x220] sm:$0xff] }
  0x79   :  { %673 = vmatprep.subr.mxu0 %v321_v36  ;;  %744 = vmatprep.subr.mxu1 %v323_v37  ;;  %v206_v36 = vld [vmem:[#allocation9 + $0x230] sm:$0xff]  ;;  %v197_v37 = vld [vmem:[#allocation9 + $0x1e8] sm:$0xff] }
  0x7a   :  { %674 = vmatpush2.msra.mxu0 %v320_v38  ;;  %745 = vmatpush2.msra.mxu1 %v322_v39  ;;  %v199_v38 = vld [vmem:[#allocation9 + $0x1f8] sm:$0xff]  ;;  %v196_v39 = vld [vmem:[#allocation9 + $0x1e0] sm:$0xff] }
  0x7b   :  { %675 = vmatprep.subr.mxu0 %v313_v40  ;;  %746 = vmatprep.subr.mxu1 %v315_v41  ;;  %v198_v40 = vld [vmem:[#allocation9 + $0x1f0] sm:$0xff]  ;;  %v189_v41 = vld [vmem:[#allocation9 + $0x1a8] sm:$0xff] }
  0x7c   :  { %676 = vmatpush2.msra.mxu0 %v312_v42  ;;  %747 = vmatpush2.msra.mxu1 %v314_v43  ;;  %v191_v42 = vld [vmem:[#allocation9 + $0x1b8] sm:$0xff]  ;;  %v188_v43 = vld [vmem:[#allocation9 + $0x1a0] sm:$0xff] }
  0x7d   :  { %677 = vmatprep.subr.mxu0 %v305_v44  ;;  %748 = vmatprep.subr.mxu1 %v307_v45  ;;  %v190_v44 = vld [vmem:[#allocation9 + $0x1b0] sm:$0xff]  ;;  %v181_v45 = vld [vmem:[#allocation9 + $0x168] sm:$0xff] }
  0x7e   :  { %678 = vmatpush2.msra.mxu0 %v304_v46  ;;  %749 = vmatpush2.msra.mxu1 %v306_v47  ;;  %v183_v46 = vld [vmem:[#allocation9 + $0x178] sm:$0xff]  ;;  %v180_v47 = vld [vmem:[#allocation9 + $0x160] sm:$0xff] }
  0x7f   :  { %679 = vmatprep.subr.mxu0 %v297_v48  ;;  %750 = vmatprep.subr.mxu1 %v299_v49  ;;  %v182_v48 = vld [vmem:[#allocation9 + $0x170] sm:$0xff]  ;;  %v173_v49 = vld [vmem:[#allocation9 + $0x128] sm:$0xff] }
  0x80   :  { %680 = vmatpush2.msra.mxu0 %v296_v50  ;;  %751 = vmatpush2.msra.mxu1 %v298_v51  ;;  %v175_v50 = vld [vmem:[#allocation9 + $0x138] sm:$0xff]  ;;  %v172_v51 = vld [vmem:[#allocation9 + $0x120] sm:$0xff] }
  0x81   :  { %681 = vmatprep.subr.mxu0 %v289_v52  ;;  %752 = vmatprep.subr.mxu1 %v291_v53  ;;  %v174_v52 = vld [vmem:[#allocation9 + $0x130] sm:$0xff]  ;;  %v165_v53 = vld [vmem:[#allocation9 + $0xe8] sm:$0xff] }
  0x82   :  { %682 = vmatpush2.msra.mxu0 %v288_v54  ;;  %753 = vmatpush2.msra.mxu1 %v290_v55  ;;  %v167_v54 = vld [vmem:[#allocation9 + $0xf8] sm:$0xff]  ;;  %v164_v55 = vld [vmem:[#allocation9 + $0xe0] sm:$0xff] }
  0x83   :  { %683 = vmatprep.subr.mxu0 %v281_v56  ;;  %754 = vmatprep.subr.mxu1 %v283_v57  ;;  %v166_v56 = vld [vmem:[#allocation9 + $0xf0] sm:$0xff]  ;;  %v157_v57 = vld [vmem:[#allocation9 + $0xa8] sm:$0xff] }
  0x84   :  { %684 = vmatpush2.msra.mxu0 %v280_v58  ;;  %755 = vmatpush2.msra.mxu1 %v282_v59  ;;  %v159_v58 = vld [vmem:[#allocation9 + $0xb8] sm:$0xff]  ;;  %v156_v59 = vld [vmem:[#allocation9 + $0xa0] sm:$0xff] }
  0x85   :  { %685 = vmatprep.subr.mxu0 %v273_v60  ;;  %756 = vmatprep.subr.mxu1 %v275_v61  ;;  %v158_v60 = vld [vmem:[#allocation9 + $0xb0] sm:$0xff]  ;;  %v149_v61 = vld [vmem:[#allocation9 + $0x68] sm:$0xff] }
  0x86   :  { %686 = vmatpush2.msra.mxu0 %v272_v62  ;;  %757 = vmatpush2.msra.mxu1 %v274_v63  ;;  %v151_v62 = vld [vmem:[#allocation9 + $0x78] sm:$0xff]  ;;  %v148_v63 = vld [vmem:[#allocation9 + $0x60] sm:$0xff] }
  0x87   :  { %687 = vmatprep.subr.mxu0 %v265_v1  ;;  %758 = vmatprep.subr.mxu1 %v267_v2  ;;  %v141_v1 = vld [vmem:[#allocation9 + $0x28] sm:$0xff]  ;;  %v150_v2 = vld [vmem:[#allocation9 + $0x70] sm:$0xff] }
  0x88   :  { %688 = vmatpush2.msra.mxu0 %v264_v3  ;;  %689 = vmatprep.mubr.f32.mxu0 %v11063_v0  ;;  %v140_v3 = vld [vmem:[#allocation9 + $0x20] sm:$0xff] }
  0x89   :  { %759 = vmatpush2.msra.mxu1 %v266_v4  ;;  %760 = vmatprep.mubr.f32.mxu1 %v11063_v0  ;;  %v143_v4 = vld [vmem:[#allocation9 + $0x38] sm:$0xff] }
  0x8a   :  { %690 = vmatmul.mubr.f32.vlgmr.msra.gmra.mxu0 %v11063_v0  ;;  %761 = vmatmul.mubr.f32.vlgmr.msra.gmra.mxu1 %v11063_v0 }
  0x8b   :  { %831 = vmatprep.mubr.f32.mxu0 %v11063_v0  ;;  %902 = vmatprep.mubr.f32.mxu1 %v11063_v0 }
  0x8c   :  { %767 = vmatprep.subr.mxu0 %v261_v5  ;;  %838 = vmatprep.subr.mxu1 %v263_v7  ;;  %v389_v5 = vld [vmem:[#allocation9 + $0x7e8] sm:$0xff]  ;;  %v388_v7 = vld [vmem:[#allocation9 + $0x7e0] sm:$0xff] }
  0x8d   :  { %768 = vmatpush1.msra.mxu0 %v260_v6  ;;  %839 = vmatpush1.msra.mxu1 %v262_v9  ;;  %v142_v6 = vld [vmem:[#allocation9 + $0x30] sm:$0xff]  ;;  %v381_v9 = vld [vmem:[#allocation9 + $0x7a8] sm:$0xff] }
  0x8e   :  { %769 = vmatprep.subr.mxu0 %v253_v8  ;;  %840 = vmatprep.subr.mxu1 %v255_v11  ;;  %v391_v8 = vld [vmem:[#allocation9 + $0x7f8] sm:$0xff]  ;;  %v380_v11 = vld [vmem:[#allocation9 + $0x7a0] sm:$0xff] }
  0x8f   :  { %770 = vmatpush1.msra.mxu0 %v252_v10  ;;  %841 = vmatpush1.msra.mxu1 %v254_v13  ;;  %v390_v10 = vld [vmem:[#allocation9 + $0x7f0] sm:$0xff]  ;;  %v373_v13 = vld [vmem:[#allocation9 + $0x768] sm:$0xff] }
  0x90   :  { %771 = vmatprep.subr.mxu0 %v245_v12  ;;  %842 = vmatprep.subr.mxu1 %v247_v15  ;;  %v383_v12 = vld [vmem:[#allocation9 + $0x7b8] sm:$0xff]  ;;  %v372_v15 = vld [vmem:[#allocation9 + $0x760] sm:$0xff] }
  0x91   :  { %772 = vmatpush1.msra.mxu0 %v244_v14  ;;  %843 = vmatpush1.msra.mxu1 %v246_v17  ;;  %v382_v14 = vld [vmem:[#allocation9 + $0x7b0] sm:$0xff]  ;;  %v365_v17 = vld [vmem:[#allocation9 + $0x728] sm:$0xff] }
  0x92   :  { %773 = vmatprep.subr.mxu0 %v237_v16  ;;  %844 = vmatprep.subr.mxu1 %v239_v18  ;;  %v375_v16 = vld [vmem:[#allocation9 + $0x778] sm:$0xff]  ;;  %v374_v18 = vld [vmem:[#allocation9 + $0x770] sm:$0xff] }
  0x93   :  { %774 = vmatpush1.msra.mxu0 %v236_v19  ;;  %845 = vmatpush1.msra.mxu1 %v238_v20  ;;  %v364_v19 = vld [vmem:[#allocation9 + $0x720] sm:$0xff]  ;;  %v367_v20 = vld [vmem:[#allocation9 + $0x738] sm:$0xff] }
  0x94   :  { %775 = vmatprep.subr.mxu0 %v229_v21  ;;  %846 = vmatprep.subr.mxu1 %v231_v22  ;;  %v357_v21 = vld [vmem:[#allocation9 + $0x6e8] sm:$0xff]  ;;  %v366_v22 = vld [vmem:[#allocation9 + $0x730] sm:$0xff] }
  0x95   :  { %776 = vmatpush1.msra.mxu0 %v228_v23  ;;  %847 = vmatpush1.msra.mxu1 %v230_v24  ;;  %v356_v23 = vld [vmem:[#allocation9 + $0x6e0] sm:$0xff]  ;;  %v359_v24 = vld [vmem:[#allocation9 + $0x6f8] sm:$0xff] }
  0x96   :  { %777 = vmatprep.subr.mxu0 %v221_v25  ;;  %848 = vmatprep.subr.mxu1 %v223_v26  ;;  %v349_v25 = vld [vmem:[#allocation9 + $0x6a8] sm:$0xff]  ;;  %v358_v26 = vld [vmem:[#allocation9 + $0x6f0] sm:$0xff] }
  0x97   :  { %778 = vmatpush1.msra.mxu0 %v220_v27  ;;  %849 = vmatpush1.msra.mxu1 %v222_v28  ;;  %v348_v27 = vld [vmem:[#allocation9 + $0x6a0] sm:$0xff]  ;;  %v351_v28 = vld [vmem:[#allocation9 + $0x6b8] sm:$0xff] }
  0x98   :  { %779 = vmatprep.subr.mxu0 %v213_v29  ;;  %850 = vmatprep.subr.mxu1 %v215_v30  ;;  %v341_v29 = vld [vmem:[#allocation9 + $0x668] sm:$0xff]  ;;  %v350_v30 = vld [vmem:[#allocation9 + $0x6b0] sm:$0xff] }
  0x99   :  { %780 = vmatpush1.msra.mxu0 %v212_v31  ;;  %851 = vmatpush1.msra.mxu1 %v214_v32  ;;  %v340_v31 = vld [vmem:[#allocation9 + $0x660] sm:$0xff]  ;;  %v343_v32 = vld [vmem:[#allocation9 + $0x678] sm:$0xff] }
  0x9a   :  { %781 = vmatprep.subr.mxu0 %v205_v33  ;;  %852 = vmatprep.subr.mxu1 %v207_v34  ;;  %v333_v33 = vld [vmem:[#allocation9 + $0x628] sm:$0xff]  ;;  %v342_v34 = vld [vmem:[#allocation9 + $0x670] sm:$0xff] }
  0x9b   :  { %782 = vmatpush1.msra.mxu0 %v204_v35  ;;  %853 = vmatpush1.msra.mxu1 %v206_v36  ;;  %v332_v35 = vld [vmem:[#allocation9 + $0x620] sm:$0xff]  ;;  %v335_v36 = vld [vmem:[#allocation9 + $0x638] sm:$0xff] }
  0x9c   :  { %783 = vmatprep.subr.mxu0 %v197_v37  ;;  %854 = vmatprep.subr.mxu1 %v199_v38  ;;  %v325_v37 = vld [vmem:[#allocation9 + $0x5e8] sm:$0xff]  ;;  %v334_v38 = vld [vmem:[#allocation9 + $0x630] sm:$0xff] }
  0x9d   :  { %784 = vmatpush1.msra.mxu0 %v196_v39  ;;  %855 = vmatpush1.msra.mxu1 %v198_v40  ;;  %v324_v39 = vld [vmem:[#allocation9 + $0x5e0] sm:$0xff]  ;;  %v327_v40 = vld [vmem:[#allocation9 + $0x5f8] sm:$0xff] }
  0x9e   :  { %785 = vmatprep.subr.mxu0 %v189_v41  ;;  %856 = vmatprep.subr.mxu1 %v191_v42  ;;  %v317_v41 = vld [vmem:[#allocation9 + $0x5a8] sm:$0xff]  ;;  %v326_v42 = vld [vmem:[#allocation9 + $0x5f0] sm:$0xff] }
  0x9f   :  { %786 = vmatpush1.msra.mxu0 %v188_v43  ;;  %857 = vmatpush1.msra.mxu1 %v190_v44  ;;  %v316_v43 = vld [vmem:[#allocation9 + $0x5a0] sm:$0xff]  ;;  %v319_v44 = vld [vmem:[#allocation9 + $0x5b8] sm:$0xff] }
  0xa0   :  { %787 = vmatprep.subr.mxu0 %v181_v45  ;;  %858 = vmatprep.subr.mxu1 %v183_v46  ;;  %v309_v45 = vld [vmem:[#allocation9 + $0x568] sm:$0xff]  ;;  %v318_v46 = vld [vmem:[#allocation9 + $0x5b0] sm:$0xff] }
  0xa1   :  { %788 = vmatpush1.msra.mxu0 %v180_v47  ;;  %859 = vmatpush1.msra.mxu1 %v182_v48  ;;  %v308_v47 = vld [vmem:[#allocation9 + $0x560] sm:$0xff]  ;;  %v311_v48 = vld [vmem:[#allocation9 + $0x578] sm:$0xff] }
  0xa2   :  { %789 = vmatprep.subr.mxu0 %v173_v49  ;;  %860 = vmatprep.subr.mxu1 %v175_v50  ;;  %v301_v49 = vld [vmem:[#allocation9 + $0x528] sm:$0xff]  ;;  %v310_v50 = vld [vmem:[#allocation9 + $0x570] sm:$0xff] }
  0xa3   :  { %790 = vmatpush1.msra.mxu0 %v172_v51  ;;  %861 = vmatpush1.msra.mxu1 %v174_v52  ;;  %v300_v51 = vld [vmem:[#allocation9 + $0x520] sm:$0xff]  ;;  %v303_v52 = vld [vmem:[#allocation9 + $0x538] sm:$0xff] }
  0xa4   :  { %791 = vmatprep.subr.mxu0 %v165_v53  ;;  %862 = vmatprep.subr.mxu1 %v167_v54  ;;  %v293_v53 = vld [vmem:[#allocation9 + $0x4e8] sm:$0xff]  ;;  %v302_v54 = vld [vmem:[#allocation9 + $0x530] sm:$0xff] }
  0xa5   :  { %792 = vmatpush1.msra.mxu0 %v164_v55  ;;  %863 = vmatpush1.msra.mxu1 %v166_v56  ;;  %v292_v55 = vld [vmem:[#allocation9 + $0x4e0] sm:$0xff]  ;;  %v295_v56 = vld [vmem:[#allocation9 + $0x4f8] sm:$0xff] }
  0xa6   :  { %793 = vmatprep.subr.mxu0 %v157_v57  ;;  %864 = vmatprep.subr.mxu1 %v159_v58  ;;  %v285_v57 = vld [vmem:[#allocation9 + $0x4a8] sm:$0xff]  ;;  %v294_v58 = vld [vmem:[#allocation9 + $0x4f0] sm:$0xff] }
  0xa7   :  { %794 = vmatpush1.msra.mxu0 %v156_v59  ;;  %865 = vmatpush1.msra.mxu1 %v158_v60  ;;  %v284_v59 = vld [vmem:[#allocation9 + $0x4a0] sm:$0xff]  ;;  %v287_v60 = vld [vmem:[#allocation9 + $0x4b8] sm:$0xff] }
  0xa8   :  { %795 = vmatprep.subr.mxu0 %v149_v61  ;;  %866 = vmatprep.subr.mxu1 %v151_v62  ;;  %v277_v61 = vld [vmem:[#allocation9 + $0x468] sm:$0xff]  ;;  %v286_v62 = vld [vmem:[#allocation9 + $0x4b0] sm:$0xff] }
  0xa9   :  { %796 = vmatpush1.msra.mxu0 %v148_v63  ;;  %867 = vmatpush1.msra.mxu1 %v150_v2  ;;  %v276_v63 = vld [vmem:[#allocation9 + $0x460] sm:$0xff]  ;;  %v269_v2 = vld [vmem:[#allocation9 + $0x428] sm:$0xff] }
  0xaa   :  { %797 = vmatprep.subr.mxu0 %v141_v1  ;;  %868 = vmatprep.subr.mxu1 %v143_v4  ;;  %v279_v1 = vld [vmem:[#allocation9 + $0x478] sm:$0xff]  ;;  %v268_v4 = vld [vmem:[#allocation9 + $0x420] sm:$0xff] }
  0xab   :  { %798 = vmatpush1.msra.mxu0 %v140_v3  ;;  %869 = vmatpush1.msra.mxu1 %v142_v6  ;;  %v278_v3 = vld [vmem:[#allocation9 + $0x470] sm:$0xff] }
  0xac   :  { %799 = vmatprep.subr.mxu0 %v389_v5  ;;  %870 = vmatprep.subr.mxu1 %v391_v8  ;;  %v271_v5 = vld [vmem:[#allocation9 + $0x438] sm:$0xff]  ;;  %v270_v6 = vld [vmem:[#allocation9 + $0x430] sm:$0xff] }
  0xad   :  { %800 = vmatpush2.msra.mxu0 %v388_v7  ;;  %871 = vmatpush2.msra.mxu1 %v390_v10  ;;  %v132_v7 = vld [vmem:[#allocation7 + $0x1e8] sm:$0xff]  ;;  %v134_v8 = vld [vmem:[#allocation7 + $0x1f8] sm:$0xff]  ;;  %v6668_v10 = vld [vmem:[#allocation7 + $0x1f0] sm:$0xff] }
  0xae   :  { %801 = vmatprep.subr.mxu0 %v381_v9  ;;  %872 = vmatprep.subr.mxu1 %v383_v12  ;;  %v6666_v9 = vld [vmem:[#allocation7 + $0x1e0] sm:$0xff]  ;;  %v6674_v12 = vld [vmem:[#allocation7 + $0x1d8] sm:$0xff] }
  0xaf   :  { %802 = vmatpush2.msra.mxu0 %v380_v11  ;;  %873 = vmatpush2.msra.mxu1 %v382_v14  ;;  %v6672_v11 = vld [vmem:[#allocation7 + $0x1c8] sm:$0xff]  ;;  %v6680_v14 = vld [vmem:[#allocation7 + $0x1d0] sm:$0xff] }
  0xb0   :  { %803 = vmatprep.subr.mxu0 %v373_v13  ;;  %874 = vmatprep.subr.mxu1 %v375_v16  ;;  %v6678_v13 = vld [vmem:[#allocation7 + $0x1c0] sm:$0xff]  ;;  %v6686_v16 = vld [vmem:[#allocation7 + $0x1b8] sm:$0xff] }
  0xb1   :  { %804 = vmatpush2.msra.mxu0 %v372_v15  ;;  %875 = vmatpush2.msra.mxu1 %v374_v18  ;;  %v6684_v15 = vld [vmem:[#allocation7 + $0x1a8] sm:$0xff]  ;;  %v6692_v18 = vld [vmem:[#allocation7 + $0x1b0] sm:$0xff] }
  0xb2   :  { %805 = vmatprep.subr.mxu0 %v365_v17  ;;  %876 = vmatprep.subr.mxu1 %v367_v20  ;;  %v6690_v17 = vld [vmem:[#allocation7 + $0x1a0] sm:$0xff]  ;;  %v6698_v20 = vld [vmem:[#allocation7 + $0x198] sm:$0xff] }
  0xb3   :  { %806 = vmatpush2.msra.mxu0 %v364_v19  ;;  %877 = vmatpush2.msra.mxu1 %v366_v22  ;;  %v6696_v19 = vld [vmem:[#allocation7 + $0x188] sm:$0xff]  ;;  %v6704_v22 = vld [vmem:[#allocation7 + $0x190] sm:$0xff] }
  0xb4   :  { %807 = vmatprep.subr.mxu0 %v357_v21  ;;  %878 = vmatprep.subr.mxu1 %v359_v24  ;;  %v6702_v21 = vld [vmem:[#allocation7 + $0x180] sm:$0xff]  ;;  %v6710_v24 = vld [vmem:[#allocation7 + $0x178] sm:$0xff] }
  0xb5   :  { %808 = vmatpush2.msra.mxu0 %v356_v23  ;;  %879 = vmatpush2.msra.mxu1 %v358_v26  ;;  %v6708_v23 = vld [vmem:[#allocation7 + $0x168] sm:$0xff]  ;;  %v6716_v26 = vld [vmem:[#allocation7 + $0x170] sm:$0xff] }
  0xb6   :  { %809 = vmatprep.subr.mxu0 %v349_v25  ;;  %880 = vmatprep.subr.mxu1 %v351_v28  ;;  %v6714_v25 = vld [vmem:[#allocation7 + $0x160] sm:$0xff]  ;;  %v6722_v28 = vld [vmem:[#allocation7 + $0x158] sm:$0xff] }
  0xb7   :  { %810 = vmatpush2.msra.mxu0 %v348_v27  ;;  %881 = vmatpush2.msra.mxu1 %v350_v30  ;;  %v6720_v27 = vld [vmem:[#allocation7 + $0x148] sm:$0xff]  ;;  %v6728_v30 = vld [vmem:[#allocation7 + $0x150] sm:$0xff] }
  0xb8   :  { %811 = vmatprep.subr.mxu0 %v341_v29  ;;  %882 = vmatprep.subr.mxu1 %v343_v32  ;;  %v6726_v29 = vld [vmem:[#allocation7 + $0x140] sm:$0xff]  ;;  %v6732_v32 = vld [vmem:[#allocation7 + $0x128] sm:$0xff] }
  0xb9   :  { %812 = vmatpush2.msra.mxu0 %v340_v31  ;;  %883 = vmatpush2.msra.mxu1 %v342_v34  ;;  %v459_v31 = vlaneseq  ;;  %v6738_v34 = vld [vmem:[#allocation7 + $0x120] sm:$0xff] }
  0xba   :  { %813 = vmatprep.subr.mxu0 %v333_v33  ;;  %884 = vmatprep.subr.mxu1 %v335_v36  ;;  %v6734_v33 = vld [vmem:[#allocation7 + $0x138] sm:$0xff]  ;;  %v6744_v36 = vld [vmem:[#allocation7 + $0x108] sm:$0xff] }
  0xbb   :  { %814 = vmatpush2.msra.mxu0 %v332_v35  ;;  %885 = vmatpush2.msra.mxu1 %v334_v38  ;;  %v6740_v35 = vld [vmem:[#allocation7 + $0x130] sm:$0xff]  ;;  %v6750_v38 = vld [vmem:[#allocation7 + $0x100] sm:$0xff] }
  0xbc   :  { %815 = vmatprep.subr.mxu0 %v325_v37  ;;  %886 = vmatprep.subr.mxu1 %v327_v40  ;;  %v6746_v37 = vld [vmem:[#allocation7 + $0x118] sm:$0xff]  ;;  %v6754_v40 = vshrl.u32 %v459_v31, 7 }
  0xbd   :  { %816 = vmatpush2.msra.mxu0 %v324_v39  ;;  %887 = vmatpush2.msra.mxu1 %v326_v42  ;;  %v6752_v39 = vld [vmem:[#allocation7 + $0x110] sm:$0xff]  ;;  %v6760_v42 = vld [vmem:[#allocation7 + $0xf8] sm:$0xff] }
  0xbe   :  { %817 = vmatprep.subr.mxu0 %v317_v41  ;;  %888 = vmatprep.subr.mxu1 %v319_v44  ;;  %v6758_v41 = vld [vmem:[#allocation7 + $0xe8] sm:$0xff]  ;;  %v6766_v44 = vld [vmem:[#allocation7 + $0xf0] sm:$0xff] }
  0xbf   :  { %818 = vmatpush2.msra.mxu0 %v316_v43  ;;  %889 = vmatpush2.msra.mxu1 %v318_v46  ;;  %v6762_v43 = vld [vmem:[#allocation7 + $0xe0] sm:$0xff]  ;;  %v6770_v46 = vld [vmem:[#allocation7 + $0xd8] sm:$0xff] }
  0xc0   :  { %819 = vmatprep.subr.mxu0 %v309_v45  ;;  %890 = vmatprep.subr.mxu1 %v311_v48  ;;  %v6768_v45 = vld [vmem:[#allocation7 + $0xc8] sm:$0xff]  ;;  %v6776_v48 = vld [vmem:[#allocation7 + $0xd0] sm:$0xff] }
  0xc1   :  { %820 = vmatpush2.msra.mxu0 %v308_v47  ;;  %891 = vmatpush2.msra.mxu1 %v310_v50  ;;  %v6774_v47 = vld [vmem:[#allocation7 + $0xc0] sm:$0xff]  ;;  %v6782_v50 = vld [vmem:[#allocation7 + $0xb8] sm:$0xff] }
  0xc2   :  { %821 = vmatprep.subr.mxu0 %v301_v49  ;;  %892 = vmatprep.subr.mxu1 %v303_v52  ;;  %v6778_v49 = vld [vmem:[#allocation7 + $0xa8] sm:$0xff]  ;;  %v11062_v52 = vsub.s32 0, %v6754_v40 }
  0xc3   :  { %822 = vmatpush2.msra.mxu0 %v300_v51  ;;  %893 = vmatpush2.msra.mxu1 %v302_v54  ;;  %v6784_v51 = vld [vmem:[#allocation7 + $0xa0] sm:$0xff]  ;;  %v6790_v54 = vld [vmem:[#allocation7 + $0xb0] sm:$0xff] }
  0xc4   :  { %823 = vmatprep.subr.mxu0 %v293_v53  ;;  %894 = vmatprep.subr.mxu1 %v295_v56  ;;  %v11061_v53 = vsub.s32 2, %v6754_v40  ;;  %11890 = vst [vmem:[#allocation14_spill] sm:$0xff] %v6790_v54  ;;  %v457_v56 = vld [vmem:[%s11054_s2] sm:$0xf] }
  0xc5   :  { %824 = vmatpush2.msra.mxu0 %v292_v55  ;;  %895 = vmatpush2.msra.mxu1 %v294_v58  ;;  %v6792_v55 = vld [vmem:[#allocation7 + $0x88] sm:$0xff]  ;;  %v6801_v58 = vld [vmem:[#allocation7 + $0x80] sm:$0xff] }
  0xc6   :  { %825 = vmatprep.subr.mxu0 %v285_v57  ;;  %896 = vmatprep.subr.mxu1 %v287_v60  ;;  %11891 = vst [vmem:[#allocation15_spill] sm:$0xff] %v6792_v55  ;;  %v6799_v57 = vld [vmem:[#allocation7 + $0x98] sm:$0xff]  ;;  %11893 = vst [vmem:[#allocation17_spill] sm:$0xff] %v6801_v58  ;;  %v11069_v60 = vsub.s32 3, %v6754_v40 }
  0xc7   :  { %826 = vmatpush2.msra.mxu0 %v284_v59  ;;  %897 = vmatpush2.msra.mxu1 %v286_v62  ;;  %11892 = vst [vmem:[#allocation16_spill] sm:$0xff] %v6799_v57  ;;  %v11067_v59 = vsub.s32 1, %v6754_v40  ;;  %v6809_v62 = vld [vmem:[#allocation7 + $0x68] sm:$0xff] }
  0xc8   :  { %827 = vmatprep.subr.mxu0 %v277_v61  ;;  %898 = vmatprep.subr.mxu1 %v279_v1  ;;  %v6807_v61 = vld [vmem:[#allocation7 + $0x90] sm:$0xff]  ;;  %11895 = vst [vmem:[#allocation19_spill] sm:$0xff] %v6809_v62  ;;  %v6815_v1 = vld [vmem:[#allocation7 + $0x60] sm:$0xff]  ;;  %v474_v31 = vrot.slane %v457_v56, %v11069_v60 }
  0xc9   :  { %828 = vmatpush2.msra.mxu0 %v276_v63  ;;  %899 = vmatpush2.msra.mxu1 %v278_v3  ;;  %11894 = vst [vmem:[#allocation18_spill] sm:$0xff] %v6807_v61  ;;  %v6813_v63 = vld [vmem:[#allocation7 + $0x78] sm:$0xff]  ;;  %11897 = vst [vmem:[#allocation21_spill] sm:$0xff] %v6815_v1  ;;  %v470_v3 = vrot.slane %v457_v56, %v11061_v53  ;;  %v6839_v53 = vld [vmem:[#allocation7 + $0x50] sm:$0xff] }
  0xca   :  { %829 = vmatprep.subr.mxu0 %v269_v2  ;;  %900 = vmatprep.subr.mxu1 %v271_v5  ;;  %11896 = vst [vmem:[#allocation20_spill] sm:$0xff] %v6813_v63  ;;  %v462_v2 = vrot.slane %v457_v56, %v11062_v52  ;;  %v6825_v5 = vld [vmem:[#allocation7 + $0x48] sm:$0xff]  ;;  %11902 = vst [vmem:[#allocation26_spill] sm:$0xff] %v6839_v53  ;;  %v6851_v60 = vld [vmem:[#allocation7 + $0x30] sm:$0xff] }
  0xcb   :  { %830 = vmatpush2.msra.mxu0 %v268_v4  ;;  %901 = vmatpush2.msra.mxu1 %v270_v6  ;;  %v6823_v4 = vld [vmem:[#allocation7 + $0x70] sm:$0xff]  ;;  %11899 = vst [vmem:[#allocation23_spill] sm:$0xff] %v6825_v5  ;;  %v6829_v6 = vld [vmem:[#allocation7 + $0x58] sm:$0xff]  ;;  %v6841_v52 = vld [vmem:[#allocation7 + $0x28] sm:$0xff] }
  0xcc   :  { %832 = vmatmul.mubr.f32.vlgmr.msra.gmra.mxu0 %v11063_v0  ;;  %971 = vmatprep.subr.mxu0 %v132_v7  ;;  %11898 = vst [vmem:[#allocation22_spill] sm:$0xff] %v6823_v4  ;;  %11900 = vst [vmem:[#allocation24_spill] sm:$0xff] %v6829_v6  ;;  %v6831_v7 = vld [vmem:[#allocation7 + $0x40] sm:$0xff] }
  0xcd   :  { %1042 = vmatprep.subr.mxu1 %v134_v8  ;;  %903 = vmatmul.mubr.f32.vlgmr.msra.gmra.mxu1 %v11063_v0  ;;  %11901 = vst [vmem:[#allocation25_spill] sm:$0xff] %v6831_v7  ;;  %v466_v8 = vrot.slane %v457_v56, %v11067_v59  ;;  %11903 = vst [vmem:[#allocation27_spill] sm:$0xff] %v6841_v52  ;;  %v6847_v59 = vld [vmem:[#allocation7 + $0x20] sm:$0xff] }
  0xce   :  { %972 = vmatpush1.msra.mxu0 %v6666_v9  ;;  %1043 = vmatpush1.msra.mxu1 %v6668_v10  ;;  %11905 = vst [vmem:[#allocation29_spill] sm:$0xff] %v6847_v59  ;;  %11906 = vst [vmem:[#allocation30_spill] sm:$0xff] %v6851_v60 }
  0xcf   :  { %973 = vmatprep.subr.mxu0 %v6672_v11  ;;  %1044 = vmatprep.subr.mxu1 %v6674_v12 }
  0xd0   :  { %974 = vmatpush1.msra.mxu0 %v6678_v13  ;;  %1045 = vmatpush1.msra.mxu1 %v6680_v14 }
  0xd1   :  { %975 = vmatprep.subr.mxu0 %v6684_v15  ;;  %1046 = vmatprep.subr.mxu1 %v6686_v16 }
  0xd2   :  { %976 = vmatpush1.msra.mxu0 %v6690_v17  ;;  %1047 = vmatpush1.msra.mxu1 %v6692_v18 }
  0xd3   :  { %977 = vmatprep.subr.mxu0 %v6696_v19  ;;  %1048 = vmatprep.subr.mxu1 %v6698_v20 }
  0xd4   :  { %978 = vmatpush1.msra.mxu0 %v6702_v21  ;;  %1049 = vmatpush1.msra.mxu1 %v6704_v22 }
  0xd5   :  { %979 = vmatprep.subr.mxu0 %v6708_v23  ;;  %1050 = vmatprep.subr.mxu1 %v6710_v24 }
  0xd6   :  { %980 = vmatpush1.msra.mxu0 %v6714_v25  ;;  %1051 = vmatpush1.msra.mxu1 %v6716_v26 }
  0xd7   :  { %981 = vmatprep.subr.mxu0 %v6720_v27  ;;  %1052 = vmatprep.subr.mxu1 %v6722_v28 }
  0xd8   :  { %982 = vmatpush1.msra.mxu0 %v6726_v29  ;;  %1053 = vmatpush1.msra.mxu1 %v6728_v30 }
  0xd9   :  { %983 = vmatprep.subr.mxu0 %v6732_v32  ;;  %1054 = vmatprep.subr.mxu1 %v6734_v33 }
  0xda   :  { %984 = vmatpush1.msra.mxu0 %v6738_v34  ;;  %1055 = vmatpush1.msra.mxu1 %v6740_v35 }
  0xdb   :  { %985 = vmatprep.subr.mxu0 %v6744_v36  ;;  %1056 = vmatprep.subr.mxu1 %v6746_v37 }
  0xdc   :  { %986 = vmatpush1.msra.mxu0 %v6750_v38  ;;  %1057 = vmatpush1.msra.mxu1 %v6752_v39 }
  0xdd   :  { %987 = vmatprep.subr.mxu0 %v6758_v41  ;;  %1058 = vmatprep.subr.mxu1 %v6760_v42 }
  0xde   :  { %988 = vmatpush1.msra.mxu0 %v6762_v43  ;;  %1059 = vmatpush1.msra.mxu1 %v6766_v44 }
  0xdf   :  { %989 = vmatprep.subr.mxu0 %v6768_v45  ;;  %1060 = vmatprep.subr.mxu1 %v6770_v46 }
  0xe0   :  { %990 = vmatpush1.msra.mxu0 %v6774_v47  ;;  %1061 = vmatpush1.msra.mxu1 %v6776_v48 }
  0xe1   :  { %991 = vmatprep.subr.mxu0 %v6778_v49  ;;  %1062 = vmatprep.subr.mxu1 %v6782_v50 }
  0xe2   :  { %992 = vmatpush1.msra.mxu0 %v6784_v51  ;;  %1063 = vmatpush1.msra.mxu1 %v6790_v54 }
  0xe3   :  { %993 = vmatprep.subr.mxu0 %v6792_v55  ;;  %1064 = vmatprep.subr.mxu1 %v6799_v57 }
  0xe4   :  { %994 = vmatpush1.msra.mxu0 %v6801_v58  ;;  %1065 = vmatpush1.msra.mxu1 %v6807_v61  ;;  %v6845_v61 = vld [vmem:[#allocation7 + $0x38] sm:$0xff] }
  0xe5   :  { %995 = vmatprep.subr.mxu0 %v6809_v62  ;;  %1066 = vmatprep.subr.mxu1 %v6813_v63  ;;  %11904 = vst [vmem:[#allocation28_spill] sm:$0xff] %v6845_v61 }
  0xe6   :  { %996 = vmatpush1.msra.mxu0 %v6815_v1  ;;  %1067 = vmatpush1.msra.mxu1 %v6823_v4  ;;  %v6853_v1 = vld [vmem:[#allocation7 + $0x8] sm:$0xff]  ;;  %v6859_v4 = vld [vmem:[#allocation7] sm:$0xff] }
  0xe7   :  { %997 = vmatprep.subr.mxu0 %v6825_v5  ;;  %1068 = vmatprep.subr.mxu1 %v6829_v6  ;;  %11907 = vst [vmem:[#allocation31_spill] sm:$0xff] %v6853_v1  ;;  %v6857_v5 = vld [vmem:[#allocation7 + $0x18] sm:$0xff]  ;;  %11909 = vst [vmem:[#allocation33_spill] sm:$0xff] %v6859_v4 }
  0xe8   :  { %998 = vmatpush1.msra.mxu0 %v6831_v7  ;;  %1069 = vmatpush1.msra.mxu1 %v6839_v53  ;;  %11908 = vst [vmem:[#allocation32_spill] sm:$0xff] %v6857_v5 }
  0xe9   :  { %999 = vmatprep.subr.mxu0 %v6841_v52  ;;  %1070 = vmatprep.subr.mxu1 %v6845_v61 }
  0xea   :  { %1000 = vmatpush1.msra.mxu0 %v6847_v59  ;;  %1071 = vmatpush1.msra.mxu1 %v6851_v60 }
  0xeb   :  { %1001 = vmatprep.subr.mxu0 %v6853_v1  ;;  %1072 = vmatprep.subr.mxu1 %v6857_v5 }
  0xec   :  { %1002 = vmatpush1.msra.mxu0 %v6859_v4 }
 0x108   :  { %v545_v0 = vpop.f32.mrf.mxu0  ;;  %v616_v62 = vpop.f32.mrf.mxu1 }
 0x109   :  { %v546_v58 = vadd.f32 %v545_v0, %v462_v2  ;;  %v617_v56 = vadd.f32 %v616_v62, %v470_v3  ;;  %v6863_v2 = vld [vmem:[#allocation7 + $0x10] sm:$0xff]  ;;  %v6597_v3 = vmov 1966171168  }
 0x10a   :  { %v547_v63 = vpop.f32.mrf.mxu0  ;;  %v618_v57 = vpop.f32.mrf.mxu1  ;;  %11910 = vst [vmem:[#allocation34_spill] sm:$0xff] %v6863_v2  ;;  %1073 = vmatpush1.msra.mxu1 %v6863_v2 }
 0x10b   :  { %621 = vst [vmem:[#allocation2] sm:$0xff] %v546_v58  ;;  %623 = vst [vmem:[#allocation2 + $0x10] sm:$0xff] %v617_v56  ;;  %v548_v0 = vadd.f32 %v547_v63, %v466_v8  ;;  %v619_v62 = vadd.f32 %v618_v57, %v474_v31  ;;  %v11911_v58 = vmov 0.0   ;;  %v6872_v57 = vld [vmem:[#allocation9 + $0x3c8] sm:$0xff]  ;;  %v6875_v63 = vld [vmem:[#allocation9 + $0x3d8] sm:$0xff]  ;;  %v917_v8 = vunpack.c.l.s4 %v6597_v3 }
 0x10c   :  { %1035 = vmatprep.mubr.f32.mxu0 %v11911_v58  ;;  %1106 = vmatprep.mubr.f32.mxu1 %v11911_v58  ;;  %11912 = vst [vmem:[#allocation35_spill] sm:$0xff] %v6872_v57  ;;  %11913 = vst [vmem:[#allocation36_spill] sm:$0xff] %v6875_v63 }
 0x10d   :  { %622 = vst [vmem:[#allocation2 + $0x8] sm:$0xff] %v548_v0  ;;  %624 = vst [vmem:[#allocation2 + $0x18] sm:$0xff] %v619_v62  ;;  %1163 = vmatprep.subr.mxu0 %v6872_v57  ;;  %1234 = vmatprep.subr.mxu1 %v6875_v63  ;;  %v918_v31 = vunpack.c.0.s8 %v917_v8 }
 0x10f   :  { %v6879_v62 = vsub.s32 %v918_v31, %v6754_v40 }
 0x111   :  { %11914 = vst [vmem:[#allocation37_spill] sm:$0xff] %v6879_v62 }
 0x114   :  { %v909_v63 = vld [vmem:[#allocation2] ss:$8 sm:$0xf] }
 0x14a   :  { %v691_v56 = vpop.f32.mrf.mxu0  ;;  %v762_v0 = vpop.f32.mrf.mxu1 }
 0x14c   :  { %v693_v4 = vpop.f32.mrf.mxu0  ;;  %v764_v2 = vpop.f32.mrf.mxu1 }
 0x14d   :  { %v914_v5 = vcombine.low %v691_v56, %v693_v4  ;;  %v915_v58 = vcombine.low %v762_v0, %v764_v2 }
 0x14f   :  { %v922_v1 = vrot.slane %v914_v5, %v6879_v62  ;;  %v929_v57 = vrot.slane %v915_v58, %v6879_v62 }
 0x151   :  { %v930_v60 = vcombine.low %v922_v1, %v929_v57 }
 0x153   :  { %v937_v59 = vrot.slane %v930_v60, %v6879_v62 }
 0x155   :  { %v939_v61 = vadd.f32 %v937_v59, %v909_v63 }
 0x157   :  { %v4913_v3 = vmul.f32 -1.442695, %v939_v61  ;;  %v947_v8 = vrot.slane %v939_v61, 1  ;;  %v958_v31 = vrot.slane %v939_v61, 3  ;;  %v955_v6 = vrot.slane %v939_v61, 2 }
 0x159   :  { %5025 = vpow2.f32 %v4913_v3  ;;  %v4914_v52 = vmul.f32 -1.442695, %v947_v8  ;;  %v4915_v53 = vmul.f32 -1.442695, %v958_v31  ;;  %v6897_v3 = vld [vmem:[#allocation9 + $0x388] sm:$0xff]  ;;  %v6900_v8 = vld [vmem:[#allocation9 + $0x398] sm:$0xff] }
 0x15a   :  { %11918 = vst [vmem:[#allocation41_spill] sm:$0xff] %v6897_v3  ;;  %11919 = vst [vmem:[#allocation42_spill] sm:$0xff] %v6900_v8  ;;  %v6903_v31 = vld [vmem:[#allocation9 + $0x380] sm:$0xff] }
 0x15b   :  { %5027 = vpow2.f32 %v4914_v52  ;;  %11920 = vst [vmem:[#allocation43_spill] sm:$0xff] %v6903_v31 }
 0x15c   :  { %5029 = vpow2.f32 %v4915_v53  ;;  %v6891_v53 = vld [vmem:[#allocation9 + $0x3c0] sm:$0xff] }
 0x15d   :  { %11916 = vst [vmem:[#allocation39_spill] sm:$0xff] %v6891_v53 }
 0x166   :  { %v5026_v7 = vpop.eup %5025 }
 0x167   :  { %v943_v4 = vadd.f32 1.0, %v5026_v7 }
 0x168   :  { %v5028_v2 = vpop.eup %5027 }
 0x169   :  { %5031 = vrcp.f32 %v943_v4  ;;  %v952_v5 = vadd.f32 1.0, %v5028_v2  ;;  %v5030_v1 = vpop.eup %5029  ;;  %v6906_v4 = vld [vmem:[#allocation9 + $0x390] sm:$0xff]  ;;  %v6909_v2 = vld [vmem:[#allocation9 + $0x348] sm:$0xff] }
 0x16a   :  { %5033 = vtanh.f32 %v955_v6  ;;  %v963_v57 = vadd.f32 1.0, %v5030_v1  ;;  %v6894_v6 = vld [vmem:[#allocation9 + $0x3d0] sm:$0xff]  ;;  %11921 = vst [vmem:[#allocation44_spill] sm:$0xff] %v6906_v4  ;;  %11922 = vst [vmem:[#allocation45_spill] sm:$0xff] %v6909_v2  ;;  %v6915_v1 = vld [vmem:[#allocation9 + $0x340] sm:$0xff] }
 0x16b   :  { %5035 = vrcp.f32 %v952_v5  ;;  %11917 = vst [vmem:[#allocation40_spill] sm:$0xff] %v6894_v6  ;;  %v6912_v5 = vld [vmem:[#allocation9 + $0x358] sm:$0xff]  ;;  %11924 = vst [vmem:[#allocation47_spill] sm:$0xff] %v6915_v1 }
 0x16c   :  { %5037 = vrcp.f32 %v963_v57  ;;  %11923 = vst [vmem:[#allocation46_spill] sm:$0xff] %v6912_v5  ;;  %v6927_v57 = vld [vmem:[#allocation9 + $0x300] sm:$0xff] }
 0x16d   :  { %11928 = vst [vmem:[#allocation51_spill] sm:$0xff] %v6927_v57 }
 0x176   :  { %v5032_v60 = vpop.eup %5031 }
 0x177   :  { %v5034_v58 = vpop.eup %5033 }
 0x178   :  { %v5036_v59 = vpop.eup %5035  ;;  %v967_v56 = vmul.f32 %v5034_v58, %v5032_v60  ;;  %v6918_v60 = vld [vmem:[#allocation9 + $0x350] sm:$0xff]  ;;  %v6921_v58 = vld [vmem:[#allocation9 + $0x308] sm:$0xff] }
 0x179   :  { %v966_v63 = vmul.f32 0.0, %v5036_v59  ;;  %v5038_v52 = vpop.eup %5037  ;;  %11925 = vst [vmem:[#allocation48_spill] sm:$0xff] %v6918_v60  ;;  %11926 = vst [vmem:[#allocation49_spill] sm:$0xff] %v6921_v58  ;;  %v6924_v59 = vld [vmem:[#allocation9 + $0x318] sm:$0xff] }
 0x17a   :  { %11927 = vst [vmem:[#allocation50_spill] sm:$0xff] %v6924_v59 }
 0x17b   :  { %v6884_v0 = vadd.f32 %v967_v56, %v966_v63  ;;  %v6930_v63 = vld [vmem:[#allocation9 + $0x310] sm:$0xff]  ;;  %v6933_v56 = vld [vmem:[#allocation9 + $0x2c8] sm:$0xff] }
 0x17c   :  { %11929 = vst [vmem:[#allocation52_spill] sm:$0xff] %v6930_v63  ;;  %11930 = vst [vmem:[#allocation53_spill] sm:$0xff] %v6933_v56 }
 0x17d   :  { %11915 = vst [vmem:[#allocation38_spill] sm:$0xff] %v6884_v0  ;;  %5039 = vtanh.f32 %v6884_v0 }
 0x18a   :  { %v5040_v61 = vpop.eup %5039 }
 0x18b   :  { %v6887_v7 = vmul.f32 %v5040_v61, %v5038_v52  ;;  %v6936_v52 = vld [vmem:[#allocation9 + $0x2d8] sm:$0xff]  ;;  %v6939_v61 = vld [vmem:[#allocation9 + $0x2c0] sm:$0xff] }
 0x18c   :  { %11931 = vst [vmem:[#allocation54_spill] sm:$0xff] %v6936_v52  ;;  %11932 = vst [vmem:[#allocation55_spill] sm:$0xff] %v6939_v61 }
 0x18d   :  { %1036 = vmatmul.mubr.f32.vlgmr.msra.gmra.mxu0 %v6887_v7  ;;  %1107 = vmatmul.mubr.f32.vlgmr.msra.gmra.mxu1 %v6887_v7 }
 0x18e   :  { %1164 = vmatpush1.msra.mxu0 %v6891_v53  ;;  %1235 = vmatpush1.msra.mxu1 %v6894_v6 }
 0x18f   :  { %1165 = vmatprep.subr.mxu0 %v6897_v3  ;;  %1236 = vmatprep.subr.mxu1 %v6900_v8 }
 0x190   :  { %1166 = vmatpush1.msra.mxu0 %v6903_v31  ;;  %1237 = vmatpush1.msra.mxu1 %v6906_v4 }
 0x191   :  { %1167 = vmatprep.subr.mxu0 %v6909_v2  ;;  %1238 = vmatprep.subr.mxu1 %v6912_v5  ;;  %v12045_v5 = vsub.s32 1, %v6754_v40 }
 0x192   :  { %1168 = vmatpush1.msra.mxu0 %v6915_v1  ;;  %1239 = vmatpush1.msra.mxu1 %v6918_v60 }
 0x193   :  { %1169 = vmatprep.subr.mxu0 %v6921_v58  ;;  %1240 = vmatprep.subr.mxu1 %v6924_v59  ;;  %v6942_v59 = vld [vmem:[#allocation9 + $0x2d0] sm:$0xff]  ;;  %v904_v58 = vpop.f32.mrf.mxu1 }
 0x194   :  { %1170 = vmatpush1.msra.mxu0 %v6927_v57  ;;  %1241 = vmatpush1.msra.mxu1 %v6930_v63  ;;  %11933 = vst [vmem:[#allocation56_spill] sm:$0xff] %v6942_v59  ;;  %v6945_v57 = vld [vmem:[#allocation9 + $0x288] sm:$0xff]  ;;  %v6948_v63 = vld [vmem:[#allocation9 + $0x298] sm:$0xff] }
 0x195   :  { %1171 = vmatprep.subr.mxu0 %v6933_v56  ;;  %1242 = vmatprep.subr.mxu1 %v6936_v52  ;;  %11934 = vst [vmem:[#allocation57_spill] sm:$0xff] %v6945_v57  ;;  %11935 = vst [vmem:[#allocation58_spill] sm:$0xff] %v6948_v63  ;;  %v6951_v56 = vld [vmem:[#allocation9 + $0x280] sm:$0xff]  ;;  %v6954_v52 = vld [vmem:[#allocation9 + $0x290] sm:$0xff] }
 0x196   :  { %1172 = vmatpush1.msra.mxu0 %v6939_v61  ;;  %1243 = vmatpush1.msra.mxu1 %v6942_v59  ;;  %11936 = vst [vmem:[#allocation59_spill] sm:$0xff] %v6951_v56  ;;  %11937 = vst [vmem:[#allocation60_spill] sm:$0xff] %v6954_v52  ;;  %v6957_v61 = vld [vmem:[#allocation9 + $0x248] sm:$0xff]  ;;  %v6960_v59 = vld [vmem:[#allocation9 + $0x258] sm:$0xff] }
 0x197   :  { %1173 = vmatprep.subr.mxu0 %v6945_v57  ;;  %1244 = vmatprep.subr.mxu1 %v6948_v63  ;;  %11938 = vst [vmem:[#allocation61_spill] sm:$0xff] %v6957_v61  ;;  %11939 = vst [vmem:[#allocation62_spill] sm:$0xff] %v6960_v59  ;;  %v6963_v57 = vld [vmem:[#allocation9 + $0x240] sm:$0xff]  ;;  %v6966_v63 = vld [vmem:[#allocation9 + $0x250] sm:$0xff] }
 0x198   :  { %1174 = vmatpush1.msra.mxu0 %v6951_v56  ;;  %1245 = vmatpush1.msra.mxu1 %v6954_v52  ;;  %11940 = vst [vmem:[#allocation63_spill] sm:$0xff] %v6963_v57  ;;  %11941 = vst [vmem:[#allocation64_spill] sm:$0xff] %v6966_v63  ;;  %v6969_v56 = vld [vmem:[#allocation9 + $0x208] sm:$0xff]  ;;  %v6972_v52 = vld [vmem:[#allocation9 + $0x218] sm:$0xff] }
 0x199   :  { %1175 = vmatprep.subr.mxu0 %v6957_v61  ;;  %1246 = vmatprep.subr.mxu1 %v6960_v59  ;;  %11942 = vst [vmem:[#allocation65_spill] sm:$0xff] %v6969_v56  ;;  %11943 = vst [vmem:[#allocation66_spill] sm:$0xff] %v6972_v52  ;;  %v6975_v61 = vld [vmem:[#allocation9 + $0x200] sm:$0xff]  ;;  %v6978_v59 = vld [vmem:[#allocation9 + $0x210] sm:$0xff] }
 0x19a   :  { %1176 = vmatpush1.msra.mxu0 %v6963_v57  ;;  %1247 = vmatpush1.msra.mxu1 %v6966_v63  ;;  %11944 = vst [vmem:[#allocation67_spill] sm:$0xff] %v6975_v61  ;;  %11945 = vst [vmem:[#allocation68_spill] sm:$0xff] %v6978_v59  ;;  %v6981_v57 = vld [vmem:[#allocation9 + $0x1c8] sm:$0xff]  ;;  %v6984_v63 = vld [vmem:[#allocation9 + $0x1d8] sm:$0xff] }
 0x19b   :  { %1177 = vmatprep.subr.mxu0 %v6969_v56  ;;  %1248 = vmatprep.subr.mxu1 %v6972_v52  ;;  %11946 = vst [vmem:[#allocation69_spill] sm:$0xff] %v6981_v57  ;;  %11947 = vst [vmem:[#allocation70_spill] sm:$0xff] %v6984_v63  ;;  %v6987_v56 = vld [vmem:[#allocation9 + $0x1c0] sm:$0xff]  ;;  %v6990_v52 = vld [vmem:[#allocation9 + $0x1d0] sm:$0xff] }
 0x19c   :  { %1178 = vmatpush1.msra.mxu0 %v6975_v61  ;;  %1249 = vmatpush1.msra.mxu1 %v6978_v59  ;;  %11948 = vst [vmem:[#allocation71_spill] sm:$0xff] %v6987_v56  ;;  %11949 = vst [vmem:[#allocation72_spill] sm:$0xff] %v6990_v52  ;;  %v6993_v61 = vld [vmem:[#allocation9 + $0x188] sm:$0xff]  ;;  %v6996_v59 = vld [vmem:[#allocation9 + $0x198] sm:$0xff] }
 0x19d   :  { %1179 = vmatprep.subr.mxu0 %v6981_v57  ;;  %1250 = vmatprep.subr.mxu1 %v6984_v63  ;;  %11950 = vst [vmem:[#allocation73_spill] sm:$0xff] %v6993_v61  ;;  %11951 = vst [vmem:[#allocation74_spill] sm:$0xff] %v6996_v59  ;;  %v6999_v57 = vld [vmem:[#allocation9 + $0x180] sm:$0xff]  ;;  %v7002_v63 = vld [vmem:[#allocation9 + $0x190] sm:$0xff] }
 0x19e   :  { %1180 = vmatpush1.msra.mxu0 %v6987_v56  ;;  %1251 = vmatpush1.msra.mxu1 %v6990_v52  ;;  %11952 = vst [vmem:[#allocation75_spill] sm:$0xff] %v6999_v57  ;;  %11953 = vst [vmem:[#allocation76_spill] sm:$0xff] %v7002_v63  ;;  %v7005_v56 = vld [vmem:[#allocation9 + $0x148] sm:$0xff]  ;;  %v7008_v52 = vld [vmem:[#allocation9 + $0x158] sm:$0xff] }
 0x19f   :  { %1181 = vmatprep.subr.mxu0 %v6993_v61  ;;  %1252 = vmatprep.subr.mxu1 %v6996_v59  ;;  %11954 = vst [vmem:[#allocation77_spill] sm:$0xff] %v7005_v56  ;;  %11955 = vst [vmem:[#allocation78_spill] sm:$0xff] %v7008_v52  ;;  %v7011_v61 = vld [vmem:[#allocation9 + $0x140] sm:$0xff]  ;;  %v7014_v59 = vld [vmem:[#allocation9 + $0x150] sm:$0xff] }
 0x1a0   :  { %1182 = vmatpush1.msra.mxu0 %v6999_v57  ;;  %1253 = vmatpush1.msra.mxu1 %v7002_v63  ;;  %11956 = vst [vmem:[#allocation79_spill] sm:$0xff] %v7011_v61  ;;  %11957 = vst [vmem:[#allocation80_spill] sm:$0xff] %v7014_v59  ;;  %v7017_v57 = vld [vmem:[#allocation9 + $0x108] sm:$0xff]  ;;  %v7020_v63 = vld [vmem:[#allocation9 + $0x118] sm:$0xff] }
 0x1a1   :  { %1183 = vmatprep.subr.mxu0 %v7005_v56  ;;  %1254 = vmatprep.subr.mxu1 %v7008_v52  ;;  %11958 = vst [vmem:[#allocation81_spill] sm:$0xff] %v7017_v57  ;;  %11959 = vst [vmem:[#allocation82_spill] sm:$0xff] %v7020_v63  ;;  %v7023_v56 = vld [vmem:[#allocation9 + $0x100] sm:$0xff]  ;;  %v7026_v52 = vld [vmem:[#allocation9 + $0x110] sm:$0xff] }
 0x1a2   :  { %1184 = vmatpush1.msra.mxu0 %v7011_v61  ;;  %1255 = vmatpush1.msra.mxu1 %v7014_v59  ;;  %11960 = vst [vmem:[#allocation83_spill] sm:$0xff] %v7023_v56  ;;  %11961 = vst [vmem:[#allocation84_spill] sm:$0xff] %v7026_v52  ;;  %v7029_v61 = vld [vmem:[#allocation9 + $0xc8] sm:$0xff]  ;;  %v7032_v59 = vld [vmem:[#allocation9 + $0xd8] sm:$0xff] }
 0x1a3   :  { %1185 = vmatprep.subr.mxu0 %v7017_v57  ;;  %1256 = vmatprep.subr.mxu1 %v7020_v63  ;;  %11962 = vst [vmem:[#allocation85_spill] sm:$0xff] %v7029_v61  ;;  %11963 = vst [vmem:[#allocation86_spill] sm:$0xff] %v7032_v59  ;;  %v7035_v57 = vld [vmem:[#allocation9 + $0xc0] sm:$0xff]  ;;  %v7038_v63 = vld [vmem:[#allocation9 + $0xd0] sm:$0xff] }
 0x1a4   :  { %1186 = vmatpush1.msra.mxu0 %v7023_v56  ;;  %1257 = vmatpush1.msra.mxu1 %v7026_v52  ;;  %11964 = vst [vmem:[#allocation87_spill] sm:$0xff] %v7035_v57  ;;  %11965 = vst [vmem:[#allocation88_spill] sm:$0xff] %v7038_v63  ;;  %v7041_v56 = vld [vmem:[#allocation9 + $0x88] sm:$0xff]  ;;  %v7044_v52 = vld [vmem:[#allocation9 + $0x98] sm:$0xff] }
 0x1a5   :  { %1187 = vmatprep.subr.mxu0 %v7029_v61  ;;  %1258 = vmatprep.subr.mxu1 %v7032_v59  ;;  %11966 = vst [vmem:[#allocation89_spill] sm:$0xff] %v7041_v56  ;;  %11967 = vst [vmem:[#allocation90_spill] sm:$0xff] %v7044_v52  ;;  %v7047_v61 = vld [vmem:[#allocation9 + $0x80] sm:$0xff]  ;;  %v7050_v59 = vld [vmem:[#allocation9 + $0x90] sm:$0xff] }
 0x1a6   :  { %1188 = vmatpush1.msra.mxu0 %v7035_v57  ;;  %1259 = vmatpush1.msra.mxu1 %v7038_v63  ;;  %11968 = vst [vmem:[#allocation91_spill] sm:$0xff] %v7047_v61  ;;  %11969 = vst [vmem:[#allocation92_spill] sm:$0xff] %v7050_v59  ;;  %v7053_v57 = vld [vmem:[#allocation9 + $0x48] sm:$0xff]  ;;  %v7056_v63 = vld [vmem:[#allocation9 + $0x58] sm:$0xff] }
 0x1a7   :  { %1189 = vmatprep.subr.mxu0 %v7041_v56  ;;  %1260 = vmatprep.subr.mxu1 %v7044_v52  ;;  %11970 = vst [vmem:[#allocation93_spill] sm:$0xff] %v7053_v57  ;;  %11971 = vst [vmem:[#allocation94_spill] sm:$0xff] %v7056_v63  ;;  %v7059_v56 = vld [vmem:[#allocation9 + $0x40] sm:$0xff]  ;;  %v7062_v52 = vld [vmem:[#allocation9 + $0x50] sm:$0xff] }
 0x1a8   :  { %1190 = vmatpush1.msra.mxu0 %v7047_v61  ;;  %1261 = vmatpush1.msra.mxu1 %v7050_v59  ;;  %11972 = vst [vmem:[#allocation95_spill] sm:$0xff] %v7059_v56  ;;  %11973 = vst [vmem:[#allocation96_spill] sm:$0xff] %v7062_v52  ;;  %v7065_v61 = vld [vmem:[#allocation9 + $0x8] sm:$0xff]  ;;  %v7068_v59 = vld [vmem:[#allocation9 + $0x18] sm:$0xff] }
 0x1a9   :  { %1191 = vmatprep.subr.mxu0 %v7053_v57  ;;  %1262 = vmatprep.subr.mxu1 %v7056_v63  ;;  %11974 = vst [vmem:[#allocation97_spill] sm:$0xff] %v7065_v61  ;;  %11975 = vst [vmem:[#allocation98_spill] sm:$0xff] %v7068_v59  ;;  %v7071_v57 = vld [vmem:[#allocation9] sm:$0xff]  ;;  %v7074_v63 = vld [vmem:[#allocation9 + $0x10] sm:$0xff] }
 0x1aa   :  { %1192 = vmatpush1.msra.mxu0 %v7059_v56  ;;  %1263 = vmatpush1.msra.mxu1 %v7062_v52  ;;  %11976 = vst [vmem:[#allocation99_spill] sm:$0xff] %v7071_v57  ;;  %11977 = vst [vmem:[#allocation100_spill] sm:$0xff] %v7074_v63  ;;  %v7077_v56 = vld [vmem:[#allocation9 + $0x7c8] sm:$0xff]  ;;  %v7080_v52 = vld [vmem:[#allocation9 + $0x7d8] sm:$0xff] }
 0x1ab   :  { %1193 = vmatprep.subr.mxu0 %v7065_v61  ;;  %1264 = vmatprep.subr.mxu1 %v7068_v59  ;;  %11978 = vst [vmem:[#allocation101_spill] sm:$0xff] %v7077_v56  ;;  %11979 = vst [vmem:[#allocation102_spill] sm:$0xff] %v7080_v52  ;;  %v7083_v61 = vld [vmem:[#allocation9 + $0x7c0] sm:$0xff]  ;;  %v7086_v59 = vld [vmem:[#allocation9 + $0x7d0] sm:$0xff] }
 0x1ac   :  { %1194 = vmatpush1.msra.mxu0 %v7071_v57  ;;  %1265 = vmatpush1.msra.mxu1 %v7074_v63  ;;  %11980 = vst [vmem:[#allocation103_spill] sm:$0xff] %v7083_v61  ;;  %11981 = vst [vmem:[#allocation104_spill] sm:$0xff] %v7086_v59  ;;  %v7089_v57 = vld [vmem:[#allocation9 + $0x788] sm:$0xff]  ;;  %v7092_v63 = vld [vmem:[#allocation9 + $0x798] sm:$0xff] }
 0x1ad   :  { %1195 = vmatprep.subr.mxu0 %v7077_v56  ;;  %1266 = vmatprep.subr.mxu1 %v7080_v52  ;;  %11982 = vst [vmem:[#allocation105_spill] sm:$0xff] %v7089_v57  ;;  %11983 = vst [vmem:[#allocation106_spill] sm:$0xff] %v7092_v63  ;;  %v7095_v56 = vld [vmem:[#allocation9 + $0x780] sm:$0xff]  ;;  %v7098_v52 = vld [vmem:[#allocation9 + $0x790] sm:$0xff] }
 0x1ae   :  { %1196 = vmatpush2.msra.mxu0 %v7083_v61  ;;  %1267 = vmatpush2.msra.mxu1 %v7086_v59  ;;  %11984 = vst [vmem:[#allocation107_spill] sm:$0xff] %v7095_v56  ;;  %11985 = vst [vmem:[#allocation108_spill] sm:$0xff] %v7098_v52  ;;  %v7101_v61 = vld [vmem:[#allocation9 + $0x748] sm:$0xff]  ;;  %v7104_v59 = vld [vmem:[#allocation9 + $0x758] sm:$0xff] }
 0x1af   :  { %1197 = vmatprep.subr.mxu0 %v7089_v57  ;;  %1268 = vmatprep.subr.mxu1 %v7092_v63  ;;  %11986 = vst [vmem:[#allocation109_spill] sm:$0xff] %v7101_v61  ;;  %11987 = vst [vmem:[#allocation110_spill] sm:$0xff] %v7104_v59  ;;  %v7107_v57 = vld [vmem:[#allocation9 + $0x740] sm:$0xff]  ;;  %v7110_v63 = vld [vmem:[#allocation9 + $0x750] sm:$0xff] }
 0x1b0   :  { %1198 = vmatpush2.msra.mxu0 %v7095_v56  ;;  %1269 = vmatpush2.msra.mxu1 %v7098_v52  ;;  %11988 = vst [vmem:[#allocation111_spill] sm:$0xff] %v7107_v57  ;;  %11989 = vst [vmem:[#allocation112_spill] sm:$0xff] %v7110_v63  ;;  %v7113_v56 = vld [vmem:[#allocation9 + $0x708] sm:$0xff]  ;;  %v7116_v52 = vld [vmem:[#allocation9 + $0x718] sm:$0xff] }
 0x1b1   :  { %1199 = vmatprep.subr.mxu0 %v7101_v61  ;;  %1270 = vmatprep.subr.mxu1 %v7104_v59  ;;  %11990 = vst [vmem:[#allocation113_spill] sm:$0xff] %v7113_v56  ;;  %11991 = vst [vmem:[#allocation114_spill] sm:$0xff] %v7116_v52  ;;  %v7119_v61 = vld [vmem:[#allocation9 + $0x700] sm:$0xff]  ;;  %v7122_v59 = vld [vmem:[#allocation9 + $0x710] sm:$0xff] }
 0x1b2   :  { %1200 = vmatpush2.msra.mxu0 %v7107_v57  ;;  %1271 = vmatpush2.msra.mxu1 %v7110_v63  ;;  %11992 = vst [vmem:[#allocation115_spill] sm:$0xff] %v7119_v61  ;;  %11993 = vst [vmem:[#allocation116_spill] sm:$0xff] %v7122_v59  ;;  %v7125_v57 = vld [vmem:[#allocation9 + $0x6c8] sm:$0xff]  ;;  %v7128_v63 = vld [vmem:[#allocation9 + $0x6d8] sm:$0xff] }
 0x1b3   :  { %1201 = vmatprep.subr.mxu0 %v7113_v56  ;;  %1272 = vmatprep.subr.mxu1 %v7116_v52  ;;  %11994 = vst [vmem:[#allocation117_spill] sm:$0xff] %v7125_v57  ;;  %11995 = vst [vmem:[#allocation118_spill] sm:$0xff] %v7128_v63  ;;  %v7131_v56 = vld [vmem:[#allocation9 + $0x6c0] sm:$0xff]  ;;  %v7134_v52 = vld [vmem:[#allocation9 + $0x6d0] sm:$0xff] }
 0x1b4   :  { %1202 = vmatpush2.msra.mxu0 %v7119_v61  ;;  %1273 = vmatpush2.msra.mxu1 %v7122_v59  ;;  %11996 = vst [vmem:[#allocation119_spill] sm:$0xff] %v7131_v56  ;;  %11997 = vst [vmem:[#allocation120_spill] sm:$0xff] %v7134_v52  ;;  %v7137_v61 = vld [vmem:[#allocation9 + $0x688] sm:$0xff]  ;;  %v7140_v59 = vld [vmem:[#allocation9 + $0x698] sm:$0xff] }
 0x1b5   :  { %1203 = vmatprep.subr.mxu0 %v7125_v57  ;;  %1274 = vmatprep.subr.mxu1 %v7128_v63  ;;  %11998 = vst [vmem:[#allocation121_spill] sm:$0xff] %v7137_v61  ;;  %11999 = vst [vmem:[#allocation122_spill] sm:$0xff] %v7140_v59  ;;  %v7143_v57 = vld [vmem:[#allocation9 + $0x680] sm:$0xff]  ;;  %v7146_v63 = vld [vmem:[#allocation9 + $0x690] sm:$0xff] }
 0x1b6   :  { %1204 = vmatpush2.msra.mxu0 %v7131_v56  ;;  %1275 = vmatpush2.msra.mxu1 %v7134_v52  ;;  %12000 = vst [vmem:[#allocation123_spill] sm:$0xff] %v7143_v57  ;;  %12001 = vst [vmem:[#allocation124_spill] sm:$0xff] %v7146_v63  ;;  %v7149_v56 = vld [vmem:[#allocation9 + $0x648] sm:$0xff]  ;;  %v7152_v52 = vld [vmem:[#allocation9 + $0x658] sm:$0xff] }
 0x1b7   :  { %1205 = vmatprep.subr.mxu0 %v7137_v61  ;;  %1276 = vmatprep.subr.mxu1 %v7140_v59  ;;  %12002 = vst [vmem:[#allocation125_spill] sm:$0xff] %v7149_v56  ;;  %12003 = vst [vmem:[#allocation126_spill] sm:$0xff] %v7152_v52  ;;  %v7155_v61 = vld [vmem:[#allocation9 + $0x640] sm:$0xff]  ;;  %v7158_v59 = vld [vmem:[#allocation9 + $0x650] sm:$0xff] }
 0x1b8   :  { %1206 = vmatpush2.msra.mxu0 %v7143_v57  ;;  %1277 = vmatpush2.msra.mxu1 %v7146_v63  ;;  %12004 = vst [vmem:[#allocation127_spill] sm:$0xff] %v7155_v61  ;;  %12005 = vst [vmem:[#allocation128_spill] sm:$0xff] %v7158_v59  ;;  %v7161_v57 = vld [vmem:[#allocation9 + $0x608] sm:$0xff]  ;;  %v7164_v63 = vld [vmem:[#allocation9 + $0x618] sm:$0xff] }
 0x1b9   :  { %1207 = vmatprep.subr.mxu0 %v7149_v56  ;;  %1278 = vmatprep.subr.mxu1 %v7152_v52  ;;  %12006 = vst [vmem:[#allocation129_spill] sm:$0xff] %v7161_v57  ;;  %12007 = vst [vmem:[#allocation130_spill] sm:$0xff] %v7164_v63  ;;  %v7167_v56 = vld [vmem:[#allocation9 + $0x600] sm:$0xff]  ;;  %v7170_v52 = vld [vmem:[#allocation9 + $0x610] sm:$0xff] }
 0x1ba   :  { %1208 = vmatpush2.msra.mxu0 %v7155_v61  ;;  %1279 = vmatpush2.msra.mxu1 %v7158_v59  ;;  %12008 = vst [vmem:[#allocation131_spill] sm:$0xff] %v7167_v56  ;;  %12009 = vst [vmem:[#allocation132_spill] sm:$0xff] %v7170_v52  ;;  %v7173_v61 = vld [vmem:[#allocation9 + $0x5c8] sm:$0xff]  ;;  %v7176_v59 = vld [vmem:[#allocation9 + $0x5d8] sm:$0xff] }
 0x1bb   :  { %1209 = vmatprep.subr.mxu0 %v7161_v57  ;;  %1280 = vmatprep.subr.mxu1 %v7164_v63  ;;  %12010 = vst [vmem:[#allocation133_spill] sm:$0xff] %v7173_v61  ;;  %12011 = vst [vmem:[#allocation134_spill] sm:$0xff] %v7176_v59  ;;  %v7179_v57 = vld [vmem:[#allocation9 + $0x5c0] sm:$0xff]  ;;  %v7182_v63 = vld [vmem:[#allocation9 + $0x5d0] sm:$0xff] }
 0x1bc   :  { %1210 = vmatpush2.msra.mxu0 %v7167_v56  ;;  %1281 = vmatpush2.msra.mxu1 %v7170_v52  ;;  %12012 = vst [vmem:[#allocation135_spill] sm:$0xff] %v7179_v57  ;;  %12013 = vst [vmem:[#allocation136_spill] sm:$0xff] %v7182_v63  ;;  %v7185_v56 = vld [vmem:[#allocation9 + $0x588] sm:$0xff]  ;;  %v7188_v52 = vld [vmem:[#allocation9 + $0x598] sm:$0xff] }
 0x1bd   :  { %1211 = vmatprep.subr.mxu0 %v7173_v61  ;;  %1282 = vmatprep.subr.mxu1 %v7176_v59  ;;  %12014 = vst [vmem:[#allocation137_spill] sm:$0xff] %v7185_v56  ;;  %12015 = vst [vmem:[#allocation138_spill] sm:$0xff] %v7188_v52  ;;  %v7191_v61 = vld [vmem:[#allocation9 + $0x580] sm:$0xff]  ;;  %v7194_v59 = vld [vmem:[#allocation9 + $0x590] sm:$0xff] }
 0x1be   :  { %1212 = vmatpush2.msra.mxu0 %v7179_v57  ;;  %1283 = vmatpush2.msra.mxu1 %v7182_v63  ;;  %12016 = vst [vmem:[#allocation139_spill] sm:$0xff] %v7191_v61  ;;  %12017 = vst [vmem:[#allocation140_spill] sm:$0xff] %v7194_v59  ;;  %v7197_v57 = vld [vmem:[#allocation9 + $0x548] sm:$0xff]  ;;  %v7200_v63 = vld [vmem:[#allocation9 + $0x558] sm:$0xff] }
 0x1bf   :  { %1213 = vmatprep.subr.mxu0 %v7185_v56  ;;  %1284 = vmatprep.subr.mxu1 %v7188_v52  ;;  %12018 = vst [vmem:[#allocation141_spill] sm:$0xff] %v7197_v57  ;;  %12019 = vst [vmem:[#allocation142_spill] sm:$0xff] %v7200_v63  ;;  %v7203_v56 = vld [vmem:[#allocation9 + $0x540] sm:$0xff]  ;;  %v7206_v52 = vld [vmem:[#allocation9 + $0x550] sm:$0xff] }
 0x1c0   :  { %1214 = vmatpush2.msra.mxu0 %v7191_v61  ;;  %1285 = vmatpush2.msra.mxu1 %v7194_v59  ;;  %12020 = vst [vmem:[#allocation143_spill] sm:$0xff] %v7203_v56  ;;  %12021 = vst [vmem:[#allocation144_spill] sm:$0xff] %v7206_v52  ;;  %v7209_v61 = vld [vmem:[#allocation9 + $0x508] sm:$0xff]  ;;  %v7212_v59 = vld [vmem:[#allocation9 + $0x518] sm:$0xff] }
 0x1c1   :  { %1215 = vmatprep.subr.mxu0 %v7197_v57  ;;  %1286 = vmatprep.subr.mxu1 %v7200_v63  ;;  %12022 = vst [vmem:[#allocation145_spill] sm:$0xff] %v7209_v61  ;;  %12023 = vst [vmem:[#allocation146_spill] sm:$0xff] %v7212_v59  ;;  %v7215_v57 = vld [vmem:[#allocation9 + $0x500] sm:$0xff]  ;;  %v7218_v63 = vld [vmem:[#allocation9 + $0x510] sm:$0xff] }
 0x1c2   :  { %1216 = vmatpush2.msra.mxu0 %v7203_v56  ;;  %1287 = vmatpush2.msra.mxu1 %v7206_v52  ;;  %12024 = vst [vmem:[#allocation147_spill] sm:$0xff] %v7215_v57  ;;  %12025 = vst [vmem:[#allocation148_spill] sm:$0xff] %v7218_v63  ;;  %v7221_v56 = vld [vmem:[#allocation9 + $0x4c8] sm:$0xff]  ;;  %v7224_v52 = vld [vmem:[#allocation9 + $0x4d8] sm:$0xff] }
 0x1c3   :  { %1217 = vmatprep.subr.mxu0 %v7209_v61  ;;  %1288 = vmatprep.subr.mxu1 %v7212_v59  ;;  %12026 = vst [vmem:[#allocation149_spill] sm:$0xff] %v7221_v56  ;;  %12027 = vst [vmem:[#allocation150_spill] sm:$0xff] %v7224_v52  ;;  %v7227_v61 = vld [vmem:[#allocation9 + $0x4c0] sm:$0xff]  ;;  %v7230_v59 = vld [vmem:[#allocation9 + $0x4d0] sm:$0xff] }
 0x1c4   :  { %1218 = vmatpush2.msra.mxu0 %v7215_v57  ;;  %1289 = vmatpush2.msra.mxu1 %v7218_v63  ;;  %12028 = vst [vmem:[#allocation151_spill] sm:$0xff] %v7227_v61  ;;  %12029 = vst [vmem:[#allocation152_spill] sm:$0xff] %v7230_v59  ;;  %v7233_v57 = vld [vmem:[#allocation9 + $0x488] sm:$0xff]  ;;  %v7236_v63 = vld [vmem:[#allocation9 + $0x498] sm:$0xff] }
 0x1c5   :  { %1219 = vmatprep.subr.mxu0 %v7221_v56  ;;  %1290 = vmatprep.subr.mxu1 %v7224_v52  ;;  %12030 = vst [vmem:[#allocation153_spill] sm:$0xff] %v7233_v57  ;;  %12031 = vst [vmem:[#allocation154_spill] sm:$0xff] %v7236_v63  ;;  %v7239_v56 = vld [vmem:[#allocation9 + $0x480] sm:$0xff]  ;;  %v7242_v52 = vld [vmem:[#allocation9 + $0x490] sm:$0xff] }
 0x1c6   :  { %1220 = vmatpush2.msra.mxu0 %v7227_v61  ;;  %1291 = vmatpush2.msra.mxu1 %v7230_v59  ;;  %12032 = vst [vmem:[#allocation155_spill] sm:$0xff] %v7239_v56  ;;  %12033 = vst [vmem:[#allocation156_spill] sm:$0xff] %v7242_v52  ;;  %v7245_v61 = vld [vmem:[#allocation9 + $0x448] sm:$0xff]  ;;  %v7248_v59 = vld [vmem:[#allocation9 + $0x458] sm:$0xff] }
 0x1c7   :  { %1221 = vmatprep.subr.mxu0 %v7233_v57  ;;  %1292 = vmatprep.subr.mxu1 %v7236_v63  ;;  %12034 = vst [vmem:[#allocation157_spill] sm:$0xff] %v7245_v61  ;;  %12035 = vst [vmem:[#allocation158_spill] sm:$0xff] %v7248_v59  ;;  %v7251_v57 = vld [vmem:[#allocation9 + $0x440] sm:$0xff]  ;;  %v7254_v63 = vld [vmem:[#allocation9 + $0x450] sm:$0xff] }
 0x1c8   :  { %1222 = vmatpush2.msra.mxu0 %v7239_v56  ;;  %1293 = vmatpush2.msra.mxu1 %v7242_v52  ;;  %12036 = vst [vmem:[#allocation159_spill] sm:$0xff] %v7251_v57  ;;  %12037 = vst [vmem:[#allocation160_spill] sm:$0xff] %v7254_v63  ;;  %v7257_v56 = vld [vmem:[#allocation9 + $0x408] sm:$0xff]  ;;  %v7260_v52 = vld [vmem:[#allocation9 + $0x418] sm:$0xff] }
 0x1c9   :  { %1223 = vmatprep.subr.mxu0 %v7245_v61  ;;  %1294 = vmatprep.subr.mxu1 %v7248_v59  ;;  %12038 = vst [vmem:[#allocation161_spill] sm:$0xff] %v7257_v56  ;;  %12039 = vst [vmem:[#allocation162_spill] sm:$0xff] %v7260_v52  ;;  %v7263_v61 = vld [vmem:[#allocation9 + $0x400] sm:$0xff]  ;;  %v7266_v59 = vld [vmem:[#allocation9 + $0x410] sm:$0xff] }
 0x1ca   :  { %1224 = vmatpush2.msra.mxu0 %v7251_v57  ;;  %1295 = vmatpush2.msra.mxu1 %v7254_v63  ;;  %12040 = vst [vmem:[#allocation163_spill] sm:$0xff] %v7263_v61  ;;  %12041 = vst [vmem:[#allocation164_spill] sm:$0xff] %v7266_v59  ;;  %v7269_v57 = vld [vmem:[#allocation9 + $0x3e8] sm:$0xff]  ;;  %v7272_v63 = vld [vmem:[#allocation9 + $0x3f8] sm:$0xff] }
 0x1cb   :  { %1225 = vmatprep.subr.mxu0 %v7257_v56  ;;  %1296 = vmatprep.subr.mxu1 %v7260_v52  ;;  %12042 = vst [vmem:[#allocation165_spill] sm:$0xff] %v7269_v57  ;;  %12043 = vst [vmem:[#allocation166_spill] sm:$0xff] %v7272_v63  ;;  %v833_v56 = vpop.f32.mrf.mxu0  ;;  %v135_v52 = vld [vmem:[%s11056_s4] sm:$0xf] }
 0x1cc   :  { %1226 = vmatpush2.msra.mxu0 %v7263_v61  ;;  %1297 = vmatpush2.msra.mxu1 %v7266_v59  ;;  %v12044_v61 = vsub.s32 0, %v6754_v40  ;;  %v7284_v2 = vrot.slane %v135_v52, %v12045_v5 }
 0x1cd   :  { %1305 = vmatprep.subr.mxu0 %v7269_v57  ;;  %1376 = vmatprep.subr.mxu1 %v7272_v63  ;;  %v835_v60 = vpop.f32.mrf.mxu0  ;;  %v906_v57 = vpop.f32.mrf.mxu1 }
 0x1ce   :  { %v7280_v1 = vrot.slane %v135_v52, %v12044_v61  ;;  %v12046_v61 = vsub.s32 3, %v6754_v40 }
 0x1d0   :  { %v7290_v55 = vrot.slane %v135_v52, %v12046_v61 }
 0x24d   :  { %v1037_v59 = vpop.f32.mrf.mxu0  ;;  %v1108_v8 = vpop.f32.mrf.mxu1 }
 0x24e   :  { %v1038_v4 = vadd.f32 %v1037_v59, %v833_v56  ;;  %v12047_v59 = vsub.s32 2, %v6754_v40 }
 0x24f   :  { %v1039_v31 = vpop.f32.mrf.mxu0  ;;  %v1110_v62 = vpop.f32.mrf.mxu1 }
 0x250   :  { %v1134_v63 = vadd.f32 %v7280_v1, %v1038_v4  ;;  %v1040_v3 = vadd.f32 %v1039_v31, %v835_v60  ;;  %v1111_v5 = vadd.f32 %v1110_v62, %v906_v57  ;;  %v7295_v56 = vrot.slane %v135_v52, %v12047_v59 }
 0x251   :  { %v1109_v4 = vadd.f32 %v1108_v8, %v904_v58 }
 0x252   :  { %v4916_v6 = vmul.f32 -1.442695, %v1134_v63  ;;  %v1135_v53 = vadd.f32 %v7284_v2, %v1040_v3  ;;  %v1137_v54 = vadd.f32 %v7290_v55, %v1111_v5 }
 0x253   :  { %v1136_v3 = vadd.f32 %v7295_v56, %v1109_v4  ;;  %v7303_v4 = vld [vmem:[#allocation9 + $0x3e0] sm:$0xff] }
 0x254   :  { %5041 = vpow2.f32 %v4916_v6  ;;  %v4917_v0 = vmul.f32 -1.442695, %v1135_v53  ;;  %v4918_v31 = vmul.f32 -1.442695, %v1137_v54 }
 0x256   :  { %5043 = vpow2.f32 %v4917_v0 }
 0x257   :  { %5045 = vpow2.f32 %v4918_v31  ;;  %v7306_v31 = vld [vmem:[#allocation9 + $0x3f0] sm:$0xff] }
 0x261   :  { %v5042_v60 = vpop.eup %5041 }
 0x262   :  { %v1141_v6 = vadd.f32 1.0, %v5042_v60  ;;  %v7309_v60 = vld [vmem:[#allocation9 + $0x3a8] sm:$0xff] }
 0x263   :  { %v5044_v53 = vpop.eup %5043 }
 0x264   :  { %5047 = vrcp.f32 %v1141_v6  ;;  %v1147_v0 = vadd.f32 1.0, %v5044_v53  ;;  %v5046_v63 = vpop.eup %5045  ;;  %v7315_v6 = vld [vmem:[#allocation9 + $0x3a0] sm:$0xff]  ;;  %v7318_v53 = vld [vmem:[#allocation9 + $0x3b0] sm:$0xff] }
 0x265   :  { %5049 = vtanh.f32 %v1136_v3  ;;  %v1154_v5 = vadd.f32 1.0, %v5046_v63  ;;  %v7312_v3 = vld [vmem:[#allocation9 + $0x3b8] sm:$0xff] }
 0x266   :  { %5051 = vrcp.f32 %v1147_v0  ;;  %v7321_v0 = vld [vmem:[#allocation9 + $0x368] sm:$0xff]  ;;  %v7324_v63 = vld [vmem:[#allocation9 + $0x378] sm:$0xff] }
 0x267   :  { %5053 = vrcp.f32 %v1154_v5  ;;  %v7336_v5 = vld [vmem:[#allocation9 + $0x338] sm:$0xff] }
 0x268   :  { %12048 = vst [vmem:[#allocation167_spill] sm:$0xff] %v7336_v5 }
 0x271   :  { %v5048_v62 = vpop.eup %5047 }
 0x272   :  { %v5050_v57 = vpop.eup %5049 }
 0x273   :  { %v5052_v61 = vpop.eup %5051  ;;  %v1158_v52 = vmul.f32 %v5050_v57, %v5048_v62  ;;  %v7327_v62 = vld [vmem:[#allocation9 + $0x360] sm:$0xff]  ;;  %v7330_v57 = vld [vmem:[#allocation9 + $0x370] sm:$0xff] }
 0x274   :  { %v1157_v40 = vmul.f32 0.0, %v5052_v61  ;;  %v5054_v54 = vpop.eup %5053  ;;  %v7333_v61 = vld [vmem:[#allocation9 + $0x328] sm:$0xff] }
 0x276   :  { %v7298_v59 = vadd.f32 %v1158_v52, %v1157_v40  ;;  %v7339_v40 = vld [vmem:[#allocation9 + $0x320] sm:$0xff]  ;;  %v7342_v52 = vld [vmem:[#allocation9 + $0x330] sm:$0xff] }
 0x277   :  { %12049 = vst [vmem:[#allocation168_spill] sm:$0xff] %v7339_v40  ;;  %12050 = vst [vmem:[#allocation169_spill] sm:$0xff] %v7342_v52 }
 0x278   :  { %5055 = vtanh.f32 %v7298_v59 }
 0x285   :  { %v5056_v8 = vpop.eup %5055 }
 0x286   :  { %v1161_v58 = vmul.f32 %v5056_v8, %v5054_v54  ;;  %v7345_v54 = vld [vmem:[#allocation9 + $0x2e8] sm:$0xff]  ;;  %v7348_v8 = vld [vmem:[#allocation9 + $0x2f8] sm:$0xff] }
 0x287   :  { %12051 = vst [vmem:[#allocation170_spill] sm:$0xff] %v7345_v54  ;;  %12052 = vst [vmem:[#allocation171_spill] sm:$0xff] %v7348_v8 }
 0x288   :  { %1162 = vst [vmem:[#allocation3] sm:$0x1] %v1161_v58  ;;  %1227 = vmatprep.mubr.f32.mxu0 %v1161_v58  ;;  %1298 = vmatprep.mubr.f32.mxu1 %v1161_v58 }
 0x289   :  { %1228 = vmatmul.mubr.f32.vlgmr.msra.gmra.mxu0 %v6887_v7  ;;  %1299 = vmatmul.mubr.f32.vlgmr.msra.gmra.mxu1 %v6887_v7 }
 0x28a   :  { %1306 = vmatpush1.msra.mxu0 %v7303_v4  ;;  %1377 = vmatpush1.msra.mxu1 %v7306_v31 }
 0x28b   :  { %1307 = vmatprep.subr.mxu0 %v7309_v60  ;;  %1369 = vmatprep.mubr.f32.mxu0 %v1161_v58 }
 0x28c   :  { %1378 = vmatprep.subr.mxu1 %v7312_v3  ;;  %1440 = vmatprep.mubr.f32.mxu1 %v1161_v58  ;;  %v7351_v58 = vld [vmem:[#allocation9 + $0x2e0] sm:$0xff] }
 0x28d   :  { %1308 = vmatpush1.msra.mxu0 %v7315_v6  ;;  %1379 = vmatpush1.msra.mxu1 %v7318_v53  ;;  %12053 = vst [vmem:[#allocation172_spill] sm:$0xff] %v7351_v58 }
 0x28e   :  { %1309 = vmatprep.subr.mxu0 %v7321_v0  ;;  %1380 = vmatprep.subr.mxu1 %v7324_v63 }
 0x28f   :  { %1310 = vmatpush1.msra.mxu0 %v7327_v62  ;;  %1381 = vmatpush1.msra.mxu1 %v7330_v57 }
 0x290   :  { %1311 = vmatprep.subr.mxu0 %v7333_v61  ;;  %1382 = vmatprep.subr.mxu1 %v7336_v5  ;;  %v7354_v5 = vld [vmem:[#allocation9 + $0x2f0] sm:$0xff] }
 0x291   :  { %1312 = vmatpush1.msra.mxu0 %v7339_v40  ;;  %1383 = vmatpush1.msra.mxu1 %v7342_v52  ;;  %12054 = vst [vmem:[#allocation173_spill] sm:$0xff] %v7354_v5  ;;  %v7357_v40 = vld [vmem:[#allocation9 + $0x2a8] sm:$0xff]  ;;  %v7360_v52 = vld [vmem:[#allocation9 + $0x2b8] sm:$0xff] }
 0x292   :  { %1313 = vmatprep.subr.mxu0 %v7345_v54  ;;  %1384 = vmatprep.subr.mxu1 %v7348_v8  ;;  %12055 = vst [vmem:[#allocation174_spill] sm:$0xff] %v7357_v40  ;;  %12056 = vst [vmem:[#allocation175_spill] sm:$0xff] %v7360_v52  ;;  %v7363_v54 = vld [vmem:[#allocation9 + $0x2a0] sm:$0xff]  ;;  %v7366_v8 = vld [vmem:[#allocation9 + $0x2b0] sm:$0xff] }
 0x293   :  { %1314 = vmatpush1.msra.mxu0 %v7351_v58  ;;  %1385 = vmatpush1.msra.mxu1 %v7354_v5  ;;  %12057 = vst [vmem:[#allocation176_spill] sm:$0xff] %v7363_v54  ;;  %12058 = vst [vmem:[#allocation177_spill] sm:$0xff] %v7366_v8  ;;  %v7369_v58 = vld [vmem:[#allocation9 + $0x268] sm:$0xff]  ;;  %v7372_v5 = vld [vmem:[#allocation9 + $0x278] sm:$0xff] }
 0x294   :  { %1315 = vmatprep.subr.mxu0 %v7357_v40  ;;  %1386 = vmatprep.subr.mxu1 %v7360_v52  ;;  %12059 = vst [vmem:[#allocation178_spill] sm:$0xff] %v7369_v58  ;;  %12060 = vst [vmem:[#allocation179_spill] sm:$0xff] %v7372_v5  ;;  %v7375_v40 = vld [vmem:[#allocation9 + $0x260] sm:$0xff]  ;;  %v7378_v52 = vld [vmem:[#allocation9 + $0x270] sm:$0xff] }
 0x295   :  { %1316 = vmatpush1.msra.mxu0 %v7363_v54  ;;  %1387 = vmatpush1.msra.mxu1 %v7366_v8  ;;  %12061 = vst [vmem:[#allocation180_spill] sm:$0xff] %v7375_v40  ;;  %12062 = vst [vmem:[#allocation181_spill] sm:$0xff] %v7378_v52  ;;  %v7381_v54 = vld [vmem:[#allocation9 + $0x228] sm:$0xff]  ;;  %v7384_v8 = vld [vmem:[#allocation9 + $0x238] sm:$0xff] }
 0x296   :  { %1317 = vmatprep.subr.mxu0 %v7369_v58  ;;  %1388 = vmatprep.subr.mxu1 %v7372_v5  ;;  %12063 = vst [vmem:[#allocation182_spill] sm:$0xff] %v7381_v54  ;;  %12064 = vst [vmem:[#allocation183_spill] sm:$0xff] %v7384_v8  ;;  %v7387_v58 = vld [vmem:[#allocation9 + $0x220] sm:$0xff]  ;;  %v7390_v5 = vld [vmem:[#allocation9 + $0x230] sm:$0xff] }
 0x297   :  { %1318 = vmatpush1.msra.mxu0 %v7375_v40  ;;  %1389 = vmatpush1.msra.mxu1 %v7378_v52  ;;  %12065 = vst [vmem:[#allocation184_spill] sm:$0xff] %v7387_v58  ;;  %12066 = vst [vmem:[#allocation185_spill] sm:$0xff] %v7390_v5  ;;  %v7393_v40 = vld [vmem:[#allocation9 + $0x1e8] sm:$0xff]  ;;  %v7396_v52 = vld [vmem:[#allocation9 + $0x1f8] sm:$0xff] }
 0x298   :  { %1319 = vmatprep.subr.mxu0 %v7381_v54  ;;  %1390 = vmatprep.subr.mxu1 %v7384_v8  ;;  %12067 = vst [vmem:[#allocation186_spill] sm:$0xff] %v7393_v40  ;;  %12068 = vst [vmem:[#allocation187_spill] sm:$0xff] %v7396_v52  ;;  %v7399_v54 = vld [vmem:[#allocation9 + $0x1e0] sm:$0xff]  ;;  %v7402_v8 = vld [vmem:[#allocation9 + $0x1f0] sm:$0xff] }
 0x299   :  { %1320 = vmatpush1.msra.mxu0 %v7387_v58  ;;  %1391 = vmatpush1.msra.mxu1 %v7390_v5  ;;  %12069 = vst [vmem:[#allocation188_spill] sm:$0xff] %v7399_v54  ;;  %12070 = vst [vmem:[#allocation189_spill] sm:$0xff] %v7402_v8  ;;  %v7405_v58 = vld [vmem:[#allocation9 + $0x1a8] sm:$0xff]  ;;  %v7408_v5 = vld [vmem:[#allocation9 + $0x1b8] sm:$0xff] }
 0x29a   :  { %1321 = vmatprep.subr.mxu0 %v7393_v40  ;;  %1392 = vmatprep.subr.mxu1 %v7396_v52  ;;  %12071 = vst [vmem:[#allocation190_spill] sm:$0xff] %v7405_v58  ;;  %12072 = vst [vmem:[#allocation191_spill] sm:$0xff] %v7408_v5  ;;  %v7411_v40 = vld [vmem:[#allocation9 + $0x1a0] sm:$0xff]  ;;  %v7414_v52 = vld [vmem:[#allocation9 + $0x1b0] sm:$0xff] }
 0x29b   :  { %1322 = vmatpush1.msra.mxu0 %v7399_v54  ;;  %1393 = vmatpush1.msra.mxu1 %v7402_v8  ;;  %12073 = vst [vmem:[#allocation192_spill] sm:$0xff] %v7411_v40  ;;  %12074 = vst [vmem:[#allocation193_spill] sm:$0xff] %v7414_v52  ;;  %v7417_v54 = vld [vmem:[#allocation9 + $0x168] sm:$0xff]  ;;  %v7420_v8 = vld [vmem:[#allocation9 + $0x178] sm:$0xff] }
 0x29c   :  { %1323 = vmatprep.subr.mxu0 %v7405_v58  ;;  %1394 = vmatprep.subr.mxu1 %v7408_v5  ;;  %12075 = vst [vmem:[#allocation194_spill] sm:$0xff] %v7417_v54  ;;  %12076 = vst [vmem:[#allocation195_spill] sm:$0xff] %v7420_v8  ;;  %v7423_v58 = vld [vmem:[#allocation9 + $0x160] sm:$0xff]  ;;  %v7426_v5 = vld [vmem:[#allocation9 + $0x170] sm:$0xff] }
 0x29d   :  { %1324 = vmatpush1.msra.mxu0 %v7411_v40  ;;  %1395 = vmatpush1.msra.mxu1 %v7414_v52  ;;  %12077 = vst [vmem:[#allocation196_spill] sm:$0xff] %v7423_v58  ;;  %12078 = vst [vmem:[#allocation197_spill] sm:$0xff] %v7426_v5  ;;  %v7429_v40 = vld [vmem:[#allocation9 + $0x128] sm:$0xff]  ;;  %v7432_v52 = vld [vmem:[#allocation9 + $0x138] sm:$0xff] }
 0x29e   :  { %1325 = vmatprep.subr.mxu0 %v7417_v54  ;;  %1396 = vmatprep.subr.mxu1 %v7420_v8  ;;  %12079 = vst [vmem:[#allocation198_spill] sm:$0xff] %v7429_v40  ;;  %12080 = vst [vmem:[#allocation199_spill] sm:$0xff] %v7432_v52  ;;  %v7435_v54 = vld [vmem:[#allocation9 + $0x120] sm:$0xff]  ;;  %v7438_v8 = vld [vmem:[#allocation9 + $0x130] sm:$0xff] }
 0x29f   :  { %1326 = vmatpush1.msra.mxu0 %v7423_v58  ;;  %1397 = vmatpush1.msra.mxu1 %v7426_v5  ;;  %12081 = vst [vmem:[#allocation200_spill] sm:$0xff] %v7435_v54  ;;  %12082 = vst [vmem:[#allocation201_spill] sm:$0xff] %v7438_v8  ;;  %v7441_v58 = vld [vmem:[#allocation9 + $0xe8] sm:$0xff]  ;;  %v7444_v5 = vld [vmem:[#allocation9 + $0xf8] sm:$0xff] }
 0x2a0   :  { %1327 = vmatprep.subr.mxu0 %v7429_v40  ;;  %1398 = vmatprep.subr.mxu1 %v7432_v52  ;;  %12083 = vst [vmem:[#allocation202_spill] sm:$0xff] %v7441_v58  ;;  %12084 = vst [vmem:[#allocation203_spill] sm:$0xff] %v7444_v5  ;;  %v7447_v40 = vld [vmem:[#allocation9 + $0xe0] sm:$0xff]  ;;  %v7450_v52 = vld [vmem:[#allocation9 + $0xf0] sm:$0xff] }
 0x2a1   :  { %1328 = vmatpush1.msra.mxu0 %v7435_v54  ;;  %1399 = vmatpush1.msra.mxu1 %v7438_v8  ;;  %12085 = vst [vmem:[#allocation204_spill] sm:$0xff] %v7447_v40  ;;  %12086 = vst [vmem:[#allocation205_spill] sm:$0xff] %v7450_v52  ;;  %v7453_v54 = vld [vmem:[#allocation9 + $0xa8] sm:$0xff]  ;;  %v7456_v8 = vld [vmem:[#allocation9 + $0xb8] sm:$0xff] }
 0x2a2   :  { %1329 = vmatprep.subr.mxu0 %v7441_v58  ;;  %1400 = vmatprep.subr.mxu1 %v7444_v5  ;;  %12087 = vst [vmem:[#allocation206_spill] sm:$0xff] %v7453_v54  ;;  %12088 = vst [vmem:[#allocation207_spill] sm:$0xff] %v7456_v8  ;;  %v7459_v58 = vld [vmem:[#allocation9 + $0xa0] sm:$0xff]  ;;  %v7462_v5 = vld [vmem:[#allocation9 + $0xb0] sm:$0xff] }
 0x2a3   :  { %1330 = vmatpush1.msra.mxu0 %v7447_v40  ;;  %1401 = vmatpush1.msra.mxu1 %v7450_v52  ;;  %12089 = vst [vmem:[#allocation208_spill] sm:$0xff] %v7459_v58  ;;  %12090 = vst [vmem:[#allocation209_spill] sm:$0xff] %v7462_v5  ;;  %v7465_v40 = vld [vmem:[#allocation9 + $0x68] sm:$0xff]  ;;  %v7468_v52 = vld [vmem:[#allocation9 + $0x78] sm:$0xff] }
 0x2a4   :  { %1331 = vmatprep.subr.mxu0 %v7453_v54  ;;  %1402 = vmatprep.subr.mxu1 %v7456_v8  ;;  %12091 = vst [vmem:[#allocation210_spill] sm:$0xff] %v7465_v40  ;;  %12092 = vst [vmem:[#allocation211_spill] sm:$0xff] %v7468_v52  ;;  %v7471_v54 = vld [vmem:[#allocation9 + $0x60] sm:$0xff]  ;;  %v7474_v8 = vld [vmem:[#allocation9 + $0x70] sm:$0xff] }
 0x2a5   :  { %1332 = vmatpush1.msra.mxu0 %v7459_v58  ;;  %1403 = vmatpush1.msra.mxu1 %v7462_v5  ;;  %12093 = vst [vmem:[#allocation212_spill] sm:$0xff] %v7471_v54  ;;  %12094 = vst [vmem:[#allocation213_spill] sm:$0xff] %v7474_v8  ;;  %v7477_v58 = vld [vmem:[#allocation9 + $0x28] sm:$0xff]  ;;  %v7480_v5 = vld [vmem:[#allocation9 + $0x38] sm:$0xff] }
 0x2a6   :  { %1333 = vmatprep.subr.mxu0 %v7465_v40  ;;  %1404 = vmatprep.subr.mxu1 %v7468_v52  ;;  %12095 = vst [vmem:[#allocation214_spill] sm:$0xff] %v7477_v58  ;;  %12096 = vst [vmem:[#allocation215_spill] sm:$0xff] %v7480_v5  ;;  %v7483_v40 = vld [vmem:[#allocation9 + $0x20] sm:$0xff]  ;;  %v7486_v52 = vld [vmem:[#allocation9 + $0x30] sm:$0xff] }
 0x2a7   :  { %1334 = vmatpush1.msra.mxu0 %v7471_v54  ;;  %1405 = vmatpush1.msra.mxu1 %v7474_v8  ;;  %12097 = vst [vmem:[#allocation216_spill] sm:$0xff] %v7483_v40  ;;  %12098 = vst [vmem:[#allocation217_spill] sm:$0xff] %v7486_v52  ;;  %v7489_v54 = vld [vmem:[#allocation9 + $0x7e8] sm:$0xff]  ;;  %v7492_v8 = vld [vmem:[#allocation9 + $0x7f8] sm:$0xff] }
 0x2a8   :  { %1335 = vmatprep.subr.mxu0 %v7477_v58  ;;  %1406 = vmatprep.subr.mxu1 %v7480_v5  ;;  %12099 = vst [vmem:[#allocation218_spill] sm:$0xff] %v7489_v54  ;;  %12100 = vst [vmem:[#allocation219_spill] sm:$0xff] %v7492_v8  ;;  %v7495_v58 = vld [vmem:[#allocation9 + $0x7e0] sm:$0xff]  ;;  %v7498_v5 = vld [vmem:[#allocation9 + $0x7f0] sm:$0xff] }
 0x2a9   :  { %1336 = vmatpush1.msra.mxu0 %v7483_v40  ;;  %1407 = vmatpush1.msra.mxu1 %v7486_v52  ;;  %12101 = vst [vmem:[#allocation220_spill] sm:$0xff] %v7495_v58  ;;  %12102 = vst [vmem:[#allocation221_spill] sm:$0xff] %v7498_v5  ;;  %v7501_v40 = vld [vmem:[#allocation9 + $0x7a8] sm:$0xff]  ;;  %v7504_v52 = vld [vmem:[#allocation9 + $0x7b8] sm:$0xff] }
 0x2aa   :  { %1337 = vmatprep.subr.mxu0 %v7489_v54  ;;  %1408 = vmatprep.subr.mxu1 %v7492_v8  ;;  %12103 = vst [vmem:[#allocation222_spill] sm:$0xff] %v7501_v40  ;;  %12104 = vst [vmem:[#allocation223_spill] sm:$0xff] %v7504_v52  ;;  %v7507_v54 = vld [vmem:[#allocation9 + $0x7a0] sm:$0xff]  ;;  %v7510_v8 = vld [vmem:[#allocation9 + $0x7b0] sm:$0xff] }
 0x2ab   :  { %1338 = vmatpush2.msra.mxu0 %v7495_v58  ;;  %1409 = vmatpush2.msra.mxu1 %v7498_v5  ;;  %12105 = vst [vmem:[#allocation224_spill] sm:$0xff] %v7507_v54  ;;  %12106 = vst [vmem:[#allocation225_spill] sm:$0xff] %v7510_v8  ;;  %v7513_v58 = vld [vmem:[#allocation9 + $0x768] sm:$0xff]  ;;  %v7516_v5 = vld [vmem:[#allocation9 + $0x778] sm:$0xff] }
 0x2ac   :  { %1339 = vmatprep.subr.mxu0 %v7501_v40  ;;  %1410 = vmatprep.subr.mxu1 %v7504_v52  ;;  %12107 = vst [vmem:[#allocation226_spill] sm:$0xff] %v7513_v58  ;;  %12108 = vst [vmem:[#allocation227_spill] sm:$0xff] %v7516_v5  ;;  %v7519_v40 = vld [vmem:[#allocation9 + $0x760] sm:$0xff]  ;;  %v7522_v52 = vld [vmem:[#allocation9 + $0x770] sm:$0xff] }
 0x2ad   :  { %1340 = vmatpush2.msra.mxu0 %v7507_v54  ;;  %1411 = vmatpush2.msra.mxu1 %v7510_v8  ;;  %12109 = vst [vmem:[#allocation228_spill] sm:$0xff] %v7519_v40  ;;  %12110 = vst [vmem:[#allocation229_spill] sm:$0xff] %v7522_v52  ;;  %v7525_v54 = vld [vmem:[#allocation9 + $0x728] sm:$0xff]  ;;  %v7528_v8 = vld [vmem:[#allocation9 + $0x738] sm:$0xff] }
 0x2ae   :  { %1341 = vmatprep.subr.mxu0 %v7513_v58  ;;  %1412 = vmatprep.subr.mxu1 %v7516_v5  ;;  %12111 = vst [vmem:[#allocation230_spill] sm:$0xff] %v7525_v54  ;;  %12112 = vst [vmem:[#allocation231_spill] sm:$0xff] %v7528_v8  ;;  %v7531_v58 = vld [vmem:[#allocation9 + $0x720] sm:$0xff]  ;;  %v7534_v5 = vld [vmem:[#allocation9 + $0x730] sm:$0xff] }
 0x2af   :  { %1342 = vmatpush2.msra.mxu0 %v7519_v40  ;;  %1413 = vmatpush2.msra.mxu1 %v7522_v52  ;;  %12113 = vst [vmem:[#allocation232_spill] sm:$0xff] %v7531_v58  ;;  %12114 = vst [vmem:[#allocation233_spill] sm:$0xff] %v7534_v5  ;;  %v7537_v40 = vld [vmem:[#allocation9 + $0x6e8] sm:$0xff]  ;;  %v7540_v52 = vld [vmem:[#allocation9 + $0x6f8] sm:$0xff] }
 0x2b0   :  { %1343 = vmatprep.subr.mxu0 %v7525_v54  ;;  %1414 = vmatprep.subr.mxu1 %v7528_v8  ;;  %12115 = vst [vmem:[#allocation234_spill] sm:$0xff] %v7537_v40  ;;  %12116 = vst [vmem:[#allocation235_spill] sm:$0xff] %v7540_v52  ;;  %v7543_v54 = vld [vmem:[#allocation9 + $0x6e0] sm:$0xff]  ;;  %v7546_v8 = vld [vmem:[#allocation9 + $0x6f0] sm:$0xff] }
 0x2b1   :  { %1344 = vmatpush2.msra.mxu0 %v7531_v58  ;;  %1415 = vmatpush2.msra.mxu1 %v7534_v5  ;;  %12117 = vst [vmem:[#allocation236_spill] sm:$0xff] %v7543_v54  ;;  %12118 = vst [vmem:[#allocation237_spill] sm:$0xff] %v7546_v8  ;;  %v7549_v58 = vld [vmem:[#allocation9 + $0x6a8] sm:$0xff]  ;;  %v7552_v5 = vld [vmem:[#allocation9 + $0x6b8] sm:$0xff] }
 0x2b2   :  { %1345 = vmatprep.subr.mxu0 %v7537_v40  ;;  %1416 = vmatprep.subr.mxu1 %v7540_v52  ;;  %12119 = vst [vmem:[#allocation238_spill] sm:$0xff] %v7549_v58  ;;  %12120 = vst [vmem:[#allocation239_spill] sm:$0xff] %v7552_v5  ;;  %v7555_v40 = vld [vmem:[#allocation9 + $0x6a0] sm:$0xff]  ;;  %v7558_v52 = vld [vmem:[#allocation9 + $0x6b0] sm:$0xff] }
 0x2b3   :  { %1346 = vmatpush2.msra.mxu0 %v7543_v54  ;;  %1417 = vmatpush2.msra.mxu1 %v7546_v8  ;;  %12121 = vst [vmem:[#allocation240_spill] sm:$0xff] %v7555_v40  ;;  %12122 = vst [vmem:[#allocation241_spill] sm:$0xff] %v7558_v52  ;;  %v7561_v54 = vld [vmem:[#allocation9 + $0x668] sm:$0xff]  ;;  %v7564_v8 = vld [vmem:[#allocation9 + $0x678] sm:$0xff] }
 0x2b4   :  { %1347 = vmatprep.subr.mxu0 %v7549_v58  ;;  %1418 = vmatprep.subr.mxu1 %v7552_v5  ;;  %12123 = vst [vmem:[#allocation242_spill] sm:$0xff] %v7561_v54  ;;  %12124 = vst [vmem:[#allocation243_spill] sm:$0xff] %v7564_v8  ;;  %v7567_v58 = vld [vmem:[#allocation9 + $0x660] sm:$0xff]  ;;  %v7570_v5 = vld [vmem:[#allocation9 + $0x670] sm:$0xff] }
 0x2b5   :  { %1348 = vmatpush2.msra.mxu0 %v7555_v40  ;;  %1419 = vmatpush2.msra.mxu1 %v7558_v52  ;;  %12125 = vst [vmem:[#allocation244_spill] sm:$0xff] %v7567_v58  ;;  %12126 = vst [vmem:[#allocation245_spill] sm:$0xff] %v7570_v5  ;;  %v7573_v40 = vld [vmem:[#allocation9 + $0x628] sm:$0xff]  ;;  %v7576_v52 = vld [vmem:[#allocation9 + $0x638] sm:$0xff] }
 0x2b6   :  { %1349 = vmatprep.subr.mxu0 %v7561_v54  ;;  %1420 = vmatprep.subr.mxu1 %v7564_v8  ;;  %12127 = vst [vmem:[#allocation246_spill] sm:$0xff] %v7573_v40  ;;  %12128 = vst [vmem:[#allocation247_spill] sm:$0xff] %v7576_v52  ;;  %v7579_v54 = vld [vmem:[#allocation9 + $0x620] sm:$0xff]  ;;  %v7582_v8 = vld [vmem:[#allocation9 + $0x630] sm:$0xff] }
 0x2b7   :  { %1350 = vmatpush2.msra.mxu0 %v7567_v58  ;;  %1421 = vmatpush2.msra.mxu1 %v7570_v5  ;;  %12129 = vst [vmem:[#allocation248_spill] sm:$0xff] %v7579_v54  ;;  %12130 = vst [vmem:[#allocation249_spill] sm:$0xff] %v7582_v8  ;;  %v7585_v58 = vld [vmem:[#allocation9 + $0x5e8] sm:$0xff]  ;;  %v7588_v5 = vld [vmem:[#allocation9 + $0x5f8] sm:$0xff] }
 0x2b8   :  { %1351 = vmatprep.subr.mxu0 %v7573_v40  ;;  %1422 = vmatprep.subr.mxu1 %v7576_v52  ;;  %12131 = vst [vmem:[#allocation250_spill] sm:$0xff] %v7585_v58  ;;  %12132 = vst [vmem:[#allocation251_spill] sm:$0xff] %v7588_v5  ;;  %v7591_v40 = vld [vmem:[#allocation9 + $0x5e0] sm:$0xff]  ;;  %v7594_v52 = vld [vmem:[#allocation9 + $0x5f0] sm:$0xff] }
 0x2b9   :  { %1352 = vmatpush2.msra.mxu0 %v7579_v54  ;;  %1423 = vmatpush2.msra.mxu1 %v7582_v8  ;;  %12133 = vst [vmem:[#allocation252_spill] sm:$0xff] %v7591_v40  ;;  %12134 = vst [vmem:[#allocation253_spill] sm:$0xff] %v7594_v52  ;;  %v7597_v54 = vld [vmem:[#allocation9 + $0x5a8] sm:$0xff]  ;;  %v7600_v8 = vld [vmem:[#allocation9 + $0x5b8] sm:$0xff] }
 0x2ba   :  { %1353 = vmatprep.subr.mxu0 %v7585_v58  ;;  %1424 = vmatprep.subr.mxu1 %v7588_v5  ;;  %12135 = vst [vmem:[#allocation254_spill] sm:$0xff] %v7597_v54  ;;  %12136 = vst [vmem:[#allocation255_spill] sm:$0xff] %v7600_v8  ;;  %v7603_v58 = vld [vmem:[#allocation9 + $0x5a0] sm:$0xff]  ;;  %v7606_v5 = vld [vmem:[#allocation9 + $0x5b0] sm:$0xff] }
 0x2bb   :  { %1354 = vmatpush2.msra.mxu0 %v7591_v40  ;;  %1425 = vmatpush2.msra.mxu1 %v7594_v52  ;;  %12137 = vst [vmem:[#allocation256_spill] sm:$0xff] %v7603_v58  ;;  %12138 = vst [vmem:[#allocation257_spill] sm:$0xff] %v7606_v5  ;;  %v7609_v40 = vld [vmem:[#allocation9 + $0x568] sm:$0xff]  ;;  %v7612_v52 = vld [vmem:[#allocation9 + $0x578] sm:$0xff] }
 0x2bc   :  { %1355 = vmatprep.subr.mxu0 %v7597_v54  ;;  %1426 = vmatprep.subr.mxu1 %v7600_v8  ;;  %12139 = vst [vmem:[#allocation258_spill] sm:$0xff] %v7609_v40  ;;  %12140 = vst [vmem:[#allocation259_spill] sm:$0xff] %v7612_v52  ;;  %v7615_v54 = vld [vmem:[#allocation9 + $0x560] sm:$0xff]  ;;  %v7618_v8 = vld [vmem:[#allocation9 + $0x570] sm:$0xff] }
 0x2bd   :  { %1356 = vmatpush2.msra.mxu0 %v7603_v58  ;;  %1427 = vmatpush2.msra.mxu1 %v7606_v5  ;;  %12141 = vst [vmem:[#allocation260_spill] sm:$0xff] %v7615_v54  ;;  %12142 = vst [vmem:[#allocation261_spill] sm:$0xff] %v7618_v8  ;;  %v7621_v58 = vld [vmem:[#allocation9 + $0x528] sm:$0xff]  ;;  %v7624_v5 = vld [vmem:[#allocation9 + $0x538] sm:$0xff] }
 0x2be   :  { %1357 = vmatprep.subr.mxu0 %v7609_v40  ;;  %1428 = vmatprep.subr.mxu1 %v7612_v52  ;;  %12143 = vst [vmem:[#allocation262_spill] sm:$0xff] %v7621_v58  ;;  %12144 = vst [vmem:[#allocation263_spill] sm:$0xff] %v7624_v5  ;;  %v7627_v40 = vld [vmem:[#allocation9 + $0x520] sm:$0xff]  ;;  %v7630_v52 = vld [vmem:[#allocation9 + $0x530] sm:$0xff] }
 0x2bf   :  { %1358 = vmatpush2.msra.mxu0 %v7615_v54  ;;  %1429 = vmatpush2.msra.mxu1 %v7618_v8  ;;  %12145 = vst [vmem:[#allocation264_spill] sm:$0xff] %v7627_v40  ;;  %12146 = vst [vmem:[#allocation265_spill] sm:$0xff] %v7630_v52  ;;  %v7633_v54 = vld [vmem:[#allocation9 + $0x4e8] sm:$0xff]  ;;  %v7636_v8 = vld [vmem:[#allocation9 + $0x4f8] sm:$0xff] }
 0x2c0   :  { %1359 = vmatprep.subr.mxu0 %v7621_v58  ;;  %1430 = vmatprep.subr.mxu1 %v7624_v5  ;;  %12147 = vst [vmem:[#allocation266_spill] sm:$0xff] %v7633_v54  ;;  %12148 = vst [vmem:[#allocation267_spill] sm:$0xff] %v7636_v8  ;;  %v7639_v58 = vld [vmem:[#allocation9 + $0x4e0] sm:$0xff]  ;;  %v7642_v5 = vld [vmem:[#allocation9 + $0x4f0] sm:$0xff] }
 0x2c1   :  { %1360 = vmatpush2.msra.mxu0 %v7627_v40  ;;  %1431 = vmatpush2.msra.mxu1 %v7630_v52  ;;  %12149 = vst [vmem:[#allocation268_spill] sm:$0xff] %v7639_v58  ;;  %12150 = vst [vmem:[#allocation269_spill] sm:$0xff] %v7642_v5  ;;  %v7645_v40 = vld [vmem:[#allocation9 + $0x4a8] sm:$0xff]  ;;  %v7648_v52 = vld [vmem:[#allocation9 + $0x4b8] sm:$0xff] }
 0x2c2   :  { %1361 = vmatprep.subr.mxu0 %v7633_v54  ;;  %1432 = vmatprep.subr.mxu1 %v7636_v8  ;;  %12151 = vst [vmem:[#allocation270_spill] sm:$0xff] %v7645_v40  ;;  %12152 = vst [vmem:[#allocation271_spill] sm:$0xff] %v7648_v52  ;;  %v7651_v54 = vld [vmem:[#allocation9 + $0x4a0] sm:$0xff]  ;;  %v7654_v8 = vld [vmem:[#allocation9 + $0x4b0] sm:$0xff] }
 0x2c3   :  { %1362 = vmatpush2.msra.mxu0 %v7639_v58  ;;  %1433 = vmatpush2.msra.mxu1 %v7642_v5  ;;  %12153 = vst [vmem:[#allocation272_spill] sm:$0xff] %v7651_v54  ;;  %12154 = vst [vmem:[#allocation273_spill] sm:$0xff] %v7654_v8  ;;  %v7657_v58 = vld [vmem:[#allocation9 + $0x468] sm:$0xff]  ;;  %v7660_v5 = vld [vmem:[#allocation9 + $0x478] sm:$0xff] }
 0x2c4   :  { %1363 = vmatprep.subr.mxu0 %v7645_v40  ;;  %1434 = vmatprep.subr.mxu1 %v7648_v52  ;;  %12155 = vst [vmem:[#allocation274_spill] sm:$0xff] %v7657_v58  ;;  %12156 = vst [vmem:[#allocation275_spill] sm:$0xff] %v7660_v5  ;;  %v7663_v40 = vld [vmem:[#allocation9 + $0x460] sm:$0xff]  ;;  %v7666_v52 = vld [vmem:[#allocation9 + $0x470] sm:$0xff] }
 0x2c5   :  { %1364 = vmatpush2.msra.mxu0 %v7651_v54  ;;  %1435 = vmatpush2.msra.mxu1 %v7654_v8  ;;  %12157 = vst [vmem:[#allocation276_spill] sm:$0xff] %v7666_v52  ;;  %v7669_v54 = vld [vmem:[#allocation9 + $0x428] sm:$0xff]  ;;  %v7672_v8 = vld [vmem:[#allocation9 + $0x438] sm:$0xff] }
 0x2c6   :  { %1365 = vmatprep.subr.mxu0 %v7657_v58  ;;  %1436 = vmatprep.subr.mxu1 %v7660_v5  ;;  %12158 = vst [vmem:[#allocation277_spill] sm:$0xff] %v7669_v54  ;;  %v7675_v58 = vld [vmem:[#allocation9 + $0x420] sm:$0xff]  ;;  %v7678_v5 = vld [vmem:[#allocation9 + $0x430] sm:$0xff] }
 0x2c7   :  { %1366 = vmatpush2.msra.mxu0 %v7663_v40  ;;  %1437 = vmatpush2.msra.mxu1 %v7666_v52  ;;  %v7683_v52 = vld [vmem:[#allocation7 + $0x1e8] sm:$0xff] }
 0x2c8   :  { %1367 = vmatprep.subr.mxu0 %v7669_v54  ;;  %1438 = vmatprep.subr.mxu1 %v7672_v8  ;;  %v7686_v54 = vld [vmem:[#allocation7 + $0x1f8] sm:$0xff] }
 0x2c9   :  { %1368 = vmatpush2.msra.mxu0 %v7675_v58  ;;  %1439 = vmatpush2.msra.mxu1 %v7678_v5 }
 0x2ca   :  { %1370 = vmatmul.mubr.f32.vlgmr.msra.gmra.mxu0 %v6887_v7  ;;  %1441 = vmatmul.mubr.f32.vlgmr.msra.gmra.mxu1 %v6887_v7 }
 0x2cb   :  { %1510 = vmatprep.subr.mxu0 %v7683_v52  ;;  %1581 = vmatprep.subr.mxu1 %v7686_v54 }
 0x2cc   :  { %1511 = vmatpush1.msra.mxu0 %v6666_v9  ;;  %1582 = vmatpush1.msra.mxu1 %v6668_v10  ;;  %v12159_v9 = vld [vmem:[#allocation14_spill] sm:$0xff]  ;;  %v12160_v10 = vld [vmem:[#allocation15_spill] sm:$0xff] }
 0x2cd   :  { %1512 = vmatprep.subr.mxu0 %v6672_v11  ;;  %1583 = vmatprep.subr.mxu1 %v6674_v12  ;;  %v12161_v11 = vld [vmem:[#allocation16_spill] sm:$0xff]  ;;  %v12162_v12 = vld [vmem:[#allocation17_spill] sm:$0xff] }
 0x2ce   :  { %1513 = vmatpush1.msra.mxu0 %v6678_v13  ;;  %1584 = vmatpush1.msra.mxu1 %v6680_v14  ;;  %v12163_v13 = vld [vmem:[#allocation18_spill] sm:$0xff]  ;;  %v12164_v14 = vld [vmem:[#allocation19_spill] sm:$0xff] }
 0x2cf   :  { %1514 = vmatprep.subr.mxu0 %v6684_v15  ;;  %1585 = vmatprep.subr.mxu1 %v6686_v16  ;;  %v12165_v15 = vld [vmem:[#allocation20_spill] sm:$0xff]  ;;  %v12166_v16 = vld [vmem:[#allocation21_spill] sm:$0xff] }
 0x2d0   :  { %1515 = vmatpush1.msra.mxu0 %v6690_v17  ;;  %1586 = vmatpush1.msra.mxu1 %v6692_v18  ;;  %v12167_v17 = vld [vmem:[#allocation22_spill] sm:$0xff]  ;;  %v12168_v18 = vld [vmem:[#allocation23_spill] sm:$0xff] }
 0x2d1   :  { %1516 = vmatprep.subr.mxu0 %v6696_v19  ;;  %1587 = vmatprep.subr.mxu1 %v6698_v20  ;;  %v12169_v19 = vld [vmem:[#allocation24_spill] sm:$0xff]  ;;  %v12170_v20 = vld [vmem:[#allocation25_spill] sm:$0xff] }
 0x2d2   :  { %1517 = vmatpush1.msra.mxu0 %v6702_v21  ;;  %1588 = vmatpush1.msra.mxu1 %v6704_v22  ;;  %v12171_v21 = vld [vmem:[#allocation26_spill] sm:$0xff]  ;;  %v12172_v22 = vld [vmem:[#allocation27_spill] sm:$0xff] }
 0x2d3   :  { %1518 = vmatprep.subr.mxu0 %v6708_v23  ;;  %1589 = vmatprep.subr.mxu1 %v6710_v24  ;;  %v12173_v23 = vld [vmem:[#allocation28_spill] sm:$0xff]  ;;  %v12174_v24 = vld [vmem:[#allocation29_spill] sm:$0xff] }
 0x2d4   :  { %1519 = vmatpush1.msra.mxu0 %v6714_v25  ;;  %1590 = vmatpush1.msra.mxu1 %v6716_v26  ;;  %v12175_v25 = vld [vmem:[#allocation30_spill] sm:$0xff]  ;;  %v12176_v26 = vld [vmem:[#allocation31_spill] sm:$0xff] }
 0x2d5   :  { %1520 = vmatprep.subr.mxu0 %v6720_v27  ;;  %1591 = vmatprep.subr.mxu1 %v6722_v28  ;;  %v12177_v27 = vld [vmem:[#allocation32_spill] sm:$0xff]  ;;  %v12178_v28 = vld [vmem:[#allocation33_spill] sm:$0xff] }
 0x2d6   :  { %1521 = vmatpush1.msra.mxu0 %v6726_v29  ;;  %1592 = vmatpush1.msra.mxu1 %v6728_v30  ;;  %v12179_v29 = vmov 0.0   ;;  %v12180_v30 = vld [vmem:[#allocation34_spill] sm:$0xff] }
 0x2d7   :  { %1522 = vmatprep.subr.mxu0 %v6732_v32  ;;  %1593 = vmatprep.subr.mxu1 %v6734_v33  ;;  %v12181_v32 = vld [vmem:[#allocation35_spill] sm:$0xff]  ;;  %v12182_v33 = vld [vmem:[#allocation36_spill] sm:$0xff] }
 0x2d8   :  { %1523 = vmatpush1.msra.mxu0 %v6738_v34  ;;  %1594 = vmatpush1.msra.mxu1 %v6740_v35 }
 0x2d9   :  { %1524 = vmatprep.subr.mxu0 %v6744_v36  ;;  %1595 = vmatprep.subr.mxu1 %v6746_v37 }
 0x2da   :  { %1525 = vmatpush1.msra.mxu0 %v6750_v38  ;;  %1596 = vmatpush1.msra.mxu1 %v6752_v39 }
 0x2db   :  { %1526 = vmatprep.subr.mxu0 %v6758_v41  ;;  %1597 = vmatprep.subr.mxu1 %v6760_v42  ;;  %v12183_v41 = vld [vmem:[#allocation37_spill] sm:$0xff] }
 0x2dc   :  { %1527 = vmatpush1.msra.mxu0 %v6762_v43  ;;  %1598 = vmatpush1.msra.mxu1 %v6766_v44 }
 0x2dd   :  { %1528 = vmatprep.subr.mxu0 %v6768_v45  ;;  %1599 = vmatprep.subr.mxu1 %v6770_v46  ;;  %v1448_v46 = vld [vmem:[#allocation2 + $0x1] ss:$8 sm:$0xf] }
 0x2de   :  { %1529 = vmatpush1.msra.mxu0 %v6774_v47  ;;  %1600 = vmatpush1.msra.mxu1 %v6776_v48 }
 0x2df   :  { %1530 = vmatprep.subr.mxu0 %v6778_v49  ;;  %1601 = vmatprep.subr.mxu1 %v6782_v50 }
 0x2e0   :  { %1531 = vmatpush1.msra.mxu0 %v6784_v51  ;;  %1602 = vmatpush1.msra.mxu1 %v12159_v9 }
 0x2e1   :  { %1532 = vmatprep.subr.mxu0 %v12160_v10  ;;  %1603 = vmatprep.subr.mxu1 %v12161_v11 }
 0x2e2   :  { %1533 = vmatpush1.msra.mxu0 %v12162_v12  ;;  %1604 = vmatpush1.msra.mxu1 %v12163_v13 }
 0x2e3   :  { %1534 = vmatprep.subr.mxu0 %v12164_v14  ;;  %1605 = vmatprep.subr.mxu1 %v12165_v15 }
 0x2e4   :  { %1535 = vmatpush1.msra.mxu0 %v12166_v16  ;;  %1606 = vmatpush1.msra.mxu1 %v12167_v17 }
 0x2e5   :  { %1536 = vmatprep.subr.mxu0 %v12168_v18  ;;  %1607 = vmatprep.subr.mxu1 %v12169_v19  ;;  %v12184_v19 = vld [vmem:[#allocation38_spill] sm:$0xff] }
 0x2e6   :  { %1537 = vmatpush1.msra.mxu0 %v12170_v20  ;;  %1608 = vmatpush1.msra.mxu1 %v12171_v21 }
 0x2e7   :  { %1538 = vmatprep.subr.mxu0 %v12172_v22  ;;  %1609 = vmatprep.subr.mxu1 %v12173_v23 }
 0x2e8   :  { %1539 = vmatpush1.msra.mxu0 %v12174_v24  ;;  %1610 = vmatpush1.msra.mxu1 %v12175_v25 }
 0x2e9   :  { %1540 = vmatprep.subr.mxu0 %v12176_v26  ;;  %1611 = vmatprep.subr.mxu1 %v12177_v27  ;;  %v12185_v26 = vld [vmem:[#allocation39_spill] sm:$0xff]  ;;  %v12186_v27 = vld [vmem:[#allocation40_spill] sm:$0xff] }
 0x2ea   :  { %1541 = vmatpush1.msra.mxu0 %v12178_v28  ;;  %1574 = vmatprep.mubr.f32.mxu0 %v12179_v29  ;;  %v12187_v28 = vld [vmem:[#allocation41_spill] sm:$0xff] }
 0x2eb   :  { %1612 = vmatpush1.msra.mxu1 %v12180_v30  ;;  %1645 = vmatprep.mubr.f32.mxu1 %v12179_v29  ;;  %v12188_v30 = vld [vmem:[#allocation42_spill] sm:$0xff] }
 0x2ec   :  { %1681 = vmatprep.subr.mxu0 %v12181_v32  ;;  %1752 = vmatprep.subr.mxu1 %v12182_v33  ;;  %v12189_v32 = vld [vmem:[#allocation43_spill] sm:$0xff]  ;;  %v12190_v33 = vld [vmem:[#allocation44_spill] sm:$0xff] }
 0x349   :  { %v1229_v34 = vpop.f32.mrf.mxu0  ;;  %v1300_v35 = vpop.f32.mrf.mxu1 }
 0x34b   :  { %v1231_v36 = vpop.f32.mrf.mxu0  ;;  %v1302_v37 = vpop.f32.mrf.mxu1 }
 0x34c   :  { %v1453_v38 = vcombine.low %v1229_v34, %v1231_v36  ;;  %v1454_v39 = vcombine.low %v1300_v35, %v1302_v37  ;;  %v12191_v34 = vld [vmem:[#allocation45_spill] sm:$0xff]  ;;  %v12192_v35 = vld [vmem:[#allocation46_spill] sm:$0xff]  ;;  %v12193_v36 = vld [vmem:[#allocation47_spill] sm:$0xff] }
 0x34d   :  { %v12194_v37 = vld [vmem:[#allocation48_spill] sm:$0xff] }
 0x34e   :  { %v1461_v42 = vrot.slane %v1453_v38, %v12183_v41  ;;  %v1468_v43 = vrot.slane %v1454_v39, %v12183_v41  ;;  %v12195_v38 = vld [vmem:[#allocation49_spill] sm:$0xff]  ;;  %v12196_v39 = vld [vmem:[#allocation50_spill] sm:$0xff] }
 0x350   :  { %v1469_v44 = vcombine.low %v1461_v42, %v1468_v43  ;;  %v12197_v42 = vld [vmem:[#allocation51_spill] sm:$0xff]  ;;  %v12198_v43 = vld [vmem:[#allocation52_spill] sm:$0xff] }
 0x352   :  { %v1476_v45 = vrot.slane %v1469_v44, %v12183_v41  ;;  %v12199_v44 = vld [vmem:[#allocation53_spill] sm:$0xff] }
 0x354   :  { %v1478_v47 = vadd.f32 %v1476_v45, %v1448_v46  ;;  %v12200_v45 = vld [vmem:[#allocation54_spill] sm:$0xff]  ;;  %v12201_v46 = vld [vmem:[#allocation55_spill] sm:$0xff] }
 0x356   :  { %v4919_v48 = vmul.f32 -1.442695, %v1478_v47  ;;  %v1486_v49 = vrot.slane %v1478_v47, 1  ;;  %v1497_v51 = vrot.slane %v1478_v47, 3  ;;  %v1494_v10 = vrot.slane %v1478_v47, 2  ;;  %v12202_v47 = vld [vmem:[#allocation56_spill] sm:$0xff] }
 0x358   :  { %5057 = vpow2.f32 %v4919_v48  ;;  %v4920_v50 = vmul.f32 -1.442695, %v1486_v49  ;;  %v4921_v7 = vmul.f32 -1.442695, %v1497_v51  ;;  %v12203_v48 = vld [vmem:[#allocation57_spill] sm:$0xff]  ;;  %v12204_v49 = vld [vmem:[#allocation58_spill] sm:$0xff] }
 0x359   :  { %v12206_v51 = vld [vmem:[#allocation60_spill] sm:$0xff] }
 0x35a   :  { %5059 = vpow2.f32 %v4920_v50  ;;  %v12205_v50 = vld [vmem:[#allocation59_spill] sm:$0xff] }
 0x35b   :  { %5061 = vpow2.f32 %v4921_v7  ;;  %v12207_v7 = vld [vmem:[#allocation61_spill] sm:$0xff] }
 0x365   :  { %v5058_v9 = vpop.eup %5057 }
 0x366   :  { %v1482_v11 = vadd.f32 1.0, %v5058_v9  ;;  %v12208_v9 = vld [vmem:[#allocation62_spill] sm:$0xff] }
 0x367   :  { %v5060_v12 = vpop.eup %5059 }
 0x368   :  { %5063 = vrcp.f32 %v1482_v11  ;;  %v1491_v13 = vadd.f32 1.0, %v5060_v12  ;;  %v5062_v14 = vpop.eup %5061  ;;  %v12210_v11 = vld [vmem:[#allocation64_spill] sm:$0xff]  ;;  %v12211_v12 = vld [vmem:[#allocation65_spill] sm:$0xff] }
 0x369   :  { %5065 = vtanh.f32 %v1494_v10  ;;  %v1502_v18 = vadd.f32 1.0, %v5062_v14  ;;  %v12209_v10 = vld [vmem:[#allocation63_spill] sm:$0xff] }
 0x36a   :  { %5067 = vrcp.f32 %v1491_v13  ;;  %v12212_v13 = vld [vmem:[#allocation66_spill] sm:$0xff]  ;;  %v12213_v14 = vld [vmem:[#allocation67_spill] sm:$0xff] }
 0x36b   :  { %5069 = vrcp.f32 %v1502_v18  ;;  %v12217_v18 = vld [vmem:[#allocation71_spill] sm:$0xff] }
 0x375   :  { %v5064_v15 = vpop.eup %5063 }
 0x376   :  { %v5066_v16 = vpop.eup %5065 }
 0x377   :  { %v5068_v17 = vpop.eup %5067  ;;  %v1506_v21 = vmul.f32 %v5066_v16, %v5064_v15  ;;  %v12214_v15 = vld [vmem:[#allocation68_spill] sm:$0xff]  ;;  %v12215_v16 = vld [vmem:[#allocation69_spill] sm:$0xff] }
 0x378   :  { %v1505_v20 = vmul.f32 %v5068_v17, %v12184_v19  ;;  %v5070_v23 = vpop.eup %5069  ;;  %v12216_v17 = vld [vmem:[#allocation70_spill] sm:$0xff]  ;;  %v12218_v19 = vld [vmem:[#allocation72_spill] sm:$0xff] }
 0x37a   :  { %v7759_v22 = vadd.f32 %v1506_v21, %v1505_v20  ;;  %v12219_v20 = vld [vmem:[#allocation73_spill] sm:$0xff]  ;;  %v12220_v21 = vld [vmem:[#allocation74_spill] sm:$0xff] }
 0x37c   :  { %5071 = vtanh.f32 %v7759_v22 }
 0x389   :  { %v5072_v24 = vpop.eup %5071 }
 0x38a   :  { %v7762_v25 = vmul.f32 %v5072_v24, %v5070_v23  ;;  %v12221_v23 = vld [vmem:[#allocation75_spill] sm:$0xff]  ;;  %v12222_v24 = vld [vmem:[#allocation76_spill] sm:$0xff] }
 0x38c   :  { %1575 = vmatmul.mubr.f32.vlgmr.msra.gmra.mxu0 %v7762_v25  ;;  %1646 = vmatmul.mubr.f32.vlgmr.msra.gmra.mxu1 %v7762_v25 }
 0x38d   :  { %1682 = vmatpush1.msra.mxu0 %v12185_v26  ;;  %1753 = vmatpush1.msra.mxu1 %v12186_v27  ;;  %v12223_v26 = vld [vmem:[#allocation77_spill] sm:$0xff]  ;;  %v12224_v27 = vld [vmem:[#allocation78_spill] sm:$0xff] }
 0x38e   :  { %1683 = vmatprep.subr.mxu0 %v12187_v28  ;;  %1754 = vmatprep.subr.mxu1 %v12188_v30  ;;  %v12225_v28 = vld [vmem:[#allocation79_spill] sm:$0xff]  ;;  %v12226_v30 = vld [vmem:[#allocation80_spill] sm:$0xff] }
 0x38f   :  { %1684 = vmatpush1.msra.mxu0 %v12189_v32  ;;  %1755 = vmatpush1.msra.mxu1 %v12190_v33  ;;  %v12227_v32 = vld [vmem:[#allocation81_spill] sm:$0xff]  ;;  %v12228_v33 = vld [vmem:[#allocation82_spill] sm:$0xff] }
 0x390   :  { %1685 = vmatprep.subr.mxu0 %v12191_v34  ;;  %1756 = vmatprep.subr.mxu1 %v12192_v35  ;;  %v12229_v34 = vld [vmem:[#allocation83_spill] sm:$0xff]  ;;  %v12230_v35 = vld [vmem:[#allocation84_spill] sm:$0xff] }
 0x391   :  { %1686 = vmatpush1.msra.mxu0 %v12193_v36  ;;  %1757 = vmatpush1.msra.mxu1 %v12194_v37  ;;  %v12231_v36 = vld [vmem:[#allocation85_spill] sm:$0xff]  ;;  %v12232_v37 = vld [vmem:[#allocation86_spill] sm:$0xff] }
 0x392   :  { %1687 = vmatprep.subr.mxu0 %v12195_v38  ;;  %1758 = vmatprep.subr.mxu1 %v12196_v39  ;;  %v12233_v38 = vld [vmem:[#allocation87_spill] sm:$0xff]  ;;  %v12234_v39 = vld [vmem:[#allocation88_spill] sm:$0xff] }
 0x393   :  { %1688 = vmatpush1.msra.mxu0 %v12197_v42  ;;  %1759 = vmatpush1.msra.mxu1 %v12198_v43  ;;  %v12235_v42 = vld [vmem:[#allocation89_spill] sm:$0xff]  ;;  %v12236_v43 = vld [vmem:[#allocation90_spill] sm:$0xff] }
 0x394   :  { %1689 = vmatprep.subr.mxu0 %v12199_v44  ;;  %1760 = vmatprep.subr.mxu1 %v12200_v45  ;;  %v12237_v44 = vld [vmem:[#allocation91_spill] sm:$0xff]  ;;  %v12238_v45 = vld [vmem:[#allocation92_spill] sm:$0xff] }
 0x395   :  { %1690 = vmatpush1.msra.mxu0 %v12201_v46  ;;  %1761 = vmatpush1.msra.mxu1 %v12202_v47  ;;  %v12239_v46 = vld [vmem:[#allocation93_spill] sm:$0xff]  ;;  %v12240_v47 = vld [vmem:[#allocation94_spill] sm:$0xff] }
 0x396   :  { %1691 = vmatprep.subr.mxu0 %v12203_v48  ;;  %1762 = vmatprep.subr.mxu1 %v12204_v49  ;;  %v12241_v48 = vld [vmem:[#allocation95_spill] sm:$0xff]  ;;  %v12242_v49 = vld [vmem:[#allocation96_spill] sm:$0xff] }
 0x397   :  { %1692 = vmatpush1.msra.mxu0 %v12205_v50  ;;  %1763 = vmatpush1.msra.mxu1 %v12206_v51  ;;  %v12243_v50 = vld [vmem:[#allocation97_spill] sm:$0xff]  ;;  %v12244_v51 = vld [vmem:[#allocation98_spill] sm:$0xff] }
 0x398   :  { %1693 = vmatprep.subr.mxu0 %v12207_v7  ;;  %1764 = vmatprep.subr.mxu1 %v12208_v9  ;;  %v12245_v7 = vld [vmem:[#allocation99_spill] sm:$0xff]  ;;  %v12246_v9 = vld [vmem:[#allocation100_spill] sm:$0xff] }
 0x399   :  { %1694 = vmatpush1.msra.mxu0 %v12209_v10  ;;  %1765 = vmatpush1.msra.mxu1 %v12210_v11  ;;  %v12247_v10 = vld [vmem:[#allocation101_spill] sm:$0xff]  ;;  %v12248_v11 = vld [vmem:[#allocation102_spill] sm:$0xff] }
 0x39a   :  { %1695 = vmatprep.subr.mxu0 %v12211_v12  ;;  %1766 = vmatprep.subr.mxu1 %v12212_v13  ;;  %v12249_v12 = vld [vmem:[#allocation103_spill] sm:$0xff]  ;;  %v12250_v13 = vld [vmem:[#allocation104_spill] sm:$0xff] }
 0x39b   :  { %1696 = vmatpush1.msra.mxu0 %v12213_v14  ;;  %1767 = vmatpush1.msra.mxu1 %v12214_v15  ;;  %v12251_v14 = vld [vmem:[#allocation105_spill] sm:$0xff]  ;;  %v12252_v15 = vld [vmem:[#allocation106_spill] sm:$0xff] }
 0x39c   :  { %1697 = vmatprep.subr.mxu0 %v12215_v16  ;;  %1768 = vmatprep.subr.mxu1 %v12216_v17  ;;  %v12253_v16 = vld [vmem:[#allocation107_spill] sm:$0xff]  ;;  %v12254_v17 = vld [vmem:[#allocation108_spill] sm:$0xff] }
 0x39d   :  { %1698 = vmatpush1.msra.mxu0 %v12217_v18  ;;  %1769 = vmatpush1.msra.mxu1 %v12218_v19  ;;  %v12255_v18 = vld [vmem:[#allocation109_spill] sm:$0xff]  ;;  %v12256_v19 = vld [vmem:[#allocation110_spill] sm:$0xff] }
 0x39e   :  { %1699 = vmatprep.subr.mxu0 %v12219_v20  ;;  %1770 = vmatprep.subr.mxu1 %v12220_v21  ;;  %v12257_v20 = vld [vmem:[#allocation111_spill] sm:$0xff]  ;;  %v12258_v21 = vld [vmem:[#allocation112_spill] sm:$0xff] }
 0x39f   :  { %1700 = vmatpush1.msra.mxu0 %v12221_v23  ;;  %1771 = vmatpush1.msra.mxu1 %v12222_v24  ;;  %v12259_v23 = vld [vmem:[#allocation113_spill] sm:$0xff]  ;;  %v12260_v24 = vld [vmem:[#allocation114_spill] sm:$0xff] }
 0x3a0   :  { %1701 = vmatprep.subr.mxu0 %v12223_v26  ;;  %1772 = vmatprep.subr.mxu1 %v12224_v27  ;;  %v12261_v26 = vld [vmem:[#allocation115_spill] sm:$0xff]  ;;  %v12262_v27 = vld [vmem:[#allocation116_spill] sm:$0xff] }
 0x3a1   :  { %1702 = vmatpush1.msra.mxu0 %v12225_v28  ;;  %1773 = vmatpush1.msra.mxu1 %v12226_v30  ;;  %v12263_v28 = vld [vmem:[#allocation117_spill] sm:$0xff]  ;;  %v12264_v30 = vld [vmem:[#allocation118_spill] sm:$0xff] }
 0x3a2   :  { %1703 = vmatprep.subr.mxu0 %v12227_v32  ;;  %1774 = vmatprep.subr.mxu1 %v12228_v33  ;;  %v12265_v32 = vld [vmem:[#allocation119_spill] sm:$0xff]  ;;  %v12266_v33 = vld [vmem:[#allocation120_spill] sm:$0xff] }
 0x3a3   :  { %1704 = vmatpush1.msra.mxu0 %v12229_v34  ;;  %1775 = vmatpush1.msra.mxu1 %v12230_v35  ;;  %v12267_v34 = vld [vmem:[#allocation121_spill] sm:$0xff]  ;;  %v12268_v35 = vld [vmem:[#allocation122_spill] sm:$0xff] }
 0x3a4   :  { %1705 = vmatprep.subr.mxu0 %v12231_v36  ;;  %1776 = vmatprep.subr.mxu1 %v12232_v37  ;;  %v12269_v36 = vld [vmem:[#allocation123_spill] sm:$0xff]  ;;  %v12270_v37 = vld [vmem:[#allocation124_spill] sm:$0xff] }
 0x3a5   :  { %1706 = vmatpush1.msra.mxu0 %v12233_v38  ;;  %1777 = vmatpush1.msra.mxu1 %v12234_v39  ;;  %v12271_v38 = vld [vmem:[#allocation125_spill] sm:$0xff]  ;;  %v12272_v39 = vld [vmem:[#allocation126_spill] sm:$0xff] }
 0x3a6   :  { %1707 = vmatprep.subr.mxu0 %v12235_v42  ;;  %1778 = vmatprep.subr.mxu1 %v12236_v43  ;;  %v12273_v42 = vld [vmem:[#allocation127_spill] sm:$0xff]  ;;  %v12274_v43 = vld [vmem:[#allocation128_spill] sm:$0xff] }
 0x3a7   :  { %1708 = vmatpush1.msra.mxu0 %v12237_v44  ;;  %1779 = vmatpush1.msra.mxu1 %v12238_v45  ;;  %v12275_v44 = vld [vmem:[#allocation129_spill] sm:$0xff]  ;;  %v12276_v45 = vld [vmem:[#allocation130_spill] sm:$0xff] }
 0x3a8   :  { %1709 = vmatprep.subr.mxu0 %v12239_v46  ;;  %1780 = vmatprep.subr.mxu1 %v12240_v47  ;;  %v12277_v46 = vld [vmem:[#allocation131_spill] sm:$0xff]  ;;  %v12278_v47 = vld [vmem:[#allocation132_spill] sm:$0xff] }
 0x3a9   :  { %1710 = vmatpush1.msra.mxu0 %v12241_v48  ;;  %1781 = vmatpush1.msra.mxu1 %v12242_v49  ;;  %v12279_v48 = vld [vmem:[#allocation133_spill] sm:$0xff]  ;;  %v12280_v49 = vld [vmem:[#allocation134_spill] sm:$0xff] }
 0x3aa   :  { %1711 = vmatprep.subr.mxu0 %v12243_v50  ;;  %1782 = vmatprep.subr.mxu1 %v12244_v51  ;;  %v12281_v50 = vld [vmem:[#allocation135_spill] sm:$0xff]  ;;  %v12282_v51 = vld [vmem:[#allocation136_spill] sm:$0xff] }
 0x3ab   :  { %1712 = vmatpush1.msra.mxu0 %v12245_v7  ;;  %1783 = vmatpush1.msra.mxu1 %v12246_v9  ;;  %v12283_v7 = vld [vmem:[#allocation137_spill] sm:$0xff]  ;;  %v12284_v9 = vld [vmem:[#allocation138_spill] sm:$0xff] }
 0x3ac   :  { %1713 = vmatprep.subr.mxu0 %v12247_v10  ;;  %1784 = vmatprep.subr.mxu1 %v12248_v11  ;;  %v12285_v10 = vld [vmem:[#allocation139_spill] sm:$0xff]  ;;  %v12286_v11 = vld [vmem:[#allocation140_spill] sm:$0xff] }
 0x3ad   :  { %1714 = vmatpush2.msra.mxu0 %v12249_v12  ;;  %1785 = vmatpush2.msra.mxu1 %v12250_v13  ;;  %v12287_v12 = vld [vmem:[#allocation141_spill] sm:$0xff]  ;;  %v12288_v13 = vld [vmem:[#allocation142_spill] sm:$0xff] }
 0x3ae   :  { %1715 = vmatprep.subr.mxu0 %v12251_v14  ;;  %1786 = vmatprep.subr.mxu1 %v12252_v15  ;;  %v12289_v14 = vld [vmem:[#allocation143_spill] sm:$0xff]  ;;  %v12290_v15 = vld [vmem:[#allocation144_spill] sm:$0xff] }
 0x3af   :  { %1716 = vmatpush2.msra.mxu0 %v12253_v16  ;;  %1787 = vmatpush2.msra.mxu1 %v12254_v17  ;;  %v12291_v16 = vld [vmem:[#allocation145_spill] sm:$0xff]  ;;  %v12292_v17 = vld [vmem:[#allocation146_spill] sm:$0xff] }
 0x3b0   :  { %1717 = vmatprep.subr.mxu0 %v12255_v18  ;;  %1788 = vmatprep.subr.mxu1 %v12256_v19  ;;  %v12293_v18 = vld [vmem:[#allocation147_spill] sm:$0xff]  ;;  %v12294_v19 = vld [vmem:[#allocation148_spill] sm:$0xff] }
 0x3b1   :  { %1718 = vmatpush2.msra.mxu0 %v12257_v20  ;;  %1789 = vmatpush2.msra.mxu1 %v12258_v21  ;;  %v12295_v20 = vld [vmem:[#allocation149_spill] sm:$0xff]  ;;  %v12296_v21 = vld [vmem:[#allocation150_spill] sm:$0xff] }
 0x3b2   :  { %1719 = vmatprep.subr.mxu0 %v12259_v23  ;;  %1790 = vmatprep.subr.mxu1 %v12260_v24  ;;  %v12297_v23 = vld [vmem:[#allocation151_spill] sm:$0xff]  ;;  %v12298_v24 = vld [vmem:[#allocation152_spill] sm:$0xff] }
 0x3b3   :  { %1720 = vmatpush2.msra.mxu0 %v12261_v26  ;;  %1791 = vmatpush2.msra.mxu1 %v12262_v27  ;;  %v12299_v26 = vld [vmem:[#allocation153_spill] sm:$0xff]  ;;  %v12300_v27 = vld [vmem:[#allocation154_spill] sm:$0xff] }
 0x3b4   :  { %1721 = vmatprep.subr.mxu0 %v12263_v28  ;;  %1792 = vmatprep.subr.mxu1 %v12264_v30  ;;  %v12301_v28 = vld [vmem:[#allocation155_spill] sm:$0xff]  ;;  %v12302_v30 = vld [vmem:[#allocation156_spill] sm:$0xff] }
 0x3b5   :  { %1722 = vmatpush2.msra.mxu0 %v12265_v32  ;;  %1793 = vmatpush2.msra.mxu1 %v12266_v33  ;;  %v12303_v32 = vld [vmem:[#allocation157_spill] sm:$0xff]  ;;  %v12304_v33 = vld [vmem:[#allocation158_spill] sm:$0xff] }
 0x3b6   :  { %1723 = vmatprep.subr.mxu0 %v12267_v34  ;;  %1794 = vmatprep.subr.mxu1 %v12268_v35  ;;  %v12305_v34 = vld [vmem:[#allocation159_spill] sm:$0xff]  ;;  %v12306_v35 = vld [vmem:[#allocation160_spill] sm:$0xff] }
 0x3b7   :  { %1724 = vmatpush2.msra.mxu0 %v12269_v36  ;;  %1795 = vmatpush2.msra.mxu1 %v12270_v37  ;;  %v12307_v36 = vld [vmem:[#allocation161_spill] sm:$0xff]  ;;  %v12308_v37 = vld [vmem:[#allocation162_spill] sm:$0xff] }
 0x3b8   :  { %1725 = vmatprep.subr.mxu0 %v12271_v38  ;;  %1796 = vmatprep.subr.mxu1 %v12272_v39  ;;  %v12309_v38 = vld [vmem:[#allocation163_spill] sm:$0xff]  ;;  %v12310_v39 = vld [vmem:[#allocation164_spill] sm:$0xff] }
 0x3b9   :  { %1726 = vmatpush2.msra.mxu0 %v12273_v42  ;;  %1797 = vmatpush2.msra.mxu1 %v12274_v43  ;;  %v12311_v42 = vld [vmem:[#allocation165_spill] sm:$0xff]  ;;  %v12312_v43 = vld [vmem:[#allocation166_spill] sm:$0xff] }
 0x3ba   :  { %1727 = vmatprep.subr.mxu0 %v12275_v44  ;;  %1798 = vmatprep.subr.mxu1 %v12276_v45  ;;  %v1371_v44 = vpop.f32.mrf.mxu0  ;;  %v1442_v45 = vpop.f32.mrf.mxu1 }
 0x3bb   :  { %1728 = vmatpush2.msra.mxu0 %v12277_v46  ;;  %1799 = vmatpush2.msra.mxu1 %v12278_v47 }
 0x3bc   :  { %1729 = vmatprep.subr.mxu0 %v12279_v48  ;;  %1800 = vmatprep.subr.mxu1 %v12280_v49  ;;  %v1373_v46 = vpop.f32.mrf.mxu0  ;;  %v1444_v48 = vpop.f32.mrf.mxu1 }
 0x3bd   :  { %1730 = vmatpush2.msra.mxu0 %v12281_v50  ;;  %1801 = vmatpush2.msra.mxu1 %v12282_v51 }
 0x3be   :  { %1731 = vmatprep.subr.mxu0 %v12283_v7  ;;  %1802 = vmatprep.subr.mxu1 %v12284_v9 }
 0x3bf   :  { %1732 = vmatpush2.msra.mxu0 %v12285_v10  ;;  %1803 = vmatpush2.msra.mxu1 %v12286_v11 }
 0x3c0   :  { %1733 = vmatprep.subr.mxu0 %v12287_v12  ;;  %1804 = vmatprep.subr.mxu1 %v12288_v13 }
 0x3c1   :  { %1734 = vmatpush2.msra.mxu0 %v12289_v14  ;;  %1805 = vmatpush2.msra.mxu1 %v12290_v15 }
 0x3c2   :  { %1735 = vmatprep.subr.mxu0 %v12291_v16  ;;  %1806 = vmatprep.subr.mxu1 %v12292_v17 }
 0x3c3   :  { %1736 = vmatpush2.msra.mxu0 %v12293_v18  ;;  %1807 = vmatpush2.msra.mxu1 %v12294_v19 }
 0x3c4   :  { %1737 = vmatprep.subr.mxu0 %v12295_v20  ;;  %1808 = vmatprep.subr.mxu1 %v12296_v21 }
 0x3c5   :  { %1738 = vmatpush2.msra.mxu0 %v12297_v23  ;;  %1809 = vmatpush2.msra.mxu1 %v12298_v24 }
 0x3c6   :  { %1739 = vmatprep.subr.mxu0 %v12299_v26  ;;  %1810 = vmatprep.subr.mxu1 %v12300_v27 }
 0x3c7   :  { %1740 = vmatpush2.msra.mxu0 %v12301_v28  ;;  %1811 = vmatpush2.msra.mxu1 %v12302_v30 }
 0x3c8   :  { %1741 = vmatprep.subr.mxu0 %v12303_v32  ;;  %1812 = vmatprep.subr.mxu1 %v12304_v33 }
 0x3c9   :  { %1742 = vmatpush2.msra.mxu0 %v12305_v34  ;;  %1813 = vmatpush2.msra.mxu1 %v12306_v35 }
 0x3ca   :  { %1743 = vmatprep.subr.mxu0 %v12307_v36  ;;  %1814 = vmatprep.subr.mxu1 %v12308_v37 }
 0x3cb   :  { %1744 = vmatpush2.msra.mxu0 %v12309_v38  ;;  %1815 = vmatpush2.msra.mxu1 %v12310_v39  ;;  %v12325_v38 = vld [vmem:[#allocation179_spill] sm:$0xff]  ;;  %v12326_v39 = vld [vmem:[#allocation180_spill] sm:$0xff] }
 0x3cc   :  { %1823 = vmatprep.subr.mxu0 %v12311_v42  ;;  %1894 = vmatprep.subr.mxu1 %v12312_v43  ;;  %v12327_v42 = vld [vmem:[#allocation181_spill] sm:$0xff]  ;;  %v12328_v43 = vld [vmem:[#allocation182_spill] sm:$0xff] }
 0x44c   :  { %v1576_v47 = vpop.f32.mrf.mxu0  ;;  %v1647_v7 = vpop.f32.mrf.mxu1 }
 0x44d   :  { %v1577_v49 = vadd.f32 %v1576_v47, %v1371_v44  ;;  %v1648_v16 = vadd.f32 %v1647_v7, %v1442_v45  ;;  %v12329_v44 = vld [vmem:[#allocation183_spill] sm:$0xff]  ;;  %v12330_v45 = vld [vmem:[#allocation184_spill] sm:$0xff]  ;;  %v12332_v47 = vld [vmem:[#allocation186_spill] sm:$0xff] }
 0x44e   :  { %v1578_v50 = vpop.f32.mrf.mxu0  ;;  %v1649_v13 = vpop.f32.mrf.mxu1  ;;  %v12337_v7 = vld [vmem:[#allocation191_spill] sm:$0xff] }
 0x44f   :  { %v1652_v51 = vadd.f32 %v1577_v49, %v7280_v1  ;;  %v1579_v9 = vadd.f32 %v1578_v50, %v1373_v46  ;;  %v1650_v14 = vadd.f32 %v1649_v13, %v1444_v48  ;;  %v1654_v19 = vadd.f32 %v1648_v16, %v7295_v56  ;;  %v12331_v46 = vld [vmem:[#allocation185_spill] sm:$0xff]  ;;  %v12333_v48 = vld [vmem:[#allocation187_spill] sm:$0xff]  ;;  %v12334_v49 = vld [vmem:[#allocation188_spill] sm:$0xff] }
 0x450   :  { %v12335_v50 = vld [vmem:[#allocation189_spill] sm:$0xff]  ;;  %v12342_v13 = vld [vmem:[#allocation196_spill] sm:$0xff]  ;;  %v12345_v16 = vld [vmem:[#allocation199_spill] sm:$0xff] }
 0x451   :  { %v4922_v10 = vmul.f32 -1.442695, %v1652_v51  ;;  %v1653_v11 = vadd.f32 %v1579_v9, %v7284_v2  ;;  %v1655_v15 = vadd.f32 %v1650_v14, %v7290_v55  ;;  %v12336_v51 = vld [vmem:[#allocation190_spill] sm:$0xff]  ;;  %v12338_v9 = vld [vmem:[#allocation192_spill] sm:$0xff]  ;;  %v12343_v14 = vld [vmem:[#allocation197_spill] sm:$0xff] }
 0x453   :  { %5073 = vpow2.f32 %v4922_v10  ;;  %v4923_v12 = vmul.f32 -1.442695, %v1653_v11  ;;  %v4924_v17 = vmul.f32 -1.442695, %v1655_v15  ;;  %v12339_v10 = vld [vmem:[#allocation193_spill] sm:$0xff]  ;;  %v12340_v11 = vld [vmem:[#allocation194_spill] sm:$0xff] }
 0x454   :  { %v12344_v15 = vld [vmem:[#allocation198_spill] sm:$0xff] }
 0x455   :  { %5075 = vpow2.f32 %v4923_v12  ;;  %v12341_v12 = vld [vmem:[#allocation195_spill] sm:$0xff] }
 0x456   :  { %5077 = vpow2.f32 %v4924_v17  ;;  %v12346_v17 = vld [vmem:[#allocation200_spill] sm:$0xff] }
 0x460   :  { %v5074_v18 = vpop.eup %5073 }
 0x461   :  { %v1659_v20 = vadd.f32 1.0, %v5074_v18  ;;  %v12347_v18 = vld [vmem:[#allocation201_spill] sm:$0xff] }
 0x462   :  { %v5076_v21 = vpop.eup %5075 }
 0x463   :  { %5079 = vrcp.f32 %v1659_v20  ;;  %v1665_v23 = vadd.f32 1.0, %v5076_v21  ;;  %v5078_v24 = vpop.eup %5077  ;;  %v12349_v20 = vld [vmem:[#allocation203_spill] sm:$0xff]  ;;  %v12350_v21 = vld [vmem:[#allocation204_spill] sm:$0xff] }
 0x464   :  { %5081 = vtanh.f32 %v1654_v19  ;;  %v1672_v30 = vadd.f32 1.0, %v5078_v24  ;;  %v12348_v19 = vld [vmem:[#allocation202_spill] sm:$0xff] }
 0x465   :  { %5083 = vrcp.f32 %v1665_v23  ;;  %v12351_v23 = vld [vmem:[#allocation205_spill] sm:$0xff]  ;;  %v12352_v24 = vld [vmem:[#allocation206_spill] sm:$0xff] }
 0x466   :  { %5085 = vrcp.f32 %v1672_v30  ;;  %v12356_v30 = vld [vmem:[#allocation210_spill] sm:$0xff] }
 0x470   :  { %v5080_v26 = vpop.eup %5079 }
 0x471   :  { %v5082_v27 = vpop.eup %5081 }
 0x472   :  { %v5084_v28 = vpop.eup %5083  ;;  %v1676_v32 = vmul.f32 %v5082_v27, %v5080_v26  ;;  %v12353_v26 = vld [vmem:[#allocation207_spill] sm:$0xff]  ;;  %v12354_v27 = vld [vmem:[#allocation208_spill] sm:$0xff] }
 0x473   :  { %v1675_v33 = vmul.f32 %v5084_v28, %v7298_v59  ;;  %v5086_v35 = vpop.eup %5085  ;;  %v12313_v59 = vld [vmem:[#allocation167_spill] sm:$0xff]  ;;  %v12355_v28 = vld [vmem:[#allocation209_spill] sm:$0xff] }
 0x475   :  { %v7899_v34 = vadd.f32 %v1676_v32, %v1675_v33  ;;  %v12357_v32 = vld [vmem:[#allocation211_spill] sm:$0xff]  ;;  %v12358_v33 = vld [vmem:[#allocation212_spill] sm:$0xff] }
 0x477   :  { %5087 = vtanh.f32 %v7899_v34 }
 0x484   :  { %v5088_v36 = vpop.eup %5087 }
 0x485   :  { %v1679_v37 = vmul.f32 %v5088_v36, %v5086_v35  ;;  %v12359_v35 = vld [vmem:[#allocation213_spill] sm:$0xff]  ;;  %v12360_v36 = vld [vmem:[#allocation214_spill] sm:$0xff] }
 0x487   :  { %1680 = vst [vmem:[#allocation3 + $0x1] sm:$0x1] %v1679_v37  ;;  %1745 = vmatprep.mubr.f32.mxu0 %v1679_v37  ;;  %1816 = vmatprep.mubr.f32.mxu1 %v1679_v37 }
 0x488   :  { %1746 = vmatmul.mubr.f32.vlgmr.msra.gmra.mxu0 %v7762_v25  ;;  %1817 = vmatmul.mubr.f32.vlgmr.msra.gmra.mxu1 %v7762_v25 }
 0x489   :  { %1824 = vmatpush1.msra.mxu0 %v7303_v4  ;;  %1895 = vmatpush1.msra.mxu1 %v7306_v31  ;;  %v12314_v4 = vld [vmem:[#allocation168_spill] sm:$0xff]  ;;  %v12315_v31 = vld [vmem:[#allocation169_spill] sm:$0xff] }
 0x48a   :  { %1825 = vmatprep.subr.mxu0 %v7309_v60  ;;  %1887 = vmatprep.mubr.f32.mxu0 %v1679_v37  ;;  %v12316_v60 = vld [vmem:[#allocation170_spill] sm:$0xff] }
 0x48b   :  { %1896 = vmatprep.subr.mxu1 %v7312_v3  ;;  %1958 = vmatprep.mubr.f32.mxu1 %v1679_v37  ;;  %v12317_v3 = vld [vmem:[#allocation171_spill] sm:$0xff] }
 0x48c   :  { %1826 = vmatpush1.msra.mxu0 %v7315_v6  ;;  %1897 = vmatpush1.msra.mxu1 %v7318_v53  ;;  %v12318_v6 = vld [vmem:[#allocation172_spill] sm:$0xff]  ;;  %v12319_v53 = vld [vmem:[#allocation173_spill] sm:$0xff]  ;;  %v12361_v37 = vld [vmem:[#allocation215_spill] sm:$0xff] }
 0x48d   :  { %1827 = vmatprep.subr.mxu0 %v7321_v0  ;;  %1898 = vmatprep.subr.mxu1 %v7324_v63  ;;  %v12320_v0 = vld [vmem:[#allocation174_spill] sm:$0xff]  ;;  %v12321_v63 = vld [vmem:[#allocation175_spill] sm:$0xff] }
 0x48e   :  { %1828 = vmatpush1.msra.mxu0 %v7327_v62  ;;  %1899 = vmatpush1.msra.mxu1 %v7330_v57  ;;  %v12322_v62 = vld [vmem:[#allocation176_spill] sm:$0xff]  ;;  %v12323_v57 = vld [vmem:[#allocation177_spill] sm:$0xff] }
 0x48f   :  { %1829 = vmatprep.subr.mxu0 %v7333_v61  ;;  %1900 = vmatprep.subr.mxu1 %v12313_v59  ;;  %v12324_v61 = vld [vmem:[#allocation178_spill] sm:$0xff]  ;;  %v12362_v59 = vld [vmem:[#allocation216_spill] sm:$0xff] }
 0x490   :  { %1830 = vmatpush1.msra.mxu0 %v12314_v4  ;;  %1901 = vmatpush1.msra.mxu1 %v12315_v31  ;;  %v12363_v4 = vld [vmem:[#allocation217_spill] sm:$0xff]  ;;  %v12364_v31 = vld [vmem:[#allocation218_spill] sm:$0xff] }
 0x491   :  { %1831 = vmatprep.subr.mxu0 %v12316_v60  ;;  %1902 = vmatprep.subr.mxu1 %v12317_v3  ;;  %v12365_v60 = vld [vmem:[#allocation219_spill] sm:$0xff]  ;;  %v12366_v3 = vld [vmem:[#allocation220_spill] sm:$0xff] }
 0x492   :  { %1832 = vmatpush1.msra.mxu0 %v12318_v6  ;;  %1903 = vmatpush1.msra.mxu1 %v12319_v53  ;;  %v12367_v6 = vld [vmem:[#allocation221_spill] sm:$0xff]  ;;  %v12368_v53 = vld [vmem:[#allocation222_spill] sm:$0xff] }
 0x493   :  { %1833 = vmatprep.subr.mxu0 %v12320_v0  ;;  %1904 = vmatprep.subr.mxu1 %v12321_v63  ;;  %v12369_v0 = vld [vmem:[#allocation223_spill] sm:$0xff]  ;;  %v12370_v63 = vld [vmem:[#allocation224_spill] sm:$0xff] }
 0x494   :  { %1834 = vmatpush1.msra.mxu0 %v12322_v62  ;;  %1905 = vmatpush1.msra.mxu1 %v12323_v57  ;;  %v12371_v62 = vld [vmem:[#allocation225_spill] sm:$0xff]  ;;  %v12372_v57 = vld [vmem:[#allocation226_spill] sm:$0xff] }
 0x495   :  { %1835 = vmatprep.subr.mxu0 %v12324_v61  ;;  %1906 = vmatprep.subr.mxu1 %v12325_v38  ;;  %v12373_v61 = vld [vmem:[#allocation227_spill] sm:$0xff]  ;;  %v12374_v38 = vld [vmem:[#allocation228_spill] sm:$0xff] }
 0x496   :  { %1836 = vmatpush1.msra.mxu0 %v12326_v39  ;;  %1907 = vmatpush1.msra.mxu1 %v12327_v42  ;;  %v12375_v39 = vld [vmem:[#allocation229_spill] sm:$0xff]  ;;  %v12376_v42 = vld [vmem:[#allocation230_spill] sm:$0xff] }
 0x497   :  { %1837 = vmatprep.subr.mxu0 %v12328_v43  ;;  %1908 = vmatprep.subr.mxu1 %v12329_v44  ;;  %v12377_v43 = vld [vmem:[#allocation231_spill] sm:$0xff]  ;;  %v12378_v44 = vld [vmem:[#allocation232_spill] sm:$0xff] }
 0x498   :  { %1838 = vmatpush1.msra.mxu0 %v12330_v45  ;;  %1909 = vmatpush1.msra.mxu1 %v12331_v46  ;;  %v12379_v45 = vld [vmem:[#allocation233_spill] sm:$0xff]  ;;  %v12380_v46 = vld [vmem:[#allocation234_spill] sm:$0xff] }
 0x499   :  { %1839 = vmatprep.subr.mxu0 %v12332_v47  ;;  %1910 = vmatprep.subr.mxu1 %v12333_v48  ;;  %v12381_v47 = vld [vmem:[#allocation235_spill] sm:$0xff]  ;;  %v12382_v48 = vld [vmem:[#allocation236_spill] sm:$0xff] }
 0x49a   :  { %1840 = vmatpush1.msra.mxu0 %v12334_v49  ;;  %1911 = vmatpush1.msra.mxu1 %v12335_v50  ;;  %v12383_v49 = vld [vmem:[#allocation237_spill] sm:$0xff]  ;;  %v12384_v50 = vld [vmem:[#allocation238_spill] sm:$0xff] }
 0x49b   :  { %1841 = vmatprep.subr.mxu0 %v12336_v51  ;;  %1912 = vmatprep.subr.mxu1 %v12337_v7  ;;  %v12385_v51 = vld [vmem:[#allocation239_spill] sm:$0xff]  ;;  %v12386_v7 = vld [vmem:[#allocation240_spill] sm:$0xff] }
 0x49c   :  { %1842 = vmatpush1.msra.mxu0 %v12338_v9  ;;  %1913 = vmatpush1.msra.mxu1 %v12339_v10  ;;  %v12387_v9 = vld [vmem:[#allocation241_spill] sm:$0xff]  ;;  %v12388_v10 = vld [vmem:[#allocation242_spill] sm:$0xff] }
 0x49d   :  { %1843 = vmatprep.subr.mxu0 %v12340_v11  ;;  %1914 = vmatprep.subr.mxu1 %v12341_v12  ;;  %v12389_v11 = vld [vmem:[#allocation243_spill] sm:$0xff]  ;;  %v12390_v12 = vld [vmem:[#allocation244_spill] sm:$0xff] }
 0x49e   :  { %1844 = vmatpush1.msra.mxu0 %v12342_v13  ;;  %1915 = vmatpush1.msra.mxu1 %v12343_v14  ;;  %v12391_v13 = vld [vmem:[#allocation245_spill] sm:$0xff]  ;;  %v12392_v14 = vld [vmem:[#allocation246_spill] sm:$0xff] }
 0x49f   :  { %1845 = vmatprep.subr.mxu0 %v12344_v15  ;;  %1916 = vmatprep.subr.mxu1 %v12345_v16  ;;  %v12393_v15 = vld [vmem:[#allocation247_spill] sm:$0xff]  ;;  %v12394_v16 = vld [vmem:[#allocation248_spill] sm:$0xff] }
 0x4a0   :  { %1846 = vmatpush1.msra.mxu0 %v12346_v17  ;;  %1917 = vmatpush1.msra.mxu1 %v12347_v18  ;;  %v12395_v17 = vld [vmem:[#allocation249_spill] sm:$0xff]  ;;  %v12396_v18 = vld [vmem:[#allocation250_spill] sm:$0xff] }
 0x4a1   :  { %1847 = vmatprep.subr.mxu0 %v12348_v19  ;;  %1918 = vmatprep.subr.mxu1 %v12349_v20  ;;  %v12397_v19 = vld [vmem:[#allocation251_spill] sm:$0xff]  ;;  %v12398_v20 = vld [vmem:[#allocation252_spill] sm:$0xff] }
 0x4a2   :  { %1848 = vmatpush1.msra.mxu0 %v12350_v21  ;;  %1919 = vmatpush1.msra.mxu1 %v12351_v23  ;;  %v12399_v21 = vld [vmem:[#allocation253_spill] sm:$0xff]  ;;  %v12400_v23 = vld [vmem:[#allocation254_spill] sm:$0xff] }
 0x4a3   :  { %1849 = vmatprep.subr.mxu0 %v12352_v24  ;;  %1920 = vmatprep.subr.mxu1 %v12353_v26  ;;  %v12401_v24 = vld [vmem:[#allocation255_spill] sm:$0xff]  ;;  %v12402_v26 = vld [vmem:[#allocation256_spill] sm:$0xff] }
 0x4a4   :  { %1850 = vmatpush1.msra.mxu0 %v12354_v27  ;;  %1921 = vmatpush1.msra.mxu1 %v12355_v28  ;;  %v12403_v27 = vld [vmem:[#allocation257_spill] sm:$0xff]  ;;  %v12404_v28 = vld [vmem:[#allocation258_spill] sm:$0xff] }
 0x4a5   :  { %1851 = vmatprep.subr.mxu0 %v12356_v30  ;;  %1922 = vmatprep.subr.mxu1 %v12357_v32  ;;  %v12405_v30 = vld [vmem:[#allocation259_spill] sm:$0xff]  ;;  %v12406_v32 = vld [vmem:[#allocation260_spill] sm:$0xff] }
 0x4a6   :  { %1852 = vmatpush1.msra.mxu0 %v12358_v33  ;;  %1923 = vmatpush1.msra.mxu1 %v12359_v35  ;;  %v12407_v33 = vld [vmem:[#allocation261_spill] sm:$0xff]  ;;  %v12408_v35 = vld [vmem:[#allocation262_spill] sm:$0xff] }
 0x4a7   :  { %1853 = vmatprep.subr.mxu0 %v12360_v36  ;;  %1924 = vmatprep.subr.mxu1 %v12361_v37  ;;  %v12409_v36 = vld [vmem:[#allocation263_spill] sm:$0xff]  ;;  %v12410_v37 = vld [vmem:[#allocation264_spill] sm:$0xff] }
 0x4a8   :  { %1854 = vmatpush1.msra.mxu0 %v12362_v59  ;;  %1925 = vmatpush1.msra.mxu1 %v12363_v4  ;;  %v12411_v59 = vld [vmem:[#allocation265_spill] sm:$0xff]  ;;  %v12412_v4 = vld [vmem:[#allocation266_spill] sm:$0xff] }
 0x4a9   :  { %1855 = vmatprep.subr.mxu0 %v12364_v31  ;;  %1926 = vmatprep.subr.mxu1 %v12365_v60  ;;  %v12413_v31 = vld [vmem:[#allocation267_spill] sm:$0xff]  ;;  %v12414_v60 = vld [vmem:[#allocation268_spill] sm:$0xff] }
 0x4aa   :  { %1856 = vmatpush2.msra.mxu0 %v12366_v3  ;;  %1927 = vmatpush2.msra.mxu1 %v12367_v6  ;;  %v12415_v3 = vld [vmem:[#allocation269_spill] sm:$0xff]  ;;  %v12416_v6 = vld [vmem:[#allocation270_spill] sm:$0xff] }
 0x4ab   :  { %1857 = vmatprep.subr.mxu0 %v12368_v53  ;;  %1928 = vmatprep.subr.mxu1 %v12369_v0  ;;  %v12417_v53 = vld [vmem:[#allocation271_spill] sm:$0xff]  ;;  %v12418_v0 = vld [vmem:[#allocation272_spill] sm:$0xff] }
 0x4ac   :  { %1858 = vmatpush2.msra.mxu0 %v12370_v63  ;;  %1929 = vmatpush2.msra.mxu1 %v12371_v62  ;;  %v12419_v63 = vld [vmem:[#allocation273_spill] sm:$0xff]  ;;  %v12420_v62 = vld [vmem:[#allocation274_spill] sm:$0xff] }
 0x4ad   :  { %1859 = vmatprep.subr.mxu0 %v12372_v57  ;;  %1930 = vmatprep.subr.mxu1 %v12373_v61  ;;  %v12421_v57 = vld [vmem:[#allocation275_spill] sm:$0xff]  ;;  %v12422_v61 = vld [vmem:[#allocation276_spill] sm:$0xff] }
 0x4ae   :  { %1860 = vmatpush2.msra.mxu0 %v12374_v38  ;;  %1931 = vmatpush2.msra.mxu1 %v12375_v39  ;;  %v12423_v38 = vld [vmem:[#allocation277_spill] sm:$0xff] }
 0x4af   :  { %1861 = vmatprep.subr.mxu0 %v12376_v42  ;;  %1932 = vmatprep.subr.mxu1 %v12377_v43  ;;  %v8034_v39 = vld [vmem:[#allocation7 + $0x1e0] sm:$0xff]  ;;  %v8061_v43 = vld [vmem:[#allocation7 + $0x1b0] sm:$0xff] }
 0x4b0   :  { %1862 = vmatpush2.msra.mxu0 %v12378_v44  ;;  %1933 = vmatpush2.msra.mxu1 %v12379_v45  ;;  %v8058_v42 = vld [vmem:[#allocation7 + $0x1a0] sm:$0xff]  ;;  %v8064_v44 = vld [vmem:[#allocation7 + $0x188] sm:$0xff]  ;;  %v8067_v45 = vld [vmem:[#allocation7 + $0x198] sm:$0xff] }
 0x4b1   :  { %1863 = vmatprep.subr.mxu0 %v12380_v46  ;;  %1934 = vmatprep.subr.mxu1 %v12381_v47  ;;  %v8070_v46 = vld [vmem:[#allocation7 + $0x180] sm:$0xff]  ;;  %v8073_v47 = vld [vmem:[#allocation7 + $0x190] sm:$0xff] }
 0x4b2   :  { %1864 = vmatpush2.msra.mxu0 %v12382_v48  ;;  %1935 = vmatpush2.msra.mxu1 %v12383_v49  ;;  %v8076_v48 = vld [vmem:[#allocation7 + $0x168] sm:$0xff]  ;;  %v8079_v49 = vld [vmem:[#allocation7 + $0x178] sm:$0xff] }
 0x4b3   :  { %1865 = vmatprep.subr.mxu0 %v12384_v50  ;;  %1936 = vmatprep.subr.mxu1 %v12385_v51  ;;  %v8082_v50 = vld [vmem:[#allocation7 + $0x160] sm:$0xff]  ;;  %v8085_v51 = vld [vmem:[#allocation7 + $0x170] sm:$0xff] }
 0x4b4   :  { %1866 = vmatpush2.msra.mxu0 %v12386_v7  ;;  %1937 = vmatpush2.msra.mxu1 %v12387_v9  ;;  %v8088_v7 = vld [vmem:[#allocation7 + $0x148] sm:$0xff]  ;;  %v8091_v9 = vld [vmem:[#allocation7 + $0x158] sm:$0xff] }
 0x4b5   :  { %1867 = vmatprep.subr.mxu0 %v12388_v10  ;;  %1938 = vmatprep.subr.mxu1 %v12389_v11  ;;  %v8094_v10 = vld [vmem:[#allocation7 + $0x140] sm:$0xff]  ;;  %v8097_v11 = vld [vmem:[#allocation7 + $0x150] sm:$0xff] }
 0x4b6   :  { %1868 = vmatpush2.msra.mxu0 %v12390_v12  ;;  %1939 = vmatpush2.msra.mxu1 %v12391_v13  ;;  %v8100_v12 = vld [vmem:[#allocation7 + $0x128] sm:$0xff]  ;;  %v8103_v13 = vld [vmem:[#allocation7 + $0x138] sm:$0xff] }
 0x4b7   :  { %1869 = vmatprep.subr.mxu0 %v12392_v14  ;;  %1940 = vmatprep.subr.mxu1 %v12393_v15  ;;  %v8106_v14 = vld [vmem:[#allocation7 + $0x120] sm:$0xff]  ;;  %v8109_v15 = vld [vmem:[#allocation7 + $0x130] sm:$0xff] }
 0x4b8   :  { %1870 = vmatpush2.msra.mxu0 %v12394_v16  ;;  %1941 = vmatpush2.msra.mxu1 %v12395_v17  ;;  %v8112_v16 = vld [vmem:[#allocation7 + $0x108] sm:$0xff]  ;;  %v8115_v17 = vld [vmem:[#allocation7 + $0x118] sm:$0xff] }
 0x4b9   :  { %1871 = vmatprep.subr.mxu0 %v12396_v18  ;;  %1942 = vmatprep.subr.mxu1 %v12397_v19  ;;  %v8118_v18 = vld [vmem:[#allocation7 + $0x100] sm:$0xff]  ;;  %v8121_v19 = vld [vmem:[#allocation7 + $0x110] sm:$0xff] }
 0x4ba   :  { %1872 = vmatpush2.msra.mxu0 %v12398_v20  ;;  %1943 = vmatpush2.msra.mxu1 %v12399_v21  ;;  %v8124_v20 = vld [vmem:[#allocation7 + $0xe8] sm:$0xff]  ;;  %v8127_v21 = vld [vmem:[#allocation7 + $0xf8] sm:$0xff] }
 0x4bb   :  { %1873 = vmatprep.subr.mxu0 %v12400_v23  ;;  %1944 = vmatprep.subr.mxu1 %v12401_v24  ;;  %v8130_v23 = vld [vmem:[#allocation7 + $0xe0] sm:$0xff]  ;;  %v8133_v24 = vld [vmem:[#allocation7 + $0xf0] sm:$0xff] }
 0x4bc   :  { %1874 = vmatpush2.msra.mxu0 %v12402_v26  ;;  %1945 = vmatpush2.msra.mxu1 %v12403_v27  ;;  %v8136_v26 = vld [vmem:[#allocation7 + $0xc8] sm:$0xff]  ;;  %v8139_v27 = vld [vmem:[#allocation7 + $0xd8] sm:$0xff] }
 0x4bd   :  { %1875 = vmatprep.subr.mxu0 %v12404_v28  ;;  %1946 = vmatprep.subr.mxu1 %v12405_v30  ;;  %v8142_v28 = vld [vmem:[#allocation7 + $0xc0] sm:$0xff]  ;;  %v8145_v30 = vld [vmem:[#allocation7 + $0xd0] sm:$0xff] }
 0x4be   :  { %1876 = vmatpush2.msra.mxu0 %v12406_v32  ;;  %1947 = vmatpush2.msra.mxu1 %v12407_v33  ;;  %v8148_v32 = vld [vmem:[#allocation7 + $0xa8] sm:$0xff]  ;;  %v8151_v33 = vld [vmem:[#allocation7 + $0xb8] sm:$0xff] }
 0x4bf   :  { %1877 = vmatprep.subr.mxu0 %v12408_v35  ;;  %1948 = vmatprep.subr.mxu1 %v12409_v36  ;;  %12424 = vst [vmem:[#allocation14_spill] sm:$0xff] %v8148_v32  ;;  %12425 = vst [vmem:[#allocation15_spill] sm:$0xff] %v8151_v33  ;;  %v8154_v35 = vld [vmem:[#allocation7 + $0xa0] sm:$0xff]  ;;  %v8157_v36 = vld [vmem:[#allocation7 + $0xb0] sm:$0xff] }
 0x4c0   :  { %1878 = vmatpush2.msra.mxu0 %v12410_v37  ;;  %1949 = vmatpush2.msra.mxu1 %v12411_v59  ;;  %12426 = vst [vmem:[#allocation16_spill] sm:$0xff] %v8154_v35  ;;  %12427 = vst [vmem:[#allocation17_spill] sm:$0xff] %v8157_v36  ;;  %v8160_v37 = vld [vmem:[#allocation7 + $0x88] sm:$0xff]  ;;  %v8163_v59 = vld [vmem:[#allocation7 + $0x98] sm:$0xff] }
 0x4c1   :  { %1879 = vmatprep.subr.mxu0 %v12412_v4  ;;  %1950 = vmatprep.subr.mxu1 %v12413_v31  ;;  %12428 = vst [vmem:[#allocation18_spill] sm:$0xff] %v8160_v37  ;;  %12429 = vst [vmem:[#allocation19_spill] sm:$0xff] %v8163_v59  ;;  %v8166_v4 = vld [vmem:[#allocation7 + $0x80] sm:$0xff]  ;;  %v8169_v31 = vld [vmem:[#allocation7 + $0x90] sm:$0xff] }
 0x4c2   :  { %1880 = vmatpush2.msra.mxu0 %v12414_v60  ;;  %1951 = vmatpush2.msra.mxu1 %v12415_v3  ;;  %12430 = vst [vmem:[#allocation20_spill] sm:$0xff] %v8166_v4  ;;  %12431 = vst [vmem:[#allocation21_spill] sm:$0xff] %v8169_v31  ;;  %v8172_v60 = vld [vmem:[#allocation7 + $0x68] sm:$0xff]  ;;  %v8175_v3 = vld [vmem:[#allocation7 + $0x78] sm:$0xff] }
 0x4c3   :  { %1881 = vmatprep.subr.mxu0 %v12416_v6  ;;  %1952 = vmatprep.subr.mxu1 %v12417_v53  ;;  %12432 = vst [vmem:[#allocation22_spill] sm:$0xff] %v8172_v60  ;;  %12433 = vst [vmem:[#allocation23_spill] sm:$0xff] %v8175_v3  ;;  %v8178_v6 = vld [vmem:[#allocation7 + $0x60] sm:$0xff]  ;;  %v8181_v53 = vld [vmem:[#allocation7 + $0x70] sm:$0xff] }
 0x4c4   :  { %1882 = vmatpush2.msra.mxu0 %v12418_v0  ;;  %1953 = vmatpush2.msra.mxu1 %v12419_v63  ;;  %12434 = vst [vmem:[#allocation24_spill] sm:$0xff] %v8178_v6  ;;  %12435 = vst [vmem:[#allocation25_spill] sm:$0xff] %v8181_v53  ;;  %v8184_v0 = vld [vmem:[#allocation7 + $0x48] sm:$0xff]  ;;  %v8187_v63 = vld [vmem:[#allocation7 + $0x58] sm:$0xff] }
 0x4c5   :  { %1883 = vmatprep.subr.mxu0 %v12420_v62  ;;  %1954 = vmatprep.subr.mxu1 %v12421_v57  ;;  %12436 = vst [vmem:[#allocation26_spill] sm:$0xff] %v8184_v0  ;;  %12437 = vst [vmem:[#allocation27_spill] sm:$0xff] %v8187_v63  ;;  %v8190_v62 = vld [vmem:[#allocation7 + $0x40] sm:$0xff]  ;;  %v8193_v57 = vld [vmem:[#allocation7 + $0x50] sm:$0xff] }
 0x4c6   :  { %1884 = vmatpush2.msra.mxu0 %v7663_v40  ;;  %1955 = vmatpush2.msra.mxu1 %v12422_v61  ;;  %v8037_v40 = vld [vmem:[#allocation7 + $0x1f0] sm:$0xff]  ;;  %12438 = vst [vmem:[#allocation28_spill] sm:$0xff] %v8190_v62  ;;  %12439 = vst [vmem:[#allocation29_spill] sm:$0xff] %v8193_v57  ;;  %v8196_v61 = vld [vmem:[#allocation7 + $0x28] sm:$0xff] }
 0x4c7   :  { %1885 = vmatprep.subr.mxu0 %v12423_v38  ;;  %1956 = vmatprep.subr.mxu1 %v7672_v8  ;;  %v8040_v8 = vld [vmem:[#allocation7 + $0x1c8] sm:$0xff]  ;;  %12440 = vst [vmem:[#allocation30_spill] sm:$0xff] %v8196_v61  ;;  %v8199_v38 = vld [vmem:[#allocation7 + $0x38] sm:$0xff] }
 0x4c8   :  { %1886 = vmatpush2.msra.mxu0 %v7675_v58  ;;  %1957 = vmatpush2.msra.mxu1 %v7678_v5  ;;  %v8043_v5 = vld [vmem:[#allocation7 + $0x1d8] sm:$0xff]  ;;  %v8046_v58 = vld [vmem:[#allocation7 + $0x1c0] sm:$0xff]  ;;  %12441 = vst [vmem:[#allocation31_spill] sm:$0xff] %v8199_v38 }
 0x4c9   :  { %1888 = vmatmul.mubr.f32.vlgmr.msra.gmra.mxu0 %v7762_v25  ;;  %1959 = vmatmul.mubr.f32.vlgmr.msra.gmra.mxu1 %v7762_v25  ;;  %v8055_v25 = vld [vmem:[#allocation7 + $0x1b8] sm:$0xff] }
 0x4ca   :  { %2028 = vmatprep.subr.mxu0 %v7683_v52  ;;  %2099 = vmatprep.subr.mxu1 %v7686_v54  ;;  %v8049_v52 = vld [vmem:[#allocation7 + $0x1d0] sm:$0xff]  ;;  %v8052_v54 = vld [vmem:[#allocation7 + $0x1a8] sm:$0xff] }
 0x4cb   :  { %2029 = vmatpush1.msra.mxu0 %v8034_v39  ;;  %2100 = vmatpush1.msra.mxu1 %v8037_v40 }
 0x4cc   :  { %2030 = vmatprep.subr.mxu0 %v8040_v8  ;;  %2101 = vmatprep.subr.mxu1 %v8043_v5 }
 0x4cd   :  { %2031 = vmatpush1.msra.mxu0 %v8046_v58  ;;  %2102 = vmatpush1.msra.mxu1 %v8049_v52 }
 0x4ce   :  { %2032 = vmatprep.subr.mxu0 %v8052_v54  ;;  %2103 = vmatprep.subr.mxu1 %v8055_v25 }
 0x4cf   :  { %2033 = vmatpush1.msra.mxu0 %v8058_v42  ;;  %2104 = vmatpush1.msra.mxu1 %v8061_v43 }
 0x4d0   :  { %2034 = vmatprep.subr.mxu0 %v8064_v44  ;;  %2105 = vmatprep.subr.mxu1 %v8067_v45 }
 0x4d1   :  { %2035 = vmatpush1.msra.mxu0 %v8070_v46  ;;  %2106 = vmatpush1.msra.mxu1 %v8073_v47 }
 0x4d2   :  { %2036 = vmatprep.subr.mxu0 %v8076_v48  ;;  %2107 = vmatprep.subr.mxu1 %v8079_v49 }
 0x4d3   :  { %2037 = vmatpush1.msra.mxu0 %v8082_v50  ;;  %2108 = vmatpush1.msra.mxu1 %v8085_v51 }
 0x4d4   :  { %2038 = vmatprep.subr.mxu0 %v8088_v7  ;;  %2109 = vmatprep.subr.mxu1 %v8091_v9 }
 0x4d5   :  { %2039 = vmatpush1.msra.mxu0 %v8094_v10  ;;  %2110 = vmatpush1.msra.mxu1 %v8097_v11 }
 0x4d6   :  { %2040 = vmatprep.subr.mxu0 %v8100_v12  ;;  %2111 = vmatprep.subr.mxu1 %v8103_v13 }
 0x4d7   :  { %2041 = vmatpush1.msra.mxu0 %v8106_v14  ;;  %2112 = vmatpush1.msra.mxu1 %v8109_v15 }
 0x4d8   :  { %2042 = vmatprep.subr.mxu0 %v8112_v16  ;;  %2113 = vmatprep.subr.mxu1 %v8115_v17 }
 0x4d9   :  { %2043 = vmatpush1.msra.mxu0 %v8118_v18  ;;  %2114 = vmatpush1.msra.mxu1 %v8121_v19 }
 0x4da   :  { %2044 = vmatprep.subr.mxu0 %v8124_v20  ;;  %2115 = vmatprep.subr.mxu1 %v8127_v21 }
 0x4db   :  { %2045 = vmatpush1.msra.mxu0 %v8130_v23  ;;  %2116 = vmatpush1.msra.mxu1 %v8133_v24 }
 0x4dc   :  { %2046 = vmatprep.subr.mxu0 %v8136_v26  ;;  %2117 = vmatprep.subr.mxu1 %v8139_v27 }
 0x4dd   :  { %2047 = vmatpush1.msra.mxu0 %v8142_v28  ;;  %2118 = vmatpush1.msra.mxu1 %v8145_v30 }
 0x4de   :  { %2048 = vmatprep.subr.mxu0 %v8148_v32  ;;  %2119 = vmatprep.subr.mxu1 %v8151_v33 }
 0x4df   :  { %2049 = vmatpush1.msra.mxu0 %v8154_v35  ;;  %2120 = vmatpush1.msra.mxu1 %v8157_v36 }
 0x4e0   :  { %2050 = vmatprep.subr.mxu0 %v8160_v37  ;;  %2121 = vmatprep.subr.mxu1 %v8163_v59 }
 0x4e1   :  { %2051 = vmatpush1.msra.mxu0 %v8166_v4  ;;  %2122 = vmatpush1.msra.mxu1 %v8169_v31  ;;  %v1966_v4 = vld [vmem:[#allocation2 + $0x2] ss:$8 sm:$0xf] }
 0x4e2   :  { %2052 = vmatprep.subr.mxu0 %v8172_v60  ;;  %2123 = vmatprep.subr.mxu1 %v8175_v3 }
 0x4e3   :  { %2053 = vmatpush1.msra.mxu0 %v8178_v6  ;;  %2124 = vmatpush1.msra.mxu1 %v8181_v53 }
 0x4e4   :  { %2054 = vmatprep.subr.mxu0 %v8184_v0  ;;  %2125 = vmatprep.subr.mxu1 %v8187_v63  ;;  %v8202_v0 = vld [vmem:[#allocation7 + $0x20] sm:$0xff]  ;;  %v8205_v63 = vld [vmem:[#allocation7 + $0x30] sm:$0xff] }
 0x4e5   :  { %2055 = vmatpush1.msra.mxu0 %v8190_v62  ;;  %2126 = vmatpush1.msra.mxu1 %v8193_v57  ;;  %12442 = vst [vmem:[#allocation32_spill] sm:$0xff] %v8202_v0  ;;  %12443 = vst [vmem:[#allocation33_spill] sm:$0xff] %v8205_v63  ;;  %v8208_v62 = vld [vmem:[#allocation7 + $0x8] sm:$0xff]  ;;  %v8211_v57 = vld [vmem:[#allocation7 + $0x18] sm:$0xff] }
 0x4e6   :  { %2056 = vmatprep.subr.mxu0 %v8196_v61  ;;  %2127 = vmatprep.subr.mxu1 %v8199_v38  ;;  %12444 = vst [vmem:[#allocation34_spill] sm:$0xff] %v8208_v62  ;;  %12445 = vst [vmem:[#allocation35_spill] sm:$0xff] %v8211_v57  ;;  %v8214_v61 = vld [vmem:[#allocation7] sm:$0xff]  ;;  %v8218_v38 = vld [vmem:[#allocation7 + $0x10] sm:$0xff] }
 0x4e7   :  { %2057 = vmatpush1.msra.mxu0 %v8202_v0  ;;  %2128 = vmatpush1.msra.mxu1 %v8205_v63  ;;  %12446 = vst [vmem:[#allocation36_spill] sm:$0xff] %v8214_v61  ;;  %12447 = vst [vmem:[#allocation38_spill] sm:$0xff] %v8218_v38  ;;  %v8222_v63 = vld [vmem:[#allocation9 + $0x3c8] sm:$0xff] }
 0x4e8   :  { %2058 = vmatprep.subr.mxu0 %v8208_v62  ;;  %2129 = vmatprep.subr.mxu1 %v8211_v57  ;;  %12448 = vst [vmem:[#allocation39_spill] sm:$0xff] %v8222_v63  ;;  %v8225_v62 = vld [vmem:[#allocation9 + $0x3d8] sm:$0xff] }
 0x4e9   :  { %2059 = vmatpush1.msra.mxu0 %v8214_v61  ;;  %2092 = vmatprep.mubr.f32.mxu0 %v12179_v29  ;;  %12449 = vst [vmem:[#allocation40_spill] sm:$0xff] %v8225_v62 }
 0x4ea   :  { %2130 = vmatpush1.msra.mxu1 %v8218_v38  ;;  %2163 = vmatprep.mubr.f32.mxu1 %v12179_v29 }
 0x4eb   :  { %2199 = vmatprep.subr.mxu0 %v8222_v63  ;;  %2270 = vmatprep.subr.mxu1 %v8225_v62 }
 0x548   :  { %v1747_v57 = vpop.f32.mrf.mxu0  ;;  %v1818_v0 = vpop.f32.mrf.mxu1 }
 0x54a   :  { %v1749_v53 = vpop.f32.mrf.mxu0  ;;  %v1820_v61 = vpop.f32.mrf.mxu1 }
 0x54b   :  { %v1971_v6 = vcombine.low %v1747_v57, %v1749_v53  ;;  %v1972_v3 = vcombine.low %v1818_v0, %v1820_v61  ;;  %v8248_v57 = vld [vmem:[#allocation9 + $0x398] sm:$0xff]  ;;  %v8251_v61 = vld [vmem:[#allocation9 + $0x380] sm:$0xff] }
 0x54c   :  { %12454 = vst [vmem:[#allocation45_spill] sm:$0xff] %v8248_v57  ;;  %12455 = vst [vmem:[#allocation46_spill] sm:$0xff] %v8251_v61 }
 0x54d   :  { %v1979_v60 = vrot.slane %v1971_v6, %v12183_v41  ;;  %v1986_v38 = vrot.slane %v1972_v3, %v12183_v41 }
 0x54f   :  { %v1987_v31 = vcombine.low %v1979_v60, %v1986_v38  ;;  %v8254_v38 = vld [vmem:[#allocation9 + $0x390] sm:$0xff] }
 0x550   :  { %12456 = vst [vmem:[#allocation47_spill] sm:$0xff] %v8254_v38 }
 0x551   :  { %v1994_v29 = vrot.slane %v1987_v31, %v12183_v41 }
 0x553   :  { %v1996_v59 = vadd.f32 %v1994_v29, %v1966_v4 }
 0x555   :  { %v4925_v63 = vmul.f32 -1.442695, %v1996_v59  ;;  %v2004_v37 = vrot.slane %v1996_v59, 1  ;;  %v2015_v62 = vrot.slane %v1996_v59, 3  ;;  %v2012_v32 = vrot.slane %v1996_v59, 2 }
 0x557   :  { %5089 = vpow2.f32 %v4925_v63  ;;  %v4926_v36 = vmul.f32 -1.442695, %v2004_v37  ;;  %v4927_v35 = vmul.f32 -1.442695, %v2015_v62  ;;  %v8242_v62 = vld [vmem:[#allocation9 + $0x3d0] sm:$0xff] }
 0x558   :  { %12452 = vst [vmem:[#allocation43_spill] sm:$0xff] %v8242_v62 }
 0x559   :  { %5091 = vpow2.f32 %v4926_v36 }
 0x55a   :  { %5093 = vpow2.f32 %v4927_v35 }
 0x564   :  { %v5090_v33 = vpop.eup %5089 }
 0x565   :  { %v2000_v53 = vadd.f32 1.0, %v5090_v33 }
 0x566   :  { %v5092_v0 = vpop.eup %5091 }
 0x567   :  { %5095 = vrcp.f32 %v2000_v53  ;;  %v2009_v6 = vadd.f32 1.0, %v5092_v0  ;;  %v5094_v60 = vpop.eup %5093  ;;  %v8257_v53 = vld [vmem:[#allocation9 + $0x348] sm:$0xff]  ;;  %v8260_v0 = vld [vmem:[#allocation9 + $0x358] sm:$0xff] }
 0x568   :  { %5097 = vtanh.f32 %v2012_v32  ;;  %v2020_v4 = vadd.f32 1.0, %v5094_v60  ;;  %v8239_v32 = vld [vmem:[#allocation9 + $0x3c0] sm:$0xff]  ;;  %12457 = vst [vmem:[#allocation48_spill] sm:$0xff] %v8257_v53  ;;  %12458 = vst [vmem:[#allocation49_spill] sm:$0xff] %v8260_v0  ;;  %v8266_v60 = vld [vmem:[#allocation9 + $0x350] sm:$0xff] }
 0x569   :  { %5099 = vrcp.f32 %v2009_v6  ;;  %12451 = vst [vmem:[#allocation42_spill] sm:$0xff] %v8239_v32  ;;  %v8263_v6 = vld [vmem:[#allocation9 + $0x340] sm:$0xff]  ;;  %12460 = vst [vmem:[#allocation51_spill] sm:$0xff] %v8266_v60 }
 0x56a   :  { %5101 = vrcp.f32 %v2020_v4  ;;  %12459 = vst [vmem:[#allocation50_spill] sm:$0xff] %v8263_v6  ;;  %v8278_v4 = vld [vmem:[#allocation9 + $0x310] sm:$0xff] }
 0x56b   :  { %12464 = vst [vmem:[#allocation55_spill] sm:$0xff] %v8278_v4 }
 0x574   :  { %v5096_v31 = vpop.eup %5095 }
 0x575   :  { %v5098_v3 = vpop.eup %5097 }
 0x576   :  { %v5100_v29 = vpop.eup %5099  ;;  %v2024_v37 = vmul.f32 %v5098_v3, %v5096_v31  ;;  %v8269_v31 = vld [vmem:[#allocation9 + $0x308] sm:$0xff]  ;;  %v8272_v3 = vld [vmem:[#allocation9 + $0x318] sm:$0xff] }
 0x577   :  { %v2023_v63 = vmul.f32 %v5100_v29, %v7759_v22  ;;  %v5102_v33 = vpop.eup %5101  ;;  %v8245_v22 = vld [vmem:[#allocation9 + $0x388] sm:$0xff]  ;;  %12461 = vst [vmem:[#allocation52_spill] sm:$0xff] %v8269_v31  ;;  %12462 = vst [vmem:[#allocation53_spill] sm:$0xff] %v8272_v3  ;;  %v8275_v29 = vld [vmem:[#allocation9 + $0x300] sm:$0xff] }
 0x578   :  { %12453 = vst [vmem:[#allocation44_spill] sm:$0xff] %v8245_v22  ;;  %12463 = vst [vmem:[#allocation54_spill] sm:$0xff] %v8275_v29 }
 0x579   :  { %v8232_v36 = vadd.f32 %v2024_v37, %v2023_v63  ;;  %v8281_v63 = vld [vmem:[#allocation9 + $0x2c8] sm:$0xff]  ;;  %v8284_v37 = vld [vmem:[#allocation9 + $0x2d8] sm:$0xff] }
 0x57a   :  { %12465 = vst [vmem:[#allocation56_spill] sm:$0xff] %v8281_v63  ;;  %12466 = vst [vmem:[#allocation57_spill] sm:$0xff] %v8284_v37 }
 0x57b   :  { %12450 = vst [vmem:[#allocation41_spill] sm:$0xff] %v8232_v36  ;;  %5103 = vtanh.f32 %v8232_v36 }
 0x588   :  { %v5104_v59 = vpop.eup %5103 }
 0x589   :  { %v8235_v35 = vmul.f32 %v5104_v59, %v5102_v33  ;;  %v8287_v33 = vld [vmem:[#allocation9 + $0x2c0] sm:$0xff]  ;;  %v8290_v59 = vld [vmem:[#allocation9 + $0x2d0] sm:$0xff] }
 0x58a   :  { %12467 = vst [vmem:[#allocation58_spill] sm:$0xff] %v8287_v33  ;;  %12468 = vst [vmem:[#allocation59_spill] sm:$0xff] %v8290_v59 }
 0x58b   :  { %2093 = vmatmul.mubr.f32.vlgmr.msra.gmra.mxu0 %v8235_v35  ;;  %2164 = vmatmul.mubr.f32.vlgmr.msra.gmra.mxu1 %v8235_v35 }
 0x58c   :  { %2200 = vmatpush1.msra.mxu0 %v8239_v32  ;;  %2271 = vmatpush1.msra.mxu1 %v8242_v62 }
 0x58d   :  { %2201 = vmatprep.subr.mxu0 %v8245_v22  ;;  %2272 = vmatprep.subr.mxu1 %v8248_v57 }
 0x58e   :  { %2202 = vmatpush1.msra.mxu0 %v8251_v61  ;;  %2273 = vmatpush1.msra.mxu1 %v8254_v38 }
 0x58f   :  { %2203 = vmatprep.subr.mxu0 %v8257_v53  ;;  %2274 = vmatprep.subr.mxu1 %v8260_v0 }
 0x590   :  { %2204 = vmatpush1.msra.mxu0 %v8263_v6  ;;  %2275 = vmatpush1.msra.mxu1 %v8266_v60 }
 0x591   :  { %2205 = vmatprep.subr.mxu0 %v8269_v31  ;;  %2276 = vmatprep.subr.mxu1 %v8272_v3  ;;  %v1960_v3 = vpop.f32.mrf.mxu1 }
 0x592   :  { %2206 = vmatpush1.msra.mxu0 %v8275_v29  ;;  %2277 = vmatpush1.msra.mxu1 %v8278_v4  ;;  %v8293_v29 = vld [vmem:[#allocation9 + $0x288] sm:$0xff]  ;;  %v8296_v4 = vld [vmem:[#allocation9 + $0x298] sm:$0xff] }
 0x593   :  { %2207 = vmatprep.subr.mxu0 %v8281_v63  ;;  %2278 = vmatprep.subr.mxu1 %v8284_v37  ;;  %12469 = vst [vmem:[#allocation60_spill] sm:$0xff] %v8293_v29  ;;  %12470 = vst [vmem:[#allocation61_spill] sm:$0xff] %v8296_v4  ;;  %v8299_v63 = vld [vmem:[#allocation9 + $0x280] sm:$0xff]  ;;  %v8302_v37 = vld [vmem:[#allocation9 + $0x290] sm:$0xff]  ;;  %v1962_v60 = vpop.f32.mrf.mxu1 }
 0x594   :  { %2208 = vmatpush1.msra.mxu0 %v8287_v33  ;;  %2279 = vmatpush1.msra.mxu1 %v8290_v59  ;;  %12471 = vst [vmem:[#allocation62_spill] sm:$0xff] %v8299_v63  ;;  %12472 = vst [vmem:[#allocation63_spill] sm:$0xff] %v8302_v37  ;;  %v8305_v33 = vld [vmem:[#allocation9 + $0x248] sm:$0xff]  ;;  %v8308_v59 = vld [vmem:[#allocation9 + $0x258] sm:$0xff] }
 0x595   :  { %2209 = vmatprep.subr.mxu0 %v8293_v29  ;;  %2280 = vmatprep.subr.mxu1 %v8296_v4  ;;  %12473 = vst [vmem:[#allocation64_spill] sm:$0xff] %v8305_v33  ;;  %12474 = vst [vmem:[#allocation65_spill] sm:$0xff] %v8308_v59  ;;  %v8311_v29 = vld [vmem:[#allocation9 + $0x240] sm:$0xff]  ;;  %v8314_v4 = vld [vmem:[#allocation9 + $0x250] sm:$0xff] }
 0x596   :  { %2210 = vmatpush1.msra.mxu0 %v8299_v63  ;;  %2281 = vmatpush1.msra.mxu1 %v8302_v37  ;;  %12475 = vst [vmem:[#allocation66_spill] sm:$0xff] %v8311_v29  ;;  %12476 = vst [vmem:[#allocation67_spill] sm:$0xff] %v8314_v4  ;;  %v8317_v63 = vld [vmem:[#allocation9 + $0x208] sm:$0xff]  ;;  %v8320_v37 = vld [vmem:[#allocation9 + $0x218] sm:$0xff] }
 0x597   :  { %2211 = vmatprep.subr.mxu0 %v8305_v33  ;;  %2282 = vmatprep.subr.mxu1 %v8308_v59  ;;  %12477 = vst [vmem:[#allocation68_spill] sm:$0xff] %v8317_v63  ;;  %12478 = vst [vmem:[#allocation69_spill] sm:$0xff] %v8320_v37  ;;  %v8323_v33 = vld [vmem:[#allocation9 + $0x200] sm:$0xff]  ;;  %v8326_v59 = vld [vmem:[#allocation9 + $0x210] sm:$0xff] }
 0x598   :  { %2212 = vmatpush1.msra.mxu0 %v8311_v29  ;;  %2283 = vmatpush1.msra.mxu1 %v8314_v4  ;;  %12479 = vst [vmem:[#allocation70_spill] sm:$0xff] %v8323_v33  ;;  %12480 = vst [vmem:[#allocation71_spill] sm:$0xff] %v8326_v59  ;;  %v8329_v29 = vld [vmem:[#allocation9 + $0x1c8] sm:$0xff]  ;;  %v8332_v4 = vld [vmem:[#allocation9 + $0x1d8] sm:$0xff] }
 0x599   :  { %2213 = vmatprep.subr.mxu0 %v8317_v63  ;;  %2284 = vmatprep.subr.mxu1 %v8320_v37  ;;  %12481 = vst [vmem:[#allocation72_spill] sm:$0xff] %v8329_v29  ;;  %12482 = vst [vmem:[#allocation73_spill] sm:$0xff] %v8332_v4  ;;  %v8335_v63 = vld [vmem:[#allocation9 + $0x1c0] sm:$0xff]  ;;  %v8338_v37 = vld [vmem:[#allocation9 + $0x1d0] sm:$0xff] }
 0x59a   :  { %2214 = vmatpush1.msra.mxu0 %v8323_v33  ;;  %2285 = vmatpush1.msra.mxu1 %v8326_v59  ;;  %12483 = vst [vmem:[#allocation74_spill] sm:$0xff] %v8335_v63  ;;  %12484 = vst [vmem:[#allocation75_spill] sm:$0xff] %v8338_v37  ;;  %v8341_v33 = vld [vmem:[#allocation9 + $0x188] sm:$0xff]  ;;  %v8344_v59 = vld [vmem:[#allocation9 + $0x198] sm:$0xff] }
 0x59b   :  { %2215 = vmatprep.subr.mxu0 %v8329_v29  ;;  %2286 = vmatprep.subr.mxu1 %v8332_v4  ;;  %12485 = vst [vmem:[#allocation76_spill] sm:$0xff] %v8341_v33  ;;  %12486 = vst [vmem:[#allocation77_spill] sm:$0xff] %v8344_v59  ;;  %v8347_v29 = vld [vmem:[#allocation9 + $0x180] sm:$0xff]  ;;  %v8350_v4 = vld [vmem:[#allocation9 + $0x190] sm:$0xff] }
 0x59c   :  { %2216 = vmatpush1.msra.mxu0 %v8335_v63  ;;  %2287 = vmatpush1.msra.mxu1 %v8338_v37  ;;  %12487 = vst [vmem:[#allocation78_spill] sm:$0xff] %v8347_v29  ;;  %12488 = vst [vmem:[#allocation79_spill] sm:$0xff] %v8350_v4  ;;  %v8353_v63 = vld [vmem:[#allocation9 + $0x148] sm:$0xff]  ;;  %v8356_v37 = vld [vmem:[#allocation9 + $0x158] sm:$0xff] }
 0x59d   :  { %2217 = vmatprep.subr.mxu0 %v8341_v33  ;;  %2288 = vmatprep.subr.mxu1 %v8344_v59  ;;  %12489 = vst [vmem:[#allocation80_spill] sm:$0xff] %v8353_v63  ;;  %12490 = vst [vmem:[#allocation81_spill] sm:$0xff] %v8356_v37  ;;  %v8359_v33 = vld [vmem:[#allocation9 + $0x140] sm:$0xff]  ;;  %v8362_v59 = vld [vmem:[#allocation9 + $0x150] sm:$0xff] }
 0x59e   :  { %2218 = vmatpush1.msra.mxu0 %v8347_v29  ;;  %2289 = vmatpush1.msra.mxu1 %v8350_v4  ;;  %12491 = vst [vmem:[#allocation82_spill] sm:$0xff] %v8359_v33  ;;  %12492 = vst [vmem:[#allocation83_spill] sm:$0xff] %v8362_v59  ;;  %v8365_v29 = vld [vmem:[#allocation9 + $0x108] sm:$0xff]  ;;  %v8368_v4 = vld [vmem:[#allocation9 + $0x118] sm:$0xff] }
 0x59f   :  { %2219 = vmatprep.subr.mxu0 %v8353_v63  ;;  %2290 = vmatprep.subr.mxu1 %v8356_v37  ;;  %12493 = vst [vmem:[#allocation84_spill] sm:$0xff] %v8365_v29  ;;  %12494 = vst [vmem:[#allocation85_spill] sm:$0xff] %v8368_v4  ;;  %v8371_v63 = vld [vmem:[#allocation9 + $0x100] sm:$0xff]  ;;  %v8374_v37 = vld [vmem:[#allocation9 + $0x110] sm:$0xff] }
 0x5a0   :  { %2220 = vmatpush1.msra.mxu0 %v8359_v33  ;;  %2291 = vmatpush1.msra.mxu1 %v8362_v59  ;;  %12495 = vst [vmem:[#allocation86_spill] sm:$0xff] %v8371_v63  ;;  %12496 = vst [vmem:[#allocation87_spill] sm:$0xff] %v8374_v37  ;;  %v8377_v33 = vld [vmem:[#allocation9 + $0xc8] sm:$0xff]  ;;  %v8380_v59 = vld [vmem:[#allocation9 + $0xd8] sm:$0xff] }
 0x5a1   :  { %2221 = vmatprep.subr.mxu0 %v8365_v29  ;;  %2292 = vmatprep.subr.mxu1 %v8368_v4  ;;  %12497 = vst [vmem:[#allocation88_spill] sm:$0xff] %v8377_v33  ;;  %12498 = vst [vmem:[#allocation89_spill] sm:$0xff] %v8380_v59  ;;  %v8383_v29 = vld [vmem:[#allocation9 + $0xc0] sm:$0xff]  ;;  %v8386_v4 = vld [vmem:[#allocation9 + $0xd0] sm:$0xff] }
 0x5a2   :  { %2222 = vmatpush1.msra.mxu0 %v8371_v63  ;;  %2293 = vmatpush1.msra.mxu1 %v8374_v37  ;;  %12499 = vst [vmem:[#allocation90_spill] sm:$0xff] %v8383_v29  ;;  %12500 = vst [vmem:[#allocation91_spill] sm:$0xff] %v8386_v4  ;;  %v8389_v63 = vld [vmem:[#allocation9 + $0x88] sm:$0xff]  ;;  %v8392_v37 = vld [vmem:[#allocation9 + $0x98] sm:$0xff] }
 0x5a3   :  { %2223 = vmatprep.subr.mxu0 %v8377_v33  ;;  %2294 = vmatprep.subr.mxu1 %v8380_v59  ;;  %12501 = vst [vmem:[#allocation92_spill] sm:$0xff] %v8389_v63  ;;  %12502 = vst [vmem:[#allocation93_spill] sm:$0xff] %v8392_v37  ;;  %v8395_v33 = vld [vmem:[#allocation9 + $0x80] sm:$0xff]  ;;  %v8398_v59 = vld [vmem:[#allocation9 + $0x90] sm:$0xff] }
 0x5a4   :  { %2224 = vmatpush1.msra.mxu0 %v8383_v29  ;;  %2295 = vmatpush1.msra.mxu1 %v8386_v4  ;;  %12503 = vst [vmem:[#allocation94_spill] sm:$0xff] %v8395_v33  ;;  %12504 = vst [vmem:[#allocation95_spill] sm:$0xff] %v8398_v59  ;;  %v8401_v29 = vld [vmem:[#allocation9 + $0x48] sm:$0xff]  ;;  %v8404_v4 = vld [vmem:[#allocation9 + $0x58] sm:$0xff] }
 0x5a5   :  { %2225 = vmatprep.subr.mxu0 %v8389_v63  ;;  %2296 = vmatprep.subr.mxu1 %v8392_v37  ;;  %12505 = vst [vmem:[#allocation96_spill] sm:$0xff] %v8401_v29  ;;  %12506 = vst [vmem:[#allocation97_spill] sm:$0xff] %v8404_v4  ;;  %v8407_v63 = vld [vmem:[#allocation9 + $0x40] sm:$0xff]  ;;  %v8410_v37 = vld [vmem:[#allocation9 + $0x50] sm:$0xff] }
 0x5a6   :  { %2226 = vmatpush1.msra.mxu0 %v8395_v33  ;;  %2297 = vmatpush1.msra.mxu1 %v8398_v59  ;;  %12507 = vst [vmem:[#allocation98_spill] sm:$0xff] %v8407_v63  ;;  %12508 = vst [vmem:[#allocation99_spill] sm:$0xff] %v8410_v37  ;;  %v8413_v33 = vld [vmem:[#allocation9 + $0x8] sm:$0xff]  ;;  %v8416_v59 = vld [vmem:[#allocation9 + $0x18] sm:$0xff] }
 0x5a7   :  { %2227 = vmatprep.subr.mxu0 %v8401_v29  ;;  %2298 = vmatprep.subr.mxu1 %v8404_v4  ;;  %12509 = vst [vmem:[#allocation100_spill] sm:$0xff] %v8413_v33  ;;  %12510 = vst [vmem:[#allocation101_spill] sm:$0xff] %v8416_v59  ;;  %v8419_v29 = vld [vmem:[#allocation9] sm:$0xff]  ;;  %v8422_v4 = vld [vmem:[#allocation9 + $0x10] sm:$0xff] }
 0x5a8   :  { %2228 = vmatpush1.msra.mxu0 %v8407_v63  ;;  %2299 = vmatpush1.msra.mxu1 %v8410_v37  ;;  %12511 = vst [vmem:[#allocation102_spill] sm:$0xff] %v8419_v29  ;;  %12512 = vst [vmem:[#allocation103_spill] sm:$0xff] %v8422_v4  ;;  %v8425_v63 = vld [vmem:[#allocation9 + $0x7c8] sm:$0xff]  ;;  %v8428_v37 = vld [vmem:[#allocation9 + $0x7d8] sm:$0xff] }
 0x5a9   :  { %2229 = vmatprep.subr.mxu0 %v8413_v33  ;;  %2300 = vmatprep.subr.mxu1 %v8416_v59  ;;  %12513 = vst [vmem:[#allocation104_spill] sm:$0xff] %v8425_v63  ;;  %12514 = vst [vmem:[#allocation105_spill] sm:$0xff] %v8428_v37  ;;  %v8431_v33 = vld [vmem:[#allocation9 + $0x7c0] sm:$0xff]  ;;  %v8434_v59 = vld [vmem:[#allocation9 + $0x7d0] sm:$0xff] }
 0x5aa   :  { %2230 = vmatpush1.msra.mxu0 %v8419_v29  ;;  %2301 = vmatpush1.msra.mxu1 %v8422_v4  ;;  %12515 = vst [vmem:[#allocation106_spill] sm:$0xff] %v8431_v33  ;;  %12516 = vst [vmem:[#allocation107_spill] sm:$0xff] %v8434_v59  ;;  %v8437_v29 = vld [vmem:[#allocation9 + $0x788] sm:$0xff]  ;;  %v8440_v4 = vld [vmem:[#allocation9 + $0x798] sm:$0xff] }
 0x5ab   :  { %2231 = vmatprep.subr.mxu0 %v8425_v63  ;;  %2302 = vmatprep.subr.mxu1 %v8428_v37  ;;  %12517 = vst [vmem:[#allocation108_spill] sm:$0xff] %v8437_v29  ;;  %12518 = vst [vmem:[#allocation109_spill] sm:$0xff] %v8440_v4  ;;  %v8443_v63 = vld [vmem:[#allocation9 + $0x780] sm:$0xff]  ;;  %v8446_v37 = vld [vmem:[#allocation9 + $0x790] sm:$0xff] }
 0x5ac   :  { %2232 = vmatpush2.msra.mxu0 %v8431_v33  ;;  %2303 = vmatpush2.msra.mxu1 %v8434_v59  ;;  %12519 = vst [vmem:[#allocation110_spill] sm:$0xff] %v8443_v63  ;;  %12520 = vst [vmem:[#allocation111_spill] sm:$0xff] %v8446_v37  ;;  %v8449_v33 = vld [vmem:[#allocation9 + $0x748] sm:$0xff]  ;;  %v8452_v59 = vld [vmem:[#allocation9 + $0x758] sm:$0xff] }
 0x5ad   :  { %2233 = vmatprep.subr.mxu0 %v8437_v29  ;;  %2304 = vmatprep.subr.mxu1 %v8440_v4  ;;  %12521 = vst [vmem:[#allocation112_spill] sm:$0xff] %v8449_v33  ;;  %12522 = vst [vmem:[#allocation113_spill] sm:$0xff] %v8452_v59  ;;  %v8455_v29 = vld [vmem:[#allocation9 + $0x740] sm:$0xff]  ;;  %v8458_v4 = vld [vmem:[#allocation9 + $0x750] sm:$0xff] }
 0x5ae   :  { %2234 = vmatpush2.msra.mxu0 %v8443_v63  ;;  %2305 = vmatpush2.msra.mxu1 %v8446_v37  ;;  %12523 = vst [vmem:[#allocation114_spill] sm:$0xff] %v8455_v29  ;;  %12524 = vst [vmem:[#allocation115_spill] sm:$0xff] %v8458_v4  ;;  %v8461_v63 = vld [vmem:[#allocation9 + $0x708] sm:$0xff]  ;;  %v8464_v37 = vld [vmem:[#allocation9 + $0x718] sm:$0xff] }
 0x5af   :  { %2235 = vmatprep.subr.mxu0 %v8449_v33  ;;  %2306 = vmatprep.subr.mxu1 %v8452_v59  ;;  %12525 = vst [vmem:[#allocation116_spill] sm:$0xff] %v8461_v63  ;;  %12526 = vst [vmem:[#allocation117_spill] sm:$0xff] %v8464_v37  ;;  %v8467_v33 = vld [vmem:[#allocation9 + $0x700] sm:$0xff]  ;;  %v8470_v59 = vld [vmem:[#allocation9 + $0x710] sm:$0xff] }
 0x5b0   :  { %2236 = vmatpush2.msra.mxu0 %v8455_v29  ;;  %2307 = vmatpush2.msra.mxu1 %v8458_v4  ;;  %12527 = vst [vmem:[#allocation118_spill] sm:$0xff] %v8467_v33  ;;  %12528 = vst [vmem:[#allocation119_spill] sm:$0xff] %v8470_v59  ;;  %v8473_v29 = vld [vmem:[#allocation9 + $0x6c8] sm:$0xff]  ;;  %v8476_v4 = vld [vmem:[#allocation9 + $0x6d8] sm:$0xff] }
 0x5b1   :  { %2237 = vmatprep.subr.mxu0 %v8461_v63  ;;  %2308 = vmatprep.subr.mxu1 %v8464_v37  ;;  %12529 = vst [vmem:[#allocation120_spill] sm:$0xff] %v8473_v29  ;;  %12530 = vst [vmem:[#allocation121_spill] sm:$0xff] %v8476_v4  ;;  %v8479_v63 = vld [vmem:[#allocation9 + $0x6c0] sm:$0xff]  ;;  %v8482_v37 = vld [vmem:[#allocation9 + $0x6d0] sm:$0xff] }
 0x5b2   :  { %2238 = vmatpush2.msra.mxu0 %v8467_v33  ;;  %2309 = vmatpush2.msra.mxu1 %v8470_v59  ;;  %12531 = vst [vmem:[#allocation122_spill] sm:$0xff] %v8479_v63  ;;  %12532 = vst [vmem:[#allocation123_spill] sm:$0xff] %v8482_v37  ;;  %v8485_v33 = vld [vmem:[#allocation9 + $0x688] sm:$0xff]  ;;  %v8488_v59 = vld [vmem:[#allocation9 + $0x698] sm:$0xff] }
 0x5b3   :  { %2239 = vmatprep.subr.mxu0 %v8473_v29  ;;  %2310 = vmatprep.subr.mxu1 %v8476_v4  ;;  %12533 = vst [vmem:[#allocation124_spill] sm:$0xff] %v8485_v33  ;;  %12534 = vst [vmem:[#allocation125_spill] sm:$0xff] %v8488_v59  ;;  %v8491_v29 = vld [vmem:[#allocation9 + $0x680] sm:$0xff]  ;;  %v8494_v4 = vld [vmem:[#allocation9 + $0x690] sm:$0xff] }
 0x5b4   :  { %2240 = vmatpush2.msra.mxu0 %v8479_v63  ;;  %2311 = vmatpush2.msra.mxu1 %v8482_v37  ;;  %12535 = vst [vmem:[#allocation126_spill] sm:$0xff] %v8491_v29  ;;  %12536 = vst [vmem:[#allocation127_spill] sm:$0xff] %v8494_v4  ;;  %v8497_v63 = vld [vmem:[#allocation9 + $0x648] sm:$0xff]  ;;  %v8500_v37 = vld [vmem:[#allocation9 + $0x658] sm:$0xff] }
 0x5b5   :  { %2241 = vmatprep.subr.mxu0 %v8485_v33  ;;  %2312 = vmatprep.subr.mxu1 %v8488_v59  ;;  %12537 = vst [vmem:[#allocation128_spill] sm:$0xff] %v8497_v63  ;;  %12538 = vst [vmem:[#allocation129_spill] sm:$0xff] %v8500_v37  ;;  %v8503_v33 = vld [vmem:[#allocation9 + $0x640] sm:$0xff]  ;;  %v8506_v59 = vld [vmem:[#allocation9 + $0x650] sm:$0xff] }
 0x5b6   :  { %2242 = vmatpush2.msra.mxu0 %v8491_v29  ;;  %2313 = vmatpush2.msra.mxu1 %v8494_v4  ;;  %12539 = vst [vmem:[#allocation130_spill] sm:$0xff] %v8503_v33  ;;  %12540 = vst [vmem:[#allocation131_spill] sm:$0xff] %v8506_v59  ;;  %v8509_v29 = vld [vmem:[#allocation9 + $0x608] sm:$0xff]  ;;  %v8512_v4 = vld [vmem:[#allocation9 + $0x618] sm:$0xff] }
 0x5b7   :  { %2243 = vmatprep.subr.mxu0 %v8497_v63  ;;  %2314 = vmatprep.subr.mxu1 %v8500_v37  ;;  %12541 = vst [vmem:[#allocation132_spill] sm:$0xff] %v8509_v29  ;;  %12542 = vst [vmem:[#allocation133_spill] sm:$0xff] %v8512_v4  ;;  %v8515_v63 = vld [vmem:[#allocation9 + $0x600] sm:$0xff]  ;;  %v8518_v37 = vld [vmem:[#allocation9 + $0x610] sm:$0xff] }
 0x5b8   :  { %2244 = vmatpush2.msra.mxu0 %v8503_v33  ;;  %2315 = vmatpush2.msra.mxu1 %v8506_v59  ;;  %12543 = vst [vmem:[#allocation134_spill] sm:$0xff] %v8515_v63  ;;  %12544 = vst [vmem:[#allocation135_spill] sm:$0xff] %v8518_v37  ;;  %v8521_v33 = vld [vmem:[#allocation9 + $0x5c8] sm:$0xff]  ;;  %v8524_v59 = vld [vmem:[#allocation9 + $0x5d8] sm:$0xff] }
 0x5b9   :  { %2245 = vmatprep.subr.mxu0 %v8509_v29  ;;  %2316 = vmatprep.subr.mxu1 %v8512_v4  ;;  %12545 = vst [vmem:[#allocation136_spill] sm:$0xff] %v8521_v33  ;;  %12546 = vst [vmem:[#allocation137_spill] sm:$0xff] %v8524_v59  ;;  %v8527_v29 = vld [vmem:[#allocation9 + $0x5c0] sm:$0xff]  ;;  %v8530_v4 = vld [vmem:[#allocation9 + $0x5d0] sm:$0xff] }
 0x5ba   :  { %2246 = vmatpush2.msra.mxu0 %v8515_v63  ;;  %2317 = vmatpush2.msra.mxu1 %v8518_v37  ;;  %12547 = vst [vmem:[#allocation138_spill] sm:$0xff] %v8527_v29  ;;  %12548 = vst [vmem:[#allocation139_spill] sm:$0xff] %v8530_v4  ;;  %v8533_v63 = vld [vmem:[#allocation9 + $0x588] sm:$0xff]  ;;  %v8536_v37 = vld [vmem:[#allocation9 + $0x598] sm:$0xff] }
 0x5bb   :  { %2247 = vmatprep.subr.mxu0 %v8521_v33  ;;  %2318 = vmatprep.subr.mxu1 %v8524_v59  ;;  %12549 = vst [vmem:[#allocation140_spill] sm:$0xff] %v8533_v63  ;;  %12550 = vst [vmem:[#allocation141_spill] sm:$0xff] %v8536_v37  ;;  %v8539_v33 = vld [vmem:[#allocation9 + $0x580] sm:$0xff]  ;;  %v8542_v59 = vld [vmem:[#allocation9 + $0x590] sm:$0xff] }
 0x5bc   :  { %2248 = vmatpush2.msra.mxu0 %v8527_v29  ;;  %2319 = vmatpush2.msra.mxu1 %v8530_v4  ;;  %12551 = vst [vmem:[#allocation142_spill] sm:$0xff] %v8539_v33  ;;  %12552 = vst [vmem:[#allocation143_spill] sm:$0xff] %v8542_v59  ;;  %v8545_v29 = vld [vmem:[#allocation9 + $0x548] sm:$0xff]  ;;  %v8548_v4 = vld [vmem:[#allocation9 + $0x558] sm:$0xff] }
 0x5bd   :  { %2249 = vmatprep.subr.mxu0 %v8533_v63  ;;  %2320 = vmatprep.subr.mxu1 %v8536_v37  ;;  %12553 = vst [vmem:[#allocation144_spill] sm:$0xff] %v8545_v29  ;;  %12554 = vst [vmem:[#allocation145_spill] sm:$0xff] %v8548_v4  ;;  %v8551_v63 = vld [vmem:[#allocation9 + $0x540] sm:$0xff]  ;;  %v8554_v37 = vld [vmem:[#allocation9 + $0x550] sm:$0xff] }
 0x5be   :  { %2250 = vmatpush2.msra.mxu0 %v8539_v33  ;;  %2321 = vmatpush2.msra.mxu1 %v8542_v59  ;;  %12555 = vst [vmem:[#allocation146_spill] sm:$0xff] %v8551_v63  ;;  %12556 = vst [vmem:[#allocation147_spill] sm:$0xff] %v8554_v37  ;;  %v8557_v33 = vld [vmem:[#allocation9 + $0x508] sm:$0xff]  ;;  %v8560_v59 = vld [vmem:[#allocation9 + $0x518] sm:$0xff] }
 0x5bf   :  { %2251 = vmatprep.subr.mxu0 %v8545_v29  ;;  %2322 = vmatprep.subr.mxu1 %v8548_v4  ;;  %12557 = vst [vmem:[#allocation148_spill] sm:$0xff] %v8557_v33  ;;  %12558 = vst [vmem:[#allocation149_spill] sm:$0xff] %v8560_v59  ;;  %v8563_v29 = vld [vmem:[#allocation9 + $0x500] sm:$0xff]  ;;  %v8566_v4 = vld [vmem:[#allocation9 + $0x510] sm:$0xff] }
 0x5c0   :  { %2252 = vmatpush2.msra.mxu0 %v8551_v63  ;;  %2323 = vmatpush2.msra.mxu1 %v8554_v37  ;;  %12559 = vst [vmem:[#allocation150_spill] sm:$0xff] %v8563_v29  ;;  %12560 = vst [vmem:[#allocation151_spill] sm:$0xff] %v8566_v4  ;;  %v8569_v63 = vld [vmem:[#allocation9 + $0x4c8] sm:$0xff]  ;;  %v8572_v37 = vld [vmem:[#allocation9 + $0x4d8] sm:$0xff] }
 0x5c1   :  { %2253 = vmatprep.subr.mxu0 %v8557_v33  ;;  %2324 = vmatprep.subr.mxu1 %v8560_v59  ;;  %12561 = vst [vmem:[#allocation152_spill] sm:$0xff] %v8569_v63  ;;  %12562 = vst [vmem:[#allocation153_spill] sm:$0xff] %v8572_v37  ;;  %v8575_v33 = vld [vmem:[#allocation9 + $0x4c0] sm:$0xff]  ;;  %v8578_v59 = vld [vmem:[#allocation9 + $0x4d0] sm:$0xff] }
 0x5c2   :  { %2254 = vmatpush2.msra.mxu0 %v8563_v29  ;;  %2325 = vmatpush2.msra.mxu1 %v8566_v4  ;;  %12563 = vst [vmem:[#allocation154_spill] sm:$0xff] %v8575_v33  ;;  %12564 = vst [vmem:[#allocation155_spill] sm:$0xff] %v8578_v59  ;;  %v8581_v29 = vld [vmem:[#allocation9 + $0x488] sm:$0xff]  ;;  %v8584_v4 = vld [vmem:[#allocation9 + $0x498] sm:$0xff] }
 0x5c3   :  { %2255 = vmatprep.subr.mxu0 %v8569_v63  ;;  %2326 = vmatprep.subr.mxu1 %v8572_v37  ;;  %12565 = vst [vmem:[#allocation156_spill] sm:$0xff] %v8581_v29  ;;  %12566 = vst [vmem:[#allocation157_spill] sm:$0xff] %v8584_v4  ;;  %v8587_v63 = vld [vmem:[#allocation9 + $0x480] sm:$0xff]  ;;  %v8590_v37 = vld [vmem:[#allocation9 + $0x490] sm:$0xff] }
 0x5c4   :  { %2256 = vmatpush2.msra.mxu0 %v8575_v33  ;;  %2327 = vmatpush2.msra.mxu1 %v8578_v59  ;;  %12567 = vst [vmem:[#allocation158_spill] sm:$0xff] %v8587_v63  ;;  %12568 = vst [vmem:[#allocation159_spill] sm:$0xff] %v8590_v37  ;;  %v8593_v33 = vld [vmem:[#allocation9 + $0x448] sm:$0xff]  ;;  %v8596_v59 = vld [vmem:[#allocation9 + $0x458] sm:$0xff] }
 0x5c5   :  { %2257 = vmatprep.subr.mxu0 %v8581_v29  ;;  %2328 = vmatprep.subr.mxu1 %v8584_v4  ;;  %12569 = vst [vmem:[#allocation160_spill] sm:$0xff] %v8593_v33  ;;  %12570 = vst [vmem:[#allocation161_spill] sm:$0xff] %v8596_v59  ;;  %v8599_v29 = vld [vmem:[#allocation9 + $0x440] sm:$0xff]  ;;  %v8602_v4 = vld [vmem:[#allocation9 + $0x450] sm:$0xff] }
 0x5c6   :  { %2258 = vmatpush2.msra.mxu0 %v8587_v63  ;;  %2329 = vmatpush2.msra.mxu1 %v8590_v37  ;;  %12571 = vst [vmem:[#allocation162_spill] sm:$0xff] %v8599_v29  ;;  %12572 = vst [vmem:[#allocation163_spill] sm:$0xff] %v8602_v4  ;;  %v8605_v63 = vld [vmem:[#allocation9 + $0x408] sm:$0xff]  ;;  %v8608_v37 = vld [vmem:[#allocation9 + $0x418] sm:$0xff] }
 0x5c7   :  { %2259 = vmatprep.subr.mxu0 %v8593_v33  ;;  %2330 = vmatprep.subr.mxu1 %v8596_v59  ;;  %12573 = vst [vmem:[#allocation164_spill] sm:$0xff] %v8605_v63  ;;  %12574 = vst [vmem:[#allocation165_spill] sm:$0xff] %v8608_v37  ;;  %v8611_v33 = vld [vmem:[#allocation9 + $0x400] sm:$0xff]  ;;  %v8614_v59 = vld [vmem:[#allocation9 + $0x410] sm:$0xff] }
 0x5c8   :  { %2260 = vmatpush2.msra.mxu0 %v8599_v29  ;;  %2331 = vmatpush2.msra.mxu1 %v8602_v4  ;;  %12575 = vst [vmem:[#allocation166_spill] sm:$0xff] %v8611_v33  ;;  %12576 = vst [vmem:[#allocation167_spill] sm:$0xff] %v8614_v59  ;;  %v8617_v29 = vld [vmem:[#allocation9 + $0x3e8] sm:$0xff]  ;;  %v8620_v4 = vld [vmem:[#allocation9 + $0x3f8] sm:$0xff] }
 0x5c9   :  { %2261 = vmatprep.subr.mxu0 %v8605_v63  ;;  %2332 = vmatprep.subr.mxu1 %v8608_v37  ;;  %12577 = vst [vmem:[#allocation168_spill] sm:$0xff] %v8617_v29  ;;  %12578 = vst [vmem:[#allocation169_spill] sm:$0xff] %v8620_v4  ;;  %v1889_v63 = vpop.f32.mrf.mxu0 }
 0x5ca   :  { %2262 = vmatpush2.msra.mxu0 %v8611_v33  ;;  %2333 = vmatpush2.msra.mxu1 %v8614_v59 }
 0x5cb   :  { %2341 = vmatprep.subr.mxu0 %v8617_v29  ;;  %2412 = vmatprep.subr.mxu1 %v8620_v4  ;;  %v1891_v31 = vpop.f32.mrf.mxu0 }
 0x64b   :  { %v2094_v37 = vpop.f32.mrf.mxu0  ;;  %v2165_v53 = vpop.f32.mrf.mxu1 }
 0x64c   :  { %v2095_v6 = vadd.f32 %v2094_v37, %v1889_v63  ;;  %v2166_v62 = vadd.f32 %v2165_v53, %v1960_v3  ;;  %v8642_v3 = vld [vmem:[#allocation9 + $0x3b8] sm:$0xff] }
 0x64d   :  { %v2096_v0 = vpop.f32.mrf.mxu0  ;;  %v2167_v57 = vpop.f32.mrf.mxu1 }
 0x64e   :  { %v2170_v33 = vadd.f32 %v2095_v6, %v7280_v1  ;;  %v2097_v38 = vadd.f32 %v2096_v0, %v1891_v31  ;;  %v2168_v22 = vadd.f32 %v2167_v57, %v1962_v60  ;;  %v2172_v63 = vadd.f32 %v2166_v62, %v7295_v56  ;;  %v8639_v60 = vld [vmem:[#allocation9 + $0x3a8] sm:$0xff] }
 0x650   :  { %v4928_v59 = vmul.f32 -1.442695, %v2170_v33  ;;  %v2171_v61 = vadd.f32 %v2097_v38, %v7284_v2  ;;  %v2173_v4 = vadd.f32 %v2168_v22, %v7290_v55  ;;  %v8648_v33 = vld [vmem:[#allocation9 + $0x3b0] sm:$0xff] }
 0x652   :  { %5105 = vpow2.f32 %v4928_v59  ;;  %v4929_v29 = vmul.f32 -1.442695, %v2171_v61  ;;  %v4930_v32 = vmul.f32 -1.442695, %v2173_v4  ;;  %v8645_v4 = vld [vmem:[#allocation9 + $0x3a0] sm:$0xff]  ;;  %v8651_v59 = vld [vmem:[#allocation9 + $0x368] sm:$0xff] }
 0x654   :  { %5107 = vpow2.f32 %v4929_v29 }
 0x655   :  { %5109 = vpow2.f32 %v4930_v32 }
 0x65f   :  { %v5106_v36 = vpop.eup %5105 }
 0x660   :  { %v2177_v37 = vadd.f32 1.0, %v5106_v36 }
 0x661   :  { %v5108_v41 = vpop.eup %5107 }
 0x662   :  { %5111 = vrcp.f32 %v2177_v37  ;;  %v2183_v0 = vadd.f32 1.0, %v5108_v41  ;;  %v5110_v38 = vpop.eup %5109  ;;  %v8633_v41 = vld [vmem:[#allocation9 + $0x3e0] sm:$0xff] }
 0x663   :  { %5113 = vtanh.f32 %v2172_v63  ;;  %v2190_v29 = vadd.f32 1.0, %v5110_v38  ;;  %v8654_v63 = vld [vmem:[#allocation9 + $0x378] sm:$0xff]  ;;  %v8657_v37 = vld [vmem:[#allocation9 + $0x360] sm:$0xff]  ;;  %v8663_v38 = vld [vmem:[#allocation9 + $0x328] sm:$0xff] }
 0x664   :  { %5115 = vrcp.f32 %v2183_v0  ;;  %v8660_v0 = vld [vmem:[#allocation9 + $0x370] sm:$0xff] }
 0x665   :  { %5117 = vrcp.f32 %v2190_v29  ;;  %v8675_v29 = vld [vmem:[#allocation9 + $0x2e8] sm:$0xff] }
 0x666   :  { %12579 = vst [vmem:[#allocation170_spill] sm:$0xff] %v8675_v29 }
 0x66f   :  { %v5112_v6 = vpop.eup %5111 }
 0x670   :  { %v5114_v61 = vpop.eup %5113 }
 0x671   :  { %v5116_v31 = vpop.eup %5115  ;;  %v2194_v57 = vmul.f32 %v5114_v61, %v5112_v6  ;;  %v8666_v6 = vld [vmem:[#allocation9 + $0x338] sm:$0xff]  ;;  %v8669_v61 = vld [vmem:[#allocation9 + $0x320] sm:$0xff] }
 0x672   :  { %v2193_v22 = vmul.f32 %v5116_v31, %v7899_v34  ;;  %v5118_v36 = vpop.eup %5117  ;;  %v8636_v34 = vld [vmem:[#allocation9 + $0x3f0] sm:$0xff] }
 0x673   :  { %v8672_v31 = vld [vmem:[#allocation9 + $0x330] sm:$0xff] }
 0x674   :  { %v8628_v53 = vadd.f32 %v2194_v57, %v2193_v22  ;;  %v8678_v57 = vld [vmem:[#allocation9 + $0x2f8] sm:$0xff]  ;;  %v8681_v22 = vld [vmem:[#allocation9 + $0x2e0] sm:$0xff] }
 0x675   :  { %12580 = vst [vmem:[#allocation171_spill] sm:$0xff] %v8678_v57  ;;  %12581 = vst [vmem:[#allocation172_spill] sm:$0xff] %v8681_v22 }
 0x676   :  { %5119 = vtanh.f32 %v8628_v53 }
 0x683   :  { %v5120_v62 = vpop.eup %5119 }
 0x684   :  { %v2197_v32 = vmul.f32 %v5120_v62, %v5118_v36  ;;  %v8684_v36 = vld [vmem:[#allocation9 + $0x2f0] sm:$0xff]  ;;  %v8687_v62 = vld [vmem:[#allocation9 + $0x2a8] sm:$0xff] }
 0x685   :  { %12582 = vst [vmem:[#allocation173_spill] sm:$0xff] %v8684_v36  ;;  %12583 = vst [vmem:[#allocation174_spill] sm:$0xff] %v8687_v62 }
 0x686   :  { %2198 = vst [vmem:[#allocation3 + $0x2] sm:$0x1] %v2197_v32  ;;  %2263 = vmatprep.mubr.f32.mxu0 %v2197_v32  ;;  %2334 = vmatprep.mubr.f32.mxu1 %v2197_v32 }
 0x687   :  { %2264 = vmatmul.mubr.f32.vlgmr.msra.gmra.mxu0 %v8235_v35  ;;  %2335 = vmatmul.mubr.f32.vlgmr.msra.gmra.mxu1 %v8235_v35 }
 0x688   :  { %2342 = vmatpush1.msra.mxu0 %v8633_v41  ;;  %2413 = vmatpush1.msra.mxu1 %v8636_v34 }
 0x689   :  { %2343 = vmatprep.subr.mxu0 %v8639_v60  ;;  %2405 = vmatprep.mubr.f32.mxu0 %v2197_v32 }
 0x68a   :  { %2414 = vmatprep.subr.mxu1 %v8642_v3  ;;  %2476 = vmatprep.mubr.f32.mxu1 %v2197_v32  ;;  %v8690_v32 = vld [vmem:[#allocation9 + $0x2b8] sm:$0xff] }
 0x68b   :  { %2344 = vmatpush1.msra.mxu0 %v8645_v4  ;;  %2415 = vmatpush1.msra.mxu1 %v8648_v33  ;;  %12584 = vst [vmem:[#allocation175_spill] sm:$0xff] %v8690_v32 }
 0x68c   :  { %2345 = vmatprep.subr.mxu0 %v8651_v59  ;;  %2416 = vmatprep.subr.mxu1 %v8654_v63 }
 0x68d   :  { %2346 = vmatpush1.msra.mxu0 %v8657_v37  ;;  %2417 = vmatpush1.msra.mxu1 %v8660_v0 }
 0x68e   :  { %2347 = vmatprep.subr.mxu0 %v8663_v38  ;;  %2418 = vmatprep.subr.mxu1 %v8666_v6 }
 0x68f   :  { %2348 = vmatpush1.msra.mxu0 %v8669_v61  ;;  %2419 = vmatpush1.msra.mxu1 %v8672_v31 }
 0x690   :  { %2349 = vmatprep.subr.mxu0 %v8675_v29  ;;  %2420 = vmatprep.subr.mxu1 %v8678_v57  ;;  %v8693_v29 = vld [vmem:[#allocation9 + $0x2a0] sm:$0xff]  ;;  %v8696_v57 = vld [vmem:[#allocation9 + $0x2b0] sm:$0xff] }
 0x691   :  { %2350 = vmatpush1.msra.mxu0 %v8681_v22  ;;  %2421 = vmatpush1.msra.mxu1 %v8684_v36  ;;  %12585 = vst [vmem:[#allocation176_spill] sm:$0xff] %v8693_v29  ;;  %12586 = vst [vmem:[#allocation177_spill] sm:$0xff] %v8696_v57  ;;  %v8699_v22 = vld [vmem:[#allocation9 + $0x268] sm:$0xff]  ;;  %v8702_v36 = vld [vmem:[#allocation9 + $0x278] sm:$0xff] }
 0x692   :  { %2351 = vmatprep.subr.mxu0 %v8687_v62  ;;  %2422 = vmatprep.subr.mxu1 %v8690_v32  ;;  %12587 = vst [vmem:[#allocation178_spill] sm:$0xff] %v8699_v22  ;;  %12588 = vst [vmem:[#allocation179_spill] sm:$0xff] %v8702_v36  ;;  %v8705_v62 = vld [vmem:[#allocation9 + $0x260] sm:$0xff]  ;;  %v8708_v32 = vld [vmem:[#allocation9 + $0x270] sm:$0xff] }
 0x693   :  { %2352 = vmatpush1.msra.mxu0 %v8693_v29  ;;  %2423 = vmatpush1.msra.mxu1 %v8696_v57  ;;  %12589 = vst [vmem:[#allocation180_spill] sm:$0xff] %v8705_v62  ;;  %12590 = vst [vmem:[#allocation181_spill] sm:$0xff] %v8708_v32  ;;  %v8711_v29 = vld [vmem:[#allocation9 + $0x228] sm:$0xff]  ;;  %v8714_v57 = vld [vmem:[#allocation9 + $0x238] sm:$0xff] }
 0x694   :  { %2353 = vmatprep.subr.mxu0 %v8699_v22  ;;  %2424 = vmatprep.subr.mxu1 %v8702_v36  ;;  %12591 = vst [vmem:[#allocation182_spill] sm:$0xff] %v8711_v29  ;;  %12592 = vst [vmem:[#allocation183_spill] sm:$0xff] %v8714_v57  ;;  %v8717_v22 = vld [vmem:[#allocation9 + $0x220] sm:$0xff]  ;;  %v8720_v36 = vld [vmem:[#allocation9 + $0x230] sm:$0xff] }
 0x695   :  { %2354 = vmatpush1.msra.mxu0 %v8705_v62  ;;  %2425 = vmatpush1.msra.mxu1 %v8708_v32  ;;  %12593 = vst [vmem:[#allocation184_spill] sm:$0xff] %v8717_v22  ;;  %12594 = vst [vmem:[#allocation185_spill] sm:$0xff] %v8720_v36  ;;  %v8723_v62 = vld [vmem:[#allocation9 + $0x1e8] sm:$0xff]  ;;  %v8726_v32 = vld [vmem:[#allocation9 + $0x1f8] sm:$0xff] }
 0x696   :  { %2355 = vmatprep.subr.mxu0 %v8711_v29  ;;  %2426 = vmatprep.subr.mxu1 %v8714_v57  ;;  %12595 = vst [vmem:[#allocation186_spill] sm:$0xff] %v8723_v62  ;;  %12596 = vst [vmem:[#allocation187_spill] sm:$0xff] %v8726_v32  ;;  %v8729_v29 = vld [vmem:[#allocation9 + $0x1e0] sm:$0xff]  ;;  %v8732_v57 = vld [vmem:[#allocation9 + $0x1f0] sm:$0xff] }
 0x697   :  { %2356 = vmatpush1.msra.mxu0 %v8717_v22  ;;  %2427 = vmatpush1.msra.mxu1 %v8720_v36  ;;  %12597 = vst [vmem:[#allocation188_spill] sm:$0xff] %v8729_v29  ;;  %12598 = vst [vmem:[#allocation189_spill] sm:$0xff] %v8732_v57  ;;  %v8735_v22 = vld [vmem:[#allocation9 + $0x1a8] sm:$0xff]  ;;  %v8738_v36 = vld [vmem:[#allocation9 + $0x1b8] sm:$0xff] }
 0x698   :  { %2357 = vmatprep.subr.mxu0 %v8723_v62  ;;  %2428 = vmatprep.subr.mxu1 %v8726_v32  ;;  %12599 = vst [vmem:[#allocation190_spill] sm:$0xff] %v8735_v22  ;;  %12600 = vst [vmem:[#allocation191_spill] sm:$0xff] %v8738_v36  ;;  %v8741_v62 = vld [vmem:[#allocation9 + $0x1a0] sm:$0xff]  ;;  %v8744_v32 = vld [vmem:[#allocation9 + $0x1b0] sm:$0xff] }
 0x699   :  { %2358 = vmatpush1.msra.mxu0 %v8729_v29  ;;  %2429 = vmatpush1.msra.mxu1 %v8732_v57  ;;  %12601 = vst [vmem:[#allocation192_spill] sm:$0xff] %v8741_v62  ;;  %12602 = vst [vmem:[#allocation193_spill] sm:$0xff] %v8744_v32  ;;  %v8747_v29 = vld [vmem:[#allocation9 + $0x168] sm:$0xff]  ;;  %v8750_v57 = vld [vmem:[#allocation9 + $0x178] sm:$0xff] }
 0x69a   :  { %2359 = vmatprep.subr.mxu0 %v8735_v22  ;;  %2430 = vmatprep.subr.mxu1 %v8738_v36  ;;  %12603 = vst [vmem:[#allocation194_spill] sm:$0xff] %v8747_v29  ;;  %12604 = vst [vmem:[#allocation195_spill] sm:$0xff] %v8750_v57  ;;  %v8753_v22 = vld [vmem:[#allocation9 + $0x160] sm:$0xff]  ;;  %v8756_v36 = vld [vmem:[#allocation9 + $0x170] sm:$0xff] }
 0x69b   :  { %2360 = vmatpush1.msra.mxu0 %v8741_v62  ;;  %2431 = vmatpush1.msra.mxu1 %v8744_v32  ;;  %12605 = vst [vmem:[#allocation196_spill] sm:$0xff] %v8753_v22  ;;  %12606 = vst [vmem:[#allocation197_spill] sm:$0xff] %v8756_v36  ;;  %v8759_v62 = vld [vmem:[#allocation9 + $0x128] sm:$0xff]  ;;  %v8762_v32 = vld [vmem:[#allocation9 + $0x138] sm:$0xff] }
 0x69c   :  { %2361 = vmatprep.subr.mxu0 %v8747_v29  ;;  %2432 = vmatprep.subr.mxu1 %v8750_v57  ;;  %12607 = vst [vmem:[#allocation198_spill] sm:$0xff] %v8759_v62  ;;  %12608 = vst [vmem:[#allocation199_spill] sm:$0xff] %v8762_v32  ;;  %v8765_v29 = vld [vmem:[#allocation9 + $0x120] sm:$0xff]  ;;  %v8768_v57 = vld [vmem:[#allocation9 + $0x130] sm:$0xff] }
 0x69d   :  { %2362 = vmatpush1.msra.mxu0 %v8753_v22  ;;  %2433 = vmatpush1.msra.mxu1 %v8756_v36  ;;  %12609 = vst [vmem:[#allocation200_spill] sm:$0xff] %v8765_v29  ;;  %12610 = vst [vmem:[#allocation201_spill] sm:$0xff] %v8768_v57  ;;  %v8771_v22 = vld [vmem:[#allocation9 + $0xe8] sm:$0xff]  ;;  %v8774_v36 = vld [vmem:[#allocation9 + $0xf8] sm:$0xff] }
 0x69e   :  { %2363 = vmatprep.subr.mxu0 %v8759_v62  ;;  %2434 = vmatprep.subr.mxu1 %v8762_v32  ;;  %12611 = vst [vmem:[#allocation202_spill] sm:$0xff] %v8771_v22  ;;  %12612 = vst [vmem:[#allocation203_spill] sm:$0xff] %v8774_v36  ;;  %v8777_v62 = vld [vmem:[#allocation9 + $0xe0] sm:$0xff]  ;;  %v8780_v32 = vld [vmem:[#allocation9 + $0xf0] sm:$0xff] }
 0x69f   :  { %2364 = vmatpush1.msra.mxu0 %v8765_v29  ;;  %2435 = vmatpush1.msra.mxu1 %v8768_v57  ;;  %12613 = vst [vmem:[#allocation204_spill] sm:$0xff] %v8777_v62  ;;  %12614 = vst [vmem:[#allocation205_spill] sm:$0xff] %v8780_v32  ;;  %v8783_v29 = vld [vmem:[#allocation9 + $0xa8] sm:$0xff]  ;;  %v8786_v57 = vld [vmem:[#allocation9 + $0xb8] sm:$0xff] }
 0x6a0   :  { %2365 = vmatprep.subr.mxu0 %v8771_v22  ;;  %2436 = vmatprep.subr.mxu1 %v8774_v36  ;;  %12615 = vst [vmem:[#allocation206_spill] sm:$0xff] %v8783_v29  ;;  %12616 = vst [vmem:[#allocation207_spill] sm:$0xff] %v8786_v57  ;;  %v8789_v22 = vld [vmem:[#allocation9 + $0xa0] sm:$0xff]  ;;  %v8792_v36 = vld [vmem:[#allocation9 + $0xb0] sm:$0xff] }
 0x6a1   :  { %2366 = vmatpush1.msra.mxu0 %v8777_v62  ;;  %2437 = vmatpush1.msra.mxu1 %v8780_v32  ;;  %12617 = vst [vmem:[#allocation208_spill] sm:$0xff] %v8789_v22  ;;  %12618 = vst [vmem:[#allocation209_spill] sm:$0xff] %v8792_v36  ;;  %v8795_v62 = vld [vmem:[#allocation9 + $0x68] sm:$0xff]  ;;  %v8798_v32 = vld [vmem:[#allocation9 + $0x78] sm:$0xff] }
 0x6a2   :  { %2367 = vmatprep.subr.mxu0 %v8783_v29  ;;  %2438 = vmatprep.subr.mxu1 %v8786_v57  ;;  %12619 = vst [vmem:[#allocation210_spill] sm:$0xff] %v8795_v62  ;;  %12620 = vst [vmem:[#allocation211_spill] sm:$0xff] %v8798_v32  ;;  %v8801_v29 = vld [vmem:[#allocation9 + $0x60] sm:$0xff]  ;;  %v8804_v57 = vld [vmem:[#allocation9 + $0x70] sm:$0xff] }
 0x6a3   :  { %2368 = vmatpush1.msra.mxu0 %v8789_v22  ;;  %2439 = vmatpush1.msra.mxu1 %v8792_v36  ;;  %12621 = vst [vmem:[#allocation212_spill] sm:$0xff] %v8801_v29  ;;  %12622 = vst [vmem:[#allocation213_spill] sm:$0xff] %v8804_v57  ;;  %v8807_v22 = vld [vmem:[#allocation9 + $0x28] sm:$0xff]  ;;  %v8810_v36 = vld [vmem:[#allocation9 + $0x38] sm:$0xff] }
 0x6a4   :  { %2369 = vmatprep.subr.mxu0 %v8795_v62  ;;  %2440 = vmatprep.subr.mxu1 %v8798_v32  ;;  %12623 = vst [vmem:[#allocation214_spill] sm:$0xff] %v8807_v22  ;;  %12624 = vst [vmem:[#allocation215_spill] sm:$0xff] %v8810_v36  ;;  %v8813_v62 = vld [vmem:[#allocation9 + $0x20] sm:$0xff]  ;;  %v8816_v32 = vld [vmem:[#allocation9 + $0x30] sm:$0xff] }
 0x6a5   :  { %2370 = vmatpush1.msra.mxu0 %v8801_v29  ;;  %2441 = vmatpush1.msra.mxu1 %v8804_v57  ;;  %12625 = vst [vmem:[#allocation216_spill] sm:$0xff] %v8813_v62  ;;  %12626 = vst [vmem:[#allocation217_spill] sm:$0xff] %v8816_v32  ;;  %v8819_v29 = vld [vmem:[#allocation9 + $0x7e8] sm:$0xff]  ;;  %v8822_v57 = vld [vmem:[#allocation9 + $0x7f8] sm:$0xff] }
 0x6a6   :  { %2371 = vmatprep.subr.mxu0 %v8807_v22  ;;  %2442 = vmatprep.subr.mxu1 %v8810_v36  ;;  %12627 = vst [vmem:[#allocation218_spill] sm:$0xff] %v8819_v29  ;;  %12628 = vst [vmem:[#allocation219_spill] sm:$0xff] %v8822_v57  ;;  %v8825_v22 = vld [vmem:[#allocation9 + $0x7e0] sm:$0xff]  ;;  %v8828_v36 = vld [vmem:[#allocation9 + $0x7f0] sm:$0xff] }
 0x6a7   :  { %2372 = vmatpush1.msra.mxu0 %v8813_v62  ;;  %2443 = vmatpush1.msra.mxu1 %v8816_v32  ;;  %12629 = vst [vmem:[#allocation220_spill] sm:$0xff] %v8825_v22  ;;  %12630 = vst [vmem:[#allocation221_spill] sm:$0xff] %v8828_v36  ;;  %v8831_v62 = vld [vmem:[#allocation9 + $0x7a8] sm:$0xff]  ;;  %v8834_v32 = vld [vmem:[#allocation9 + $0x7b8] sm:$0xff] }
 0x6a8   :  { %2373 = vmatprep.subr.mxu0 %v8819_v29  ;;  %2444 = vmatprep.subr.mxu1 %v8822_v57  ;;  %12631 = vst [vmem:[#allocation222_spill] sm:$0xff] %v8831_v62  ;;  %12632 = vst [vmem:[#allocation223_spill] sm:$0xff] %v8834_v32  ;;  %v8837_v29 = vld [vmem:[#allocation9 + $0x7a0] sm:$0xff]  ;;  %v8840_v57 = vld [vmem:[#allocation9 + $0x7b0] sm:$0xff] }
 0x6a9   :  { %2374 = vmatpush2.msra.mxu0 %v8825_v22  ;;  %2445 = vmatpush2.msra.mxu1 %v8828_v36  ;;  %12633 = vst [vmem:[#allocation224_spill] sm:$0xff] %v8837_v29  ;;  %12634 = vst [vmem:[#allocation225_spill] sm:$0xff] %v8840_v57  ;;  %v8843_v22 = vld [vmem:[#allocation9 + $0x768] sm:$0xff]  ;;  %v8846_v36 = vld [vmem:[#allocation9 + $0x778] sm:$0xff] }
 0x6aa   :  { %2375 = vmatprep.subr.mxu0 %v8831_v62  ;;  %2446 = vmatprep.subr.mxu1 %v8834_v32  ;;  %12635 = vst [vmem:[#allocation226_spill] sm:$0xff] %v8843_v22  ;;  %12636 = vst [vmem:[#allocation227_spill] sm:$0xff] %v8846_v36  ;;  %v8849_v62 = vld [vmem:[#allocation9 + $0x760] sm:$0xff]  ;;  %v8852_v32 = vld [vmem:[#allocation9 + $0x770] sm:$0xff] }
 0x6ab   :  { %2376 = vmatpush2.msra.mxu0 %v8837_v29  ;;  %2447 = vmatpush2.msra.mxu1 %v8840_v57  ;;  %12637 = vst [vmem:[#allocation228_spill] sm:$0xff] %v8849_v62  ;;  %12638 = vst [vmem:[#allocation229_spill] sm:$0xff] %v8852_v32  ;;  %v8855_v29 = vld [vmem:[#allocation9 + $0x728] sm:$0xff]  ;;  %v8858_v57 = vld [vmem:[#allocation9 + $0x738] sm:$0xff] }
 0x6ac   :  { %2377 = vmatprep.subr.mxu0 %v8843_v22  ;;  %2448 = vmatprep.subr.mxu1 %v8846_v36  ;;  %12639 = vst [vmem:[#allocation230_spill] sm:$0xff] %v8855_v29  ;;  %12640 = vst [vmem:[#allocation231_spill] sm:$0xff] %v8858_v57  ;;  %v8861_v22 = vld [vmem:[#allocation9 + $0x720] sm:$0xff]  ;;  %v8864_v36 = vld [vmem:[#allocation9 + $0x730] sm:$0xff] }
 0x6ad   :  { %2378 = vmatpush2.msra.mxu0 %v8849_v62  ;;  %2449 = vmatpush2.msra.mxu1 %v8852_v32  ;;  %12641 = vst [vmem:[#allocation232_spill] sm:$0xff] %v8861_v22  ;;  %12642 = vst [vmem:[#allocation233_spill] sm:$0xff] %v8864_v36  ;;  %v8867_v62 = vld [vmem:[#allocation9 + $0x6e8] sm:$0xff]  ;;  %v8870_v32 = vld [vmem:[#allocation9 + $0x6f8] sm:$0xff] }
 0x6ae   :  { %2379 = vmatprep.subr.mxu0 %v8855_v29  ;;  %2450 = vmatprep.subr.mxu1 %v8858_v57  ;;  %12643 = vst [vmem:[#allocation234_spill] sm:$0xff] %v8867_v62  ;;  %12644 = vst [vmem:[#allocation235_spill] sm:$0xff] %v8870_v32  ;;  %v8873_v29 = vld [vmem:[#allocation9 + $0x6e0] sm:$0xff]  ;;  %v8876_v57 = vld [vmem:[#allocation9 + $0x6f0] sm:$0xff] }
 0x6af   :  { %2380 = vmatpush2.msra.mxu0 %v8861_v22  ;;  %2451 = vmatpush2.msra.mxu1 %v8864_v36  ;;  %12645 = vst [vmem:[#allocation236_spill] sm:$0xff] %v8873_v29  ;;  %12646 = vst [vmem:[#allocation237_spill] sm:$0xff] %v8876_v57  ;;  %v8879_v22 = vld [vmem:[#allocation9 + $0x6a8] sm:$0xff]  ;;  %v8882_v36 = vld [vmem:[#allocation9 + $0x6b8] sm:$0xff] }
 0x6b0   :  { %2381 = vmatprep.subr.mxu0 %v8867_v62  ;;  %2452 = vmatprep.subr.mxu1 %v8870_v32  ;;  %12647 = vst [vmem:[#allocation238_spill] sm:$0xff] %v8879_v22  ;;  %12648 = vst [vmem:[#allocation239_spill] sm:$0xff] %v8882_v36  ;;  %v8885_v62 = vld [vmem:[#allocation9 + $0x6a0] sm:$0xff]  ;;  %v8888_v32 = vld [vmem:[#allocation9 + $0x6b0] sm:$0xff] }
 0x6b1   :  { %2382 = vmatpush2.msra.mxu0 %v8873_v29  ;;  %2453 = vmatpush2.msra.mxu1 %v8876_v57  ;;  %12649 = vst [vmem:[#allocation240_spill] sm:$0xff] %v8885_v62  ;;  %12650 = vst [vmem:[#allocation241_spill] sm:$0xff] %v8888_v32  ;;  %v8891_v29 = vld [vmem:[#allocation9 + $0x668] sm:$0xff]  ;;  %v8894_v57 = vld [vmem:[#allocation9 + $0x678] sm:$0xff] }
 0x6b2   :  { %2383 = vmatprep.subr.mxu0 %v8879_v22  ;;  %2454 = vmatprep.subr.mxu1 %v8882_v36  ;;  %12651 = vst [vmem:[#allocation242_spill] sm:$0xff] %v8891_v29  ;;  %12652 = vst [vmem:[#allocation243_spill] sm:$0xff] %v8894_v57  ;;  %v8897_v22 = vld [vmem:[#allocation9 + $0x660] sm:$0xff]  ;;  %v8900_v36 = vld [vmem:[#allocation9 + $0x670] sm:$0xff] }
 0x6b3   :  { %2384 = vmatpush2.msra.mxu0 %v8885_v62  ;;  %2455 = vmatpush2.msra.mxu1 %v8888_v32  ;;  %12653 = vst [vmem:[#allocation244_spill] sm:$0xff] %v8897_v22  ;;  %12654 = vst [vmem:[#allocation245_spill] sm:$0xff] %v8900_v36  ;;  %v8903_v62 = vld [vmem:[#allocation9 + $0x628] sm:$0xff]  ;;  %v8906_v32 = vld [vmem:[#allocation9 + $0x638] sm:$0xff] }
 0x6b4   :  { %2385 = vmatprep.subr.mxu0 %v8891_v29  ;;  %2456 = vmatprep.subr.mxu1 %v8894_v57  ;;  %12655 = vst [vmem:[#allocation246_spill] sm:$0xff] %v8903_v62  ;;  %12656 = vst [vmem:[#allocation247_spill] sm:$0xff] %v8906_v32  ;;  %v8909_v29 = vld [vmem:[#allocation9 + $0x620] sm:$0xff]  ;;  %v8912_v57 = vld [vmem:[#allocation9 + $0x630] sm:$0xff] }
 0x6b5   :  { %2386 = vmatpush2.msra.mxu0 %v8897_v22  ;;  %2457 = vmatpush2.msra.mxu1 %v8900_v36  ;;  %12657 = vst [vmem:[#allocation248_spill] sm:$0xff] %v8909_v29  ;;  %12658 = vst [vmem:[#allocation249_spill] sm:$0xff] %v8912_v57  ;;  %v8915_v22 = vld [vmem:[#allocation9 + $0x5e8] sm:$0xff]  ;;  %v8918_v36 = vld [vmem:[#allocation9 + $0x5f8] sm:$0xff] }
 0x6b6   :  { %2387 = vmatprep.subr.mxu0 %v8903_v62  ;;  %2458 = vmatprep.subr.mxu1 %v8906_v32  ;;  %12659 = vst [vmem:[#allocation250_spill] sm:$0xff] %v8915_v22  ;;  %12660 = vst [vmem:[#allocation251_spill] sm:$0xff] %v8918_v36  ;;  %v8921_v62 = vld [vmem:[#allocation9 + $0x5e0] sm:$0xff]  ;;  %v8924_v32 = vld [vmem:[#allocation9 + $0x5f0] sm:$0xff] }
 0x6b7   :  { %2388 = vmatpush2.msra.mxu0 %v8909_v29  ;;  %2459 = vmatpush2.msra.mxu1 %v8912_v57  ;;  %12661 = vst [vmem:[#allocation252_spill] sm:$0xff] %v8921_v62  ;;  %12662 = vst [vmem:[#allocation253_spill] sm:$0xff] %v8924_v32  ;;  %v8927_v29 = vld [vmem:[#allocation9 + $0x5a8] sm:$0xff]  ;;  %v8930_v57 = vld [vmem:[#allocation9 + $0x5b8] sm:$0xff] }
 0x6b8   :  { %2389 = vmatprep.subr.mxu0 %v8915_v22  ;;  %2460 = vmatprep.subr.mxu1 %v8918_v36  ;;  %12663 = vst [vmem:[#allocation254_spill] sm:$0xff] %v8927_v29  ;;  %12664 = vst [vmem:[#allocation255_spill] sm:$0xff] %v8930_v57  ;;  %v8933_v22 = vld [vmem:[#allocation9 + $0x5a0] sm:$0xff]  ;;  %v8936_v36 = vld [vmem:[#allocation9 + $0x5b0] sm:$0xff] }
 0x6b9   :  { %2390 = vmatpush2.msra.mxu0 %v8921_v62  ;;  %2461 = vmatpush2.msra.mxu1 %v8924_v32  ;;  %12665 = vst [vmem:[#allocation256_spill] sm:$0xff] %v8933_v22  ;;  %12666 = vst [vmem:[#allocation257_spill] sm:$0xff] %v8936_v36  ;;  %v8939_v62 = vld [vmem:[#allocation9 + $0x568] sm:$0xff]  ;;  %v8942_v32 = vld [vmem:[#allocation9 + $0x578] sm:$0xff] }
 0x6ba   :  { %2391 = vmatprep.subr.mxu0 %v8927_v29  ;;  %2462 = vmatprep.subr.mxu1 %v8930_v57  ;;  %12667 = vst [vmem:[#allocation258_spill] sm:$0xff] %v8939_v62  ;;  %12668 = vst [vmem:[#allocation259_spill] sm:$0xff] %v8942_v32  ;;  %v8945_v29 = vld [vmem:[#allocation9 + $0x560] sm:$0xff]  ;;  %v8948_v57 = vld [vmem:[#allocation9 + $0x570] sm:$0xff] }
 0x6bb   :  { %2392 = vmatpush2.msra.mxu0 %v8933_v22  ;;  %2463 = vmatpush2.msra.mxu1 %v8936_v36  ;;  %12669 = vst [vmem:[#allocation260_spill] sm:$0xff] %v8945_v29  ;;  %12670 = vst [vmem:[#allocation261_spill] sm:$0xff] %v8948_v57  ;;  %v8951_v22 = vld [vmem:[#allocation9 + $0x528] sm:$0xff]  ;;  %v8954_v36 = vld [vmem:[#allocation9 + $0x538] sm:$0xff] }
 0x6bc   :  { %2393 = vmatprep.subr.mxu0 %v8939_v62  ;;  %2464 = vmatprep.subr.mxu1 %v8942_v32  ;;  %12671 = vst [vmem:[#allocation262_spill] sm:$0xff] %v8951_v22  ;;  %12672 = vst [vmem:[#allocation263_spill] sm:$0xff] %v8954_v36  ;;  %v8957_v62 = vld [vmem:[#allocation9 + $0x520] sm:$0xff]  ;;  %v8960_v32 = vld [vmem:[#allocation9 + $0x530] sm:$0xff] }
 0x6bd   :  { %2394 = vmatpush2.msra.mxu0 %v8945_v29  ;;  %2465 = vmatpush2.msra.mxu1 %v8948_v57  ;;  %12673 = vst [vmem:[#allocation264_spill] sm:$0xff] %v8957_v62  ;;  %12674 = vst [vmem:[#allocation265_spill] sm:$0xff] %v8960_v32  ;;  %v8963_v29 = vld [vmem:[#allocation9 + $0x4e8] sm:$0xff]  ;;  %v8966_v57 = vld [vmem:[#allocation9 + $0x4f8] sm:$0xff] }
 0x6be   :  { %2395 = vmatprep.subr.mxu0 %v8951_v22  ;;  %2466 = vmatprep.subr.mxu1 %v8954_v36  ;;  %12675 = vst [vmem:[#allocation266_spill] sm:$0xff] %v8963_v29  ;;  %12676 = vst [vmem:[#allocation267_spill] sm:$0xff] %v8966_v57  ;;  %v8969_v22 = vld [vmem:[#allocation9 + $0x4e0] sm:$0xff]  ;;  %v8972_v36 = vld [vmem:[#allocation9 + $0x4f0] sm:$0xff] }
 0x6bf   :  { %2396 = vmatpush2.msra.mxu0 %v8957_v62  ;;  %2467 = vmatpush2.msra.mxu1 %v8960_v32  ;;  %12677 = vst [vmem:[#allocation268_spill] sm:$0xff] %v8969_v22  ;;  %12678 = vst [vmem:[#allocation269_spill] sm:$0xff] %v8972_v36  ;;  %v8975_v62 = vld [vmem:[#allocation9 + $0x4a8] sm:$0xff]  ;;  %v8978_v32 = vld [vmem:[#allocation9 + $0x4b8] sm:$0xff] }
 0x6c0   :  { %2397 = vmatprep.subr.mxu0 %v8963_v29  ;;  %2468 = vmatprep.subr.mxu1 %v8966_v57  ;;  %12679 = vst [vmem:[#allocation270_spill] sm:$0xff] %v8975_v62  ;;  %12680 = vst [vmem:[#allocation271_spill] sm:$0xff] %v8978_v32  ;;  %v8981_v29 = vld [vmem:[#allocation9 + $0x4a0] sm:$0xff]  ;;  %v8984_v57 = vld [vmem:[#allocation9 + $0x4b0] sm:$0xff] }
 0x6c1   :  { %2398 = vmatpush2.msra.mxu0 %v8969_v22  ;;  %2469 = vmatpush2.msra.mxu1 %v8972_v36  ;;  %12681 = vst [vmem:[#allocation272_spill] sm:$0xff] %v8981_v29  ;;  %12682 = vst [vmem:[#allocation273_spill] sm:$0xff] %v8984_v57  ;;  %v8987_v22 = vld [vmem:[#allocation9 + $0x468] sm:$0xff]  ;;  %v8990_v36 = vld [vmem:[#allocation9 + $0x478] sm:$0xff] }
 0x6c2   :  { %2399 = vmatprep.subr.mxu0 %v8975_v62  ;;  %2470 = vmatprep.subr.mxu1 %v8978_v32  ;;  %12683 = vst [vmem:[#allocation274_spill] sm:$0xff] %v8987_v22  ;;  %12684 = vst [vmem:[#allocation275_spill] sm:$0xff] %v8990_v36  ;;  %v8993_v62 = vld [vmem:[#allocation9 + $0x460] sm:$0xff]  ;;  %v8996_v32 = vld [vmem:[#allocation9 + $0x470] sm:$0xff] }
 0x6c3   :  { %2400 = vmatpush2.msra.mxu0 %v8981_v29  ;;  %2471 = vmatpush2.msra.mxu1 %v8984_v57  ;;  %12685 = vst [vmem:[#allocation276_spill] sm:$0xff] %v8996_v32  ;;  %v8999_v29 = vld [vmem:[#allocation9 + $0x428] sm:$0xff]  ;;  %v9002_v57 = vld [vmem:[#allocation9 + $0x438] sm:$0xff] }
 0x6c4   :  { %2401 = vmatprep.subr.mxu0 %v8987_v22  ;;  %2472 = vmatprep.subr.mxu1 %v8990_v36  ;;  %12686 = vst [vmem:[#allocation277_spill] sm:$0xff] %v8999_v29  ;;  %v9005_v22 = vld [vmem:[#allocation9 + $0x420] sm:$0xff]  ;;  %v9008_v36 = vld [vmem:[#allocation9 + $0x430] sm:$0xff] }
 0x6c5   :  { %2402 = vmatpush2.msra.mxu0 %v8993_v62  ;;  %2473 = vmatpush2.msra.mxu1 %v8996_v32  ;;  %v9013_v32 = vld [vmem:[#allocation7 + $0x1e8] sm:$0xff] }
 0x6c6   :  { %2403 = vmatprep.subr.mxu0 %v8999_v29  ;;  %2474 = vmatprep.subr.mxu1 %v9002_v57  ;;  %v9016_v29 = vld [vmem:[#allocation7 + $0x1f8] sm:$0xff] }
 0x6c7   :  { %2404 = vmatpush2.msra.mxu0 %v9005_v22  ;;  %2475 = vmatpush2.msra.mxu1 %v9008_v36 }
 0x6c8   :  { %2406 = vmatmul.mubr.f32.vlgmr.msra.gmra.mxu0 %v8235_v35  ;;  %2477 = vmatmul.mubr.f32.vlgmr.msra.gmra.mxu1 %v8235_v35  ;;  %v2484_v35 = vld [vmem:[#allocation2 + $0x3] ss:$8 sm:$0xf] }
 0x6c9   :  { %2546 = vmatprep.subr.mxu0 %v9013_v32  ;;  %2617 = vmatprep.subr.mxu1 %v9016_v29 }
 0x6ca   :  { %2547 = vmatpush1.msra.mxu0 %v8034_v39  ;;  %2618 = vmatpush1.msra.mxu1 %v8037_v40  ;;  %v12687_v39 = vld [vmem:[#allocation14_spill] sm:$0xff]  ;;  %v12688_v40 = vld [vmem:[#allocation15_spill] sm:$0xff] }
 0x6cb   :  { %2548 = vmatprep.subr.mxu0 %v8040_v8  ;;  %2619 = vmatprep.subr.mxu1 %v8043_v5  ;;  %v12689_v8 = vld [vmem:[#allocation16_spill] sm:$0xff]  ;;  %v12690_v5 = vld [vmem:[#allocation17_spill] sm:$0xff] }
 0x6cc   :  { %2549 = vmatpush1.msra.mxu0 %v8046_v58  ;;  %2620 = vmatpush1.msra.mxu1 %v8049_v52  ;;  %v12691_v58 = vld [vmem:[#allocation18_spill] sm:$0xff]  ;;  %v12692_v52 = vld [vmem:[#allocation19_spill] sm:$0xff] }
 0x6cd   :  { %2550 = vmatprep.subr.mxu0 %v8052_v54  ;;  %2621 = vmatprep.subr.mxu1 %v8055_v25  ;;  %v12693_v54 = vld [vmem:[#allocation20_spill] sm:$0xff]  ;;  %v12694_v25 = vld [vmem:[#allocation21_spill] sm:$0xff] }
 0x6ce   :  { %2551 = vmatpush1.msra.mxu0 %v8058_v42  ;;  %2622 = vmatpush1.msra.mxu1 %v8061_v43  ;;  %v12695_v42 = vld [vmem:[#allocation22_spill] sm:$0xff]  ;;  %v12696_v43 = vld [vmem:[#allocation23_spill] sm:$0xff] }
 0x6cf   :  { %2552 = vmatprep.subr.mxu0 %v8064_v44  ;;  %2623 = vmatprep.subr.mxu1 %v8067_v45  ;;  %v12697_v44 = vld [vmem:[#allocation24_spill] sm:$0xff]  ;;  %v12698_v45 = vld [vmem:[#allocation25_spill] sm:$0xff] }
 0x6d0   :  { %2553 = vmatpush1.msra.mxu0 %v8070_v46  ;;  %2624 = vmatpush1.msra.mxu1 %v8073_v47  ;;  %v12699_v46 = vld [vmem:[#allocation26_spill] sm:$0xff]  ;;  %v12700_v47 = vld [vmem:[#allocation27_spill] sm:$0xff] }
 0x6d1   :  { %2554 = vmatprep.subr.mxu0 %v8076_v48  ;;  %2625 = vmatprep.subr.mxu1 %v8079_v49  ;;  %v12701_v48 = vld [vmem:[#allocation28_spill] sm:$0xff]  ;;  %v12702_v49 = vld [vmem:[#allocation29_spill] sm:$0xff] }
 0x6d2   :  { %2555 = vmatpush1.msra.mxu0 %v8082_v50  ;;  %2626 = vmatpush1.msra.mxu1 %v8085_v51  ;;  %v12703_v50 = vld [vmem:[#allocation30_spill] sm:$0xff]  ;;  %v12704_v51 = vld [vmem:[#allocation31_spill] sm:$0xff] }
 0x6d3   :  { %2556 = vmatprep.subr.mxu0 %v8088_v7  ;;  %2627 = vmatprep.subr.mxu1 %v8091_v9  ;;  %v12705_v7 = vld [vmem:[#allocation32_spill] sm:$0xff]  ;;  %v12706_v9 = vld [vmem:[#allocation33_spill] sm:$0xff] }
 0x6d4   :  { %2557 = vmatpush1.msra.mxu0 %v8094_v10  ;;  %2628 = vmatpush1.msra.mxu1 %v8097_v11  ;;  %v12707_v10 = vld [vmem:[#allocation34_spill] sm:$0xff]  ;;  %v12708_v11 = vld [vmem:[#allocation35_spill] sm:$0xff] }
 0x6d5   :  { %2558 = vmatprep.subr.mxu0 %v8100_v12  ;;  %2629 = vmatprep.subr.mxu1 %v8103_v13  ;;  %v12709_v12 = vld [vmem:[#allocation36_spill] sm:$0xff]  ;;  %v12710_v13 = vmov 0.0  }
 0x6d6   :  { %2559 = vmatpush1.msra.mxu0 %v8106_v14  ;;  %2630 = vmatpush1.msra.mxu1 %v8109_v15  ;;  %v12711_v14 = vld [vmem:[#allocation38_spill] sm:$0xff]  ;;  %v12712_v15 = vld [vmem:[#allocation39_spill] sm:$0xff] }
 0x6d7   :  { %2560 = vmatprep.subr.mxu0 %v8112_v16  ;;  %2631 = vmatprep.subr.mxu1 %v8115_v17  ;;  %v12713_v16 = vld [vmem:[#allocation40_spill] sm:$0xff] }
 0x6d8   :  { %2561 = vmatpush1.msra.mxu0 %v8118_v18  ;;  %2632 = vmatpush1.msra.mxu1 %v8121_v19 }
 0x6d9   :  { %2562 = vmatprep.subr.mxu0 %v8124_v20  ;;  %2633 = vmatprep.subr.mxu1 %v8127_v21 }
 0x6da   :  { %2563 = vmatpush1.msra.mxu0 %v8130_v23  ;;  %2634 = vmatpush1.msra.mxu1 %v8133_v24  ;;  %v12714_v24 = vld [vmem:[#allocation37_spill] sm:$0xff] }
 0x6db   :  { %2564 = vmatprep.subr.mxu0 %v8136_v26  ;;  %2635 = vmatprep.subr.mxu1 %v8139_v27 }
 0x6dc   :  { %2565 = vmatpush1.msra.mxu0 %v8142_v28  ;;  %2636 = vmatpush1.msra.mxu1 %v8145_v30 }
 0x6dd   :  { %2566 = vmatprep.subr.mxu0 %v12687_v39  ;;  %2637 = vmatprep.subr.mxu1 %v12688_v40 }
 0x6de   :  { %2567 = vmatpush1.msra.mxu0 %v12689_v8  ;;  %2638 = vmatpush1.msra.mxu1 %v12690_v5 }
 0x6df   :  { %2568 = vmatprep.subr.mxu0 %v12691_v58  ;;  %2639 = vmatprep.subr.mxu1 %v12692_v52 }
 0x6e0   :  { %2569 = vmatpush1.msra.mxu0 %v12693_v54  ;;  %2640 = vmatpush1.msra.mxu1 %v12694_v25 }
 0x6e1   :  { %2570 = vmatprep.subr.mxu0 %v12695_v42  ;;  %2641 = vmatprep.subr.mxu1 %v12696_v43 }
 0x6e2   :  { %2571 = vmatpush1.msra.mxu0 %v12697_v44  ;;  %2642 = vmatpush1.msra.mxu1 %v12698_v45 }
 0x6e3   :  { %2572 = vmatprep.subr.mxu0 %v12699_v46  ;;  %2643 = vmatprep.subr.mxu1 %v12700_v47 }
 0x6e4   :  { %2573 = vmatpush1.msra.mxu0 %v12701_v48  ;;  %2644 = vmatpush1.msra.mxu1 %v12702_v49 }
 0x6e5   :  { %2574 = vmatprep.subr.mxu0 %v12703_v50  ;;  %2645 = vmatprep.subr.mxu1 %v12704_v51  ;;  %v12715_v50 = vld [vmem:[#allocation41_spill] sm:$0xff] }
 0x6e6   :  { %2575 = vmatpush1.msra.mxu0 %v12705_v7  ;;  %2646 = vmatpush1.msra.mxu1 %v12706_v9 }
 0x6e7   :  { %2576 = vmatprep.subr.mxu0 %v12707_v10  ;;  %2647 = vmatprep.subr.mxu1 %v12708_v11 }
 0x6e8   :  { %2577 = vmatpush1.msra.mxu0 %v12709_v12  ;;  %2610 = vmatprep.mubr.f32.mxu0 %v12710_v13 }
 0x6e9   :  { %2648 = vmatpush1.msra.mxu1 %v12711_v14  ;;  %2681 = vmatprep.mubr.f32.mxu1 %v12710_v13  ;;  %v12716_v14 = vld [vmem:[#allocation42_spill] sm:$0xff] }
 0x6ea   :  { %2717 = vmatprep.subr.mxu0 %v12712_v15  ;;  %2788 = vmatprep.subr.mxu1 %v12713_v16  ;;  %v12717_v15 = vld [vmem:[#allocation43_spill] sm:$0xff]  ;;  %v12718_v16 = vld [vmem:[#allocation44_spill] sm:$0xff] }
 0x747   :  { %v2265_v17 = vpop.f32.mrf.mxu0  ;;  %v2336_v18 = vpop.f32.mrf.mxu1 }
 0x749   :  { %v2267_v19 = vpop.f32.mrf.mxu0  ;;  %v2338_v20 = vpop.f32.mrf.mxu1 }
 0x74a   :  { %v2489_v21 = vcombine.low %v2265_v17, %v2267_v19  ;;  %v2490_v23 = vcombine.low %v2336_v18, %v2338_v20  ;;  %v12719_v17 = vld [vmem:[#allocation45_spill] sm:$0xff]  ;;  %v12720_v18 = vld [vmem:[#allocation46_spill] sm:$0xff]  ;;  %v12721_v19 = vld [vmem:[#allocation47_spill] sm:$0xff] }
 0x74b   :  { %v12722_v20 = vld [vmem:[#allocation48_spill] sm:$0xff] }
 0x74c   :  { %v2497_v26 = vrot.slane %v2489_v21, %v12714_v24  ;;  %v2504_v27 = vrot.slane %v2490_v23, %v12714_v24  ;;  %v12723_v21 = vld [vmem:[#allocation49_spill] sm:$0xff]  ;;  %v12724_v23 = vld [vmem:[#allocation50_spill] sm:$0xff] }
 0x74e   :  { %v2505_v28 = vcombine.low %v2497_v26, %v2504_v27  ;;  %v12725_v26 = vld [vmem:[#allocation51_spill] sm:$0xff]  ;;  %v12726_v27 = vld [vmem:[#allocation52_spill] sm:$0xff] }
 0x750   :  { %v2512_v30 = vrot.slane %v2505_v28, %v12714_v24  ;;  %v12727_v28 = vld [vmem:[#allocation53_spill] sm:$0xff] }
 0x752   :  { %v2514_v39 = vadd.f32 %v2512_v30, %v2484_v35  ;;  %v12728_v30 = vld [vmem:[#allocation54_spill] sm:$0xff]  ;;  %v12729_v35 = vld [vmem:[#allocation55_spill] sm:$0xff] }
 0x754   :  { %v4931_v40 = vmul.f32 -1.442695, %v2514_v39  ;;  %v2522_v8 = vrot.slane %v2514_v39, 1  ;;  %v2533_v58 = vrot.slane %v2514_v39, 3  ;;  %v2530_v25 = vrot.slane %v2514_v39, 2  ;;  %v12730_v39 = vld [vmem:[#allocation56_spill] sm:$0xff] }
 0x756   :  { %5121 = vpow2.f32 %v4931_v40  ;;  %v4932_v5 = vmul.f32 -1.442695, %v2522_v8  ;;  %v4933_v52 = vmul.f32 -1.442695, %v2533_v58  ;;  %v12731_v40 = vld [vmem:[#allocation57_spill] sm:$0xff]  ;;  %v12732_v8 = vld [vmem:[#allocation58_spill] sm:$0xff] }
 0x757   :  { %v12734_v58 = vld [vmem:[#allocation60_spill] sm:$0xff] }
 0x758   :  { %5123 = vpow2.f32 %v4932_v5  ;;  %v12733_v5 = vld [vmem:[#allocation59_spill] sm:$0xff] }
 0x759   :  { %5125 = vpow2.f32 %v4933_v52  ;;  %v12735_v52 = vld [vmem:[#allocation61_spill] sm:$0xff] }
 0x763   :  { %v5122_v54 = vpop.eup %5121 }
 0x764   :  { %v2518_v42 = vadd.f32 1.0, %v5122_v54  ;;  %v12736_v54 = vld [vmem:[#allocation62_spill] sm:$0xff] }
 0x765   :  { %v5124_v43 = vpop.eup %5123 }
 0x766   :  { %5127 = vrcp.f32 %v2518_v42  ;;  %v2527_v44 = vadd.f32 1.0, %v5124_v43  ;;  %v5126_v45 = vpop.eup %5125  ;;  %v12738_v42 = vld [vmem:[#allocation64_spill] sm:$0xff]  ;;  %v12739_v43 = vld [vmem:[#allocation65_spill] sm:$0xff] }
 0x767   :  { %5129 = vtanh.f32 %v2530_v25  ;;  %v2538_v49 = vadd.f32 1.0, %v5126_v45  ;;  %v12737_v25 = vld [vmem:[#allocation63_spill] sm:$0xff] }
 0x768   :  { %5131 = vrcp.f32 %v2527_v44  ;;  %v12740_v44 = vld [vmem:[#allocation66_spill] sm:$0xff]  ;;  %v12741_v45 = vld [vmem:[#allocation67_spill] sm:$0xff] }
 0x769   :  { %5133 = vrcp.f32 %v2538_v49  ;;  %v12745_v49 = vld [vmem:[#allocation71_spill] sm:$0xff] }
 0x773   :  { %v5128_v46 = vpop.eup %5127 }
 0x774   :  { %v5130_v47 = vpop.eup %5129 }
 0x775   :  { %v5132_v48 = vpop.eup %5131  ;;  %v2542_v7 = vmul.f32 %v5130_v47, %v5128_v46  ;;  %v12742_v46 = vld [vmem:[#allocation68_spill] sm:$0xff]  ;;  %v12743_v47 = vld [vmem:[#allocation69_spill] sm:$0xff] }
 0x776   :  { %v2541_v51 = vmul.f32 %v5132_v48, %v12715_v50  ;;  %v5134_v10 = vpop.eup %5133  ;;  %v12744_v48 = vld [vmem:[#allocation70_spill] sm:$0xff]  ;;  %v12746_v50 = vld [vmem:[#allocation72_spill] sm:$0xff] }
 0x778   :  { %v9089_v9 = vadd.f32 %v2542_v7, %v2541_v51  ;;  %v12747_v51 = vld [vmem:[#allocation73_spill] sm:$0xff]  ;;  %v12748_v7 = vld [vmem:[#allocation74_spill] sm:$0xff] }
 0x77a   :  { %5135 = vtanh.f32 %v9089_v9 }
 0x787   :  { %v5136_v11 = vpop.eup %5135 }
 0x788   :  { %v9092_v12 = vmul.f32 %v5136_v11, %v5134_v10  ;;  %v12749_v10 = vld [vmem:[#allocation75_spill] sm:$0xff]  ;;  %v12750_v11 = vld [vmem:[#allocation76_spill] sm:$0xff] }
 0x78a   :  { %2611 = vmatmul.mubr.f32.vlgmr.msra.gmra.mxu0 %v9092_v12  ;;  %2682 = vmatmul.mubr.f32.vlgmr.msra.gmra.mxu1 %v9092_v12 }
 0x78b   :  { %2718 = vmatpush1.msra.mxu0 %v12716_v14  ;;  %2789 = vmatpush1.msra.mxu1 %v12717_v15  ;;  %v12751_v14 = vld [vmem:[#allocation77_spill] sm:$0xff]  ;;  %v12752_v15 = vld [vmem:[#allocation78_spill] sm:$0xff] }
 0x78c   :  { %2719 = vmatprep.subr.mxu0 %v12718_v16  ;;  %2790 = vmatprep.subr.mxu1 %v12719_v17  ;;  %v12753_v16 = vld [vmem:[#allocation79_spill] sm:$0xff]  ;;  %v12754_v17 = vld [vmem:[#allocation80_spill] sm:$0xff] }
 0x78d   :  { %2720 = vmatpush1.msra.mxu0 %v12720_v18  ;;  %2791 = vmatpush1.msra.mxu1 %v12721_v19  ;;  %v12755_v18 = vld [vmem:[#allocation81_spill] sm:$0xff]  ;;  %v12756_v19 = vld [vmem:[#allocation82_spill] sm:$0xff] }
 0x78e   :  { %2721 = vmatprep.subr.mxu0 %v12722_v20  ;;  %2792 = vmatprep.subr.mxu1 %v12723_v21  ;;  %v12757_v20 = vld [vmem:[#allocation83_spill] sm:$0xff]  ;;  %v12758_v21 = vld [vmem:[#allocation84_spill] sm:$0xff] }
 0x78f   :  { %2722 = vmatpush1.msra.mxu0 %v12724_v23  ;;  %2793 = vmatpush1.msra.mxu1 %v12725_v26  ;;  %v12759_v23 = vld [vmem:[#allocation85_spill] sm:$0xff]  ;;  %v12760_v26 = vld [vmem:[#allocation86_spill] sm:$0xff] }
 0x790   :  { %2723 = vmatprep.subr.mxu0 %v12726_v27  ;;  %2794 = vmatprep.subr.mxu1 %v12727_v28  ;;  %v12761_v27 = vld [vmem:[#allocation87_spill] sm:$0xff]  ;;  %v12762_v28 = vld [vmem:[#allocation88_spill] sm:$0xff] }
 0x791   :  { %2724 = vmatpush1.msra.mxu0 %v12728_v30  ;;  %2795 = vmatpush1.msra.mxu1 %v12729_v35  ;;  %v12763_v30 = vld [vmem:[#allocation89_spill] sm:$0xff]  ;;  %v12764_v35 = vld [vmem:[#allocation90_spill] sm:$0xff] }
 0x792   :  { %2725 = vmatprep.subr.mxu0 %v12730_v39  ;;  %2796 = vmatprep.subr.mxu1 %v12731_v40  ;;  %v12765_v39 = vld [vmem:[#allocation91_spill] sm:$0xff]  ;;  %v12766_v40 = vld [vmem:[#allocation92_spill] sm:$0xff] }
 0x793   :  { %2726 = vmatpush1.msra.mxu0 %v12732_v8  ;;  %2797 = vmatpush1.msra.mxu1 %v12733_v5  ;;  %v12767_v8 = vld [vmem:[#allocation93_spill] sm:$0xff]  ;;  %v12768_v5 = vld [vmem:[#allocation94_spill] sm:$0xff] }
 0x794   :  { %2727 = vmatprep.subr.mxu0 %v12734_v58  ;;  %2798 = vmatprep.subr.mxu1 %v12735_v52  ;;  %v12769_v58 = vld [vmem:[#allocation95_spill] sm:$0xff]  ;;  %v12770_v52 = vld [vmem:[#allocation96_spill] sm:$0xff] }
 0x795   :  { %2728 = vmatpush1.msra.mxu0 %v12736_v54  ;;  %2799 = vmatpush1.msra.mxu1 %v12737_v25  ;;  %v12771_v54 = vld [vmem:[#allocation97_spill] sm:$0xff]  ;;  %v12772_v25 = vld [vmem:[#allocation98_spill] sm:$0xff] }
 0x796   :  { %2729 = vmatprep.subr.mxu0 %v12738_v42  ;;  %2800 = vmatprep.subr.mxu1 %v12739_v43  ;;  %v12773_v42 = vld [vmem:[#allocation99_spill] sm:$0xff]  ;;  %v12774_v43 = vld [vmem:[#allocation100_spill] sm:$0xff] }
 0x797   :  { %2730 = vmatpush1.msra.mxu0 %v12740_v44  ;;  %2801 = vmatpush1.msra.mxu1 %v12741_v45  ;;  %v12775_v44 = vld [vmem:[#allocation101_spill] sm:$0xff]  ;;  %v12776_v45 = vld [vmem:[#allocation102_spill] sm:$0xff] }
 0x798   :  { %2731 = vmatprep.subr.mxu0 %v12742_v46  ;;  %2802 = vmatprep.subr.mxu1 %v12743_v47  ;;  %v12777_v46 = vld [vmem:[#allocation103_spill] sm:$0xff]  ;;  %v12778_v47 = vld [vmem:[#allocation104_spill] sm:$0xff] }
 0x799   :  { %2732 = vmatpush1.msra.mxu0 %v12744_v48  ;;  %2803 = vmatpush1.msra.mxu1 %v12745_v49  ;;  %v12779_v48 = vld [vmem:[#allocation105_spill] sm:$0xff]  ;;  %v12780_v49 = vld [vmem:[#allocation106_spill] sm:$0xff] }
 0x79a   :  { %2733 = vmatprep.subr.mxu0 %v12746_v50  ;;  %2804 = vmatprep.subr.mxu1 %v12747_v51  ;;  %v12781_v50 = vld [vmem:[#allocation107_spill] sm:$0xff]  ;;  %v12782_v51 = vld [vmem:[#allocation108_spill] sm:$0xff] }
 0x79b   :  { %2734 = vmatpush1.msra.mxu0 %v12748_v7  ;;  %2805 = vmatpush1.msra.mxu1 %v12749_v10  ;;  %v12783_v7 = vld [vmem:[#allocation109_spill] sm:$0xff]  ;;  %v12784_v10 = vld [vmem:[#allocation110_spill] sm:$0xff] }
 0x79c   :  { %2735 = vmatprep.subr.mxu0 %v12750_v11  ;;  %2806 = vmatprep.subr.mxu1 %v12751_v14  ;;  %v12785_v11 = vld [vmem:[#allocation111_spill] sm:$0xff]  ;;  %v12786_v14 = vld [vmem:[#allocation112_spill] sm:$0xff] }
 0x79d   :  { %2736 = vmatpush1.msra.mxu0 %v12752_v15  ;;  %2807 = vmatpush1.msra.mxu1 %v12753_v16  ;;  %v12787_v15 = vld [vmem:[#allocation113_spill] sm:$0xff]  ;;  %v12788_v16 = vld [vmem:[#allocation114_spill] sm:$0xff] }
 0x79e   :  { %2737 = vmatprep.subr.mxu0 %v12754_v17  ;;  %2808 = vmatprep.subr.mxu1 %v12755_v18  ;;  %v12789_v17 = vld [vmem:[#allocation115_spill] sm:$0xff]  ;;  %v12790_v18 = vld [vmem:[#allocation116_spill] sm:$0xff] }
 0x79f   :  { %2738 = vmatpush1.msra.mxu0 %v12756_v19  ;;  %2809 = vmatpush1.msra.mxu1 %v12757_v20  ;;  %v12791_v19 = vld [vmem:[#allocation117_spill] sm:$0xff]  ;;  %v12792_v20 = vld [vmem:[#allocation118_spill] sm:$0xff] }
 0x7a0   :  { %2739 = vmatprep.subr.mxu0 %v12758_v21  ;;  %2810 = vmatprep.subr.mxu1 %v12759_v23  ;;  %v12793_v21 = vld [vmem:[#allocation119_spill] sm:$0xff]  ;;  %v12794_v23 = vld [vmem:[#allocation120_spill] sm:$0xff] }
 0x7a1   :  { %2740 = vmatpush1.msra.mxu0 %v12760_v26  ;;  %2811 = vmatpush1.msra.mxu1 %v12761_v27  ;;  %v12795_v26 = vld [vmem:[#allocation121_spill] sm:$0xff]  ;;  %v12796_v27 = vld [vmem:[#allocation122_spill] sm:$0xff] }
 0x7a2   :  { %2741 = vmatprep.subr.mxu0 %v12762_v28  ;;  %2812 = vmatprep.subr.mxu1 %v12763_v30  ;;  %v12797_v28 = vld [vmem:[#allocation123_spill] sm:$0xff]  ;;  %v12798_v30 = vld [vmem:[#allocation124_spill] sm:$0xff] }
 0x7a3   :  { %2742 = vmatpush1.msra.mxu0 %v12764_v35  ;;  %2813 = vmatpush1.msra.mxu1 %v12765_v39  ;;  %v12799_v35 = vld [vmem:[#allocation125_spill] sm:$0xff]  ;;  %v12800_v39 = vld [vmem:[#allocation126_spill] sm:$0xff] }
 0x7a4   :  { %2743 = vmatprep.subr.mxu0 %v12766_v40  ;;  %2814 = vmatprep.subr.mxu1 %v12767_v8  ;;  %v12801_v40 = vld [vmem:[#allocation127_spill] sm:$0xff]  ;;  %v12802_v8 = vld [vmem:[#allocation128_spill] sm:$0xff] }
 0x7a5   :  { %2744 = vmatpush1.msra.mxu0 %v12768_v5  ;;  %2815 = vmatpush1.msra.mxu1 %v12769_v58  ;;  %v12803_v5 = vld [vmem:[#allocation129_spill] sm:$0xff]  ;;  %v12804_v58 = vld [vmem:[#allocation130_spill] sm:$0xff] }
 0x7a6   :  { %2745 = vmatprep.subr.mxu0 %v12770_v52  ;;  %2816 = vmatprep.subr.mxu1 %v12771_v54  ;;  %v12805_v52 = vld [vmem:[#allocation131_spill] sm:$0xff]  ;;  %v12806_v54 = vld [vmem:[#allocation132_spill] sm:$0xff] }
 0x7a7   :  { %2746 = vmatpush1.msra.mxu0 %v12772_v25  ;;  %2817 = vmatpush1.msra.mxu1 %v12773_v42  ;;  %v12807_v25 = vld [vmem:[#allocation133_spill] sm:$0xff]  ;;  %v12808_v42 = vld [vmem:[#allocation134_spill] sm:$0xff] }
 0x7a8   :  { %2747 = vmatprep.subr.mxu0 %v12774_v43  ;;  %2818 = vmatprep.subr.mxu1 %v12775_v44  ;;  %v12809_v43 = vld [vmem:[#allocation135_spill] sm:$0xff]  ;;  %v12810_v44 = vld [vmem:[#allocation136_spill] sm:$0xff] }
 0x7a9   :  { %2748 = vmatpush1.msra.mxu0 %v12776_v45  ;;  %2819 = vmatpush1.msra.mxu1 %v12777_v46  ;;  %v12811_v45 = vld [vmem:[#allocation137_spill] sm:$0xff]  ;;  %v12812_v46 = vld [vmem:[#allocation138_spill] sm:$0xff] }
 0x7aa   :  { %2749 = vmatprep.subr.mxu0 %v12778_v47  ;;  %2820 = vmatprep.subr.mxu1 %v12779_v48  ;;  %v12813_v47 = vld [vmem:[#allocation139_spill] sm:$0xff]  ;;  %v12814_v48 = vld [vmem:[#allocation140_spill] sm:$0xff] }
 0x7ab   :  { %2750 = vmatpush2.msra.mxu0 %v12780_v49  ;;  %2821 = vmatpush2.msra.mxu1 %v12781_v50  ;;  %v12815_v49 = vld [vmem:[#allocation141_spill] sm:$0xff]  ;;  %v12816_v50 = vld [vmem:[#allocation142_spill] sm:$0xff] }
 0x7ac   :  { %2751 = vmatprep.subr.mxu0 %v12782_v51  ;;  %2822 = vmatprep.subr.mxu1 %v12783_v7  ;;  %v12817_v51 = vld [vmem:[#allocation143_spill] sm:$0xff]  ;;  %v12818_v7 = vld [vmem:[#allocation144_spill] sm:$0xff] }
 0x7ad   :  { %2752 = vmatpush2.msra.mxu0 %v12784_v10  ;;  %2823 = vmatpush2.msra.mxu1 %v12785_v11  ;;  %v12819_v10 = vld [vmem:[#allocation145_spill] sm:$0xff]  ;;  %v12820_v11 = vld [vmem:[#allocation146_spill] sm:$0xff] }
 0x7ae   :  { %2753 = vmatprep.subr.mxu0 %v12786_v14  ;;  %2824 = vmatprep.subr.mxu1 %v12787_v15  ;;  %v12821_v14 = vld [vmem:[#allocation147_spill] sm:$0xff]  ;;  %v12822_v15 = vld [vmem:[#allocation148_spill] sm:$0xff] }
 0x7af   :  { %2754 = vmatpush2.msra.mxu0 %v12788_v16  ;;  %2825 = vmatpush2.msra.mxu1 %v12789_v17  ;;  %v12823_v16 = vld [vmem:[#allocation149_spill] sm:$0xff]  ;;  %v12824_v17 = vld [vmem:[#allocation150_spill] sm:$0xff] }
 0x7b0   :  { %2755 = vmatprep.subr.mxu0 %v12790_v18  ;;  %2826 = vmatprep.subr.mxu1 %v12791_v19  ;;  %v12825_v18 = vld [vmem:[#allocation151_spill] sm:$0xff]  ;;  %v12826_v19 = vld [vmem:[#allocation152_spill] sm:$0xff] }
 0x7b1   :  { %2756 = vmatpush2.msra.mxu0 %v12792_v20  ;;  %2827 = vmatpush2.msra.mxu1 %v12793_v21  ;;  %v12827_v20 = vld [vmem:[#allocation153_spill] sm:$0xff]  ;;  %v12828_v21 = vld [vmem:[#allocation154_spill] sm:$0xff] }
 0x7b2   :  { %2757 = vmatprep.subr.mxu0 %v12794_v23  ;;  %2828 = vmatprep.subr.mxu1 %v12795_v26  ;;  %v12829_v23 = vld [vmem:[#allocation155_spill] sm:$0xff]  ;;  %v12830_v26 = vld [vmem:[#allocation156_spill] sm:$0xff] }
 0x7b3   :  { %2758 = vmatpush2.msra.mxu0 %v12796_v27  ;;  %2829 = vmatpush2.msra.mxu1 %v12797_v28  ;;  %v12831_v27 = vld [vmem:[#allocation157_spill] sm:$0xff]  ;;  %v12832_v28 = vld [vmem:[#allocation158_spill] sm:$0xff] }
 0x7b4   :  { %2759 = vmatprep.subr.mxu0 %v12798_v30  ;;  %2830 = vmatprep.subr.mxu1 %v12799_v35  ;;  %v12833_v30 = vld [vmem:[#allocation159_spill] sm:$0xff]  ;;  %v12834_v35 = vld [vmem:[#allocation160_spill] sm:$0xff] }
 0x7b5   :  { %2760 = vmatpush2.msra.mxu0 %v12800_v39  ;;  %2831 = vmatpush2.msra.mxu1 %v12801_v40  ;;  %v12835_v39 = vld [vmem:[#allocation161_spill] sm:$0xff]  ;;  %v12836_v40 = vld [vmem:[#allocation162_spill] sm:$0xff] }
 0x7b6   :  { %2761 = vmatprep.subr.mxu0 %v12802_v8  ;;  %2832 = vmatprep.subr.mxu1 %v12803_v5  ;;  %v12837_v8 = vld [vmem:[#allocation163_spill] sm:$0xff]  ;;  %v12838_v5 = vld [vmem:[#allocation164_spill] sm:$0xff] }
 0x7b7   :  { %2762 = vmatpush2.msra.mxu0 %v12804_v58  ;;  %2833 = vmatpush2.msra.mxu1 %v12805_v52  ;;  %v12839_v58 = vld [vmem:[#allocation165_spill] sm:$0xff]  ;;  %v12840_v52 = vld [vmem:[#allocation166_spill] sm:$0xff] }
 0x7b8   :  { %2763 = vmatprep.subr.mxu0 %v12806_v54  ;;  %2834 = vmatprep.subr.mxu1 %v12807_v25  ;;  %v12841_v54 = vld [vmem:[#allocation167_spill] sm:$0xff]  ;;  %v12842_v25 = vld [vmem:[#allocation168_spill] sm:$0xff] }
 0x7b9   :  { %2764 = vmatpush2.msra.mxu0 %v12808_v42  ;;  %2835 = vmatpush2.msra.mxu1 %v12809_v43  ;;  %v12843_v42 = vld [vmem:[#allocation169_spill] sm:$0xff]  ;;  %v2407_v43 = vpop.f32.mrf.mxu0 }
 0x7ba   :  { %2765 = vmatprep.subr.mxu0 %v12810_v44  ;;  %2836 = vmatprep.subr.mxu1 %v12811_v45  ;;  %v2478_v44 = vpop.f32.mrf.mxu1 }
 0x7bb   :  { %2766 = vmatpush2.msra.mxu0 %v12812_v46  ;;  %2837 = vmatpush2.msra.mxu1 %v12813_v47  ;;  %v2409_v45 = vpop.f32.mrf.mxu0 }
 0x7bc   :  { %2767 = vmatprep.subr.mxu0 %v12814_v48  ;;  %2838 = vmatprep.subr.mxu1 %v12815_v49  ;;  %v2480_v47 = vpop.f32.mrf.mxu1 }
 0x7bd   :  { %2768 = vmatpush2.msra.mxu0 %v12816_v50  ;;  %2839 = vmatpush2.msra.mxu1 %v12817_v51 }
 0x7be   :  { %2769 = vmatprep.subr.mxu0 %v12818_v7  ;;  %2840 = vmatprep.subr.mxu1 %v12819_v10 }
 0x7bf   :  { %2770 = vmatpush2.msra.mxu0 %v12820_v11  ;;  %2841 = vmatpush2.msra.mxu1 %v12821_v14 }
 0x7c0   :  { %2771 = vmatprep.subr.mxu0 %v12822_v15  ;;  %2842 = vmatprep.subr.mxu1 %v12823_v16 }
 0x7c1   :  { %2772 = vmatpush2.msra.mxu0 %v12824_v17  ;;  %2843 = vmatpush2.msra.mxu1 %v12825_v18 }
 0x7c2   :  { %2773 = vmatprep.subr.mxu0 %v12826_v19  ;;  %2844 = vmatprep.subr.mxu1 %v12827_v20 }
 0x7c3   :  { %2774 = vmatpush2.msra.mxu0 %v12828_v21  ;;  %2845 = vmatpush2.msra.mxu1 %v12829_v23 }
 0x7c4   :  { %2775 = vmatprep.subr.mxu0 %v12830_v26  ;;  %2846 = vmatprep.subr.mxu1 %v12831_v27 }
 0x7c5   :  { %2776 = vmatpush2.msra.mxu0 %v12832_v28  ;;  %2847 = vmatpush2.msra.mxu1 %v12833_v30 }
 0x7c6   :  { %2777 = vmatprep.subr.mxu0 %v12834_v35  ;;  %2848 = vmatprep.subr.mxu1 %v12835_v39 }
 0x7c7   :  { %2778 = vmatpush2.msra.mxu0 %v12836_v40  ;;  %2849 = vmatpush2.msra.mxu1 %v12837_v8 }
 0x7c8   :  { %2779 = vmatprep.subr.mxu0 %v12838_v5  ;;  %2850 = vmatprep.subr.mxu1 %v12839_v58 }
 0x7c9   :  { %2780 = vmatpush2.msra.mxu0 %v12840_v52  ;;  %2851 = vmatpush2.msra.mxu1 %v12841_v54 }
 0x7ca   :  { %2859 = vmatprep.subr.mxu0 %v12842_v25  ;;  %2930 = vmatprep.subr.mxu1 %v12843_v42  ;;  %v12859_v42 = vld [vmem:[#allocation185_spill] sm:$0xff] }
 0x84a   :  { %v2612_v46 = vpop.f32.mrf.mxu0  ;;  %v2683_v51 = vpop.f32.mrf.mxu1 }
 0x84b   :  { %v2613_v48 = vadd.f32 %v2612_v46, %v2407_v43  ;;  %v2684_v18 = vadd.f32 %v2683_v51, %v2478_v44  ;;  %v12860_v43 = vld [vmem:[#allocation186_spill] sm:$0xff]  ;;  %v12861_v44 = vld [vmem:[#allocation187_spill] sm:$0xff]  ;;  %v12863_v46 = vld [vmem:[#allocation189_spill] sm:$0xff] }
 0x84c   :  { %v2614_v49 = vpop.f32.mrf.mxu0  ;;  %v2685_v15 = vpop.f32.mrf.mxu1  ;;  %v12868_v51 = vld [vmem:[#allocation194_spill] sm:$0xff] }
 0x84d   :  { %v2688_v50 = vadd.f32 %v2613_v48, %v7280_v1  ;;  %v2615_v7 = vadd.f32 %v2614_v49, %v2409_v45  ;;  %v2686_v16 = vadd.f32 %v2685_v15, %v2480_v47  ;;  %v2690_v21 = vadd.f32 %v2684_v18, %v7295_v56  ;;  %v12862_v45 = vld [vmem:[#allocation188_spill] sm:$0xff]  ;;  %v12864_v47 = vld [vmem:[#allocation190_spill] sm:$0xff]  ;;  %v12865_v48 = vld [vmem:[#allocation191_spill] sm:$0xff] }
 0x84e   :  { %v12866_v49 = vld [vmem:[#allocation192_spill] sm:$0xff]  ;;  %v12873_v15 = vld [vmem:[#allocation199_spill] sm:$0xff]  ;;  %v12876_v18 = vld [vmem:[#allocation202_spill] sm:$0xff] }
 0x84f   :  { %v4934_v10 = vmul.f32 -1.442695, %v2688_v50  ;;  %v2689_v11 = vadd.f32 %v2615_v7, %v7284_v2  ;;  %v2691_v17 = vadd.f32 %v2686_v16, %v7290_v55  ;;  %v12867_v50 = vld [vmem:[#allocation193_spill] sm:$0xff]  ;;  %v12869_v7 = vld [vmem:[#allocation195_spill] sm:$0xff]  ;;  %v12874_v16 = vld [vmem:[#allocation200_spill] sm:$0xff] }
 0x851   :  { %5137 = vpow2.f32 %v4934_v10  ;;  %v4935_v14 = vmul.f32 -1.442695, %v2689_v11  ;;  %v4936_v19 = vmul.f32 -1.442695, %v2691_v17  ;;  %v12870_v10 = vld [vmem:[#allocation196_spill] sm:$0xff]  ;;  %v12871_v11 = vld [vmem:[#allocation197_spill] sm:$0xff] }
 0x852   :  { %v12875_v17 = vld [vmem:[#allocation201_spill] sm:$0xff] }
 0x853   :  { %5139 = vpow2.f32 %v4935_v14  ;;  %v12872_v14 = vld [vmem:[#allocation198_spill] sm:$0xff] }
 0x854   :  { %5141 = vpow2.f32 %v4936_v19  ;;  %v12877_v19 = vld [vmem:[#allocation203_spill] sm:$0xff] }
 0x85e   :  { %v5138_v20 = vpop.eup %5137 }
 0x85f   :  { %v2695_v23 = vadd.f32 1.0, %v5138_v20  ;;  %v12878_v20 = vld [vmem:[#allocation204_spill] sm:$0xff] }
 0x860   :  { %v5140_v26 = vpop.eup %5139 }
 0x861   :  { %5143 = vrcp.f32 %v2695_v23  ;;  %v2701_v27 = vadd.f32 1.0, %v5140_v26  ;;  %v5142_v28 = vpop.eup %5141  ;;  %v12880_v23 = vld [vmem:[#allocation206_spill] sm:$0xff]  ;;  %v12881_v26 = vld [vmem:[#allocation207_spill] sm:$0xff] }
 0x862   :  { %5145 = vtanh.f32 %v2690_v21  ;;  %v2708_v40 = vadd.f32 1.0, %v5142_v28  ;;  %v12879_v21 = vld [vmem:[#allocation205_spill] sm:$0xff] }
 0x863   :  { %5147 = vrcp.f32 %v2701_v27  ;;  %v12882_v27 = vld [vmem:[#allocation208_spill] sm:$0xff]  ;;  %v12883_v28 = vld [vmem:[#allocation209_spill] sm:$0xff] }
 0x864   :  { %5149 = vrcp.f32 %v2708_v40  ;;  %v12887_v40 = vld [vmem:[#allocation213_spill] sm:$0xff] }
 0x86e   :  { %v5144_v30 = vpop.eup %5143 }
 0x86f   :  { %v5146_v35 = vpop.eup %5145 }
 0x870   :  { %v5148_v39 = vpop.eup %5147  ;;  %v2712_v8 = vmul.f32 %v5146_v35, %v5144_v30  ;;  %v12884_v30 = vld [vmem:[#allocation210_spill] sm:$0xff]  ;;  %v12885_v35 = vld [vmem:[#allocation211_spill] sm:$0xff] }
 0x871   :  { %v2711_v5 = vmul.f32 %v5148_v39, %v8628_v53  ;;  %v5150_v52 = vpop.eup %5149  ;;  %v12844_v53 = vld [vmem:[#allocation170_spill] sm:$0xff]  ;;  %v12886_v39 = vld [vmem:[#allocation212_spill] sm:$0xff] }
 0x873   :  { %v9229_v58 = vadd.f32 %v2712_v8, %v2711_v5  ;;  %v12888_v8 = vld [vmem:[#allocation214_spill] sm:$0xff]  ;;  %v12889_v5 = vld [vmem:[#allocation215_spill] sm:$0xff] }
 0x875   :  { %5151 = vtanh.f32 %v9229_v58 }
 0x882   :  { %v5152_v54 = vpop.eup %5151 }
 0x883   :  { %v2715_v25 = vmul.f32 %v5152_v54, %v5150_v52  ;;  %v12890_v52 = vld [vmem:[#allocation216_spill] sm:$0xff]  ;;  %v12891_v54 = vld [vmem:[#allocation217_spill] sm:$0xff] }
 0x885   :  { %2716 = vst [vmem:[#allocation3 + $0x3] sm:$0x1] %v2715_v25  ;;  %2781 = vmatprep.mubr.f32.mxu0 %v2715_v25  ;;  %2852 = vmatprep.mubr.f32.mxu1 %v2715_v25 }
 0x886   :  { %2782 = vmatmul.mubr.f32.vlgmr.msra.gmra.mxu0 %v9092_v12  ;;  %2853 = vmatmul.mubr.f32.vlgmr.msra.gmra.mxu1 %v9092_v12 }
 0x887   :  { %2860 = vmatpush1.msra.mxu0 %v8633_v41  ;;  %2931 = vmatpush1.msra.mxu1 %v8636_v34  ;;  %v12845_v41 = vld [vmem:[#allocation171_spill] sm:$0xff]  ;;  %v12846_v34 = vld [vmem:[#allocation172_spill] sm:$0xff] }
 0x888   :  { %2861 = vmatprep.subr.mxu0 %v8639_v60  ;;  %2923 = vmatprep.mubr.f32.mxu0 %v2715_v25  ;;  %v12847_v60 = vld [vmem:[#allocation173_spill] sm:$0xff] }
 0x889   :  { %2932 = vmatprep.subr.mxu1 %v8642_v3  ;;  %2994 = vmatprep.mubr.f32.mxu1 %v2715_v25  ;;  %v12848_v3 = vld [vmem:[#allocation174_spill] sm:$0xff] }
 0x88a   :  { %2862 = vmatpush1.msra.mxu0 %v8645_v4  ;;  %2933 = vmatpush1.msra.mxu1 %v8648_v33  ;;  %v12849_v4 = vld [vmem:[#allocation175_spill] sm:$0xff]  ;;  %v12850_v33 = vld [vmem:[#allocation176_spill] sm:$0xff]  ;;  %v12892_v25 = vld [vmem:[#allocation218_spill] sm:$0xff] }
 0x88b   :  { %2863 = vmatprep.subr.mxu0 %v8651_v59  ;;  %2934 = vmatprep.subr.mxu1 %v8654_v63  ;;  %v12851_v59 = vld [vmem:[#allocation177_spill] sm:$0xff]  ;;  %v12852_v63 = vld [vmem:[#allocation178_spill] sm:$0xff] }
 0x88c   :  { %2864 = vmatpush1.msra.mxu0 %v8657_v37  ;;  %2935 = vmatpush1.msra.mxu1 %v8660_v0  ;;  %v12853_v37 = vld [vmem:[#allocation179_spill] sm:$0xff]  ;;  %v12854_v0 = vld [vmem:[#allocation180_spill] sm:$0xff] }
 0x88d   :  { %2865 = vmatprep.subr.mxu0 %v8663_v38  ;;  %2936 = vmatprep.subr.mxu1 %v8666_v6  ;;  %v12855_v38 = vld [vmem:[#allocation181_spill] sm:$0xff]  ;;  %v12856_v6 = vld [vmem:[#allocation182_spill] sm:$0xff] }
 0x88e   :  { %2866 = vmatpush1.msra.mxu0 %v8669_v61  ;;  %2937 = vmatpush1.msra.mxu1 %v8672_v31  ;;  %v12857_v61 = vld [vmem:[#allocation183_spill] sm:$0xff]  ;;  %v12858_v31 = vld [vmem:[#allocation184_spill] sm:$0xff] }
 0x88f   :  { %2867 = vmatprep.subr.mxu0 %v12844_v53  ;;  %2938 = vmatprep.subr.mxu1 %v12845_v41  ;;  %v12893_v53 = vld [vmem:[#allocation219_spill] sm:$0xff]  ;;  %v12894_v41 = vld [vmem:[#allocation220_spill] sm:$0xff] }
 0x890   :  { %2868 = vmatpush1.msra.mxu0 %v12846_v34  ;;  %2939 = vmatpush1.msra.mxu1 %v12847_v60  ;;  %v12895_v34 = vld [vmem:[#allocation221_spill] sm:$0xff]  ;;  %v12896_v60 = vld [vmem:[#allocation222_spill] sm:$0xff] }
 0x891   :  { %2869 = vmatprep.subr.mxu0 %v12848_v3  ;;  %2940 = vmatprep.subr.mxu1 %v12849_v4  ;;  %v12897_v3 = vld [vmem:[#allocation223_spill] sm:$0xff]  ;;  %v12898_v4 = vld [vmem:[#allocation224_spill] sm:$0xff] }
 0x892   :  { %2870 = vmatpush1.msra.mxu0 %v12850_v33  ;;  %2941 = vmatpush1.msra.mxu1 %v12851_v59  ;;  %v12899_v33 = vld [vmem:[#allocation225_spill] sm:$0xff]  ;;  %v12900_v59 = vld [vmem:[#allocation226_spill] sm:$0xff] }
 0x893   :  { %2871 = vmatprep.subr.mxu0 %v12852_v63  ;;  %2942 = vmatprep.subr.mxu1 %v12853_v37  ;;  %v12901_v63 = vld [vmem:[#allocation227_spill] sm:$0xff]  ;;  %v12902_v37 = vld [vmem:[#allocation228_spill] sm:$0xff] }
 0x894   :  { %2872 = vmatpush1.msra.mxu0 %v12854_v0  ;;  %2943 = vmatpush1.msra.mxu1 %v12855_v38  ;;  %v12903_v0 = vld [vmem:[#allocation229_spill] sm:$0xff]  ;;  %v12904_v38 = vld [vmem:[#allocation230_spill] sm:$0xff] }
 0x895   :  { %2873 = vmatprep.subr.mxu0 %v12856_v6  ;;  %2944 = vmatprep.subr.mxu1 %v12857_v61  ;;  %v12905_v6 = vld [vmem:[#allocation231_spill] sm:$0xff]  ;;  %v12906_v61 = vld [vmem:[#allocation232_spill] sm:$0xff] }
 0x896   :  { %2874 = vmatpush1.msra.mxu0 %v12858_v31  ;;  %2945 = vmatpush1.msra.mxu1 %v12859_v42  ;;  %v12907_v31 = vld [vmem:[#allocation233_spill] sm:$0xff]  ;;  %v12908_v42 = vld [vmem:[#allocation234_spill] sm:$0xff] }
 0x897   :  { %2875 = vmatprep.subr.mxu0 %v12860_v43  ;;  %2946 = vmatprep.subr.mxu1 %v12861_v44  ;;  %v12909_v43 = vld [vmem:[#allocation235_spill] sm:$0xff]  ;;  %v12910_v44 = vld [vmem:[#allocation236_spill] sm:$0xff] }
 0x898   :  { %2876 = vmatpush1.msra.mxu0 %v12862_v45  ;;  %2947 = vmatpush1.msra.mxu1 %v12863_v46  ;;  %v12911_v45 = vld [vmem:[#allocation237_spill] sm:$0xff]  ;;  %v12912_v46 = vld [vmem:[#allocation238_spill] sm:$0xff] }
 0x899   :  { %2877 = vmatprep.subr.mxu0 %v12864_v47  ;;  %2948 = vmatprep.subr.mxu1 %v12865_v48  ;;  %v12913_v47 = vld [vmem:[#allocation239_spill] sm:$0xff]  ;;  %v12914_v48 = vld [vmem:[#allocation240_spill] sm:$0xff] }
 0x89a   :  { %2878 = vmatpush1.msra.mxu0 %v12866_v49  ;;  %2949 = vmatpush1.msra.mxu1 %v12867_v50  ;;  %v12915_v49 = vld [vmem:[#allocation241_spill] sm:$0xff]  ;;  %v12916_v50 = vld [vmem:[#allocation242_spill] sm:$0xff] }
 0x89b   :  { %2879 = vmatprep.subr.mxu0 %v12868_v51  ;;  %2950 = vmatprep.subr.mxu1 %v12869_v7  ;;  %v12917_v51 = vld [vmem:[#allocation243_spill] sm:$0xff]  ;;  %v12918_v7 = vld [vmem:[#allocation244_spill] sm:$0xff] }
 0x89c   :  { %2880 = vmatpush1.msra.mxu0 %v12870_v10  ;;  %2951 = vmatpush1.msra.mxu1 %v12871_v11  ;;  %v12919_v10 = vld [vmem:[#allocation245_spill] sm:$0xff]  ;;  %v12920_v11 = vld [vmem:[#allocation246_spill] sm:$0xff] }
 0x89d   :  { %2881 = vmatprep.subr.mxu0 %v12872_v14  ;;  %2952 = vmatprep.subr.mxu1 %v12873_v15  ;;  %v12921_v14 = vld [vmem:[#allocation247_spill] sm:$0xff]  ;;  %v12922_v15 = vld [vmem:[#allocation248_spill] sm:$0xff] }
 0x89e   :  { %2882 = vmatpush1.msra.mxu0 %v12874_v16  ;;  %2953 = vmatpush1.msra.mxu1 %v12875_v17  ;;  %v12923_v16 = vld [vmem:[#allocation249_spill] sm:$0xff]  ;;  %v12924_v17 = vld [vmem:[#allocation250_spill] sm:$0xff] }
 0x89f   :  { %2883 = vmatprep.subr.mxu0 %v12876_v18  ;;  %2954 = vmatprep.subr.mxu1 %v12877_v19  ;;  %v12925_v18 = vld [vmem:[#allocation251_spill] sm:$0xff]  ;;  %v12926_v19 = vld [vmem:[#allocation252_spill] sm:$0xff] }
 0x8a0   :  { %2884 = vmatpush1.msra.mxu0 %v12878_v20  ;;  %2955 = vmatpush1.msra.mxu1 %v12879_v21  ;;  %v12927_v20 = vld [vmem:[#allocation253_spill] sm:$0xff]  ;;  %v12928_v21 = vld [vmem:[#allocation254_spill] sm:$0xff] }
 0x8a1   :  { %2885 = vmatprep.subr.mxu0 %v12880_v23  ;;  %2956 = vmatprep.subr.mxu1 %v12881_v26  ;;  %v12929_v23 = vld [vmem:[#allocation255_spill] sm:$0xff]  ;;  %v12930_v26 = vld [vmem:[#allocation256_spill] sm:$0xff] }
 0x8a2   :  { %2886 = vmatpush1.msra.mxu0 %v12882_v27  ;;  %2957 = vmatpush1.msra.mxu1 %v12883_v28  ;;  %v12931_v27 = vld [vmem:[#allocation257_spill] sm:$0xff]  ;;  %v12932_v28 = vld [vmem:[#allocation258_spill] sm:$0xff] }
 0x8a3   :  { %2887 = vmatprep.subr.mxu0 %v12884_v30  ;;  %2958 = vmatprep.subr.mxu1 %v12885_v35  ;;  %v12933_v30 = vld [vmem:[#allocation259_spill] sm:$0xff]  ;;  %v12934_v35 = vld [vmem:[#allocation260_spill] sm:$0xff] }
 0x8a4   :  { %2888 = vmatpush1.msra.mxu0 %v12886_v39  ;;  %2959 = vmatpush1.msra.mxu1 %v12887_v40  ;;  %v12935_v39 = vld [vmem:[#allocation261_spill] sm:$0xff]  ;;  %v12936_v40 = vld [vmem:[#allocation262_spill] sm:$0xff] }
 0x8a5   :  { %2889 = vmatprep.subr.mxu0 %v12888_v8  ;;  %2960 = vmatprep.subr.mxu1 %v12889_v5  ;;  %v12937_v8 = vld [vmem:[#allocation263_spill] sm:$0xff]  ;;  %v12938_v5 = vld [vmem:[#allocation264_spill] sm:$0xff] }
 0x8a6   :  { %2890 = vmatpush1.msra.mxu0 %v12890_v52  ;;  %2961 = vmatpush1.msra.mxu1 %v12891_v54  ;;  %v12939_v52 = vld [vmem:[#allocation265_spill] sm:$0xff]  ;;  %v12940_v54 = vld [vmem:[#allocation266_spill] sm:$0xff] }
 0x8a7   :  { %2891 = vmatprep.subr.mxu0 %v12892_v25  ;;  %2962 = vmatprep.subr.mxu1 %v12893_v53  ;;  %v12941_v25 = vld [vmem:[#allocation267_spill] sm:$0xff]  ;;  %v12942_v53 = vld [vmem:[#allocation268_spill] sm:$0xff] }
 0x8a8   :  { %2892 = vmatpush2.msra.mxu0 %v12894_v41  ;;  %2963 = vmatpush2.msra.mxu1 %v12895_v34  ;;  %v12943_v41 = vld [vmem:[#allocation269_spill] sm:$0xff]  ;;  %v12944_v34 = vld [vmem:[#allocation270_spill] sm:$0xff] }
 0x8a9   :  { %2893 = vmatprep.subr.mxu0 %v12896_v60  ;;  %2964 = vmatprep.subr.mxu1 %v12897_v3  ;;  %v12945_v60 = vld [vmem:[#allocation271_spill] sm:$0xff]  ;;  %v12946_v3 = vld [vmem:[#allocation272_spill] sm:$0xff] }
 0x8aa   :  { %2894 = vmatpush2.msra.mxu0 %v12898_v4  ;;  %2965 = vmatpush2.msra.mxu1 %v12899_v33  ;;  %v12947_v4 = vld [vmem:[#allocation273_spill] sm:$0xff]  ;;  %v12948_v33 = vld [vmem:[#allocation274_spill] sm:$0xff] }
 0x8ab   :  { %2895 = vmatprep.subr.mxu0 %v12900_v59  ;;  %2966 = vmatprep.subr.mxu1 %v12901_v63  ;;  %v12949_v59 = vld [vmem:[#allocation275_spill] sm:$0xff]  ;;  %v12950_v63 = vld [vmem:[#allocation276_spill] sm:$0xff] }
 0x8ac   :  { %2896 = vmatpush2.msra.mxu0 %v12902_v37  ;;  %2967 = vmatpush2.msra.mxu1 %v12903_v0  ;;  %v12951_v37 = vld [vmem:[#allocation277_spill] sm:$0xff] }
 0x8ad   :  { %2897 = vmatprep.subr.mxu0 %v12904_v38  ;;  %2968 = vmatprep.subr.mxu1 %v12905_v6  ;;  %v9364_v0 = vld [vmem:[#allocation7 + $0x1e0] sm:$0xff]  ;;  %v9391_v6 = vld [vmem:[#allocation7 + $0x1b0] sm:$0xff] }
 0x8ae   :  { %2898 = vmatpush2.msra.mxu0 %v12906_v61  ;;  %2969 = vmatpush2.msra.mxu1 %v12907_v31  ;;  %v9388_v38 = vld [vmem:[#allocation7 + $0x1a0] sm:$0xff]  ;;  %v9394_v61 = vld [vmem:[#allocation7 + $0x188] sm:$0xff]  ;;  %v9397_v31 = vld [vmem:[#allocation7 + $0x198] sm:$0xff] }
 0x8af   :  { %2899 = vmatprep.subr.mxu0 %v12908_v42  ;;  %2970 = vmatprep.subr.mxu1 %v12909_v43  ;;  %v9400_v42 = vld [vmem:[#allocation7 + $0x180] sm:$0xff]  ;;  %v9403_v43 = vld [vmem:[#allocation7 + $0x190] sm:$0xff] }
 0x8b0   :  { %2900 = vmatpush2.msra.mxu0 %v12910_v44  ;;  %2971 = vmatpush2.msra.mxu1 %v12911_v45  ;;  %v9406_v44 = vld [vmem:[#allocation7 + $0x168] sm:$0xff]  ;;  %v9409_v45 = vld [vmem:[#allocation7 + $0x178] sm:$0xff] }
 0x8b1   :  { %2901 = vmatprep.subr.mxu0 %v12912_v46  ;;  %2972 = vmatprep.subr.mxu1 %v12913_v47  ;;  %v9412_v46 = vld [vmem:[#allocation7 + $0x160] sm:$0xff]  ;;  %v9415_v47 = vld [vmem:[#allocation7 + $0x170] sm:$0xff] }
 0x8b2   :  { %2902 = vmatpush2.msra.mxu0 %v12914_v48  ;;  %2973 = vmatpush2.msra.mxu1 %v12915_v49  ;;  %v9418_v48 = vld [vmem:[#allocation7 + $0x148] sm:$0xff]  ;;  %v9421_v49 = vld [vmem:[#allocation7 + $0x158] sm:$0xff] }
 0x8b3   :  { %2903 = vmatprep.subr.mxu0 %v12916_v50  ;;  %2974 = vmatprep.subr.mxu1 %v12917_v51  ;;  %v9424_v50 = vld [vmem:[#allocation7 + $0x140] sm:$0xff]  ;;  %v9427_v51 = vld [vmem:[#allocation7 + $0x150] sm:$0xff] }
 0x8b4   :  { %2904 = vmatpush2.msra.mxu0 %v12918_v7  ;;  %2975 = vmatpush2.msra.mxu1 %v12919_v10  ;;  %v9430_v7 = vld [vmem:[#allocation7 + $0x128] sm:$0xff]  ;;  %v9433_v10 = vld [vmem:[#allocation7 + $0x138] sm:$0xff] }
 0x8b5   :  { %2905 = vmatprep.subr.mxu0 %v12920_v11  ;;  %2976 = vmatprep.subr.mxu1 %v12921_v14  ;;  %v9436_v11 = vld [vmem:[#allocation7 + $0x120] sm:$0xff]  ;;  %v9439_v14 = vld [vmem:[#allocation7 + $0x130] sm:$0xff] }
 0x8b6   :  { %2906 = vmatpush2.msra.mxu0 %v12922_v15  ;;  %2977 = vmatpush2.msra.mxu1 %v12923_v16  ;;  %v9442_v15 = vld [vmem:[#allocation7 + $0x108] sm:$0xff]  ;;  %v9445_v16 = vld [vmem:[#allocation7 + $0x118] sm:$0xff] }
 0x8b7   :  { %2907 = vmatprep.subr.mxu0 %v12924_v17  ;;  %2978 = vmatprep.subr.mxu1 %v12925_v18  ;;  %v9448_v17 = vld [vmem:[#allocation7 + $0x100] sm:$0xff]  ;;  %v9451_v18 = vld [vmem:[#allocation7 + $0x110] sm:$0xff] }
 0x8b8   :  { %2908 = vmatpush2.msra.mxu0 %v12926_v19  ;;  %2979 = vmatpush2.msra.mxu1 %v12927_v20  ;;  %v9454_v19 = vld [vmem:[#allocation7 + $0xe8] sm:$0xff]  ;;  %v9457_v20 = vld [vmem:[#allocation7 + $0xf8] sm:$0xff] }
 0x8b9   :  { %2909 = vmatprep.subr.mxu0 %v12928_v21  ;;  %2980 = vmatprep.subr.mxu1 %v12929_v23  ;;  %v9460_v21 = vld [vmem:[#allocation7 + $0xe0] sm:$0xff]  ;;  %v9463_v23 = vld [vmem:[#allocation7 + $0xf0] sm:$0xff] }
 0x8ba   :  { %2910 = vmatpush2.msra.mxu0 %v12930_v26  ;;  %2981 = vmatpush2.msra.mxu1 %v12931_v27  ;;  %v9466_v26 = vld [vmem:[#allocation7 + $0xc8] sm:$0xff]  ;;  %v9469_v27 = vld [vmem:[#allocation7 + $0xd8] sm:$0xff] }
 0x8bb   :  { %2911 = vmatprep.subr.mxu0 %v12932_v28  ;;  %2982 = vmatprep.subr.mxu1 %v12933_v30  ;;  %v9472_v28 = vld [vmem:[#allocation7 + $0xc0] sm:$0xff]  ;;  %v9475_v30 = vld [vmem:[#allocation7 + $0xd0] sm:$0xff] }
 0x8bc   :  { %2912 = vmatpush2.msra.mxu0 %v12934_v35  ;;  %2983 = vmatpush2.msra.mxu1 %v12935_v39  ;;  %v9478_v35 = vld [vmem:[#allocation7 + $0xa8] sm:$0xff]  ;;  %v9481_v39 = vld [vmem:[#allocation7 + $0xb8] sm:$0xff] }
 0x8bd   :  { %2913 = vmatprep.subr.mxu0 %v12936_v40  ;;  %2984 = vmatprep.subr.mxu1 %v12937_v8  ;;  %12952 = vst [vmem:[#allocation14_spill] sm:$0xff] %v9478_v35  ;;  %12953 = vst [vmem:[#allocation15_spill] sm:$0xff] %v9481_v39  ;;  %v9484_v40 = vld [vmem:[#allocation7 + $0xa0] sm:$0xff]  ;;  %v9487_v8 = vld [vmem:[#allocation7 + $0xb0] sm:$0xff] }
 0x8be   :  { %2914 = vmatpush2.msra.mxu0 %v12938_v5  ;;  %2985 = vmatpush2.msra.mxu1 %v12939_v52  ;;  %12954 = vst [vmem:[#allocation16_spill] sm:$0xff] %v9484_v40  ;;  %12955 = vst [vmem:[#allocation17_spill] sm:$0xff] %v9487_v8  ;;  %v9490_v5 = vld [vmem:[#allocation7 + $0x88] sm:$0xff]  ;;  %v9493_v52 = vld [vmem:[#allocation7 + $0x98] sm:$0xff] }
 0x8bf   :  { %2915 = vmatprep.subr.mxu0 %v12940_v54  ;;  %2986 = vmatprep.subr.mxu1 %v12941_v25  ;;  %12956 = vst [vmem:[#allocation18_spill] sm:$0xff] %v9490_v5  ;;  %12957 = vst [vmem:[#allocation19_spill] sm:$0xff] %v9493_v52  ;;  %v9496_v54 = vld [vmem:[#allocation7 + $0x80] sm:$0xff]  ;;  %v9499_v25 = vld [vmem:[#allocation7 + $0x90] sm:$0xff] }
 0x8c0   :  { %2916 = vmatpush2.msra.mxu0 %v12942_v53  ;;  %2987 = vmatpush2.msra.mxu1 %v12943_v41  ;;  %12958 = vst [vmem:[#allocation20_spill] sm:$0xff] %v9496_v54  ;;  %12959 = vst [vmem:[#allocation21_spill] sm:$0xff] %v9499_v25  ;;  %v9502_v53 = vld [vmem:[#allocation7 + $0x68] sm:$0xff]  ;;  %v9505_v41 = vld [vmem:[#allocation7 + $0x78] sm:$0xff] }
 0x8c1   :  { %2917 = vmatprep.subr.mxu0 %v12944_v34  ;;  %2988 = vmatprep.subr.mxu1 %v12945_v60  ;;  %12960 = vst [vmem:[#allocation22_spill] sm:$0xff] %v9502_v53  ;;  %12961 = vst [vmem:[#allocation23_spill] sm:$0xff] %v9505_v41  ;;  %v9508_v34 = vld [vmem:[#allocation7 + $0x60] sm:$0xff]  ;;  %v9511_v60 = vld [vmem:[#allocation7 + $0x70] sm:$0xff] }
 0x8c2   :  { %2918 = vmatpush2.msra.mxu0 %v12946_v3  ;;  %2989 = vmatpush2.msra.mxu1 %v12947_v4  ;;  %12962 = vst [vmem:[#allocation24_spill] sm:$0xff] %v9508_v34  ;;  %12963 = vst [vmem:[#allocation25_spill] sm:$0xff] %v9511_v60  ;;  %v9514_v3 = vld [vmem:[#allocation7 + $0x48] sm:$0xff]  ;;  %v9517_v4 = vld [vmem:[#allocation7 + $0x58] sm:$0xff] }
 0x8c3   :  { %2919 = vmatprep.subr.mxu0 %v12948_v33  ;;  %2990 = vmatprep.subr.mxu1 %v12949_v59  ;;  %12964 = vst [vmem:[#allocation26_spill] sm:$0xff] %v9514_v3  ;;  %12965 = vst [vmem:[#allocation27_spill] sm:$0xff] %v9517_v4  ;;  %v9520_v33 = vld [vmem:[#allocation7 + $0x40] sm:$0xff]  ;;  %v9523_v59 = vld [vmem:[#allocation7 + $0x50] sm:$0xff] }
 0x8c4   :  { %2920 = vmatpush2.msra.mxu0 %v8993_v62  ;;  %2991 = vmatpush2.msra.mxu1 %v12950_v63  ;;  %v9367_v62 = vld [vmem:[#allocation7 + $0x1f0] sm:$0xff]  ;;  %12966 = vst [vmem:[#allocation28_spill] sm:$0xff] %v9520_v33  ;;  %12967 = vst [vmem:[#allocation29_spill] sm:$0xff] %v9523_v59  ;;  %v9526_v63 = vld [vmem:[#allocation7 + $0x28] sm:$0xff] }
 0x8c5   :  { %2921 = vmatprep.subr.mxu0 %v12951_v37  ;;  %2992 = vmatprep.subr.mxu1 %v9002_v57  ;;  %v9370_v57 = vld [vmem:[#allocation7 + $0x1c8] sm:$0xff]  ;;  %12968 = vst [vmem:[#allocation30_spill] sm:$0xff] %v9526_v63  ;;  %v9529_v37 = vld [vmem:[#allocation7 + $0x38] sm:$0xff] }
 0x8c6   :  { %2922 = vmatpush2.msra.mxu0 %v9005_v22  ;;  %2993 = vmatpush2.msra.mxu1 %v9008_v36  ;;  %v9373_v22 = vld [vmem:[#allocation7 + $0x1d8] sm:$0xff]  ;;  %v9376_v36 = vld [vmem:[#allocation7 + $0x1c0] sm:$0xff]  ;;  %12969 = vst [vmem:[#allocation31_spill] sm:$0xff] %v9529_v37 }
 0x8c7   :  { %2924 = vmatmul.mubr.f32.vlgmr.msra.gmra.mxu0 %v9092_v12  ;;  %2995 = vmatmul.mubr.f32.vlgmr.msra.gmra.mxu1 %v9092_v12  ;;  %v9385_v12 = vld [vmem:[#allocation7 + $0x1b8] sm:$0xff] }
 0x8c8   :  { %3064 = vmatprep.subr.mxu0 %v9013_v32  ;;  %3135 = vmatprep.subr.mxu1 %v9016_v29  ;;  %v9379_v29 = vld [vmem:[#allocation7 + $0x1d0] sm:$0xff]  ;;  %v9382_v32 = vld [vmem:[#allocation7 + $0x1a8] sm:$0xff] }
 0x8c9   :  { %3065 = vmatpush1.msra.mxu0 %v9364_v0  ;;  %3136 = vmatpush1.msra.mxu1 %v9367_v62 }
 0x8ca   :  { %3066 = vmatprep.subr.mxu0 %v9370_v57  ;;  %3137 = vmatprep.subr.mxu1 %v9373_v22 }
 0x8cb   :  { %3067 = vmatpush1.msra.mxu0 %v9376_v36  ;;  %3138 = vmatpush1.msra.mxu1 %v9379_v29 }
 0x8cc   :  { %3068 = vmatprep.subr.mxu0 %v9382_v32  ;;  %3139 = vmatprep.subr.mxu1 %v9385_v12 }
 0x8cd   :  { %3069 = vmatpush1.msra.mxu0 %v9388_v38  ;;  %3140 = vmatpush1.msra.mxu1 %v9391_v6 }
 0x8ce   :  { %3070 = vmatprep.subr.mxu0 %v9394_v61  ;;  %3141 = vmatprep.subr.mxu1 %v9397_v31 }
 0x8cf   :  { %3071 = vmatpush1.msra.mxu0 %v9400_v42  ;;  %3142 = vmatpush1.msra.mxu1 %v9403_v43 }
 0x8d0   :  { %3072 = vmatprep.subr.mxu0 %v9406_v44  ;;  %3143 = vmatprep.subr.mxu1 %v9409_v45 }
 0x8d1   :  { %3073 = vmatpush1.msra.mxu0 %v9412_v46  ;;  %3144 = vmatpush1.msra.mxu1 %v9415_v47 }
 0x8d2   :  { %3074 = vmatprep.subr.mxu0 %v9418_v48  ;;  %3145 = vmatprep.subr.mxu1 %v9421_v49 }
 0x8d3   :  { %3075 = vmatpush1.msra.mxu0 %v9424_v50  ;;  %3146 = vmatpush1.msra.mxu1 %v9427_v51 }
 0x8d4   :  { %3076 = vmatprep.subr.mxu0 %v9430_v7  ;;  %3147 = vmatprep.subr.mxu1 %v9433_v10 }
 0x8d5   :  { %3077 = vmatpush1.msra.mxu0 %v9436_v11  ;;  %3148 = vmatpush1.msra.mxu1 %v9439_v14 }
 0x8d6   :  { %3078 = vmatprep.subr.mxu0 %v9442_v15  ;;  %3149 = vmatprep.subr.mxu1 %v9445_v16 }
 0x8d7   :  { %3079 = vmatpush1.msra.mxu0 %v9448_v17  ;;  %3150 = vmatpush1.msra.mxu1 %v9451_v18 }
 0x8d8   :  { %3080 = vmatprep.subr.mxu0 %v9454_v19  ;;  %3151 = vmatprep.subr.mxu1 %v9457_v20 }
 0x8d9   :  { %3081 = vmatpush1.msra.mxu0 %v9460_v21  ;;  %3152 = vmatpush1.msra.mxu1 %v9463_v23 }
 0x8da   :  { %3082 = vmatprep.subr.mxu0 %v9466_v26  ;;  %3153 = vmatprep.subr.mxu1 %v9469_v27 }
 0x8db   :  { %3083 = vmatpush1.msra.mxu0 %v9472_v28  ;;  %3154 = vmatpush1.msra.mxu1 %v9475_v30 }
 0x8dc   :  { %3084 = vmatprep.subr.mxu0 %v9478_v35  ;;  %3155 = vmatprep.subr.mxu1 %v9481_v39 }
 0x8dd   :  { %3085 = vmatpush1.msra.mxu0 %v9484_v40  ;;  %3156 = vmatpush1.msra.mxu1 %v9487_v8 }
 0x8de   :  { %3086 = vmatprep.subr.mxu0 %v9490_v5  ;;  %3157 = vmatprep.subr.mxu1 %v9493_v52 }
 0x8df   :  { %3087 = vmatpush1.msra.mxu0 %v9496_v54  ;;  %3158 = vmatpush1.msra.mxu1 %v9499_v25  ;;  %v3002_v54 = vld [vmem:[#allocation2 + $0x4] ss:$8 sm:$0xf] }
 0x8e0   :  { %3088 = vmatprep.subr.mxu0 %v9502_v53  ;;  %3159 = vmatprep.subr.mxu1 %v9505_v41 }
 0x8e1   :  { %3089 = vmatpush1.msra.mxu0 %v9508_v34  ;;  %3160 = vmatpush1.msra.mxu1 %v9511_v60 }
 0x8e2   :  { %3090 = vmatprep.subr.mxu0 %v9514_v3  ;;  %3161 = vmatprep.subr.mxu1 %v9517_v4  ;;  %v9532_v3 = vld [vmem:[#allocation7 + $0x20] sm:$0xff]  ;;  %v9535_v4 = vld [vmem:[#allocation7 + $0x30] sm:$0xff] }
 0x8e3   :  { %3091 = vmatpush1.msra.mxu0 %v9520_v33  ;;  %3162 = vmatpush1.msra.mxu1 %v9523_v59  ;;  %12970 = vst [vmem:[#allocation32_spill] sm:$0xff] %v9532_v3  ;;  %12971 = vst [vmem:[#allocation33_spill] sm:$0xff] %v9535_v4  ;;  %v9538_v33 = vld [vmem:[#allocation7 + $0x8] sm:$0xff]  ;;  %v9541_v59 = vld [vmem:[#allocation7 + $0x18] sm:$0xff] }
 0x8e4   :  { %3092 = vmatprep.subr.mxu0 %v9526_v63  ;;  %3163 = vmatprep.subr.mxu1 %v9529_v37  ;;  %12972 = vst [vmem:[#allocation34_spill] sm:$0xff] %v9538_v33  ;;  %12973 = vst [vmem:[#allocation35_spill] sm:$0xff] %v9541_v59  ;;  %v9544_v63 = vld [vmem:[#allocation7] sm:$0xff]  ;;  %v9548_v37 = vld [vmem:[#allocation7 + $0x10] sm:$0xff] }
 0x8e5   :  { %3093 = vmatpush1.msra.mxu0 %v9532_v3  ;;  %3164 = vmatpush1.msra.mxu1 %v9535_v4  ;;  %12974 = vst [vmem:[#allocation36_spill] sm:$0xff] %v9544_v63  ;;  %12975 = vst [vmem:[#allocation38_spill] sm:$0xff] %v9548_v37  ;;  %v9552_v4 = vld [vmem:[#allocation9 + $0x3c8] sm:$0xff] }
 0x8e6   :  { %3094 = vmatprep.subr.mxu0 %v9538_v33  ;;  %3165 = vmatprep.subr.mxu1 %v9541_v59  ;;  %12976 = vst [vmem:[#allocation39_spill] sm:$0xff] %v9552_v4  ;;  %v9555_v33 = vld [vmem:[#allocation9 + $0x3d8] sm:$0xff] }
 0x8e7   :  { %3095 = vmatpush1.msra.mxu0 %v9544_v63  ;;  %3128 = vmatprep.mubr.f32.mxu0 %v12710_v13  ;;  %12977 = vst [vmem:[#allocation40_spill] sm:$0xff] %v9555_v33 }
 0x8e8   :  { %3166 = vmatpush1.msra.mxu1 %v9548_v37  ;;  %3199 = vmatprep.mubr.f32.mxu1 %v12710_v13 }
 0x8e9   :  { %3235 = vmatprep.subr.mxu0 %v9552_v4  ;;  %3306 = vmatprep.subr.mxu1 %v9555_v33 }
 0x946   :  { %v2783_v59 = vpop.f32.mrf.mxu0  ;;  %v2854_v3 = vpop.f32.mrf.mxu1 }
 0x948   :  { %v2785_v60 = vpop.f32.mrf.mxu0  ;;  %v2856_v63 = vpop.f32.mrf.mxu1 }
 0x949   :  { %v3007_v34 = vcombine.low %v2783_v59, %v2785_v60  ;;  %v3008_v41 = vcombine.low %v2854_v3, %v2856_v63  ;;  %v9578_v59 = vld [vmem:[#allocation9 + $0x398] sm:$0xff]  ;;  %v9581_v63 = vld [vmem:[#allocation9 + $0x380] sm:$0xff] }
 0x94a   :  { %12982 = vst [vmem:[#allocation45_spill] sm:$0xff] %v9578_v59  ;;  %12983 = vst [vmem:[#allocation46_spill] sm:$0xff] %v9581_v63 }
 0x94b   :  { %v3015_v53 = vrot.slane %v3007_v34, %v12714_v24  ;;  %v3022_v37 = vrot.slane %v3008_v41, %v12714_v24 }
 0x94d   :  { %v3023_v25 = vcombine.low %v3015_v53, %v3022_v37  ;;  %v9584_v37 = vld [vmem:[#allocation9 + $0x390] sm:$0xff] }
 0x94e   :  { %12984 = vst [vmem:[#allocation47_spill] sm:$0xff] %v9584_v37 }
 0x94f   :  { %v3030_v13 = vrot.slane %v3023_v25, %v12714_v24 }
 0x951   :  { %v3032_v52 = vadd.f32 %v3030_v13, %v3002_v54 }
 0x953   :  { %v4937_v4 = vmul.f32 -1.442695, %v3032_v52  ;;  %v3040_v5 = vrot.slane %v3032_v52, 1  ;;  %v3051_v33 = vrot.slane %v3032_v52, 3  ;;  %v3048_v35 = vrot.slane %v3032_v52, 2 }
 0x955   :  { %5153 = vpow2.f32 %v4937_v4  ;;  %v4938_v8 = vmul.f32 -1.442695, %v3040_v5  ;;  %v4939_v40 = vmul.f32 -1.442695, %v3051_v33  ;;  %v9572_v33 = vld [vmem:[#allocation9 + $0x3d0] sm:$0xff] }
 0x956   :  { %12980 = vst [vmem:[#allocation43_spill] sm:$0xff] %v9572_v33 }
 0x957   :  { %5155 = vpow2.f32 %v4938_v8 }
 0x958   :  { %5157 = vpow2.f32 %v4939_v40 }
 0x962   :  { %v5154_v39 = vpop.eup %5153 }
 0x963   :  { %v3036_v60 = vadd.f32 1.0, %v5154_v39 }
 0x964   :  { %v5156_v3 = vpop.eup %5155 }
 0x965   :  { %5159 = vrcp.f32 %v3036_v60  ;;  %v3045_v34 = vadd.f32 1.0, %v5156_v3  ;;  %v5158_v53 = vpop.eup %5157  ;;  %v9587_v60 = vld [vmem:[#allocation9 + $0x348] sm:$0xff]  ;;  %v9590_v3 = vld [vmem:[#allocation9 + $0x358] sm:$0xff] }
 0x966   :  { %5161 = vtanh.f32 %v3048_v35  ;;  %v3056_v54 = vadd.f32 1.0, %v5158_v53  ;;  %v9569_v35 = vld [vmem:[#allocation9 + $0x3c0] sm:$0xff]  ;;  %12985 = vst [vmem:[#allocation48_spill] sm:$0xff] %v9587_v60  ;;  %12986 = vst [vmem:[#allocation49_spill] sm:$0xff] %v9590_v3  ;;  %v9596_v53 = vld [vmem:[#allocation9 + $0x350] sm:$0xff] }
 0x967   :  { %5163 = vrcp.f32 %v3045_v34  ;;  %12979 = vst [vmem:[#allocation42_spill] sm:$0xff] %v9569_v35  ;;  %v9593_v34 = vld [vmem:[#allocation9 + $0x340] sm:$0xff]  ;;  %12988 = vst [vmem:[#allocation51_spill] sm:$0xff] %v9596_v53 }
 0x968   :  { %5165 = vrcp.f32 %v3056_v54  ;;  %12987 = vst [vmem:[#allocation50_spill] sm:$0xff] %v9593_v34  ;;  %v9608_v54 = vld [vmem:[#allocation9 + $0x310] sm:$0xff] }
 0x969   :  { %12992 = vst [vmem:[#allocation55_spill] sm:$0xff] %v9608_v54 }
 0x972   :  { %v5160_v25 = vpop.eup %5159 }
 0x973   :  { %v5162_v41 = vpop.eup %5161 }
 0x974   :  { %v5164_v13 = vpop.eup %5163  ;;  %v3060_v5 = vmul.f32 %v5162_v41, %v5160_v25  ;;  %v9599_v25 = vld [vmem:[#allocation9 + $0x308] sm:$0xff]  ;;  %v9602_v41 = vld [vmem:[#allocation9 + $0x318] sm:$0xff] }
 0x975   :  { %v3059_v4 = vmul.f32 %v5164_v13, %v9089_v9  ;;  %v5166_v39 = vpop.eup %5165  ;;  %v9575_v9 = vld [vmem:[#allocation9 + $0x388] sm:$0xff]  ;;  %12989 = vst [vmem:[#allocation52_spill] sm:$0xff] %v9599_v25  ;;  %12990 = vst [vmem:[#allocation53_spill] sm:$0xff] %v9602_v41  ;;  %v9605_v13 = vld [vmem:[#allocation9 + $0x300] sm:$0xff] }
 0x976   :  { %12981 = vst [vmem:[#allocation44_spill] sm:$0xff] %v9575_v9  ;;  %12991 = vst [vmem:[#allocation54_spill] sm:$0xff] %v9605_v13 }
 0x977   :  { %v9562_v8 = vadd.f32 %v3060_v5, %v3059_v4  ;;  %v9611_v4 = vld [vmem:[#allocation9 + $0x2c8] sm:$0xff]  ;;  %v9614_v5 = vld [vmem:[#allocation9 + $0x2d8] sm:$0xff] }
 0x978   :  { %12993 = vst [vmem:[#allocation56_spill] sm:$0xff] %v9611_v4  ;;  %12994 = vst [vmem:[#allocation57_spill] sm:$0xff] %v9614_v5 }
 0x979   :  { %12978 = vst [vmem:[#allocation41_spill] sm:$0xff] %v9562_v8  ;;  %5167 = vtanh.f32 %v9562_v8 }
 0x986   :  { %v5168_v52 = vpop.eup %5167 }
 0x987   :  { %v9565_v40 = vmul.f32 %v5168_v52, %v5166_v39  ;;  %v9617_v39 = vld [vmem:[#allocation9 + $0x2c0] sm:$0xff]  ;;  %v9620_v52 = vld [vmem:[#allocation9 + $0x2d0] sm:$0xff] }
 0x988   :  { %12995 = vst [vmem:[#allocation58_spill] sm:$0xff] %v9617_v39  ;;  %12996 = vst [vmem:[#allocation59_spill] sm:$0xff] %v9620_v52 }
 0x989   :  { %3129 = vmatmul.mubr.f32.vlgmr.msra.gmra.mxu0 %v9565_v40  ;;  %3200 = vmatmul.mubr.f32.vlgmr.msra.gmra.mxu1 %v9565_v40 }
 0x98a   :  { %3236 = vmatpush1.msra.mxu0 %v9569_v35  ;;  %3307 = vmatpush1.msra.mxu1 %v9572_v33 }
 0x98b   :  { %3237 = vmatprep.subr.mxu0 %v9575_v9  ;;  %3308 = vmatprep.subr.mxu1 %v9578_v59 }
 0x98c   :  { %3238 = vmatpush1.msra.mxu0 %v9581_v63  ;;  %3309 = vmatpush1.msra.mxu1 %v9584_v37 }
 0x98d   :  { %3239 = vmatprep.subr.mxu0 %v9587_v60  ;;  %3310 = vmatprep.subr.mxu1 %v9590_v3 }
 0x98e   :  { %3240 = vmatpush1.msra.mxu0 %v9593_v34  ;;  %3311 = vmatpush1.msra.mxu1 %v9596_v53 }
 0x98f   :  { %3241 = vmatprep.subr.mxu0 %v9599_v25  ;;  %3312 = vmatprep.subr.mxu1 %v9602_v41  ;;  %v2996_v41 = vpop.f32.mrf.mxu1 }
 0x990   :  { %3242 = vmatpush1.msra.mxu0 %v9605_v13  ;;  %3313 = vmatpush1.msra.mxu1 %v9608_v54  ;;  %v9623_v13 = vld [vmem:[#allocation9 + $0x288] sm:$0xff]  ;;  %v9626_v54 = vld [vmem:[#allocation9 + $0x298] sm:$0xff] }
 0x991   :  { %3243 = vmatprep.subr.mxu0 %v9611_v4  ;;  %3314 = vmatprep.subr.mxu1 %v9614_v5  ;;  %12997 = vst [vmem:[#allocation60_spill] sm:$0xff] %v9623_v13  ;;  %12998 = vst [vmem:[#allocation61_spill] sm:$0xff] %v9626_v54  ;;  %v9629_v4 = vld [vmem:[#allocation9 + $0x280] sm:$0xff]  ;;  %v9632_v5 = vld [vmem:[#allocation9 + $0x290] sm:$0xff]  ;;  %v2998_v53 = vpop.f32.mrf.mxu1 }
 0x992   :  { %3244 = vmatpush1.msra.mxu0 %v9617_v39  ;;  %3315 = vmatpush1.msra.mxu1 %v9620_v52  ;;  %12999 = vst [vmem:[#allocation62_spill] sm:$0xff] %v9629_v4  ;;  %13000 = vst [vmem:[#allocation63_spill] sm:$0xff] %v9632_v5  ;;  %v9635_v39 = vld [vmem:[#allocation9 + $0x248] sm:$0xff]  ;;  %v9638_v52 = vld [vmem:[#allocation9 + $0x258] sm:$0xff] }
 0x993   :  { %3245 = vmatprep.subr.mxu0 %v9623_v13  ;;  %3316 = vmatprep.subr.mxu1 %v9626_v54  ;;  %13001 = vst [vmem:[#allocation64_spill] sm:$0xff] %v9635_v39  ;;  %13002 = vst [vmem:[#allocation65_spill] sm:$0xff] %v9638_v52  ;;  %v9641_v13 = vld [vmem:[#allocation9 + $0x240] sm:$0xff]  ;;  %v9644_v54 = vld [vmem:[#allocation9 + $0x250] sm:$0xff] }
 0x994   :  { %3246 = vmatpush1.msra.mxu0 %v9629_v4  ;;  %3317 = vmatpush1.msra.mxu1 %v9632_v5  ;;  %13003 = vst [vmem:[#allocation66_spill] sm:$0xff] %v9641_v13  ;;  %13004 = vst [vmem:[#allocation67_spill] sm:$0xff] %v9644_v54  ;;  %v9647_v4 = vld [vmem:[#allocation9 + $0x208] sm:$0xff]  ;;  %v9650_v5 = vld [vmem:[#allocation9 + $0x218] sm:$0xff] }
 0x995   :  { %3247 = vmatprep.subr.mxu0 %v9635_v39  ;;  %3318 = vmatprep.subr.mxu1 %v9638_v52  ;;  %13005 = vst [vmem:[#allocation68_spill] sm:$0xff] %v9647_v4  ;;  %13006 = vst [vmem:[#allocation69_spill] sm:$0xff] %v9650_v5  ;;  %v9653_v39 = vld [vmem:[#allocation9 + $0x200] sm:$0xff]  ;;  %v9656_v52 = vld [vmem:[#allocation9 + $0x210] sm:$0xff] }
 0x996   :  { %3248 = vmatpush1.msra.mxu0 %v9641_v13  ;;  %3319 = vmatpush1.msra.mxu1 %v9644_v54  ;;  %13007 = vst [vmem:[#allocation70_spill] sm:$0xff] %v9653_v39  ;;  %13008 = vst [vmem:[#allocation71_spill] sm:$0xff] %v9656_v52  ;;  %v9659_v13 = vld [vmem:[#allocation9 + $0x1c8] sm:$0xff]  ;;  %v9662_v54 = vld [vmem:[#allocation9 + $0x1d8] sm:$0xff] }
 0x997   :  { %3249 = vmatprep.subr.mxu0 %v9647_v4  ;;  %3320 = vmatprep.subr.mxu1 %v9650_v5  ;;  %13009 = vst [vmem:[#allocation72_spill] sm:$0xff] %v9659_v13  ;;  %13010 = vst [vmem:[#allocation73_spill] sm:$0xff] %v9662_v54  ;;  %v9665_v4 = vld [vmem:[#allocation9 + $0x1c0] sm:$0xff]  ;;  %v9668_v5 = vld [vmem:[#allocation9 + $0x1d0] sm:$0xff] }
 0x998   :  { %3250 = vmatpush1.msra.mxu0 %v9653_v39  ;;  %3321 = vmatpush1.msra.mxu1 %v9656_v52  ;;  %13011 = vst [vmem:[#allocation74_spill] sm:$0xff] %v9665_v4  ;;  %13012 = vst [vmem:[#allocation75_spill] sm:$0xff] %v9668_v5  ;;  %v9671_v39 = vld [vmem:[#allocation9 + $0x188] sm:$0xff]  ;;  %v9674_v52 = vld [vmem:[#allocation9 + $0x198] sm:$0xff] }
 0x999   :  { %3251 = vmatprep.subr.mxu0 %v9659_v13  ;;  %3322 = vmatprep.subr.mxu1 %v9662_v54  ;;  %13013 = vst [vmem:[#allocation76_spill] sm:$0xff] %v9671_v39  ;;  %13014 = vst [vmem:[#allocation77_spill] sm:$0xff] %v9674_v52  ;;  %v9677_v13 = vld [vmem:[#allocation9 + $0x180] sm:$0xff]  ;;  %v9680_v54 = vld [vmem:[#allocation9 + $0x190] sm:$0xff] }
 0x99a   :  { %3252 = vmatpush1.msra.mxu0 %v9665_v4  ;;  %3323 = vmatpush1.msra.mxu1 %v9668_v5  ;;  %13015 = vst [vmem:[#allocation78_spill] sm:$0xff] %v9677_v13  ;;  %13016 = vst [vmem:[#allocation79_spill] sm:$0xff] %v9680_v54  ;;  %v9683_v4 = vld [vmem:[#allocation9 + $0x148] sm:$0xff]  ;;  %v9686_v5 = vld [vmem:[#allocation9 + $0x158] sm:$0xff] }
 0x99b   :  { %3253 = vmatprep.subr.mxu0 %v9671_v39  ;;  %3324 = vmatprep.subr.mxu1 %v9674_v52  ;;  %13017 = vst [vmem:[#allocation80_spill] sm:$0xff] %v9683_v4  ;;  %13018 = vst [vmem:[#allocation81_spill] sm:$0xff] %v9686_v5  ;;  %v9689_v39 = vld [vmem:[#allocation9 + $0x140] sm:$0xff]  ;;  %v9692_v52 = vld [vmem:[#allocation9 + $0x150] sm:$0xff] }
 0x99c   :  { %3254 = vmatpush1.msra.mxu0 %v9677_v13  ;;  %3325 = vmatpush1.msra.mxu1 %v9680_v54  ;;  %13019 = vst [vmem:[#allocation82_spill] sm:$0xff] %v9689_v39  ;;  %13020 = vst [vmem:[#allocation83_spill] sm:$0xff] %v9692_v52  ;;  %v9695_v13 = vld [vmem:[#allocation9 + $0x108] sm:$0xff]  ;;  %v9698_v54 = vld [vmem:[#allocation9 + $0x118] sm:$0xff] }
 0x99d   :  { %3255 = vmatprep.subr.mxu0 %v9683_v4  ;;  %3326 = vmatprep.subr.mxu1 %v9686_v5  ;;  %13021 = vst [vmem:[#allocation84_spill] sm:$0xff] %v9695_v13  ;;  %13022 = vst [vmem:[#allocation85_spill] sm:$0xff] %v9698_v54  ;;  %v9701_v4 = vld [vmem:[#allocation9 + $0x100] sm:$0xff]  ;;  %v9704_v5 = vld [vmem:[#allocation9 + $0x110] sm:$0xff] }
 0x99e   :  { %3256 = vmatpush1.msra.mxu0 %v9689_v39  ;;  %3327 = vmatpush1.msra.mxu1 %v9692_v52  ;;  %13023 = vst [vmem:[#allocation86_spill] sm:$0xff] %v9701_v4  ;;  %13024 = vst [vmem:[#allocation87_spill] sm:$0xff] %v9704_v5  ;;  %v9707_v39 = vld [vmem:[#allocation9 + $0xc8] sm:$0xff]  ;;  %v9710_v52 = vld [vmem:[#allocation9 + $0xd8] sm:$0xff] }
 0x99f   :  { %3257 = vmatprep.subr.mxu0 %v9695_v13  ;;  %3328 = vmatprep.subr.mxu1 %v9698_v54  ;;  %13025 = vst [vmem:[#allocation88_spill] sm:$0xff] %v9707_v39  ;;  %13026 = vst [vmem:[#allocation89_spill] sm:$0xff] %v9710_v52  ;;  %v9713_v13 = vld [vmem:[#allocation9 + $0xc0] sm:$0xff]  ;;  %v9716_v54 = vld [vmem:[#allocation9 + $0xd0] sm:$0xff] }
 0x9a0   :  { %3258 = vmatpush1.msra.mxu0 %v9701_v4  ;;  %3329 = vmatpush1.msra.mxu1 %v9704_v5  ;;  %13027 = vst [vmem:[#allocation90_spill] sm:$0xff] %v9713_v13  ;;  %13028 = vst [vmem:[#allocation91_spill] sm:$0xff] %v9716_v54  ;;  %v9719_v4 = vld [vmem:[#allocation9 + $0x88] sm:$0xff]  ;;  %v9722_v5 = vld [vmem:[#allocation9 + $0x98] sm:$0xff] }
 0x9a1   :  { %3259 = vmatprep.subr.mxu0 %v9707_v39  ;;  %3330 = vmatprep.subr.mxu1 %v9710_v52  ;;  %13029 = vst [vmem:[#allocation92_spill] sm:$0xff] %v9719_v4  ;;  %13030 = vst [vmem:[#allocation93_spill] sm:$0xff] %v9722_v5  ;;  %v9725_v39 = vld [vmem:[#allocation9 + $0x80] sm:$0xff]  ;;  %v9728_v52 = vld [vmem:[#allocation9 + $0x90] sm:$0xff] }
 0x9a2   :  { %3260 = vmatpush1.msra.mxu0 %v9713_v13  ;;  %3331 = vmatpush1.msra.mxu1 %v9716_v54  ;;  %13031 = vst [vmem:[#allocation94_spill] sm:$0xff] %v9725_v39  ;;  %13032 = vst [vmem:[#allocation95_spill] sm:$0xff] %v9728_v52  ;;  %v9731_v13 = vld [vmem:[#allocation9 + $0x48] sm:$0xff]  ;;  %v9734_v54 = vld [vmem:[#allocation9 + $0x58] sm:$0xff] }
 0x9a3   :  { %3261 = vmatprep.subr.mxu0 %v9719_v4  ;;  %3332 = vmatprep.subr.mxu1 %v9722_v5  ;;  %13033 = vst [vmem:[#allocation96_spill] sm:$0xff] %v9731_v13  ;;  %13034 = vst [vmem:[#allocation97_spill] sm:$0xff] %v9734_v54  ;;  %v9737_v4 = vld [vmem:[#allocation9 + $0x40] sm:$0xff]  ;;  %v9740_v5 = vld [vmem:[#allocation9 + $0x50] sm:$0xff] }
 0x9a4   :  { %3262 = vmatpush1.msra.mxu0 %v9725_v39  ;;  %3333 = vmatpush1.msra.mxu1 %v9728_v52  ;;  %13035 = vst [vmem:[#allocation98_spill] sm:$0xff] %v9737_v4  ;;  %13036 = vst [vmem:[#allocation99_spill] sm:$0xff] %v9740_v5  ;;  %v9743_v39 = vld [vmem:[#allocation9 + $0x8] sm:$0xff]  ;;  %v9746_v52 = vld [vmem:[#allocation9 + $0x18] sm:$0xff] }
 0x9a5   :  { %3263 = vmatprep.subr.mxu0 %v9731_v13  ;;  %3334 = vmatprep.subr.mxu1 %v9734_v54  ;;  %13037 = vst [vmem:[#allocation100_spill] sm:$0xff] %v9743_v39  ;;  %13038 = vst [vmem:[#allocation101_spill] sm:$0xff] %v9746_v52  ;;  %v9749_v13 = vld [vmem:[#allocation9] sm:$0xff]  ;;  %v9752_v54 = vld [vmem:[#allocation9 + $0x10] sm:$0xff] }
 0x9a6   :  { %3264 = vmatpush1.msra.mxu0 %v9737_v4  ;;  %3335 = vmatpush1.msra.mxu1 %v9740_v5  ;;  %13039 = vst [vmem:[#allocation102_spill] sm:$0xff] %v9749_v13  ;;  %13040 = vst [vmem:[#allocation103_spill] sm:$0xff] %v9752_v54  ;;  %v9755_v4 = vld [vmem:[#allocation9 + $0x7c8] sm:$0xff]  ;;  %v9758_v5 = vld [vmem:[#allocation9 + $0x7d8] sm:$0xff] }
 0x9a7   :  { %3265 = vmatprep.subr.mxu0 %v9743_v39  ;;  %3336 = vmatprep.subr.mxu1 %v9746_v52  ;;  %13041 = vst [vmem:[#allocation104_spill] sm:$0xff] %v9755_v4  ;;  %13042 = vst [vmem:[#allocation105_spill] sm:$0xff] %v9758_v5  ;;  %v9761_v39 = vld [vmem:[#allocation9 + $0x7c0] sm:$0xff]  ;;  %v9764_v52 = vld [vmem:[#allocation9 + $0x7d0] sm:$0xff] }
 0x9a8   :  { %3266 = vmatpush1.msra.mxu0 %v9749_v13  ;;  %3337 = vmatpush1.msra.mxu1 %v9752_v54  ;;  %13043 = vst [vmem:[#allocation106_spill] sm:$0xff] %v9761_v39  ;;  %13044 = vst [vmem:[#allocation107_spill] sm:$0xff] %v9764_v52  ;;  %v9767_v13 = vld [vmem:[#allocation9 + $0x788] sm:$0xff]  ;;  %v9770_v54 = vld [vmem:[#allocation9 + $0x798] sm:$0xff] }
 0x9a9   :  { %3267 = vmatprep.subr.mxu0 %v9755_v4  ;;  %3338 = vmatprep.subr.mxu1 %v9758_v5  ;;  %13045 = vst [vmem:[#allocation108_spill] sm:$0xff] %v9767_v13  ;;  %13046 = vst [vmem:[#allocation109_spill] sm:$0xff] %v9770_v54  ;;  %v9773_v4 = vld [vmem:[#allocation9 + $0x780] sm:$0xff]  ;;  %v9776_v5 = vld [vmem:[#allocation9 + $0x790] sm:$0xff] }
 0x9aa   :  { %3268 = vmatpush2.msra.mxu0 %v9761_v39  ;;  %3339 = vmatpush2.msra.mxu1 %v9764_v52  ;;  %13047 = vst [vmem:[#allocation110_spill] sm:$0xff] %v9773_v4  ;;  %13048 = vst [vmem:[#allocation111_spill] sm:$0xff] %v9776_v5  ;;  %v9779_v39 = vld [vmem:[#allocation9 + $0x748] sm:$0xff]  ;;  %v9782_v52 = vld [vmem:[#allocation9 + $0x758] sm:$0xff] }
 0x9ab   :  { %3269 = vmatprep.subr.mxu0 %v9767_v13  ;;  %3340 = vmatprep.subr.mxu1 %v9770_v54  ;;  %13049 = vst [vmem:[#allocation112_spill] sm:$0xff] %v9779_v39  ;;  %13050 = vst [vmem:[#allocation113_spill] sm:$0xff] %v9782_v52  ;;  %v9785_v13 = vld [vmem:[#allocation9 + $0x740] sm:$0xff]  ;;  %v9788_v54 = vld [vmem:[#allocation9 + $0x750] sm:$0xff] }
 0x9ac   :  { %3270 = vmatpush2.msra.mxu0 %v9773_v4  ;;  %3341 = vmatpush2.msra.mxu1 %v9776_v5  ;;  %13051 = vst [vmem:[#allocation114_spill] sm:$0xff] %v9785_v13  ;;  %13052 = vst [vmem:[#allocation115_spill] sm:$0xff] %v9788_v54  ;;  %v9791_v4 = vld [vmem:[#allocation9 + $0x708] sm:$0xff]  ;;  %v9794_v5 = vld [vmem:[#allocation9 + $0x718] sm:$0xff] }
 0x9ad   :  { %3271 = vmatprep.subr.mxu0 %v9779_v39  ;;  %3342 = vmatprep.subr.mxu1 %v9782_v52  ;;  %13053 = vst [vmem:[#allocation116_spill] sm:$0xff] %v9791_v4  ;;  %13054 = vst [vmem:[#allocation117_spill] sm:$0xff] %v9794_v5  ;;  %v9797_v39 = vld [vmem:[#allocation9 + $0x700] sm:$0xff]  ;;  %v9800_v52 = vld [vmem:[#allocation9 + $0x710] sm:$0xff] }
 0x9ae   :  { %3272 = vmatpush2.msra.mxu0 %v9785_v13  ;;  %3343 = vmatpush2.msra.mxu1 %v9788_v54  ;;  %13055 = vst [vmem:[#allocation118_spill] sm:$0xff] %v9797_v39  ;;  %13056 = vst [vmem:[#allocation119_spill] sm:$0xff] %v9800_v52  ;;  %v9803_v13 = vld [vmem:[#allocation9 + $0x6c8] sm:$0xff]  ;;  %v9806_v54 = vld [vmem:[#allocation9 + $0x6d8] sm:$0xff] }
 0x9af   :  { %3273 = vmatprep.subr.mxu0 %v9791_v4  ;;  %3344 = vmatprep.subr.mxu1 %v9794_v5  ;;  %13057 = vst [vmem:[#allocation120_spill] sm:$0xff] %v9803_v13  ;;  %13058 = vst [vmem:[#allocation121_spill] sm:$0xff] %v9806_v54  ;;  %v9809_v4 = vld [vmem:[#allocation9 + $0x6c0] sm:$0xff]  ;;  %v9812_v5 = vld [vmem:[#allocation9 + $0x6d0] sm:$0xff] }
 0x9b0   :  { %3274 = vmatpush2.msra.mxu0 %v9797_v39  ;;  %3345 = vmatpush2.msra.mxu1 %v9800_v52  ;;  %13059 = vst [vmem:[#allocation122_spill] sm:$0xff] %v9809_v4  ;;  %13060 = vst [vmem:[#allocation123_spill] sm:$0xff] %v9812_v5  ;;  %v9815_v39 = vld [vmem:[#allocation9 + $0x688] sm:$0xff]  ;;  %v9818_v52 = vld [vmem:[#allocation9 + $0x698] sm:$0xff] }
 0x9b1   :  { %3275 = vmatprep.subr.mxu0 %v9803_v13  ;;  %3346 = vmatprep.subr.mxu1 %v9806_v54  ;;  %13061 = vst [vmem:[#allocation124_spill] sm:$0xff] %v9815_v39  ;;  %13062 = vst [vmem:[#allocation125_spill] sm:$0xff] %v9818_v52  ;;  %v9821_v13 = vld [vmem:[#allocation9 + $0x680] sm:$0xff]  ;;  %v9824_v54 = vld [vmem:[#allocation9 + $0x690] sm:$0xff] }
 0x9b2   :  { %3276 = vmatpush2.msra.mxu0 %v9809_v4  ;;  %3347 = vmatpush2.msra.mxu1 %v9812_v5  ;;  %13063 = vst [vmem:[#allocation126_spill] sm:$0xff] %v9821_v13  ;;  %13064 = vst [vmem:[#allocation127_spill] sm:$0xff] %v9824_v54  ;;  %v9827_v4 = vld [vmem:[#allocation9 + $0x648] sm:$0xff]  ;;  %v9830_v5 = vld [vmem:[#allocation9 + $0x658] sm:$0xff] }
 0x9b3   :  { %3277 = vmatprep.subr.mxu0 %v9815_v39  ;;  %3348 = vmatprep.subr.mxu1 %v9818_v52  ;;  %13065 = vst [vmem:[#allocation128_spill] sm:$0xff] %v9827_v4  ;;  %13066 = vst [vmem:[#allocation129_spill] sm:$0xff] %v9830_v5  ;;  %v9833_v39 = vld [vmem:[#allocation9 + $0x640] sm:$0xff]  ;;  %v9836_v52 = vld [vmem:[#allocation9 + $0x650] sm:$0xff] }
 0x9b4   :  { %3278 = vmatpush2.msra.mxu0 %v9821_v13  ;;  %3349 = vmatpush2.msra.mxu1 %v9824_v54  ;;  %13067 = vst [vmem:[#allocation130_spill] sm:$0xff] %v9833_v39  ;;  %13068 = vst [vmem:[#allocation131_spill] sm:$0xff] %v9836_v52  ;;  %v9839_v13 = vld [vmem:[#allocation9 + $0x608] sm:$0xff]  ;;  %v9842_v54 = vld [vmem:[#allocation9 + $0x618] sm:$0xff] }
 0x9b5   :  { %3279 = vmatprep.subr.mxu0 %v9827_v4  ;;  %3350 = vmatprep.subr.mxu1 %v9830_v5  ;;  %13069 = vst [vmem:[#allocation132_spill] sm:$0xff] %v9839_v13  ;;  %13070 = vst [vmem:[#allocation133_spill] sm:$0xff] %v9842_v54  ;;  %v9845_v4 = vld [vmem:[#allocation9 + $0x600] sm:$0xff]  ;;  %v9848_v5 = vld [vmem:[#allocation9 + $0x610] sm:$0xff] }
 0x9b6   :  { %3280 = vmatpush2.msra.mxu0 %v9833_v39  ;;  %3351 = vmatpush2.msra.mxu1 %v9836_v52  ;;  %13071 = vst [vmem:[#allocation134_spill] sm:$0xff] %v9845_v4  ;;  %13072 = vst [vmem:[#allocation135_spill] sm:$0xff] %v9848_v5  ;;  %v9851_v39 = vld [vmem:[#allocation9 + $0x5c8] sm:$0xff]  ;;  %v9854_v52 = vld [vmem:[#allocation9 + $0x5d8] sm:$0xff] }
 0x9b7   :  { %3281 = vmatprep.subr.mxu0 %v9839_v13  ;;  %3352 = vmatprep.subr.mxu1 %v9842_v54  ;;  %13073 = vst [vmem:[#allocation136_spill] sm:$0xff] %v9851_v39  ;;  %13074 = vst [vmem:[#allocation137_spill] sm:$0xff] %v9854_v52  ;;  %v9857_v13 = vld [vmem:[#allocation9 + $0x5c0] sm:$0xff]  ;;  %v9860_v54 = vld [vmem:[#allocation9 + $0x5d0] sm:$0xff] }
 0x9b8   :  { %3282 = vmatpush2.msra.mxu0 %v9845_v4  ;;  %3353 = vmatpush2.msra.mxu1 %v9848_v5  ;;  %13075 = vst [vmem:[#allocation138_spill] sm:$0xff] %v9857_v13  ;;  %13076 = vst [vmem:[#allocation139_spill] sm:$0xff] %v9860_v54  ;;  %v9863_v4 = vld [vmem:[#allocation9 + $0x588] sm:$0xff]  ;;  %v9866_v5 = vld [vmem:[#allocation9 + $0x598] sm:$0xff] }
 0x9b9   :  { %3283 = vmatprep.subr.mxu0 %v9851_v39  ;;  %3354 = vmatprep.subr.mxu1 %v9854_v52  ;;  %13077 = vst [vmem:[#allocation140_spill] sm:$0xff] %v9863_v4  ;;  %13078 = vst [vmem:[#allocation141_spill] sm:$0xff] %v9866_v5  ;;  %v9869_v39 = vld [vmem:[#allocation9 + $0x580] sm:$0xff]  ;;  %v9872_v52 = vld [vmem:[#allocation9 + $0x590] sm:$0xff] }
 0x9ba   :  { %3284 = vmatpush2.msra.mxu0 %v9857_v13  ;;  %3355 = vmatpush2.msra.mxu1 %v9860_v54  ;;  %13079 = vst [vmem:[#allocation142_spill] sm:$0xff] %v9869_v39  ;;  %13080 = vst [vmem:[#allocation143_spill] sm:$0xff] %v9872_v52  ;;  %v9875_v13 = vld [vmem:[#allocation9 + $0x548] sm:$0xff]  ;;  %v9878_v54 = vld [vmem:[#allocation9 + $0x558] sm:$0xff] }
 0x9bb   :  { %3285 = vmatprep.subr.mxu0 %v9863_v4  ;;  %3356 = vmatprep.subr.mxu1 %v9866_v5  ;;  %13081 = vst [vmem:[#allocation144_spill] sm:$0xff] %v9875_v13  ;;  %13082 = vst [vmem:[#allocation145_spill] sm:$0xff] %v9878_v54  ;;  %v9881_v4 = vld [vmem:[#allocation9 + $0x540] sm:$0xff]  ;;  %v9884_v5 = vld [vmem:[#allocation9 + $0x550] sm:$0xff] }
 0x9bc   :  { %3286 = vmatpush2.msra.mxu0 %v9869_v39  ;;  %3357 = vmatpush2.msra.mxu1 %v9872_v52  ;;  %13083 = vst [vmem:[#allocation146_spill] sm:$0xff] %v9881_v4  ;;  %13084 = vst [vmem:[#allocation147_spill] sm:$0xff] %v9884_v5  ;;  %v9887_v39 = vld [vmem:[#allocation9 + $0x508] sm:$0xff]  ;;  %v9890_v52 = vld [vmem:[#allocation9 + $0x518] sm:$0xff] }
 0x9bd   :  { %3287 = vmatprep.subr.mxu0 %v9875_v13  ;;  %3358 = vmatprep.subr.mxu1 %v9878_v54  ;;  %13085 = vst [vmem:[#allocation148_spill] sm:$0xff] %v9887_v39  ;;  %13086 = vst [vmem:[#allocation149_spill] sm:$0xff] %v9890_v52  ;;  %v9893_v13 = vld [vmem:[#allocation9 + $0x500] sm:$0xff]  ;;  %v9896_v54 = vld [vmem:[#allocation9 + $0x510] sm:$0xff] }
 0x9be   :  { %3288 = vmatpush2.msra.mxu0 %v9881_v4  ;;  %3359 = vmatpush2.msra.mxu1 %v9884_v5  ;;  %13087 = vst [vmem:[#allocation150_spill] sm:$0xff] %v9893_v13  ;;  %13088 = vst [vmem:[#allocation151_spill] sm:$0xff] %v9896_v54  ;;  %v9899_v4 = vld [vmem:[#allocation9 + $0x4c8] sm:$0xff]  ;;  %v9902_v5 = vld [vmem:[#allocation9 + $0x4d8] sm:$0xff] }
 0x9bf   :  { %3289 = vmatprep.subr.mxu0 %v9887_v39  ;;  %3360 = vmatprep.subr.mxu1 %v9890_v52  ;;  %13089 = vst [vmem:[#allocation152_spill] sm:$0xff] %v9899_v4  ;;  %13090 = vst [vmem:[#allocation153_spill] sm:$0xff] %v9902_v5  ;;  %v9905_v39 = vld [vmem:[#allocation9 + $0x4c0] sm:$0xff]  ;;  %v9908_v52 = vld [vmem:[#allocation9 + $0x4d0] sm:$0xff] }
 0x9c0   :  { %3290 = vmatpush2.msra.mxu0 %v9893_v13  ;;  %3361 = vmatpush2.msra.mxu1 %v9896_v54  ;;  %13091 = vst [vmem:[#allocation154_spill] sm:$0xff] %v9905_v39  ;;  %13092 = vst [vmem:[#allocation155_spill] sm:$0xff] %v9908_v52  ;;  %v9911_v13 = vld [vmem:[#allocation9 + $0x488] sm:$0xff]  ;;  %v9914_v54 = vld [vmem:[#allocation9 + $0x498] sm:$0xff] }
 0x9c1   :  { %3291 = vmatprep.subr.mxu0 %v9899_v4  ;;  %3362 = vmatprep.subr.mxu1 %v9902_v5  ;;  %13093 = vst [vmem:[#allocation156_spill] sm:$0xff] %v9911_v13  ;;  %13094 = vst [vmem:[#allocation157_spill] sm:$0xff] %v9914_v54  ;;  %v9917_v4 = vld [vmem:[#allocation9 + $0x480] sm:$0xff]  ;;  %v9920_v5 = vld [vmem:[#allocation9 + $0x490] sm:$0xff] }
 0x9c2   :  { %3292 = vmatpush2.msra.mxu0 %v9905_v39  ;;  %3363 = vmatpush2.msra.mxu1 %v9908_v52  ;;  %13095 = vst [vmem:[#allocation158_spill] sm:$0xff] %v9917_v4  ;;  %13096 = vst [vmem:[#allocation159_spill] sm:$0xff] %v9920_v5  ;;  %v9923_v39 = vld [vmem:[#allocation9 + $0x448] sm:$0xff]  ;;  %v9926_v52 = vld [vmem:[#allocation9 + $0x458] sm:$0xff] }
 0x9c3   :  { %3293 = vmatprep.subr.mxu0 %v9911_v13  ;;  %3364 = vmatprep.subr.mxu1 %v9914_v54  ;;  %13097 = vst [vmem:[#allocation160_spill] sm:$0xff] %v9923_v39  ;;  %13098 = vst [vmem:[#allocation161_spill] sm:$0xff] %v9926_v52  ;;  %v9929_v13 = vld [vmem:[#allocation9 + $0x440] sm:$0xff]  ;;  %v9932_v54 = vld [vmem:[#allocation9 + $0x450] sm:$0xff] }
 0x9c4   :  { %3294 = vmatpush2.msra.mxu0 %v9917_v4  ;;  %3365 = vmatpush2.msra.mxu1 %v9920_v5  ;;  %13099 = vst [vmem:[#allocation162_spill] sm:$0xff] %v9929_v13  ;;  %13100 = vst [vmem:[#allocation163_spill] sm:$0xff] %v9932_v54  ;;  %v9935_v4 = vld [vmem:[#allocation9 + $0x408] sm:$0xff]  ;;  %v9938_v5 = vld [vmem:[#allocation9 + $0x418] sm:$0xff] }
 0x9c5   :  { %3295 = vmatprep.subr.mxu0 %v9923_v39  ;;  %3366 = vmatprep.subr.mxu1 %v9926_v52  ;;  %13101 = vst [vmem:[#allocation164_spill] sm:$0xff] %v9935_v4  ;;  %13102 = vst [vmem:[#allocation165_spill] sm:$0xff] %v9938_v5  ;;  %v9941_v39 = vld [vmem:[#allocation9 + $0x400] sm:$0xff]  ;;  %v9944_v52 = vld [vmem:[#allocation9 + $0x410] sm:$0xff] }
 0x9c6   :  { %3296 = vmatpush2.msra.mxu0 %v9929_v13  ;;  %3367 = vmatpush2.msra.mxu1 %v9932_v54  ;;  %13103 = vst [vmem:[#allocation166_spill] sm:$0xff] %v9941_v39  ;;  %13104 = vst [vmem:[#allocation167_spill] sm:$0xff] %v9944_v52  ;;  %v9947_v13 = vld [vmem:[#allocation9 + $0x3e8] sm:$0xff]  ;;  %v9950_v54 = vld [vmem:[#allocation9 + $0x3f8] sm:$0xff] }
 0x9c7   :  { %3297 = vmatprep.subr.mxu0 %v9935_v4  ;;  %3368 = vmatprep.subr.mxu1 %v9938_v5  ;;  %13105 = vst [vmem:[#allocation168_spill] sm:$0xff] %v9947_v13  ;;  %13106 = vst [vmem:[#allocation169_spill] sm:$0xff] %v9950_v54  ;;  %v2925_v4 = vpop.f32.mrf.mxu0 }
 0x9c8   :  { %3298 = vmatpush2.msra.mxu0 %v9941_v39  ;;  %3369 = vmatpush2.msra.mxu1 %v9944_v52 }
 0x9c9   :  { %3377 = vmatprep.subr.mxu0 %v9947_v13  ;;  %3448 = vmatprep.subr.mxu1 %v9950_v54  ;;  %v2927_v25 = vpop.f32.mrf.mxu0 }
 0xa49   :  { %v3130_v5 = vpop.f32.mrf.mxu0  ;;  %v3201_v60 = vpop.f32.mrf.mxu1 }
 0xa4a   :  { %v3131_v34 = vadd.f32 %v3130_v5, %v2925_v4  ;;  %v3202_v33 = vadd.f32 %v3201_v60, %v2996_v41  ;;  %v9972_v41 = vld [vmem:[#allocation9 + $0x3b8] sm:$0xff] }
 0xa4b   :  { %v3132_v3 = vpop.f32.mrf.mxu0  ;;  %v3203_v59 = vpop.f32.mrf.mxu1 }
 0xa4c   :  { %v3206_v39 = vadd.f32 %v3131_v34, %v7280_v1  ;;  %v3133_v37 = vadd.f32 %v3132_v3, %v2927_v25  ;;  %v3204_v9 = vadd.f32 %v3203_v59, %v2998_v53  ;;  %v3208_v4 = vadd.f32 %v3202_v33, %v7295_v56  ;;  %v9969_v53 = vld [vmem:[#allocation9 + $0x3a8] sm:$0xff] }
 0xa4e   :  { %v4940_v52 = vmul.f32 -1.442695, %v3206_v39  ;;  %v3207_v63 = vadd.f32 %v3133_v37, %v7284_v2  ;;  %v3209_v54 = vadd.f32 %v3204_v9, %v7290_v55  ;;  %v9978_v39 = vld [vmem:[#allocation9 + $0x3b0] sm:$0xff] }
 0xa50   :  { %5169 = vpow2.f32 %v4940_v52  ;;  %v4941_v13 = vmul.f32 -1.442695, %v3207_v63  ;;  %v4942_v35 = vmul.f32 -1.442695, %v3209_v54  ;;  %v9975_v54 = vld [vmem:[#allocation9 + $0x3a0] sm:$0xff]  ;;  %v9981_v52 = vld [vmem:[#allocation9 + $0x368] sm:$0xff] }
 0xa52   :  { %5171 = vpow2.f32 %v4941_v13 }
 0xa53   :  { %5173 = vpow2.f32 %v4942_v35 }
 0xa5d   :  { %v5170_v8 = vpop.eup %5169 }
 0xa5e   :  { %v3213_v5 = vadd.f32 1.0, %v5170_v8 }
 0xa5f   :  { %v5172_v24 = vpop.eup %5171 }
 0xa60   :  { %5175 = vrcp.f32 %v3213_v5  ;;  %v3219_v3 = vadd.f32 1.0, %v5172_v24  ;;  %v5174_v37 = vpop.eup %5173  ;;  %v9963_v24 = vld [vmem:[#allocation9 + $0x3e0] sm:$0xff] }
 0xa61   :  { %5177 = vtanh.f32 %v3208_v4  ;;  %v3226_v13 = vadd.f32 1.0, %v5174_v37  ;;  %v9984_v4 = vld [vmem:[#allocation9 + $0x378] sm:$0xff]  ;;  %v9987_v5 = vld [vmem:[#allocation9 + $0x360] sm:$0xff]  ;;  %v9993_v37 = vld [vmem:[#allocation9 + $0x328] sm:$0xff] }
 0xa62   :  { %5179 = vrcp.f32 %v3219_v3  ;;  %v9990_v3 = vld [vmem:[#allocation9 + $0x370] sm:$0xff] }
 0xa63   :  { %5181 = vrcp.f32 %v3226_v13  ;;  %v10005_v13 = vld [vmem:[#allocation9 + $0x2e8] sm:$0xff] }
 0xa64   :  { %13107 = vst [vmem:[#allocation170_spill] sm:$0xff] %v10005_v13 }
 0xa6d   :  { %v5176_v34 = vpop.eup %5175 }
 0xa6e   :  { %v5178_v63 = vpop.eup %5177 }
 0xa6f   :  { %v5180_v25 = vpop.eup %5179  ;;  %v3230_v59 = vmul.f32 %v5178_v63, %v5176_v34  ;;  %v9996_v34 = vld [vmem:[#allocation9 + $0x338] sm:$0xff]  ;;  %v9999_v63 = vld [vmem:[#allocation9 + $0x320] sm:$0xff] }
 0xa70   :  { %v3229_v9 = vmul.f32 %v5180_v25, %v9229_v58  ;;  %v5182_v8 = vpop.eup %5181  ;;  %v9966_v58 = vld [vmem:[#allocation9 + $0x3f0] sm:$0xff] }
 0xa71   :  { %v10002_v25 = vld [vmem:[#allocation9 + $0x330] sm:$0xff] }
 0xa72   :  { %v9958_v60 = vadd.f32 %v3230_v59, %v3229_v9  ;;  %v10008_v59 = vld [vmem:[#allocation9 + $0x2f8] sm:$0xff]  ;;  %v10011_v9 = vld [vmem:[#allocation9 + $0x2e0] sm:$0xff] }
 0xa73   :  { %13108 = vst [vmem:[#allocation171_spill] sm:$0xff] %v10008_v59  ;;  %13109 = vst [vmem:[#allocation172_spill] sm:$0xff] %v10011_v9 }
 0xa74   :  { %5183 = vtanh.f32 %v9958_v60 }
 0xa81   :  { %v5184_v33 = vpop.eup %5183 }
 0xa82   :  { %v3233_v35 = vmul.f32 %v5184_v33, %v5182_v8  ;;  %v10014_v8 = vld [vmem:[#allocation9 + $0x2f0] sm:$0xff]  ;;  %v10017_v33 = vld [vmem:[#allocation9 + $0x2a8] sm:$0xff] }
 0xa83   :  { %13110 = vst [vmem:[#allocation173_spill] sm:$0xff] %v10014_v8  ;;  %13111 = vst [vmem:[#allocation174_spill] sm:$0xff] %v10017_v33 }
 0xa84   :  { %3234 = vst [vmem:[#allocation3 + $0x4] sm:$0x1] %v3233_v35  ;;  %3299 = vmatprep.mubr.f32.mxu0 %v3233_v35  ;;  %3370 = vmatprep.mubr.f32.mxu1 %v3233_v35 }
 0xa85   :  { %3300 = vmatmul.mubr.f32.vlgmr.msra.gmra.mxu0 %v9565_v40  ;;  %3371 = vmatmul.mubr.f32.vlgmr.msra.gmra.mxu1 %v9565_v40 }
 0xa86   :  { %3378 = vmatpush1.msra.mxu0 %v9963_v24  ;;  %3449 = vmatpush1.msra.mxu1 %v9966_v58 }
 0xa87   :  { %3379 = vmatprep.subr.mxu0 %v9969_v53  ;;  %3441 = vmatprep.mubr.f32.mxu0 %v3233_v35 }
 0xa88   :  { %3450 = vmatprep.subr.mxu1 %v9972_v41  ;;  %3512 = vmatprep.mubr.f32.mxu1 %v3233_v35  ;;  %v10020_v35 = vld [vmem:[#allocation9 + $0x2b8] sm:$0xff] }
 0xa89   :  { %3380 = vmatpush1.msra.mxu0 %v9975_v54  ;;  %3451 = vmatpush1.msra.mxu1 %v9978_v39  ;;  %13112 = vst [vmem:[#allocation175_spill] sm:$0xff] %v10020_v35 }
 0xa8a   :  { %3381 = vmatprep.subr.mxu0 %v9981_v52  ;;  %3452 = vmatprep.subr.mxu1 %v9984_v4 }
 0xa8b   :  { %3382 = vmatpush1.msra.mxu0 %v9987_v5  ;;  %3453 = vmatpush1.msra.mxu1 %v9990_v3 }
 0xa8c   :  { %3383 = vmatprep.subr.mxu0 %v9993_v37  ;;  %3454 = vmatprep.subr.mxu1 %v9996_v34 }
 0xa8d   :  { %3384 = vmatpush1.msra.mxu0 %v9999_v63  ;;  %3455 = vmatpush1.msra.mxu1 %v10002_v25 }
 0xa8e   :  { %3385 = vmatprep.subr.mxu0 %v10005_v13  ;;  %3456 = vmatprep.subr.mxu1 %v10008_v59  ;;  %v10023_v13 = vld [vmem:[#allocation9 + $0x2a0] sm:$0xff]  ;;  %v10026_v59 = vld [vmem:[#allocation9 + $0x2b0] sm:$0xff] }
 0xa8f   :  { %3386 = vmatpush1.msra.mxu0 %v10011_v9  ;;  %3457 = vmatpush1.msra.mxu1 %v10014_v8  ;;  %13113 = vst [vmem:[#allocation176_spill] sm:$0xff] %v10023_v13  ;;  %13114 = vst [vmem:[#allocation177_spill] sm:$0xff] %v10026_v59  ;;  %v10029_v9 = vld [vmem:[#allocation9 + $0x268] sm:$0xff]  ;;  %v10032_v8 = vld [vmem:[#allocation9 + $0x278] sm:$0xff] }
 0xa90   :  { %3387 = vmatprep.subr.mxu0 %v10017_v33  ;;  %3458 = vmatprep.subr.mxu1 %v10020_v35  ;;  %13115 = vst [vmem:[#allocation178_spill] sm:$0xff] %v10029_v9  ;;  %13116 = vst [vmem:[#allocation179_spill] sm:$0xff] %v10032_v8  ;;  %v10035_v33 = vld [vmem:[#allocation9 + $0x260] sm:$0xff]  ;;  %v10038_v35 = vld [vmem:[#allocation9 + $0x270] sm:$0xff] }
 0xa91   :  { %3388 = vmatpush1.msra.mxu0 %v10023_v13  ;;  %3459 = vmatpush1.msra.mxu1 %v10026_v59  ;;  %13117 = vst [vmem:[#allocation180_spill] sm:$0xff] %v10035_v33  ;;  %13118 = vst [vmem:[#allocation181_spill] sm:$0xff] %v10038_v35  ;;  %v10041_v13 = vld [vmem:[#allocation9 + $0x228] sm:$0xff]  ;;  %v10044_v59 = vld [vmem:[#allocation9 + $0x238] sm:$0xff] }
 0xa92   :  { %3389 = vmatprep.subr.mxu0 %v10029_v9  ;;  %3460 = vmatprep.subr.mxu1 %v10032_v8  ;;  %13119 = vst [vmem:[#allocation182_spill] sm:$0xff] %v10041_v13  ;;  %13120 = vst [vmem:[#allocation183_spill] sm:$0xff] %v10044_v59  ;;  %v10047_v9 = vld [vmem:[#allocation9 + $0x220] sm:$0xff]  ;;  %v10050_v8 = vld [vmem:[#allocation9 + $0x230] sm:$0xff] }
 0xa93   :  { %3390 = vmatpush1.msra.mxu0 %v10035_v33  ;;  %3461 = vmatpush1.msra.mxu1 %v10038_v35  ;;  %13121 = vst [vmem:[#allocation184_spill] sm:$0xff] %v10047_v9  ;;  %13122 = vst [vmem:[#allocation185_spill] sm:$0xff] %v10050_v8  ;;  %v10053_v33 = vld [vmem:[#allocation9 + $0x1e8] sm:$0xff]  ;;  %v10056_v35 = vld [vmem:[#allocation9 + $0x1f8] sm:$0xff] }
 0xa94   :  { %3391 = vmatprep.subr.mxu0 %v10041_v13  ;;  %3462 = vmatprep.subr.mxu1 %v10044_v59  ;;  %13123 = vst [vmem:[#allocation186_spill] sm:$0xff] %v10053_v33  ;;  %13124 = vst [vmem:[#allocation187_spill] sm:$0xff] %v10056_v35  ;;  %v10059_v13 = vld [vmem:[#allocation9 + $0x1e0] sm:$0xff]  ;;  %v10062_v59 = vld [vmem:[#allocation9 + $0x1f0] sm:$0xff] }
 0xa95   :  { %3392 = vmatpush1.msra.mxu0 %v10047_v9  ;;  %3463 = vmatpush1.msra.mxu1 %v10050_v8  ;;  %13125 = vst [vmem:[#allocation188_spill] sm:$0xff] %v10059_v13  ;;  %13126 = vst [vmem:[#allocation189_spill] sm:$0xff] %v10062_v59  ;;  %v10065_v9 = vld [vmem:[#allocation9 + $0x1a8] sm:$0xff]  ;;  %v10068_v8 = vld [vmem:[#allocation9 + $0x1b8] sm:$0xff] }
 0xa96   :  { %3393 = vmatprep.subr.mxu0 %v10053_v33  ;;  %3464 = vmatprep.subr.mxu1 %v10056_v35  ;;  %13127 = vst [vmem:[#allocation190_spill] sm:$0xff] %v10065_v9  ;;  %13128 = vst [vmem:[#allocation191_spill] sm:$0xff] %v10068_v8  ;;  %v10071_v33 = vld [vmem:[#allocation9 + $0x1a0] sm:$0xff]  ;;  %v10074_v35 = vld [vmem:[#allocation9 + $0x1b0] sm:$0xff] }
 0xa97   :  { %3394 = vmatpush1.msra.mxu0 %v10059_v13  ;;  %3465 = vmatpush1.msra.mxu1 %v10062_v59  ;;  %13129 = vst [vmem:[#allocation192_spill] sm:$0xff] %v10071_v33  ;;  %13130 = vst [vmem:[#allocation193_spill] sm:$0xff] %v10074_v35  ;;  %v10077_v13 = vld [vmem:[#allocation9 + $0x168] sm:$0xff]  ;;  %v10080_v59 = vld [vmem:[#allocation9 + $0x178] sm:$0xff] }
 0xa98   :  { %3395 = vmatprep.subr.mxu0 %v10065_v9  ;;  %3466 = vmatprep.subr.mxu1 %v10068_v8  ;;  %13131 = vst [vmem:[#allocation194_spill] sm:$0xff] %v10077_v13  ;;  %13132 = vst [vmem:[#allocation195_spill] sm:$0xff] %v10080_v59  ;;  %v10083_v9 = vld [vmem:[#allocation9 + $0x160] sm:$0xff]  ;;  %v10086_v8 = vld [vmem:[#allocation9 + $0x170] sm:$0xff] }
 0xa99   :  { %3396 = vmatpush1.msra.mxu0 %v10071_v33  ;;  %3467 = vmatpush1.msra.mxu1 %v10074_v35  ;;  %13133 = vst [vmem:[#allocation196_spill] sm:$0xff] %v10083_v9  ;;  %13134 = vst [vmem:[#allocation197_spill] sm:$0xff] %v10086_v8  ;;  %v10089_v33 = vld [vmem:[#allocation9 + $0x128] sm:$0xff]  ;;  %v10092_v35 = vld [vmem:[#allocation9 + $0x138] sm:$0xff] }
 0xa9a   :  { %3397 = vmatprep.subr.mxu0 %v10077_v13  ;;  %3468 = vmatprep.subr.mxu1 %v10080_v59  ;;  %13135 = vst [vmem:[#allocation198_spill] sm:$0xff] %v10089_v33  ;;  %13136 = vst [vmem:[#allocation199_spill] sm:$0xff] %v10092_v35  ;;  %v10095_v13 = vld [vmem:[#allocation9 + $0x120] sm:$0xff]  ;;  %v10098_v59 = vld [vmem:[#allocation9 + $0x130] sm:$0xff] }
 0xa9b   :  { %3398 = vmatpush1.msra.mxu0 %v10083_v9  ;;  %3469 = vmatpush1.msra.mxu1 %v10086_v8  ;;  %13137 = vst [vmem:[#allocation200_spill] sm:$0xff] %v10095_v13  ;;  %13138 = vst [vmem:[#allocation201_spill] sm:$0xff] %v10098_v59  ;;  %v10101_v9 = vld [vmem:[#allocation9 + $0xe8] sm:$0xff]  ;;  %v10104_v8 = vld [vmem:[#allocation9 + $0xf8] sm:$0xff] }
 0xa9c   :  { %3399 = vmatprep.subr.mxu0 %v10089_v33  ;;  %3470 = vmatprep.subr.mxu1 %v10092_v35  ;;  %13139 = vst [vmem:[#allocation202_spill] sm:$0xff] %v10101_v9  ;;  %13140 = vst [vmem:[#allocation203_spill] sm:$0xff] %v10104_v8  ;;  %v10107_v33 = vld [vmem:[#allocation9 + $0xe0] sm:$0xff]  ;;  %v10110_v35 = vld [vmem:[#allocation9 + $0xf0] sm:$0xff] }
 0xa9d   :  { %3400 = vmatpush1.msra.mxu0 %v10095_v13  ;;  %3471 = vmatpush1.msra.mxu1 %v10098_v59  ;;  %13141 = vst [vmem:[#allocation204_spill] sm:$0xff] %v10107_v33  ;;  %13142 = vst [vmem:[#allocation205_spill] sm:$0xff] %v10110_v35  ;;  %v10113_v13 = vld [vmem:[#allocation9 + $0xa8] sm:$0xff]  ;;  %v10116_v59 = vld [vmem:[#allocation9 + $0xb8] sm:$0xff] }
 0xa9e   :  { %3401 = vmatprep.subr.mxu0 %v10101_v9  ;;  %3472 = vmatprep.subr.mxu1 %v10104_v8  ;;  %13143 = vst [vmem:[#allocation206_spill] sm:$0xff] %v10113_v13  ;;  %13144 = vst [vmem:[#allocation207_spill] sm:$0xff] %v10116_v59  ;;  %v10119_v9 = vld [vmem:[#allocation9 + $0xa0] sm:$0xff]  ;;  %v10122_v8 = vld [vmem:[#allocation9 + $0xb0] sm:$0xff] }
 0xa9f   :  { %3402 = vmatpush1.msra.mxu0 %v10107_v33  ;;  %3473 = vmatpush1.msra.mxu1 %v10110_v35  ;;  %13145 = vst [vmem:[#allocation208_spill] sm:$0xff] %v10119_v9  ;;  %13146 = vst [vmem:[#allocation209_spill] sm:$0xff] %v10122_v8  ;;  %v10125_v33 = vld [vmem:[#allocation9 + $0x68] sm:$0xff]  ;;  %v10128_v35 = vld [vmem:[#allocation9 + $0x78] sm:$0xff] }
 0xaa0   :  { %3403 = vmatprep.subr.mxu0 %v10113_v13  ;;  %3474 = vmatprep.subr.mxu1 %v10116_v59  ;;  %13147 = vst [vmem:[#allocation210_spill] sm:$0xff] %v10125_v33  ;;  %13148 = vst [vmem:[#allocation211_spill] sm:$0xff] %v10128_v35  ;;  %v10131_v13 = vld [vmem:[#allocation9 + $0x60] sm:$0xff]  ;;  %v10134_v59 = vld [vmem:[#allocation9 + $0x70] sm:$0xff] }
 0xaa1   :  { %3404 = vmatpush1.msra.mxu0 %v10119_v9  ;;  %3475 = vmatpush1.msra.mxu1 %v10122_v8  ;;  %13149 = vst [vmem:[#allocation212_spill] sm:$0xff] %v10131_v13  ;;  %13150 = vst [vmem:[#allocation213_spill] sm:$0xff] %v10134_v59  ;;  %v10137_v9 = vld [vmem:[#allocation9 + $0x28] sm:$0xff]  ;;  %v10140_v8 = vld [vmem:[#allocation9 + $0x38] sm:$0xff] }
 0xaa2   :  { %3405 = vmatprep.subr.mxu0 %v10125_v33  ;;  %3476 = vmatprep.subr.mxu1 %v10128_v35  ;;  %13151 = vst [vmem:[#allocation214_spill] sm:$0xff] %v10137_v9  ;;  %13152 = vst [vmem:[#allocation215_spill] sm:$0xff] %v10140_v8  ;;  %v10143_v33 = vld [vmem:[#allocation9 + $0x20] sm:$0xff]  ;;  %v10146_v35 = vld [vmem:[#allocation9 + $0x30] sm:$0xff] }
 0xaa3   :  { %3406 = vmatpush1.msra.mxu0 %v10131_v13  ;;  %3477 = vmatpush1.msra.mxu1 %v10134_v59  ;;  %13153 = vst [vmem:[#allocation216_spill] sm:$0xff] %v10143_v33  ;;  %13154 = vst [vmem:[#allocation217_spill] sm:$0xff] %v10146_v35  ;;  %v10149_v13 = vld [vmem:[#allocation9 + $0x7e8] sm:$0xff]  ;;  %v10152_v59 = vld [vmem:[#allocation9 + $0x7f8] sm:$0xff] }
 0xaa4   :  { %3407 = vmatprep.subr.mxu0 %v10137_v9  ;;  %3478 = vmatprep.subr.mxu1 %v10140_v8  ;;  %13155 = vst [vmem:[#allocation218_spill] sm:$0xff] %v10149_v13  ;;  %13156 = vst [vmem:[#allocation219_spill] sm:$0xff] %v10152_v59  ;;  %v10155_v9 = vld [vmem:[#allocation9 + $0x7e0] sm:$0xff]  ;;  %v10158_v8 = vld [vmem:[#allocation9 + $0x7f0] sm:$0xff] }
 0xaa5   :  { %3408 = vmatpush1.msra.mxu0 %v10143_v33  ;;  %3479 = vmatpush1.msra.mxu1 %v10146_v35  ;;  %13157 = vst [vmem:[#allocation220_spill] sm:$0xff] %v10155_v9  ;;  %13158 = vst [vmem:[#allocation221_spill] sm:$0xff] %v10158_v8  ;;  %v10161_v33 = vld [vmem:[#allocation9 + $0x7a8] sm:$0xff]  ;;  %v10164_v35 = vld [vmem:[#allocation9 + $0x7b8] sm:$0xff] }
 0xaa6   :  { %3409 = vmatprep.subr.mxu0 %v10149_v13  ;;  %3480 = vmatprep.subr.mxu1 %v10152_v59  ;;  %13159 = vst [vmem:[#allocation222_spill] sm:$0xff] %v10161_v33  ;;  %13160 = vst [vmem:[#allocation223_spill] sm:$0xff] %v10164_v35  ;;  %v10167_v13 = vld [vmem:[#allocation9 + $0x7a0] sm:$0xff]  ;;  %v10170_v59 = vld [vmem:[#allocation9 + $0x7b0] sm:$0xff] }
 0xaa7   :  { %3410 = vmatpush2.msra.mxu0 %v10155_v9  ;;  %3481 = vmatpush2.msra.mxu1 %v10158_v8  ;;  %13161 = vst [vmem:[#allocation224_spill] sm:$0xff] %v10167_v13  ;;  %13162 = vst [vmem:[#allocation225_spill] sm:$0xff] %v10170_v59  ;;  %v10173_v9 = vld [vmem:[#allocation9 + $0x768] sm:$0xff]  ;;  %v10176_v8 = vld [vmem:[#allocation9 + $0x778] sm:$0xff] }
 0xaa8   :  { %3411 = vmatprep.subr.mxu0 %v10161_v33  ;;  %3482 = vmatprep.subr.mxu1 %v10164_v35  ;;  %13163 = vst [vmem:[#allocation226_spill] sm:$0xff] %v10173_v9  ;;  %13164 = vst [vmem:[#allocation227_spill] sm:$0xff] %v10176_v8  ;;  %v10179_v33 = vld [vmem:[#allocation9 + $0x760] sm:$0xff]  ;;  %v10182_v35 = vld [vmem:[#allocation9 + $0x770] sm:$0xff] }
 0xaa9   :  { %3412 = vmatpush2.msra.mxu0 %v10167_v13  ;;  %3483 = vmatpush2.msra.mxu1 %v10170_v59  ;;  %13165 = vst [vmem:[#allocation228_spill] sm:$0xff] %v10179_v33  ;;  %13166 = vst [vmem:[#allocation229_spill] sm:$0xff] %v10182_v35  ;;  %v10185_v13 = vld [vmem:[#allocation9 + $0x728] sm:$0xff]  ;;  %v10188_v59 = vld [vmem:[#allocation9 + $0x738] sm:$0xff] }
 0xaaa   :  { %3413 = vmatprep.subr.mxu0 %v10173_v9  ;;  %3484 = vmatprep.subr.mxu1 %v10176_v8  ;;  %13167 = vst [vmem:[#allocation230_spill] sm:$0xff] %v10185_v13  ;;  %13168 = vst [vmem:[#allocation231_spill] sm:$0xff] %v10188_v59  ;;  %v10191_v9 = vld [vmem:[#allocation9 + $0x720] sm:$0xff]  ;;  %v10194_v8 = vld [vmem:[#allocation9 + $0x730] sm:$0xff] }
 0xaab   :  { %3414 = vmatpush2.msra.mxu0 %v10179_v33  ;;  %3485 = vmatpush2.msra.mxu1 %v10182_v35  ;;  %13169 = vst [vmem:[#allocation232_spill] sm:$0xff] %v10191_v9  ;;  %13170 = vst [vmem:[#allocation233_spill] sm:$0xff] %v10194_v8  ;;  %v10197_v33 = vld [vmem:[#allocation9 + $0x6e8] sm:$0xff]  ;;  %v10200_v35 = vld [vmem:[#allocation9 + $0x6f8] sm:$0xff] }
 0xaac   :  { %3415 = vmatprep.subr.mxu0 %v10185_v13  ;;  %3486 = vmatprep.subr.mxu1 %v10188_v59  ;;  %13171 = vst [vmem:[#allocation234_spill] sm:$0xff] %v10197_v33  ;;  %13172 = vst [vmem:[#allocation235_spill] sm:$0xff] %v10200_v35  ;;  %v10203_v13 = vld [vmem:[#allocation9 + $0x6e0] sm:$0xff]  ;;  %v10206_v59 = vld [vmem:[#allocation9 + $0x6f0] sm:$0xff] }
 0xaad   :  { %3416 = vmatpush2.msra.mxu0 %v10191_v9  ;;  %3487 = vmatpush2.msra.mxu1 %v10194_v8  ;;  %13173 = vst [vmem:[#allocation236_spill] sm:$0xff] %v10203_v13  ;;  %13174 = vst [vmem:[#allocation237_spill] sm:$0xff] %v10206_v59  ;;  %v10209_v9 = vld [vmem:[#allocation9 + $0x6a8] sm:$0xff]  ;;  %v10212_v8 = vld [vmem:[#allocation9 + $0x6b8] sm:$0xff] }
 0xaae   :  { %3417 = vmatprep.subr.mxu0 %v10197_v33  ;;  %3488 = vmatprep.subr.mxu1 %v10200_v35  ;;  %13175 = vst [vmem:[#allocation238_spill] sm:$0xff] %v10209_v9  ;;  %13176 = vst [vmem:[#allocation239_spill] sm:$0xff] %v10212_v8  ;;  %v10215_v33 = vld [vmem:[#allocation9 + $0x6a0] sm:$0xff]  ;;  %v10218_v35 = vld [vmem:[#allocation9 + $0x6b0] sm:$0xff] }
 0xaaf   :  { %3418 = vmatpush2.msra.mxu0 %v10203_v13  ;;  %3489 = vmatpush2.msra.mxu1 %v10206_v59  ;;  %13177 = vst [vmem:[#allocation240_spill] sm:$0xff] %v10215_v33  ;;  %13178 = vst [vmem:[#allocation241_spill] sm:$0xff] %v10218_v35  ;;  %v10221_v13 = vld [vmem:[#allocation9 + $0x668] sm:$0xff]  ;;  %v10224_v59 = vld [vmem:[#allocation9 + $0x678] sm:$0xff] }
 0xab0   :  { %3419 = vmatprep.subr.mxu0 %v10209_v9  ;;  %3490 = vmatprep.subr.mxu1 %v10212_v8  ;;  %13179 = vst [vmem:[#allocation242_spill] sm:$0xff] %v10221_v13  ;;  %13180 = vst [vmem:[#allocation243_spill] sm:$0xff] %v10224_v59  ;;  %v10227_v9 = vld [vmem:[#allocation9 + $0x660] sm:$0xff]  ;;  %v10230_v8 = vld [vmem:[#allocation9 + $0x670] sm:$0xff] }
 0xab1   :  { %3420 = vmatpush2.msra.mxu0 %v10215_v33  ;;  %3491 = vmatpush2.msra.mxu1 %v10218_v35  ;;  %13181 = vst [vmem:[#allocation244_spill] sm:$0xff] %v10227_v9  ;;  %13182 = vst [vmem:[#allocation245_spill] sm:$0xff] %v10230_v8  ;;  %v10233_v33 = vld [vmem:[#allocation9 + $0x628] sm:$0xff]  ;;  %v10236_v35 = vld [vmem:[#allocation9 + $0x638] sm:$0xff] }
 0xab2   :  { %3421 = vmatprep.subr.mxu0 %v10221_v13  ;;  %3492 = vmatprep.subr.mxu1 %v10224_v59  ;;  %13183 = vst [vmem:[#allocation246_spill] sm:$0xff] %v10233_v33  ;;  %13184 = vst [vmem:[#allocation247_spill] sm:$0xff] %v10236_v35  ;;  %v10239_v13 = vld [vmem:[#allocation9 + $0x620] sm:$0xff]  ;;  %v10242_v59 = vld [vmem:[#allocation9 + $0x630] sm:$0xff] }
 0xab3   :  { %3422 = vmatpush2.msra.mxu0 %v10227_v9  ;;  %3493 = vmatpush2.msra.mxu1 %v10230_v8  ;;  %13185 = vst [vmem:[#allocation248_spill] sm:$0xff] %v10239_v13  ;;  %13186 = vst [vmem:[#allocation249_spill] sm:$0xff] %v10242_v59  ;;  %v10245_v9 = vld [vmem:[#allocation9 + $0x5e8] sm:$0xff]  ;;  %v10248_v8 = vld [vmem:[#allocation9 + $0x5f8] sm:$0xff] }
 0xab4   :  { %3423 = vmatprep.subr.mxu0 %v10233_v33  ;;  %3494 = vmatprep.subr.mxu1 %v10236_v35  ;;  %13187 = vst [vmem:[#allocation250_spill] sm:$0xff] %v10245_v9  ;;  %13188 = vst [vmem:[#allocation251_spill] sm:$0xff] %v10248_v8  ;;  %v10251_v33 = vld [vmem:[#allocation9 + $0x5e0] sm:$0xff]  ;;  %v10254_v35 = vld [vmem:[#allocation9 + $0x5f0] sm:$0xff] }
 0xab5   :  { %3424 = vmatpush2.msra.mxu0 %v10239_v13  ;;  %3495 = vmatpush2.msra.mxu1 %v10242_v59  ;;  %13189 = vst [vmem:[#allocation252_spill] sm:$0xff] %v10251_v33  ;;  %13190 = vst [vmem:[#allocation253_spill] sm:$0xff] %v10254_v35  ;;  %v10257_v13 = vld [vmem:[#allocation9 + $0x5a8] sm:$0xff]  ;;  %v10260_v59 = vld [vmem:[#allocation9 + $0x5b8] sm:$0xff] }
 0xab6   :  { %3425 = vmatprep.subr.mxu0 %v10245_v9  ;;  %3496 = vmatprep.subr.mxu1 %v10248_v8  ;;  %13191 = vst [vmem:[#allocation254_spill] sm:$0xff] %v10257_v13  ;;  %13192 = vst [vmem:[#allocation255_spill] sm:$0xff] %v10260_v59  ;;  %v10263_v9 = vld [vmem:[#allocation9 + $0x5a0] sm:$0xff]  ;;  %v10266_v8 = vld [vmem:[#allocation9 + $0x5b0] sm:$0xff] }
 0xab7   :  { %3426 = vmatpush2.msra.mxu0 %v10251_v33  ;;  %3497 = vmatpush2.msra.mxu1 %v10254_v35  ;;  %13193 = vst [vmem:[#allocation256_spill] sm:$0xff] %v10263_v9  ;;  %13194 = vst [vmem:[#allocation257_spill] sm:$0xff] %v10266_v8  ;;  %v10269_v33 = vld [vmem:[#allocation9 + $0x568] sm:$0xff]  ;;  %v10272_v35 = vld [vmem:[#allocation9 + $0x578] sm:$0xff] }
 0xab8   :  { %3427 = vmatprep.subr.mxu0 %v10257_v13  ;;  %3498 = vmatprep.subr.mxu1 %v10260_v59  ;;  %13195 = vst [vmem:[#allocation258_spill] sm:$0xff] %v10269_v33  ;;  %13196 = vst [vmem:[#allocation259_spill] sm:$0xff] %v10272_v35  ;;  %v10275_v13 = vld [vmem:[#allocation9 + $0x560] sm:$0xff]  ;;  %v10278_v59 = vld [vmem:[#allocation9 + $0x570] sm:$0xff] }
 0xab9   :  { %3428 = vmatpush2.msra.mxu0 %v10263_v9  ;;  %3499 = vmatpush2.msra.mxu1 %v10266_v8  ;;  %13197 = vst [vmem:[#allocation260_spill] sm:$0xff] %v10275_v13  ;;  %13198 = vst [vmem:[#allocation261_spill] sm:$0xff] %v10278_v59  ;;  %v10281_v9 = vld [vmem:[#allocation9 + $0x528] sm:$0xff]  ;;  %v10284_v8 = vld [vmem:[#allocation9 + $0x538] sm:$0xff] }
 0xaba   :  { %3429 = vmatprep.subr.mxu0 %v10269_v33  ;;  %3500 = vmatprep.subr.mxu1 %v10272_v35  ;;  %13199 = vst [vmem:[#allocation262_spill] sm:$0xff] %v10281_v9  ;;  %13200 = vst [vmem:[#allocation263_spill] sm:$0xff] %v10284_v8  ;;  %v10287_v33 = vld [vmem:[#allocation9 + $0x520] sm:$0xff]  ;;  %v10290_v35 = vld [vmem:[#allocation9 + $0x530] sm:$0xff] }
 0xabb   :  { %3430 = vmatpush2.msra.mxu0 %v10275_v13  ;;  %3501 = vmatpush2.msra.mxu1 %v10278_v59  ;;  %13201 = vst [vmem:[#allocation264_spill] sm:$0xff] %v10287_v33  ;;  %13202 = vst [vmem:[#allocation265_spill] sm:$0xff] %v10290_v35  ;;  %v10293_v13 = vld [vmem:[#allocation9 + $0x4e8] sm:$0xff]  ;;  %v10296_v59 = vld [vmem:[#allocation9 + $0x4f8] sm:$0xff] }
 0xabc   :  { %3431 = vmatprep.subr.mxu0 %v10281_v9  ;;  %3502 = vmatprep.subr.mxu1 %v10284_v8  ;;  %13203 = vst [vmem:[#allocation266_spill] sm:$0xff] %v10293_v13  ;;  %13204 = vst [vmem:[#allocation267_spill] sm:$0xff] %v10296_v59  ;;  %v10299_v9 = vld [vmem:[#allocation9 + $0x4e0] sm:$0xff]  ;;  %v10302_v8 = vld [vmem:[#allocation9 + $0x4f0] sm:$0xff] }
 0xabd   :  { %3432 = vmatpush2.msra.mxu0 %v10287_v33  ;;  %3503 = vmatpush2.msra.mxu1 %v10290_v35  ;;  %13205 = vst [vmem:[#allocation268_spill] sm:$0xff] %v10299_v9  ;;  %13206 = vst [vmem:[#allocation269_spill] sm:$0xff] %v10302_v8  ;;  %v10305_v33 = vld [vmem:[#allocation9 + $0x4a8] sm:$0xff]  ;;  %v10308_v35 = vld [vmem:[#allocation9 + $0x4b8] sm:$0xff] }
 0xabe   :  { %3433 = vmatprep.subr.mxu0 %v10293_v13  ;;  %3504 = vmatprep.subr.mxu1 %v10296_v59  ;;  %13207 = vst [vmem:[#allocation270_spill] sm:$0xff] %v10305_v33  ;;  %13208 = vst [vmem:[#allocation271_spill] sm:$0xff] %v10308_v35  ;;  %v10311_v13 = vld [vmem:[#allocation9 + $0x4a0] sm:$0xff]  ;;  %v10314_v59 = vld [vmem:[#allocation9 + $0x4b0] sm:$0xff] }
 0xabf   :  { %3434 = vmatpush2.msra.mxu0 %v10299_v9  ;;  %3505 = vmatpush2.msra.mxu1 %v10302_v8  ;;  %13209 = vst [vmem:[#allocation272_spill] sm:$0xff] %v10311_v13  ;;  %13210 = vst [vmem:[#allocation273_spill] sm:$0xff] %v10314_v59  ;;  %v10317_v9 = vld [vmem:[#allocation9 + $0x468] sm:$0xff]  ;;  %v10320_v8 = vld [vmem:[#allocation9 + $0x478] sm:$0xff] }
 0xac0   :  { %3435 = vmatprep.subr.mxu0 %v10305_v33  ;;  %3506 = vmatprep.subr.mxu1 %v10308_v35  ;;  %13211 = vst [vmem:[#allocation274_spill] sm:$0xff] %v10317_v9  ;;  %13212 = vst [vmem:[#allocation275_spill] sm:$0xff] %v10320_v8  ;;  %v10323_v33 = vld [vmem:[#allocation9 + $0x460] sm:$0xff]  ;;  %v10326_v35 = vld [vmem:[#allocation9 + $0x470] sm:$0xff] }
 0xac1   :  { %3436 = vmatpush2.msra.mxu0 %v10311_v13  ;;  %3507 = vmatpush2.msra.mxu1 %v10314_v59  ;;  %13213 = vst [vmem:[#allocation276_spill] sm:$0xff] %v10326_v35  ;;  %v10329_v13 = vld [vmem:[#allocation9 + $0x428] sm:$0xff]  ;;  %v10332_v59 = vld [vmem:[#allocation9 + $0x438] sm:$0xff] }
 0xac2   :  { %3437 = vmatprep.subr.mxu0 %v10317_v9  ;;  %3508 = vmatprep.subr.mxu1 %v10320_v8  ;;  %13214 = vst [vmem:[#allocation277_spill] sm:$0xff] %v10329_v13  ;;  %v10335_v9 = vld [vmem:[#allocation9 + $0x420] sm:$0xff]  ;;  %v10338_v8 = vld [vmem:[#allocation9 + $0x430] sm:$0xff] }
 0xac3   :  { %3438 = vmatpush2.msra.mxu0 %v10323_v33  ;;  %3509 = vmatpush2.msra.mxu1 %v10326_v35  ;;  %v10343_v35 = vld [vmem:[#allocation7 + $0x1e8] sm:$0xff] }
 0xac4   :  { %3439 = vmatprep.subr.mxu0 %v10329_v13  ;;  %3510 = vmatprep.subr.mxu1 %v10332_v59  ;;  %v10346_v13 = vld [vmem:[#allocation7 + $0x1f8] sm:$0xff] }
 0xac5   :  { %3440 = vmatpush2.msra.mxu0 %v10335_v9  ;;  %3511 = vmatpush2.msra.mxu1 %v10338_v8 }
 0xac6   :  { %3442 = vmatmul.mubr.f32.vlgmr.msra.gmra.mxu0 %v9565_v40  ;;  %3513 = vmatmul.mubr.f32.vlgmr.msra.gmra.mxu1 %v9565_v40  ;;  %v3520_v40 = vld [vmem:[#allocation2 + $0x5] ss:$8 sm:$0xf] }
 0xac7   :  { %3582 = vmatprep.subr.mxu0 %v10343_v35  ;;  %3653 = vmatprep.subr.mxu1 %v10346_v13 }
 0xac8   :  { %3583 = vmatpush1.msra.mxu0 %v9364_v0  ;;  %3654 = vmatpush1.msra.mxu1 %v9367_v62  ;;  %v13215_v0 = vld [vmem:[#allocation14_spill] sm:$0xff]  ;;  %v13216_v62 = vld [vmem:[#allocation15_spill] sm:$0xff] }
 0xac9   :  { %3584 = vmatprep.subr.mxu0 %v9370_v57  ;;  %3655 = vmatprep.subr.mxu1 %v9373_v22  ;;  %v13217_v57 = vld [vmem:[#allocation16_spill] sm:$0xff]  ;;  %v13218_v22 = vld [vmem:[#allocation17_spill] sm:$0xff] }
 0xaca   :  { %3585 = vmatpush1.msra.mxu0 %v9376_v36  ;;  %3656 = vmatpush1.msra.mxu1 %v9379_v29  ;;  %v13219_v36 = vld [vmem:[#allocation18_spill] sm:$0xff]  ;;  %v13220_v29 = vld [vmem:[#allocation19_spill] sm:$0xff] }
 0xacb   :  { %3586 = vmatprep.subr.mxu0 %v9382_v32  ;;  %3657 = vmatprep.subr.mxu1 %v9385_v12  ;;  %v13221_v32 = vld [vmem:[#allocation20_spill] sm:$0xff]  ;;  %v13222_v12 = vld [vmem:[#allocation21_spill] sm:$0xff] }
 0xacc   :  { %3587 = vmatpush1.msra.mxu0 %v9388_v38  ;;  %3658 = vmatpush1.msra.mxu1 %v9391_v6  ;;  %v13223_v38 = vld [vmem:[#allocation22_spill] sm:$0xff]  ;;  %v13224_v6 = vld [vmem:[#allocation23_spill] sm:$0xff] }
 0xacd   :  { %3588 = vmatprep.subr.mxu0 %v9394_v61  ;;  %3659 = vmatprep.subr.mxu1 %v9397_v31  ;;  %v13225_v61 = vld [vmem:[#allocation24_spill] sm:$0xff]  ;;  %v13226_v31 = vld [vmem:[#allocation25_spill] sm:$0xff] }
 0xace   :  { %3589 = vmatpush1.msra.mxu0 %v9400_v42  ;;  %3660 = vmatpush1.msra.mxu1 %v9403_v43  ;;  %v13227_v42 = vld [vmem:[#allocation26_spill] sm:$0xff]  ;;  %v13228_v43 = vld [vmem:[#allocation27_spill] sm:$0xff] }
 0xacf   :  { %3590 = vmatprep.subr.mxu0 %v9406_v44  ;;  %3661 = vmatprep.subr.mxu1 %v9409_v45  ;;  %v13229_v44 = vld [vmem:[#allocation28_spill] sm:$0xff]  ;;  %v13230_v45 = vld [vmem:[#allocation29_spill] sm:$0xff] }
 0xad0   :  { %3591 = vmatpush1.msra.mxu0 %v9412_v46  ;;  %3662 = vmatpush1.msra.mxu1 %v9415_v47  ;;  %v13231_v46 = vld [vmem:[#allocation30_spill] sm:$0xff]  ;;  %v13232_v47 = vld [vmem:[#allocation31_spill] sm:$0xff] }
 0xad1   :  { %3592 = vmatprep.subr.mxu0 %v9418_v48  ;;  %3663 = vmatprep.subr.mxu1 %v9421_v49  ;;  %v13233_v48 = vld [vmem:[#allocation32_spill] sm:$0xff]  ;;  %v13234_v49 = vld [vmem:[#allocation33_spill] sm:$0xff] }
 0xad2   :  { %3593 = vmatpush1.msra.mxu0 %v9424_v50  ;;  %3664 = vmatpush1.msra.mxu1 %v9427_v51  ;;  %v13235_v50 = vld [vmem:[#allocation34_spill] sm:$0xff]  ;;  %v13236_v51 = vld [vmem:[#allocation35_spill] sm:$0xff] }
 0xad3   :  { %3594 = vmatprep.subr.mxu0 %v9430_v7  ;;  %3665 = vmatprep.subr.mxu1 %v9433_v10  ;;  %v13237_v7 = vld [vmem:[#allocation36_spill] sm:$0xff]  ;;  %v13238_v10 = vmov 0.0  }
 0xad4   :  { %3595 = vmatpush1.msra.mxu0 %v9436_v11  ;;  %3666 = vmatpush1.msra.mxu1 %v9439_v14  ;;  %v13239_v11 = vld [vmem:[#allocation38_spill] sm:$0xff]  ;;  %v13240_v14 = vld [vmem:[#allocation39_spill] sm:$0xff] }
 0xad5   :  { %3596 = vmatprep.subr.mxu0 %v9442_v15  ;;  %3667 = vmatprep.subr.mxu1 %v9445_v16  ;;  %v13241_v15 = vld [vmem:[#allocation40_spill] sm:$0xff] }
 0xad6   :  { %3597 = vmatpush1.msra.mxu0 %v9448_v17  ;;  %3668 = vmatpush1.msra.mxu1 %v9451_v18 }
 0xad7   :  { %3598 = vmatprep.subr.mxu0 %v9454_v19  ;;  %3669 = vmatprep.subr.mxu1 %v9457_v20 }
 0xad8   :  { %3599 = vmatpush1.msra.mxu0 %v9460_v21  ;;  %3670 = vmatpush1.msra.mxu1 %v9463_v23  ;;  %v13242_v23 = vld [vmem:[#allocation37_spill] sm:$0xff] }
 0xad9   :  { %3600 = vmatprep.subr.mxu0 %v9466_v26  ;;  %3671 = vmatprep.subr.mxu1 %v9469_v27 }
 0xada   :  { %3601 = vmatpush1.msra.mxu0 %v9472_v28  ;;  %3672 = vmatpush1.msra.mxu1 %v9475_v30 }
 0xadb   :  { %3602 = vmatprep.subr.mxu0 %v13215_v0  ;;  %3673 = vmatprep.subr.mxu1 %v13216_v62 }
 0xadc   :  { %3603 = vmatpush1.msra.mxu0 %v13217_v57  ;;  %3674 = vmatpush1.msra.mxu1 %v13218_v22 }
 0xadd   :  { %3604 = vmatprep.subr.mxu0 %v13219_v36  ;;  %3675 = vmatprep.subr.mxu1 %v13220_v29 }
 0xade   :  { %3605 = vmatpush1.msra.mxu0 %v13221_v32  ;;  %3676 = vmatpush1.msra.mxu1 %v13222_v12 }
 0xadf   :  { %3606 = vmatprep.subr.mxu0 %v13223_v38  ;;  %3677 = vmatprep.subr.mxu1 %v13224_v6 }
 0xae0   :  { %3607 = vmatpush1.msra.mxu0 %v13225_v61  ;;  %3678 = vmatpush1.msra.mxu1 %v13226_v31 }
 0xae1   :  { %3608 = vmatprep.subr.mxu0 %v13227_v42  ;;  %3679 = vmatprep.subr.mxu1 %v13228_v43 }
 0xae2   :  { %3609 = vmatpush1.msra.mxu0 %v13229_v44  ;;  %3680 = vmatpush1.msra.mxu1 %v13230_v45 }
 0xae3   :  { %3610 = vmatprep.subr.mxu0 %v13231_v46  ;;  %3681 = vmatprep.subr.mxu1 %v13232_v47  ;;  %v13243_v46 = vld [vmem:[#allocation41_spill] sm:$0xff] }
 0xae4   :  { %3611 = vmatpush1.msra.mxu0 %v13233_v48  ;;  %3682 = vmatpush1.msra.mxu1 %v13234_v49 }
 0xae5   :  { %3612 = vmatprep.subr.mxu0 %v13235_v50  ;;  %3683 = vmatprep.subr.mxu1 %v13236_v51 }
 0xae6   :  { %3613 = vmatpush1.msra.mxu0 %v13237_v7  ;;  %3646 = vmatprep.mubr.f32.mxu0 %v13238_v10 }
 0xae7   :  { %3684 = vmatpush1.msra.mxu1 %v13239_v11  ;;  %3717 = vmatprep.mubr.f32.mxu1 %v13238_v10  ;;  %v13244_v11 = vld [vmem:[#allocation42_spill] sm:$0xff] }
 0xae8   :  { %3753 = vmatprep.subr.mxu0 %v13240_v14  ;;  %3824 = vmatprep.subr.mxu1 %v13241_v15  ;;  %v13245_v14 = vld [vmem:[#allocation43_spill] sm:$0xff]  ;;  %v13246_v15 = vld [vmem:[#allocation44_spill] sm:$0xff] }
 0xb45   :  { %v3301_v16 = vpop.f32.mrf.mxu0  ;;  %v3372_v17 = vpop.f32.mrf.mxu1 }
 0xb47   :  { %v3303_v18 = vpop.f32.mrf.mxu0  ;;  %v3374_v19 = vpop.f32.mrf.mxu1 }
 0xb48   :  { %v3525_v20 = vcombine.low %v3301_v16, %v3303_v18  ;;  %v3526_v21 = vcombine.low %v3372_v17, %v3374_v19  ;;  %v13247_v16 = vld [vmem:[#allocation45_spill] sm:$0xff]  ;;  %v13248_v17 = vld [vmem:[#allocation46_spill] sm:$0xff]  ;;  %v13249_v18 = vld [vmem:[#allocation47_spill] sm:$0xff] }
 0xb49   :  { %v13250_v19 = vld [vmem:[#allocation48_spill] sm:$0xff] }
 0xb4a   :  { %v3533_v26 = vrot.slane %v3525_v20, %v13242_v23  ;;  %v3540_v27 = vrot.slane %v3526_v21, %v13242_v23  ;;  %v13251_v20 = vld [vmem:[#allocation49_spill] sm:$0xff]  ;;  %v13252_v21 = vld [vmem:[#allocation50_spill] sm:$0xff] }
 0xb4c   :  { %v3541_v28 = vcombine.low %v3533_v26, %v3540_v27  ;;  %v13253_v26 = vld [vmem:[#allocation51_spill] sm:$0xff]  ;;  %v13254_v27 = vld [vmem:[#allocation52_spill] sm:$0xff] }
 0xb4e   :  { %v3548_v30 = vrot.slane %v3541_v28, %v13242_v23  ;;  %v13255_v28 = vld [vmem:[#allocation53_spill] sm:$0xff] }
 0xb50   :  { %v3550_v0 = vadd.f32 %v3548_v30, %v3520_v40  ;;  %v13256_v30 = vld [vmem:[#allocation54_spill] sm:$0xff]  ;;  %v13257_v40 = vld [vmem:[#allocation55_spill] sm:$0xff] }
 0xb52   :  { %v4943_v62 = vmul.f32 -1.442695, %v3550_v0  ;;  %v3558_v57 = vrot.slane %v3550_v0, 1  ;;  %v3569_v36 = vrot.slane %v3550_v0, 3  ;;  %v3566_v12 = vrot.slane %v3550_v0, 2  ;;  %v13258_v0 = vld [vmem:[#allocation56_spill] sm:$0xff] }
 0xb54   :  { %5185 = vpow2.f32 %v4943_v62  ;;  %v4944_v22 = vmul.f32 -1.442695, %v3558_v57  ;;  %v4945_v29 = vmul.f32 -1.442695, %v3569_v36  ;;  %v13259_v62 = vld [vmem:[#allocation57_spill] sm:$0xff]  ;;  %v13260_v57 = vld [vmem:[#allocation58_spill] sm:$0xff] }
 0xb55   :  { %v13262_v36 = vld [vmem:[#allocation60_spill] sm:$0xff] }
 0xb56   :  { %5187 = vpow2.f32 %v4944_v22  ;;  %v13261_v22 = vld [vmem:[#allocation59_spill] sm:$0xff] }
 0xb57   :  { %5189 = vpow2.f32 %v4945_v29  ;;  %v13263_v29 = vld [vmem:[#allocation61_spill] sm:$0xff] }
 0xb61   :  { %v5186_v32 = vpop.eup %5185 }
 0xb62   :  { %v3554_v38 = vadd.f32 1.0, %v5186_v32  ;;  %v13264_v32 = vld [vmem:[#allocation62_spill] sm:$0xff] }
 0xb63   :  { %v5188_v6 = vpop.eup %5187 }
 0xb64   :  { %5191 = vrcp.f32 %v3554_v38  ;;  %v3563_v61 = vadd.f32 1.0, %v5188_v6  ;;  %v5190_v31 = vpop.eup %5189  ;;  %v13266_v38 = vld [vmem:[#allocation64_spill] sm:$0xff]  ;;  %v13267_v6 = vld [vmem:[#allocation65_spill] sm:$0xff] }
 0xb65   :  { %5193 = vtanh.f32 %v3566_v12  ;;  %v3574_v45 = vadd.f32 1.0, %v5190_v31  ;;  %v13265_v12 = vld [vmem:[#allocation63_spill] sm:$0xff] }
 0xb66   :  { %5195 = vrcp.f32 %v3563_v61  ;;  %v13268_v61 = vld [vmem:[#allocation66_spill] sm:$0xff]  ;;  %v13269_v31 = vld [vmem:[#allocation67_spill] sm:$0xff] }
 0xb67   :  { %5197 = vrcp.f32 %v3574_v45  ;;  %v13273_v45 = vld [vmem:[#allocation71_spill] sm:$0xff] }
 0xb71   :  { %v5192_v42 = vpop.eup %5191 }
 0xb72   :  { %v5194_v43 = vpop.eup %5193 }
 0xb73   :  { %v5196_v44 = vpop.eup %5195  ;;  %v3578_v48 = vmul.f32 %v5194_v43, %v5192_v42  ;;  %v13270_v42 = vld [vmem:[#allocation68_spill] sm:$0xff]  ;;  %v13271_v43 = vld [vmem:[#allocation69_spill] sm:$0xff] }
 0xb74   :  { %v3577_v47 = vmul.f32 %v5196_v44, %v13243_v46  ;;  %v5198_v50 = vpop.eup %5197  ;;  %v13272_v44 = vld [vmem:[#allocation70_spill] sm:$0xff]  ;;  %v13274_v46 = vld [vmem:[#allocation72_spill] sm:$0xff] }
 0xb76   :  { %v10419_v49 = vadd.f32 %v3578_v48, %v3577_v47  ;;  %v13275_v47 = vld [vmem:[#allocation73_spill] sm:$0xff]  ;;  %v13276_v48 = vld [vmem:[#allocation74_spill] sm:$0xff] }
 0xb78   :  { %5199 = vtanh.f32 %v10419_v49 }
 0xb85   :  { %v5200_v51 = vpop.eup %5199 }
 0xb86   :  { %v10422_v7 = vmul.f32 %v5200_v51, %v5198_v50  ;;  %v13277_v50 = vld [vmem:[#allocation75_spill] sm:$0xff]  ;;  %v13278_v51 = vld [vmem:[#allocation76_spill] sm:$0xff] }
 0xb88   :  { %3647 = vmatmul.mubr.f32.vlgmr.msra.gmra.mxu0 %v10422_v7  ;;  %3718 = vmatmul.mubr.f32.vlgmr.msra.gmra.mxu1 %v10422_v7 }
 0xb89   :  { %3754 = vmatpush1.msra.mxu0 %v13244_v11  ;;  %3825 = vmatpush1.msra.mxu1 %v13245_v14  ;;  %v13279_v11 = vld [vmem:[#allocation77_spill] sm:$0xff]  ;;  %v13280_v14 = vld [vmem:[#allocation78_spill] sm:$0xff] }
 0xb8a   :  { %3755 = vmatprep.subr.mxu0 %v13246_v15  ;;  %3826 = vmatprep.subr.mxu1 %v13247_v16  ;;  %v13281_v15 = vld [vmem:[#allocation79_spill] sm:$0xff]  ;;  %v13282_v16 = vld [vmem:[#allocation80_spill] sm:$0xff] }
 0xb8b   :  { %3756 = vmatpush1.msra.mxu0 %v13248_v17  ;;  %3827 = vmatpush1.msra.mxu1 %v13249_v18  ;;  %v13283_v17 = vld [vmem:[#allocation81_spill] sm:$0xff]  ;;  %v13284_v18 = vld [vmem:[#allocation82_spill] sm:$0xff] }
 0xb8c   :  { %3757 = vmatprep.subr.mxu0 %v13250_v19  ;;  %3828 = vmatprep.subr.mxu1 %v13251_v20  ;;  %v13285_v19 = vld [vmem:[#allocation83_spill] sm:$0xff]  ;;  %v13286_v20 = vld [vmem:[#allocation84_spill] sm:$0xff] }
 0xb8d   :  { %3758 = vmatpush1.msra.mxu0 %v13252_v21  ;;  %3829 = vmatpush1.msra.mxu1 %v13253_v26  ;;  %v13287_v21 = vld [vmem:[#allocation85_spill] sm:$0xff]  ;;  %v13288_v26 = vld [vmem:[#allocation86_spill] sm:$0xff] }
 0xb8e   :  { %3759 = vmatprep.subr.mxu0 %v13254_v27  ;;  %3830 = vmatprep.subr.mxu1 %v13255_v28  ;;  %v13289_v27 = vld [vmem:[#allocation87_spill] sm:$0xff]  ;;  %v13290_v28 = vld [vmem:[#allocation88_spill] sm:$0xff] }
 0xb8f   :  { %3760 = vmatpush1.msra.mxu0 %v13256_v30  ;;  %3831 = vmatpush1.msra.mxu1 %v13257_v40  ;;  %v13291_v30 = vld [vmem:[#allocation89_spill] sm:$0xff]  ;;  %v13292_v40 = vld [vmem:[#allocation90_spill] sm:$0xff] }
 0xb90   :  { %3761 = vmatprep.subr.mxu0 %v13258_v0  ;;  %3832 = vmatprep.subr.mxu1 %v13259_v62  ;;  %v13293_v0 = vld [vmem:[#allocation91_spill] sm:$0xff]  ;;  %v13294_v62 = vld [vmem:[#allocation92_spill] sm:$0xff] }
 0xb91   :  { %3762 = vmatpush1.msra.mxu0 %v13260_v57  ;;  %3833 = vmatpush1.msra.mxu1 %v13261_v22  ;;  %v13295_v57 = vld [vmem:[#allocation93_spill] sm:$0xff]  ;;  %v13296_v22 = vld [vmem:[#allocation94_spill] sm:$0xff] }
 0xb92   :  { %3763 = vmatprep.subr.mxu0 %v13262_v36  ;;  %3834 = vmatprep.subr.mxu1 %v13263_v29  ;;  %v13297_v36 = vld [vmem:[#allocation95_spill] sm:$0xff]  ;;  %v13298_v29 = vld [vmem:[#allocation96_spill] sm:$0xff] }
 0xb93   :  { %3764 = vmatpush1.msra.mxu0 %v13264_v32  ;;  %3835 = vmatpush1.msra.mxu1 %v13265_v12  ;;  %v13299_v32 = vld [vmem:[#allocation97_spill] sm:$0xff]  ;;  %v13300_v12 = vld [vmem:[#allocation98_spill] sm:$0xff] }
 0xb94   :  { %3765 = vmatprep.subr.mxu0 %v13266_v38  ;;  %3836 = vmatprep.subr.mxu1 %v13267_v6  ;;  %v13301_v38 = vld [vmem:[#allocation99_spill] sm:$0xff]  ;;  %v13302_v6 = vld [vmem:[#allocation100_spill] sm:$0xff] }
 0xb95   :  { %3766 = vmatpush1.msra.mxu0 %v13268_v61  ;;  %3837 = vmatpush1.msra.mxu1 %v13269_v31  ;;  %v13303_v61 = vld [vmem:[#allocation101_spill] sm:$0xff]  ;;  %v13304_v31 = vld [vmem:[#allocation102_spill] sm:$0xff] }
 0xb96   :  { %3767 = vmatprep.subr.mxu0 %v13270_v42  ;;  %3838 = vmatprep.subr.mxu1 %v13271_v43  ;;  %v13305_v42 = vld [vmem:[#allocation103_spill] sm:$0xff]  ;;  %v13306_v43 = vld [vmem:[#allocation104_spill] sm:$0xff] }
 0xb97   :  { %3768 = vmatpush1.msra.mxu0 %v13272_v44  ;;  %3839 = vmatpush1.msra.mxu1 %v13273_v45  ;;  %v13307_v44 = vld [vmem:[#allocation105_spill] sm:$0xff]  ;;  %v13308_v45 = vld [vmem:[#allocation106_spill] sm:$0xff] }
 0xb98   :  { %3769 = vmatprep.subr.mxu0 %v13274_v46  ;;  %3840 = vmatprep.subr.mxu1 %v13275_v47  ;;  %v13309_v46 = vld [vmem:[#allocation107_spill] sm:$0xff]  ;;  %v13310_v47 = vld [vmem:[#allocation108_spill] sm:$0xff] }
 0xb99   :  { %3770 = vmatpush1.msra.mxu0 %v13276_v48  ;;  %3841 = vmatpush1.msra.mxu1 %v13277_v50  ;;  %v13311_v48 = vld [vmem:[#allocation109_spill] sm:$0xff]  ;;  %v13312_v50 = vld [vmem:[#allocation110_spill] sm:$0xff] }
 0xb9a   :  { %3771 = vmatprep.subr.mxu0 %v13278_v51  ;;  %3842 = vmatprep.subr.mxu1 %v13279_v11  ;;  %v13313_v51 = vld [vmem:[#allocation111_spill] sm:$0xff]  ;;  %v13314_v11 = vld [vmem:[#allocation112_spill] sm:$0xff] }
 0xb9b   :  { %3772 = vmatpush1.msra.mxu0 %v13280_v14  ;;  %3843 = vmatpush1.msra.mxu1 %v13281_v15  ;;  %v13315_v14 = vld [vmem:[#allocation113_spill] sm:$0xff]  ;;  %v13316_v15 = vld [vmem:[#allocation114_spill] sm:$0xff] }
 0xb9c   :  { %3773 = vmatprep.subr.mxu0 %v13282_v16  ;;  %3844 = vmatprep.subr.mxu1 %v13283_v17  ;;  %v13317_v16 = vld [vmem:[#allocation115_spill] sm:$0xff]  ;;  %v13318_v17 = vld [vmem:[#allocation116_spill] sm:$0xff] }
 0xb9d   :  { %3774 = vmatpush1.msra.mxu0 %v13284_v18  ;;  %3845 = vmatpush1.msra.mxu1 %v13285_v19  ;;  %v13319_v18 = vld [vmem:[#allocation117_spill] sm:$0xff]  ;;  %v13320_v19 = vld [vmem:[#allocation118_spill] sm:$0xff] }
 0xb9e   :  { %3775 = vmatprep.subr.mxu0 %v13286_v20  ;;  %3846 = vmatprep.subr.mxu1 %v13287_v21  ;;  %v13321_v20 = vld [vmem:[#allocation119_spill] sm:$0xff]  ;;  %v13322_v21 = vld [vmem:[#allocation120_spill] sm:$0xff] }
 0xb9f   :  { %3776 = vmatpush1.msra.mxu0 %v13288_v26  ;;  %3847 = vmatpush1.msra.mxu1 %v13289_v27  ;;  %v13323_v26 = vld [vmem:[#allocation121_spill] sm:$0xff]  ;;  %v13324_v27 = vld [vmem:[#allocation122_spill] sm:$0xff] }
 0xba0   :  { %3777 = vmatprep.subr.mxu0 %v13290_v28  ;;  %3848 = vmatprep.subr.mxu1 %v13291_v30  ;;  %v13325_v28 = vld [vmem:[#allocation123_spill] sm:$0xff]  ;;  %v13326_v30 = vld [vmem:[#allocation124_spill] sm:$0xff] }
 0xba1   :  { %3778 = vmatpush1.msra.mxu0 %v13292_v40  ;;  %3849 = vmatpush1.msra.mxu1 %v13293_v0  ;;  %v13327_v40 = vld [vmem:[#allocation125_spill] sm:$0xff]  ;;  %v13328_v0 = vld [vmem:[#allocation126_spill] sm:$0xff] }
 0xba2   :  { %3779 = vmatprep.subr.mxu0 %v13294_v62  ;;  %3850 = vmatprep.subr.mxu1 %v13295_v57  ;;  %v13329_v62 = vld [vmem:[#allocation127_spill] sm:$0xff]  ;;  %v13330_v57 = vld [vmem:[#allocation128_spill] sm:$0xff] }
 0xba3   :  { %3780 = vmatpush1.msra.mxu0 %v13296_v22  ;;  %3851 = vmatpush1.msra.mxu1 %v13297_v36  ;;  %v13331_v22 = vld [vmem:[#allocation129_spill] sm:$0xff]  ;;  %v13332_v36 = vld [vmem:[#allocation130_spill] sm:$0xff] }
 0xba4   :  { %3781 = vmatprep.subr.mxu0 %v13298_v29  ;;  %3852 = vmatprep.subr.mxu1 %v13299_v32  ;;  %v13333_v29 = vld [vmem:[#allocation131_spill] sm:$0xff]  ;;  %v13334_v32 = vld [vmem:[#allocation132_spill] sm:$0xff] }
 0xba5   :  { %3782 = vmatpush1.msra.mxu0 %v13300_v12  ;;  %3853 = vmatpush1.msra.mxu1 %v13301_v38  ;;  %v13335_v12 = vld [vmem:[#allocation133_spill] sm:$0xff]  ;;  %v13336_v38 = vld [vmem:[#allocation134_spill] sm:$0xff] }
 0xba6   :  { %3783 = vmatprep.subr.mxu0 %v13302_v6  ;;  %3854 = vmatprep.subr.mxu1 %v13303_v61  ;;  %v13337_v6 = vld [vmem:[#allocation135_spill] sm:$0xff]  ;;  %v13338_v61 = vld [vmem:[#allocation136_spill] sm:$0xff] }
 0xba7   :  { %3784 = vmatpush1.msra.mxu0 %v13304_v31  ;;  %3855 = vmatpush1.msra.mxu1 %v13305_v42  ;;  %v13339_v31 = vld [vmem:[#allocation137_spill] sm:$0xff]  ;;  %v13340_v42 = vld [vmem:[#allocation138_spill] sm:$0xff] }
 0xba8   :  { %3785 = vmatprep.subr.mxu0 %v13306_v43  ;;  %3856 = vmatprep.subr.mxu1 %v13307_v44  ;;  %v13341_v43 = vld [vmem:[#allocation139_spill] sm:$0xff]  ;;  %v13342_v44 = vld [vmem:[#allocation140_spill] sm:$0xff] }
 0xba9   :  { %3786 = vmatpush2.msra.mxu0 %v13308_v45  ;;  %3857 = vmatpush2.msra.mxu1 %v13309_v46  ;;  %v13343_v45 = vld [vmem:[#allocation141_spill] sm:$0xff]  ;;  %v13344_v46 = vld [vmem:[#allocation142_spill] sm:$0xff] }
 0xbaa   :  { %3787 = vmatprep.subr.mxu0 %v13310_v47  ;;  %3858 = vmatprep.subr.mxu1 %v13311_v48  ;;  %v13345_v47 = vld [vmem:[#allocation143_spill] sm:$0xff]  ;;  %v13346_v48 = vld [vmem:[#allocation144_spill] sm:$0xff] }
 0xbab   :  { %3788 = vmatpush2.msra.mxu0 %v13312_v50  ;;  %3859 = vmatpush2.msra.mxu1 %v13313_v51  ;;  %v13347_v50 = vld [vmem:[#allocation145_spill] sm:$0xff]  ;;  %v13348_v51 = vld [vmem:[#allocation146_spill] sm:$0xff] }
 0xbac   :  { %3789 = vmatprep.subr.mxu0 %v13314_v11  ;;  %3860 = vmatprep.subr.mxu1 %v13315_v14  ;;  %v13349_v11 = vld [vmem:[#allocation147_spill] sm:$0xff]  ;;  %v13350_v14 = vld [vmem:[#allocation148_spill] sm:$0xff] }
 0xbad   :  { %3790 = vmatpush2.msra.mxu0 %v13316_v15  ;;  %3861 = vmatpush2.msra.mxu1 %v13317_v16  ;;  %v13351_v15 = vld [vmem:[#allocation149_spill] sm:$0xff]  ;;  %v13352_v16 = vld [vmem:[#allocation150_spill] sm:$0xff] }
 0xbae   :  { %3791 = vmatprep.subr.mxu0 %v13318_v17  ;;  %3862 = vmatprep.subr.mxu1 %v13319_v18  ;;  %v13353_v17 = vld [vmem:[#allocation151_spill] sm:$0xff]  ;;  %v13354_v18 = vld [vmem:[#allocation152_spill] sm:$0xff] }
 0xbaf   :  { %3792 = vmatpush2.msra.mxu0 %v13320_v19  ;;  %3863 = vmatpush2.msra.mxu1 %v13321_v20  ;;  %v13355_v19 = vld [vmem:[#allocation153_spill] sm:$0xff]  ;;  %v13356_v20 = vld [vmem:[#allocation154_spill] sm:$0xff] }
 0xbb0   :  { %3793 = vmatprep.subr.mxu0 %v13322_v21  ;;  %3864 = vmatprep.subr.mxu1 %v13323_v26  ;;  %v13357_v21 = vld [vmem:[#allocation155_spill] sm:$0xff]  ;;  %v13358_v26 = vld [vmem:[#allocation156_spill] sm:$0xff] }
 0xbb1   :  { %3794 = vmatpush2.msra.mxu0 %v13324_v27  ;;  %3865 = vmatpush2.msra.mxu1 %v13325_v28  ;;  %v13359_v27 = vld [vmem:[#allocation157_spill] sm:$0xff]  ;;  %v13360_v28 = vld [vmem:[#allocation158_spill] sm:$0xff] }
 0xbb2   :  { %3795 = vmatprep.subr.mxu0 %v13326_v30  ;;  %3866 = vmatprep.subr.mxu1 %v13327_v40  ;;  %v13361_v30 = vld [vmem:[#allocation159_spill] sm:$0xff]  ;;  %v13362_v40 = vld [vmem:[#allocation160_spill] sm:$0xff] }
 0xbb3   :  { %3796 = vmatpush2.msra.mxu0 %v13328_v0  ;;  %3867 = vmatpush2.msra.mxu1 %v13329_v62  ;;  %v13363_v0 = vld [vmem:[#allocation161_spill] sm:$0xff]  ;;  %v13364_v62 = vld [vmem:[#allocation162_spill] sm:$0xff] }
 0xbb4   :  { %3797 = vmatprep.subr.mxu0 %v13330_v57  ;;  %3868 = vmatprep.subr.mxu1 %v13331_v22  ;;  %v13365_v57 = vld [vmem:[#allocation163_spill] sm:$0xff]  ;;  %v13366_v22 = vld [vmem:[#allocation164_spill] sm:$0xff] }
 0xbb5   :  { %3798 = vmatpush2.msra.mxu0 %v13332_v36  ;;  %3869 = vmatpush2.msra.mxu1 %v13333_v29  ;;  %v13367_v36 = vld [vmem:[#allocation165_spill] sm:$0xff]  ;;  %v13368_v29 = vld [vmem:[#allocation166_spill] sm:$0xff] }
 0xbb6   :  { %3799 = vmatprep.subr.mxu0 %v13334_v32  ;;  %3870 = vmatprep.subr.mxu1 %v13335_v12  ;;  %v13369_v32 = vld [vmem:[#allocation167_spill] sm:$0xff]  ;;  %v13370_v12 = vld [vmem:[#allocation168_spill] sm:$0xff] }
 0xbb7   :  { %3800 = vmatpush2.msra.mxu0 %v13336_v38  ;;  %3871 = vmatpush2.msra.mxu1 %v13337_v6  ;;  %v13371_v38 = vld [vmem:[#allocation169_spill] sm:$0xff]  ;;  %v3443_v6 = vpop.f32.mrf.mxu0 }
 0xbb8   :  { %3801 = vmatprep.subr.mxu0 %v13338_v61  ;;  %3872 = vmatprep.subr.mxu1 %v13339_v31  ;;  %v3514_v61 = vpop.f32.mrf.mxu1 }
 0xbb9   :  { %3802 = vmatpush2.msra.mxu0 %v13340_v42  ;;  %3873 = vmatpush2.msra.mxu1 %v13341_v43  ;;  %v3445_v31 = vpop.f32.mrf.mxu0 }
 0xbba   :  { %3803 = vmatprep.subr.mxu0 %v13342_v44  ;;  %3874 = vmatprep.subr.mxu1 %v13343_v45  ;;  %v3516_v43 = vpop.f32.mrf.mxu1 }
 0xbbb   :  { %3804 = vmatpush2.msra.mxu0 %v13344_v46  ;;  %3875 = vmatpush2.msra.mxu1 %v13345_v47 }
 0xbbc   :  { %3805 = vmatprep.subr.mxu0 %v13346_v48  ;;  %3876 = vmatprep.subr.mxu1 %v13347_v50 }
 0xbbd   :  { %3806 = vmatpush2.msra.mxu0 %v13348_v51  ;;  %3877 = vmatpush2.msra.mxu1 %v13349_v11 }
 0xbbe   :  { %3807 = vmatprep.subr.mxu0 %v13350_v14  ;;  %3878 = vmatprep.subr.mxu1 %v13351_v15 }
 0xbbf   :  { %3808 = vmatpush2.msra.mxu0 %v13352_v16  ;;  %3879 = vmatpush2.msra.mxu1 %v13353_v17 }
 0xbc0   :  { %3809 = vmatprep.subr.mxu0 %v13354_v18  ;;  %3880 = vmatprep.subr.mxu1 %v13355_v19 }
 0xbc1   :  { %3810 = vmatpush2.msra.mxu0 %v13356_v20  ;;  %3881 = vmatpush2.msra.mxu1 %v13357_v21 }
 0xbc2   :  { %3811 = vmatprep.subr.mxu0 %v13358_v26  ;;  %3882 = vmatprep.subr.mxu1 %v13359_v27 }
 0xbc3   :  { %3812 = vmatpush2.msra.mxu0 %v13360_v28  ;;  %3883 = vmatpush2.msra.mxu1 %v13361_v30 }
 0xbc4   :  { %3813 = vmatprep.subr.mxu0 %v13362_v40  ;;  %3884 = vmatprep.subr.mxu1 %v13363_v0 }
 0xbc5   :  { %3814 = vmatpush2.msra.mxu0 %v13364_v62  ;;  %3885 = vmatpush2.msra.mxu1 %v13365_v57 }
 0xbc6   :  { %3815 = vmatprep.subr.mxu0 %v13366_v22  ;;  %3886 = vmatprep.subr.mxu1 %v13367_v36 }
 0xbc7   :  { %3816 = vmatpush2.msra.mxu0 %v13368_v29  ;;  %3887 = vmatpush2.msra.mxu1 %v13369_v32 }
 0xbc8   :  { %3895 = vmatprep.subr.mxu0 %v13370_v12  ;;  %3966 = vmatprep.subr.mxu1 %v13371_v38  ;;  %v13387_v38 = vld [vmem:[#allocation185_spill] sm:$0xff] }
 0xc48   :  { %v3648_v42 = vpop.f32.mrf.mxu0  ;;  %v3719_v47 = vpop.f32.mrf.mxu1 }
 0xc49   :  { %v3649_v44 = vadd.f32 %v3648_v42, %v3443_v6  ;;  %v3720_v17 = vadd.f32 %v3719_v47, %v3514_v61  ;;  %v13388_v6 = vld [vmem:[#allocation186_spill] sm:$0xff]  ;;  %v13389_v61 = vld [vmem:[#allocation187_spill] sm:$0xff]  ;;  %v13391_v42 = vld [vmem:[#allocation189_spill] sm:$0xff] }
 0xc4a   :  { %v3650_v45 = vpop.f32.mrf.mxu0  ;;  %v3721_v14 = vpop.f32.mrf.mxu1  ;;  %v13396_v47 = vld [vmem:[#allocation194_spill] sm:$0xff] }
 0xc4b   :  { %v3724_v46 = vadd.f32 %v3649_v44, %v7280_v1  ;;  %v3651_v48 = vadd.f32 %v3650_v45, %v3445_v31  ;;  %v3722_v15 = vadd.f32 %v3721_v14, %v3516_v43  ;;  %v3726_v20 = vadd.f32 %v3720_v17, %v7295_v56  ;;  %v13390_v31 = vld [vmem:[#allocation188_spill] sm:$0xff]  ;;  %v13392_v43 = vld [vmem:[#allocation190_spill] sm:$0xff]  ;;  %v13393_v44 = vld [vmem:[#allocation191_spill] sm:$0xff] }
 0xc4c   :  { %v13394_v45 = vld [vmem:[#allocation192_spill] sm:$0xff]  ;;  %v13401_v14 = vld [vmem:[#allocation199_spill] sm:$0xff]  ;;  %v13404_v17 = vld [vmem:[#allocation202_spill] sm:$0xff] }
 0xc4d   :  { %v4946_v50 = vmul.f32 -1.442695, %v3724_v46  ;;  %v3725_v51 = vadd.f32 %v3651_v48, %v7284_v2  ;;  %v3727_v16 = vadd.f32 %v3722_v15, %v7290_v55  ;;  %v13395_v46 = vld [vmem:[#allocation193_spill] sm:$0xff]  ;;  %v13397_v48 = vld [vmem:[#allocation195_spill] sm:$0xff]  ;;  %v13402_v15 = vld [vmem:[#allocation200_spill] sm:$0xff] }
 0xc4f   :  { %5201 = vpow2.f32 %v4946_v50  ;;  %v4947_v11 = vmul.f32 -1.442695, %v3725_v51  ;;  %v4948_v18 = vmul.f32 -1.442695, %v3727_v16  ;;  %v13398_v50 = vld [vmem:[#allocation196_spill] sm:$0xff]  ;;  %v13399_v51 = vld [vmem:[#allocation197_spill] sm:$0xff] }
 0xc50   :  { %v13403_v16 = vld [vmem:[#allocation201_spill] sm:$0xff] }
 0xc51   :  { %5203 = vpow2.f32 %v4947_v11  ;;  %v13400_v11 = vld [vmem:[#allocation198_spill] sm:$0xff] }
 0xc52   :  { %5205 = vpow2.f32 %v4948_v18  ;;  %v13405_v18 = vld [vmem:[#allocation203_spill] sm:$0xff] }
 0xc5c   :  { %v5202_v19 = vpop.eup %5201 }
 0xc5d   :  { %v3731_v21 = vadd.f32 1.0, %v5202_v19  ;;  %v13406_v19 = vld [vmem:[#allocation204_spill] sm:$0xff] }
 0xc5e   :  { %v5204_v26 = vpop.eup %5203 }
 0xc5f   :  { %5207 = vrcp.f32 %v3731_v21  ;;  %v3737_v27 = vadd.f32 1.0, %v5204_v26  ;;  %v5206_v28 = vpop.eup %5205  ;;  %v13408_v21 = vld [vmem:[#allocation206_spill] sm:$0xff]  ;;  %v13409_v26 = vld [vmem:[#allocation207_spill] sm:$0xff] }
 0xc60   :  { %5209 = vtanh.f32 %v3726_v20  ;;  %v3744_v62 = vadd.f32 1.0, %v5206_v28  ;;  %v13407_v20 = vld [vmem:[#allocation205_spill] sm:$0xff] }
 0xc61   :  { %5211 = vrcp.f32 %v3737_v27  ;;  %v13410_v27 = vld [vmem:[#allocation208_spill] sm:$0xff]  ;;  %v13411_v28 = vld [vmem:[#allocation209_spill] sm:$0xff] }
 0xc62   :  { %5213 = vrcp.f32 %v3744_v62  ;;  %v13415_v62 = vld [vmem:[#allocation213_spill] sm:$0xff] }
 0xc6c   :  { %v5208_v30 = vpop.eup %5207 }
 0xc6d   :  { %v5210_v40 = vpop.eup %5209 }
 0xc6e   :  { %v5212_v0 = vpop.eup %5211  ;;  %v3748_v57 = vmul.f32 %v5210_v40, %v5208_v30  ;;  %v13412_v30 = vld [vmem:[#allocation210_spill] sm:$0xff]  ;;  %v13413_v40 = vld [vmem:[#allocation211_spill] sm:$0xff] }
 0xc6f   :  { %v3747_v22 = vmul.f32 %v5212_v0, %v9958_v60  ;;  %v5214_v29 = vpop.eup %5213  ;;  %v13372_v60 = vld [vmem:[#allocation170_spill] sm:$0xff]  ;;  %v13414_v0 = vld [vmem:[#allocation212_spill] sm:$0xff] }
 0xc71   :  { %v10559_v36 = vadd.f32 %v3748_v57, %v3747_v22  ;;  %v13416_v57 = vld [vmem:[#allocation214_spill] sm:$0xff]  ;;  %v13417_v22 = vld [vmem:[#allocation215_spill] sm:$0xff] }
 0xc73   :  { %5215 = vtanh.f32 %v10559_v36 }
 0xc80   :  { %v5216_v32 = vpop.eup %5215 }
 0xc81   :  { %v3751_v12 = vmul.f32 %v5216_v32, %v5214_v29  ;;  %v13418_v29 = vld [vmem:[#allocation216_spill] sm:$0xff]  ;;  %v13419_v32 = vld [vmem:[#allocation217_spill] sm:$0xff] }
 0xc83   :  { %3752 = vst [vmem:[#allocation3 + $0x5] sm:$0x1] %v3751_v12  ;;  %3817 = vmatprep.mubr.f32.mxu0 %v3751_v12  ;;  %3888 = vmatprep.mubr.f32.mxu1 %v3751_v12 }
 0xc84   :  { %3818 = vmatmul.mubr.f32.vlgmr.msra.gmra.mxu0 %v10422_v7  ;;  %3889 = vmatmul.mubr.f32.vlgmr.msra.gmra.mxu1 %v10422_v7 }
 0xc85   :  { %3896 = vmatpush1.msra.mxu0 %v9963_v24  ;;  %3967 = vmatpush1.msra.mxu1 %v9966_v58  ;;  %v13373_v24 = vld [vmem:[#allocation171_spill] sm:$0xff]  ;;  %v13374_v58 = vld [vmem:[#allocation172_spill] sm:$0xff] }
 0xc86   :  { %3897 = vmatprep.subr.mxu0 %v9969_v53  ;;  %3959 = vmatprep.mubr.f32.mxu0 %v3751_v12  ;;  %v13375_v53 = vld [vmem:[#allocation173_spill] sm:$0xff] }
 0xc87   :  { %3968 = vmatprep.subr.mxu1 %v9972_v41  ;;  %4030 = vmatprep.mubr.f32.mxu1 %v3751_v12  ;;  %v13376_v41 = vld [vmem:[#allocation174_spill] sm:$0xff] }
 0xc88   :  { %3898 = vmatpush1.msra.mxu0 %v9975_v54  ;;  %3969 = vmatpush1.msra.mxu1 %v9978_v39  ;;  %v13377_v54 = vld [vmem:[#allocation175_spill] sm:$0xff]  ;;  %v13378_v39 = vld [vmem:[#allocation176_spill] sm:$0xff]  ;;  %v13420_v12 = vld [vmem:[#allocation218_spill] sm:$0xff] }
 0xc89   :  { %3899 = vmatprep.subr.mxu0 %v9981_v52  ;;  %3970 = vmatprep.subr.mxu1 %v9984_v4  ;;  %v13379_v52 = vld [vmem:[#allocation177_spill] sm:$0xff]  ;;  %v13380_v4 = vld [vmem:[#allocation178_spill] sm:$0xff] }
 0xc8a   :  { %3900 = vmatpush1.msra.mxu0 %v9987_v5  ;;  %3971 = vmatpush1.msra.mxu1 %v9990_v3  ;;  %v13381_v5 = vld [vmem:[#allocation179_spill] sm:$0xff]  ;;  %v13382_v3 = vld [vmem:[#allocation180_spill] sm:$0xff] }
 0xc8b   :  { %3901 = vmatprep.subr.mxu0 %v9993_v37  ;;  %3972 = vmatprep.subr.mxu1 %v9996_v34  ;;  %v13383_v37 = vld [vmem:[#allocation181_spill] sm:$0xff]  ;;  %v13384_v34 = vld [vmem:[#allocation182_spill] sm:$0xff] }
 0xc8c   :  { %3902 = vmatpush1.msra.mxu0 %v9999_v63  ;;  %3973 = vmatpush1.msra.mxu1 %v10002_v25  ;;  %v13385_v63 = vld [vmem:[#allocation183_spill] sm:$0xff]  ;;  %v13386_v25 = vld [vmem:[#allocation184_spill] sm:$0xff] }
 0xc8d   :  { %3903 = vmatprep.subr.mxu0 %v13372_v60  ;;  %3974 = vmatprep.subr.mxu1 %v13373_v24  ;;  %v13421_v60 = vld [vmem:[#allocation219_spill] sm:$0xff]  ;;  %v13422_v24 = vld [vmem:[#allocation220_spill] sm:$0xff] }
 0xc8e   :  { %3904 = vmatpush1.msra.mxu0 %v13374_v58  ;;  %3975 = vmatpush1.msra.mxu1 %v13375_v53  ;;  %v13423_v58 = vld [vmem:[#allocation221_spill] sm:$0xff]  ;;  %v13424_v53 = vld [vmem:[#allocation222_spill] sm:$0xff] }
 0xc8f   :  { %3905 = vmatprep.subr.mxu0 %v13376_v41  ;;  %3976 = vmatprep.subr.mxu1 %v13377_v54  ;;  %v13425_v41 = vld [vmem:[#allocation223_spill] sm:$0xff]  ;;  %v13426_v54 = vld [vmem:[#allocation224_spill] sm:$0xff] }
 0xc90   :  { %3906 = vmatpush1.msra.mxu0 %v13378_v39  ;;  %3977 = vmatpush1.msra.mxu1 %v13379_v52  ;;  %v13427_v39 = vld [vmem:[#allocation225_spill] sm:$0xff]  ;;  %v13428_v52 = vld [vmem:[#allocation226_spill] sm:$0xff] }
 0xc91   :  { %3907 = vmatprep.subr.mxu0 %v13380_v4  ;;  %3978 = vmatprep.subr.mxu1 %v13381_v5  ;;  %v13429_v4 = vld [vmem:[#allocation227_spill] sm:$0xff]  ;;  %v13430_v5 = vld [vmem:[#allocation228_spill] sm:$0xff] }
 0xc92   :  { %3908 = vmatpush1.msra.mxu0 %v13382_v3  ;;  %3979 = vmatpush1.msra.mxu1 %v13383_v37  ;;  %v13431_v3 = vld [vmem:[#allocation229_spill] sm:$0xff]  ;;  %v13432_v37 = vld [vmem:[#allocation230_spill] sm:$0xff] }
 0xc93   :  { %3909 = vmatprep.subr.mxu0 %v13384_v34  ;;  %3980 = vmatprep.subr.mxu1 %v13385_v63  ;;  %v13433_v34 = vld [vmem:[#allocation231_spill] sm:$0xff]  ;;  %v13434_v63 = vld [vmem:[#allocation232_spill] sm:$0xff] }
 0xc94   :  { %3910 = vmatpush1.msra.mxu0 %v13386_v25  ;;  %3981 = vmatpush1.msra.mxu1 %v13387_v38  ;;  %v13435_v25 = vld [vmem:[#allocation233_spill] sm:$0xff]  ;;  %v13436_v38 = vld [vmem:[#allocation234_spill] sm:$0xff] }
 0xc95   :  { %3911 = vmatprep.subr.mxu0 %v13388_v6  ;;  %3982 = vmatprep.subr.mxu1 %v13389_v61  ;;  %v13437_v6 = vld [vmem:[#allocation235_spill] sm:$0xff]  ;;  %v13438_v61 = vld [vmem:[#allocation236_spill] sm:$0xff] }
 0xc96   :  { %3912 = vmatpush1.msra.mxu0 %v13390_v31  ;;  %3983 = vmatpush1.msra.mxu1 %v13391_v42  ;;  %v13439_v31 = vld [vmem:[#allocation237_spill] sm:$0xff]  ;;  %v13440_v42 = vld [vmem:[#allocation238_spill] sm:$0xff] }
 0xc97   :  { %3913 = vmatprep.subr.mxu0 %v13392_v43  ;;  %3984 = vmatprep.subr.mxu1 %v13393_v44  ;;  %v13441_v43 = vld [vmem:[#allocation239_spill] sm:$0xff]  ;;  %v13442_v44 = vld [vmem:[#allocation240_spill] sm:$0xff] }
 0xc98   :  { %3914 = vmatpush1.msra.mxu0 %v13394_v45  ;;  %3985 = vmatpush1.msra.mxu1 %v13395_v46  ;;  %v13443_v45 = vld [vmem:[#allocation241_spill] sm:$0xff]  ;;  %v13444_v46 = vld [vmem:[#allocation242_spill] sm:$0xff] }
 0xc99   :  { %3915 = vmatprep.subr.mxu0 %v13396_v47  ;;  %3986 = vmatprep.subr.mxu1 %v13397_v48  ;;  %v13445_v47 = vld [vmem:[#allocation243_spill] sm:$0xff]  ;;  %v13446_v48 = vld [vmem:[#allocation244_spill] sm:$0xff] }
 0xc9a   :  { %3916 = vmatpush1.msra.mxu0 %v13398_v50  ;;  %3987 = vmatpush1.msra.mxu1 %v13399_v51  ;;  %v13447_v50 = vld [vmem:[#allocation245_spill] sm:$0xff]  ;;  %v13448_v51 = vld [vmem:[#allocation246_spill] sm:$0xff] }
 0xc9b   :  { %3917 = vmatprep.subr.mxu0 %v13400_v11  ;;  %3988 = vmatprep.subr.mxu1 %v13401_v14  ;;  %v13449_v11 = vld [vmem:[#allocation247_spill] sm:$0xff]  ;;  %v13450_v14 = vld [vmem:[#allocation248_spill] sm:$0xff] }
 0xc9c   :  { %3918 = vmatpush1.msra.mxu0 %v13402_v15  ;;  %3989 = vmatpush1.msra.mxu1 %v13403_v16  ;;  %v13451_v15 = vld [vmem:[#allocation249_spill] sm:$0xff]  ;;  %v13452_v16 = vld [vmem:[#allocation250_spill] sm:$0xff] }
 0xc9d   :  { %3919 = vmatprep.subr.mxu0 %v13404_v17  ;;  %3990 = vmatprep.subr.mxu1 %v13405_v18  ;;  %v13453_v17 = vld [vmem:[#allocation251_spill] sm:$0xff]  ;;  %v13454_v18 = vld [vmem:[#allocation252_spill] sm:$0xff] }
 0xc9e   :  { %3920 = vmatpush1.msra.mxu0 %v13406_v19  ;;  %3991 = vmatpush1.msra.mxu1 %v13407_v20  ;;  %v13455_v19 = vld [vmem:[#allocation253_spill] sm:$0xff]  ;;  %v13456_v20 = vld [vmem:[#allocation254_spill] sm:$0xff] }
 0xc9f   :  { %3921 = vmatprep.subr.mxu0 %v13408_v21  ;;  %3992 = vmatprep.subr.mxu1 %v13409_v26  ;;  %v13457_v21 = vld [vmem:[#allocation255_spill] sm:$0xff]  ;;  %v13458_v26 = vld [vmem:[#allocation256_spill] sm:$0xff] }
 0xca0   :  { %3922 = vmatpush1.msra.mxu0 %v13410_v27  ;;  %3993 = vmatpush1.msra.mxu1 %v13411_v28  ;;  %v13459_v27 = vld [vmem:[#allocation257_spill] sm:$0xff]  ;;  %v13460_v28 = vld [vmem:[#allocation258_spill] sm:$0xff] }
 0xca1   :  { %3923 = vmatprep.subr.mxu0 %v13412_v30  ;;  %3994 = vmatprep.subr.mxu1 %v13413_v40  ;;  %v13461_v30 = vld [vmem:[#allocation259_spill] sm:$0xff]  ;;  %v13462_v40 = vld [vmem:[#allocation260_spill] sm:$0xff] }
 0xca2   :  { %3924 = vmatpush1.msra.mxu0 %v13414_v0  ;;  %3995 = vmatpush1.msra.mxu1 %v13415_v62  ;;  %v13463_v0 = vld [vmem:[#allocation261_spill] sm:$0xff]  ;;  %v13464_v62 = vld [vmem:[#allocation262_spill] sm:$0xff] }
 0xca3   :  { %3925 = vmatprep.subr.mxu0 %v13416_v57  ;;  %3996 = vmatprep.subr.mxu1 %v13417_v22  ;;  %v13465_v57 = vld [vmem:[#allocation263_spill] sm:$0xff]  ;;  %v13466_v22 = vld [vmem:[#allocation264_spill] sm:$0xff] }
 0xca4   :  { %3926 = vmatpush1.msra.mxu0 %v13418_v29  ;;  %3997 = vmatpush1.msra.mxu1 %v13419_v32  ;;  %v13467_v29 = vld [vmem:[#allocation265_spill] sm:$0xff]  ;;  %v13468_v32 = vld [vmem:[#allocation266_spill] sm:$0xff] }
 0xca5   :  { %3927 = vmatprep.subr.mxu0 %v13420_v12  ;;  %3998 = vmatprep.subr.mxu1 %v13421_v60  ;;  %v13469_v12 = vld [vmem:[#allocation267_spill] sm:$0xff]  ;;  %v13470_v60 = vld [vmem:[#allocation268_spill] sm:$0xff] }
 0xca6   :  { %3928 = vmatpush2.msra.mxu0 %v13422_v24  ;;  %3999 = vmatpush2.msra.mxu1 %v13423_v58  ;;  %v13471_v24 = vld [vmem:[#allocation269_spill] sm:$0xff]  ;;  %v13472_v58 = vld [vmem:[#allocation270_spill] sm:$0xff] }
 0xca7   :  { %3929 = vmatprep.subr.mxu0 %v13424_v53  ;;  %4000 = vmatprep.subr.mxu1 %v13425_v41  ;;  %v13473_v53 = vld [vmem:[#allocation271_spill] sm:$0xff]  ;;  %v13474_v41 = vld [vmem:[#allocation272_spill] sm:$0xff] }
 0xca8   :  { %3930 = vmatpush2.msra.mxu0 %v13426_v54  ;;  %4001 = vmatpush2.msra.mxu1 %v13427_v39  ;;  %v13475_v54 = vld [vmem:[#allocation273_spill] sm:$0xff]  ;;  %v13476_v39 = vld [vmem:[#allocation274_spill] sm:$0xff] }
 0xca9   :  { %3931 = vmatprep.subr.mxu0 %v13428_v52  ;;  %4002 = vmatprep.subr.mxu1 %v13429_v4  ;;  %v13477_v52 = vld [vmem:[#allocation275_spill] sm:$0xff]  ;;  %v13478_v4 = vld [vmem:[#allocation276_spill] sm:$0xff] }
 0xcaa   :  { %3932 = vmatpush2.msra.mxu0 %v13430_v5  ;;  %4003 = vmatpush2.msra.mxu1 %v13431_v3  ;;  %v13479_v5 = vld [vmem:[#allocation277_spill] sm:$0xff] }
 0xcab   :  { %3933 = vmatprep.subr.mxu0 %v13432_v37  ;;  %4004 = vmatprep.subr.mxu1 %v13433_v34  ;;  %v10694_v3 = vld [vmem:[#allocation7 + $0x1e0] sm:$0xff]  ;;  %v10721_v34 = vld [vmem:[#allocation7 + $0x1b0] sm:$0xff] }
 0xcac   :  { %3934 = vmatpush2.msra.mxu0 %v13434_v63  ;;  %4005 = vmatpush2.msra.mxu1 %v13435_v25  ;;  %v10718_v37 = vld [vmem:[#allocation7 + $0x1a0] sm:$0xff]  ;;  %v10724_v63 = vld [vmem:[#allocation7 + $0x188] sm:$0xff]  ;;  %v10727_v25 = vld [vmem:[#allocation7 + $0x198] sm:$0xff] }
 0xcad   :  { %3935 = vmatprep.subr.mxu0 %v13436_v38  ;;  %4006 = vmatprep.subr.mxu1 %v13437_v6  ;;  %v10730_v38 = vld [vmem:[#allocation7 + $0x180] sm:$0xff]  ;;  %v10733_v6 = vld [vmem:[#allocation7 + $0x190] sm:$0xff] }
 0xcae   :  { %3936 = vmatpush2.msra.mxu0 %v13438_v61  ;;  %4007 = vmatpush2.msra.mxu1 %v13439_v31  ;;  %v10736_v61 = vld [vmem:[#allocation7 + $0x168] sm:$0xff]  ;;  %v10739_v31 = vld [vmem:[#allocation7 + $0x178] sm:$0xff] }
 0xcaf   :  { %3937 = vmatprep.subr.mxu0 %v13440_v42  ;;  %4008 = vmatprep.subr.mxu1 %v13441_v43  ;;  %v10742_v42 = vld [vmem:[#allocation7 + $0x160] sm:$0xff]  ;;  %v10745_v43 = vld [vmem:[#allocation7 + $0x170] sm:$0xff] }
 0xcb0   :  { %3938 = vmatpush2.msra.mxu0 %v13442_v44  ;;  %4009 = vmatpush2.msra.mxu1 %v13443_v45  ;;  %v10748_v44 = vld [vmem:[#allocation7 + $0x148] sm:$0xff]  ;;  %v10751_v45 = vld [vmem:[#allocation7 + $0x158] sm:$0xff] }
 0xcb1   :  { %3939 = vmatprep.subr.mxu0 %v13444_v46  ;;  %4010 = vmatprep.subr.mxu1 %v13445_v47  ;;  %v10754_v46 = vld [vmem:[#allocation7 + $0x140] sm:$0xff]  ;;  %v10757_v47 = vld [vmem:[#allocation7 + $0x150] sm:$0xff] }
 0xcb2   :  { %3940 = vmatpush2.msra.mxu0 %v13446_v48  ;;  %4011 = vmatpush2.msra.mxu1 %v13447_v50  ;;  %v10760_v48 = vld [vmem:[#allocation7 + $0x128] sm:$0xff]  ;;  %v10763_v50 = vld [vmem:[#allocation7 + $0x138] sm:$0xff] }
 0xcb3   :  { %3941 = vmatprep.subr.mxu0 %v13448_v51  ;;  %4012 = vmatprep.subr.mxu1 %v13449_v11  ;;  %v10766_v51 = vld [vmem:[#allocation7 + $0x120] sm:$0xff]  ;;  %v10769_v11 = vld [vmem:[#allocation7 + $0x130] sm:$0xff] }
 0xcb4   :  { %3942 = vmatpush2.msra.mxu0 %v13450_v14  ;;  %4013 = vmatpush2.msra.mxu1 %v13451_v15  ;;  %v10772_v14 = vld [vmem:[#allocation7 + $0x108] sm:$0xff]  ;;  %v10775_v15 = vld [vmem:[#allocation7 + $0x118] sm:$0xff] }
 0xcb5   :  { %3943 = vmatprep.subr.mxu0 %v13452_v16  ;;  %4014 = vmatprep.subr.mxu1 %v13453_v17  ;;  %v10778_v16 = vld [vmem:[#allocation7 + $0x100] sm:$0xff]  ;;  %v10781_v17 = vld [vmem:[#allocation7 + $0x110] sm:$0xff] }
 0xcb6   :  { %3944 = vmatpush2.msra.mxu0 %v13454_v18  ;;  %4015 = vmatpush2.msra.mxu1 %v13455_v19  ;;  %v10784_v18 = vld [vmem:[#allocation7 + $0xe8] sm:$0xff]  ;;  %v10787_v19 = vld [vmem:[#allocation7 + $0xf8] sm:$0xff] }
 0xcb7   :  { %3945 = vmatprep.subr.mxu0 %v13456_v20  ;;  %4016 = vmatprep.subr.mxu1 %v13457_v21  ;;  %v10790_v20 = vld [vmem:[#allocation7 + $0xe0] sm:$0xff]  ;;  %v10793_v21 = vld [vmem:[#allocation7 + $0xf0] sm:$0xff] }
 0xcb8   :  { %3946 = vmatpush2.msra.mxu0 %v13458_v26  ;;  %4017 = vmatpush2.msra.mxu1 %v13459_v27  ;;  %v10796_v26 = vld [vmem:[#allocation7 + $0xc8] sm:$0xff]  ;;  %v10799_v27 = vld [vmem:[#allocation7 + $0xd8] sm:$0xff] }
 0xcb9   :  { %3947 = vmatprep.subr.mxu0 %v13460_v28  ;;  %4018 = vmatprep.subr.mxu1 %v13461_v30  ;;  %v10802_v28 = vld [vmem:[#allocation7 + $0xc0] sm:$0xff]  ;;  %v10805_v30 = vld [vmem:[#allocation7 + $0xd0] sm:$0xff] }
 0xcba   :  { %3948 = vmatpush2.msra.mxu0 %v13462_v40  ;;  %4019 = vmatpush2.msra.mxu1 %v13463_v0  ;;  %v10808_v40 = vld [vmem:[#allocation7 + $0xa8] sm:$0xff]  ;;  %v10811_v0 = vld [vmem:[#allocation7 + $0xb8] sm:$0xff] }
 0xcbb   :  { %3949 = vmatprep.subr.mxu0 %v13464_v62  ;;  %4020 = vmatprep.subr.mxu1 %v13465_v57  ;;  %13480 = vst [vmem:[#allocation14_spill] sm:$0xff] %v10808_v40  ;;  %13481 = vst [vmem:[#allocation15_spill] sm:$0xff] %v10811_v0  ;;  %v10814_v62 = vld [vmem:[#allocation7 + $0xa0] sm:$0xff]  ;;  %v10817_v57 = vld [vmem:[#allocation7 + $0xb0] sm:$0xff] }
 0xcbc   :  { %3950 = vmatpush2.msra.mxu0 %v13466_v22  ;;  %4021 = vmatpush2.msra.mxu1 %v13467_v29  ;;  %13482 = vst [vmem:[#allocation16_spill] sm:$0xff] %v10814_v62  ;;  %13483 = vst [vmem:[#allocation17_spill] sm:$0xff] %v10817_v57  ;;  %v10820_v22 = vld [vmem:[#allocation7 + $0x88] sm:$0xff]  ;;  %v10823_v29 = vld [vmem:[#allocation7 + $0x98] sm:$0xff] }
 0xcbd   :  { %3951 = vmatprep.subr.mxu0 %v13468_v32  ;;  %4022 = vmatprep.subr.mxu1 %v13469_v12  ;;  %13484 = vst [vmem:[#allocation18_spill] sm:$0xff] %v10820_v22  ;;  %13485 = vst [vmem:[#allocation19_spill] sm:$0xff] %v10823_v29  ;;  %v10826_v32 = vld [vmem:[#allocation7 + $0x80] sm:$0xff]  ;;  %v10829_v12 = vld [vmem:[#allocation7 + $0x90] sm:$0xff] }
 0xcbe   :  { %3952 = vmatpush2.msra.mxu0 %v13470_v60  ;;  %4023 = vmatpush2.msra.mxu1 %v13471_v24  ;;  %13486 = vst [vmem:[#allocation20_spill] sm:$0xff] %v10826_v32  ;;  %13487 = vst [vmem:[#allocation21_spill] sm:$0xff] %v10829_v12  ;;  %v10832_v60 = vld [vmem:[#allocation7 + $0x68] sm:$0xff]  ;;  %v10835_v24 = vld [vmem:[#allocation7 + $0x78] sm:$0xff] }
 0xcbf   :  { %3953 = vmatprep.subr.mxu0 %v13472_v58  ;;  %4024 = vmatprep.subr.mxu1 %v13473_v53  ;;  %13488 = vst [vmem:[#allocation22_spill] sm:$0xff] %v10832_v60  ;;  %13489 = vst [vmem:[#allocation23_spill] sm:$0xff] %v10835_v24  ;;  %v10838_v58 = vld [vmem:[#allocation7 + $0x60] sm:$0xff]  ;;  %v10841_v53 = vld [vmem:[#allocation7 + $0x70] sm:$0xff] }
 0xcc0   :  { %3954 = vmatpush2.msra.mxu0 %v13474_v41  ;;  %4025 = vmatpush2.msra.mxu1 %v13475_v54  ;;  %13490 = vst [vmem:[#allocation24_spill] sm:$0xff] %v10838_v58  ;;  %13491 = vst [vmem:[#allocation25_spill] sm:$0xff] %v10841_v53  ;;  %v10844_v41 = vld [vmem:[#allocation7 + $0x48] sm:$0xff]  ;;  %v10847_v54 = vld [vmem:[#allocation7 + $0x58] sm:$0xff] }
 0xcc1   :  { %3955 = vmatprep.subr.mxu0 %v13476_v39  ;;  %4026 = vmatprep.subr.mxu1 %v13477_v52  ;;  %13492 = vst [vmem:[#allocation26_spill] sm:$0xff] %v10844_v41  ;;  %13493 = vst [vmem:[#allocation27_spill] sm:$0xff] %v10847_v54  ;;  %v10850_v39 = vld [vmem:[#allocation7 + $0x40] sm:$0xff]  ;;  %v10853_v52 = vld [vmem:[#allocation7 + $0x50] sm:$0xff] }
 0xcc2   :  { %3956 = vmatpush2.msra.mxu0 %v10323_v33  ;;  %4027 = vmatpush2.msra.mxu1 %v13478_v4  ;;  %v10697_v33 = vld [vmem:[#allocation7 + $0x1f0] sm:$0xff]  ;;  %13494 = vst [vmem:[#allocation28_spill] sm:$0xff] %v10850_v39  ;;  %13495 = vst [vmem:[#allocation29_spill] sm:$0xff] %v10853_v52  ;;  %v10856_v4 = vld [vmem:[#allocation7 + $0x28] sm:$0xff] }
 0xcc3   :  { %3957 = vmatprep.subr.mxu0 %v13479_v5  ;;  %4028 = vmatprep.subr.mxu1 %v10332_v59  ;;  %v10700_v59 = vld [vmem:[#allocation7 + $0x1c8] sm:$0xff]  ;;  %13496 = vst [vmem:[#allocation30_spill] sm:$0xff] %v10856_v4  ;;  %v10859_v5 = vld [vmem:[#allocation7 + $0x38] sm:$0xff] }
 0xcc4   :  { %3958 = vmatpush2.msra.mxu0 %v10335_v9  ;;  %4029 = vmatpush2.msra.mxu1 %v10338_v8  ;;  %v10703_v9 = vld [vmem:[#allocation7 + $0x1d8] sm:$0xff]  ;;  %v10706_v8 = vld [vmem:[#allocation7 + $0x1c0] sm:$0xff]  ;;  %13497 = vst [vmem:[#allocation31_spill] sm:$0xff] %v10859_v5 }
 0xcc5   :  { %3960 = vmatmul.mubr.f32.vlgmr.msra.gmra.mxu0 %v10422_v7  ;;  %4031 = vmatmul.mubr.f32.vlgmr.msra.gmra.mxu1 %v10422_v7  ;;  %v10715_v7 = vld [vmem:[#allocation7 + $0x1b8] sm:$0xff] }
 0xcc6   :  { %4100 = vmatprep.subr.mxu0 %v10343_v35  ;;  %4171 = vmatprep.subr.mxu1 %v10346_v13  ;;  %v10709_v13 = vld [vmem:[#allocation7 + $0x1d0] sm:$0xff]  ;;  %v10712_v35 = vld [vmem:[#allocation7 + $0x1a8] sm:$0xff] }
 0xcc7   :  { %4101 = vmatpush1.msra.mxu0 %v10694_v3  ;;  %4172 = vmatpush1.msra.mxu1 %v10697_v33 }
 0xcc8   :  { %4102 = vmatprep.subr.mxu0 %v10700_v59  ;;  %4173 = vmatprep.subr.mxu1 %v10703_v9 }
 0xcc9   :  { %4103 = vmatpush1.msra.mxu0 %v10706_v8  ;;  %4174 = vmatpush1.msra.mxu1 %v10709_v13 }
 0xcca   :  { %4104 = vmatprep.subr.mxu0 %v10712_v35  ;;  %4175 = vmatprep.subr.mxu1 %v10715_v7 }
 0xccb   :  { %4105 = vmatpush1.msra.mxu0 %v10718_v37  ;;  %4176 = vmatpush1.msra.mxu1 %v10721_v34 }
 0xccc   :  { %4106 = vmatprep.subr.mxu0 %v10724_v63  ;;  %4177 = vmatprep.subr.mxu1 %v10727_v25 }
 0xccd   :  { %4107 = vmatpush1.msra.mxu0 %v10730_v38  ;;  %4178 = vmatpush1.msra.mxu1 %v10733_v6 }
 0xcce   :  { %4108 = vmatprep.subr.mxu0 %v10736_v61  ;;  %4179 = vmatprep.subr.mxu1 %v10739_v31 }
 0xccf   :  { %4109 = vmatpush1.msra.mxu0 %v10742_v42  ;;  %4180 = vmatpush1.msra.mxu1 %v10745_v43 }
 0xcd0   :  { %4110 = vmatprep.subr.mxu0 %v10748_v44  ;;  %4181 = vmatprep.subr.mxu1 %v10751_v45 }
 0xcd1   :  { %4111 = vmatpush1.msra.mxu0 %v10754_v46  ;;  %4182 = vmatpush1.msra.mxu1 %v10757_v47 }
 0xcd2   :  { %4112 = vmatprep.subr.mxu0 %v10760_v48  ;;  %4183 = vmatprep.subr.mxu1 %v10763_v50 }
 0xcd3   :  { %4113 = vmatpush1.msra.mxu0 %v10766_v51  ;;  %4184 = vmatpush1.msra.mxu1 %v10769_v11 }
 0xcd4   :  { %4114 = vmatprep.subr.mxu0 %v10772_v14  ;;  %4185 = vmatprep.subr.mxu1 %v10775_v15 }
 0xcd5   :  { %4115 = vmatpush1.msra.mxu0 %v10778_v16  ;;  %4186 = vmatpush1.msra.mxu1 %v10781_v17 }
 0xcd6   :  { %4116 = vmatprep.subr.mxu0 %v10784_v18  ;;  %4187 = vmatprep.subr.mxu1 %v10787_v19 }
 0xcd7   :  { %4117 = vmatpush1.msra.mxu0 %v10790_v20  ;;  %4188 = vmatpush1.msra.mxu1 %v10793_v21 }
 0xcd8   :  { %4118 = vmatprep.subr.mxu0 %v10796_v26  ;;  %4189 = vmatprep.subr.mxu1 %v10799_v27 }
 0xcd9   :  { %4119 = vmatpush1.msra.mxu0 %v10802_v28  ;;  %4190 = vmatpush1.msra.mxu1 %v10805_v30 }
 0xcda   :  { %4120 = vmatprep.subr.mxu0 %v10808_v40  ;;  %4191 = vmatprep.subr.mxu1 %v10811_v0 }
 0xcdb   :  { %4121 = vmatpush1.msra.mxu0 %v10814_v62  ;;  %4192 = vmatpush1.msra.mxu1 %v10817_v57 }
 0xcdc   :  { %4122 = vmatprep.subr.mxu0 %v10820_v22  ;;  %4193 = vmatprep.subr.mxu1 %v10823_v29 }
 0xcdd   :  { %4123 = vmatpush1.msra.mxu0 %v10826_v32  ;;  %4194 = vmatpush1.msra.mxu1 %v10829_v12 }
 0xcde   :  { %4124 = vmatprep.subr.mxu0 %v10832_v60  ;;  %4195 = vmatprep.subr.mxu1 %v10835_v24 }
 0xcdf   :  { %4125 = vmatpush1.msra.mxu0 %v10838_v58  ;;  %4196 = vmatpush1.msra.mxu1 %v10841_v53 }
 0xce0   :  { %4126 = vmatprep.subr.mxu0 %v10844_v41  ;;  %4197 = vmatprep.subr.mxu1 %v10847_v54  ;;  %v10862_v41 = vld [vmem:[#allocation7 + $0x20] sm:$0xff]  ;;  %v10865_v54 = vld [vmem:[#allocation7 + $0x30] sm:$0xff] }
 0xce1   :  { %4127 = vmatpush1.msra.mxu0 %v10850_v39  ;;  %4198 = vmatpush1.msra.mxu1 %v10853_v52  ;;  %13498 = vst [vmem:[#allocation32_spill] sm:$0xff] %v10862_v41  ;;  %13499 = vst [vmem:[#allocation33_spill] sm:$0xff] %v10865_v54  ;;  %v10868_v39 = vld [vmem:[#allocation7 + $0x8] sm:$0xff]  ;;  %v10871_v52 = vld [vmem:[#allocation7 + $0x18] sm:$0xff] }
 0xce2   :  { %4128 = vmatprep.subr.mxu0 %v10856_v4  ;;  %4199 = vmatprep.subr.mxu1 %v10859_v5  ;;  %13500 = vst [vmem:[#allocation34_spill] sm:$0xff] %v10868_v39  ;;  %13501 = vst [vmem:[#allocation35_spill] sm:$0xff] %v10871_v52  ;;  %v10874_v4 = vld [vmem:[#allocation7] sm:$0xff]  ;;  %v10878_v5 = vld [vmem:[#allocation7 + $0x10] sm:$0xff] }
 0xce3   :  { %4129 = vmatpush1.msra.mxu0 %v10862_v41  ;;  %4200 = vmatpush1.msra.mxu1 %v10865_v54  ;;  %13502 = vst [vmem:[#allocation36_spill] sm:$0xff] %v10874_v4  ;;  %13503 = vst [vmem:[#allocation38_spill] sm:$0xff] %v10878_v5  ;;  %v6245_v54 = vld [vmem:[#allocation9 + $0x3c8] sm:$0xff]  ;;  %v6246_v41 = vld [vmem:[#allocation9 + $0x3d8] sm:$0xff] }
 0xce4   :  { %4130 = vmatprep.subr.mxu0 %v10868_v39  ;;  %4201 = vmatprep.subr.mxu1 %v10871_v52 }
 0xce5   :  { %4131 = vmatpush1.msra.mxu0 %v10874_v4  ;;  %4164 = vmatprep.mubr.f32.mxu0 %v13238_v10 }
 0xce6   :  { %4202 = vmatpush1.msra.mxu1 %v10878_v5  ;;  %4235 = vmatprep.mubr.f32.mxu1 %v13238_v10  ;;  %v4038_v5 = vld [vmem:[#allocation2 + $0x6] ss:$8 sm:$0xf] }
 0xce7   :  { %4271 = vmatprep.subr.mxu0 %v6245_v54  ;;  %4342 = vmatprep.subr.mxu1 %v6246_v41 }
 0xd44   :  { %v3819_v39 = vpop.f32.mrf.mxu0  ;;  %v3890_v53 = vpop.f32.mrf.mxu1 }
 0xd46   :  { %v3821_v58 = vpop.f32.mrf.mxu0  ;;  %v3892_v52 = vpop.f32.mrf.mxu1 }
 0xd47   :  { %v4043_v24 = vcombine.low %v3819_v39, %v3821_v58  ;;  %v4044_v60 = vcombine.low %v3890_v53, %v3892_v52 }
 0xd49   :  { %v4051_v4 = vrot.slane %v4043_v24, %v13242_v23  ;;  %v4058_v12 = vrot.slane %v4044_v60, %v13242_v23 }
 0xd4b   :  { %v4059_v32 = vcombine.low %v4051_v4, %v4058_v12  ;;  %v6248_v4 = vld [vmem:[#allocation9 + $0x3d0] sm:$0xff] }
 0xd4d   :  { %v4066_v29 = vrot.slane %v4059_v32, %v13242_v23 }
 0xd4f   :  { %v4068_v22 = vadd.f32 %v4066_v29, %v4038_v5  ;;  %v6249_v5 = vld [vmem:[#allocation9 + $0x388] sm:$0xff] }
 0xd51   :  { %v4949_v10 = vmul.f32 -1.442695, %v4068_v22  ;;  %v4076_v57 = vrot.slane %v4068_v22, 1  ;;  %v4087_v41 = vrot.slane %v4068_v22, 3  ;;  %v4084_v40 = vrot.slane %v4068_v22, 2 }
 0xd53   :  { %5217 = vpow2.f32 %v4949_v10  ;;  %v4950_v54 = vmul.f32 -1.442695, %v4076_v57  ;;  %v4951_v62 = vmul.f32 -1.442695, %v4087_v41  ;;  %v6252_v41 = vld [vmem:[#allocation9 + $0x390] sm:$0xff] }
 0xd55   :  { %5219 = vpow2.f32 %v4950_v54  ;;  %v6251_v54 = vld [vmem:[#allocation9 + $0x380] sm:$0xff] }
 0xd56   :  { %5221 = vpow2.f32 %v4951_v62 }
 0xd60   :  { %v5218_v0 = vpop.eup %5217 }
 0xd61   :  { %v4072_v58 = vadd.f32 1.0, %v5218_v0 }
 0xd62   :  { %v5220_v53 = vpop.eup %5219 }
 0xd63   :  { %5223 = vrcp.f32 %v4072_v58  ;;  %v4081_v24 = vadd.f32 1.0, %v5220_v53  ;;  %v5222_v12 = vpop.eup %5221  ;;  %v6253_v58 = vld [vmem:[#allocation9 + $0x348] sm:$0xff]  ;;  %v6254_v53 = vld [vmem:[#allocation9 + $0x358] sm:$0xff] }
 0xd64   :  { %5225 = vtanh.f32 %v4084_v40  ;;  %v4092_v39 = vadd.f32 1.0, %v5222_v12  ;;  %v6247_v40 = vld [vmem:[#allocation9 + $0x3c0] sm:$0xff]  ;;  %v6256_v12 = vld [vmem:[#allocation9 + $0x350] sm:$0xff] }
 0xd65   :  { %5227 = vrcp.f32 %v4081_v24  ;;  %v6255_v24 = vld [vmem:[#allocation9 + $0x340] sm:$0xff] }
 0xd66   :  { %5229 = vrcp.f32 %v4092_v39  ;;  %v6260_v39 = vld [vmem:[#allocation9 + $0x310] sm:$0xff] }
 0xd70   :  { %v5224_v32 = vpop.eup %5223 }
 0xd71   :  { %v5226_v60 = vpop.eup %5225 }
 0xd72   :  { %v5228_v29 = vpop.eup %5227  ;;  %v4096_v57 = vmul.f32 %v5226_v60, %v5224_v32  ;;  %v6257_v32 = vld [vmem:[#allocation9 + $0x308] sm:$0xff]  ;;  %v6258_v60 = vld [vmem:[#allocation9 + $0x318] sm:$0xff] }
 0xd73   :  { %v4095_v10 = vmul.f32 %v5228_v29, %v10419_v49  ;;  %v5230_v0 = vpop.eup %5229  ;;  %v6250_v49 = vld [vmem:[#allocation9 + $0x398] sm:$0xff]  ;;  %v6259_v29 = vld [vmem:[#allocation9 + $0x300] sm:$0xff] }
 0xd75   :  { %v10886_v52 = vadd.f32 %v4096_v57, %v4095_v10  ;;  %v6261_v10 = vld [vmem:[#allocation9 + $0x2c8] sm:$0xff]  ;;  %v6262_v57 = vld [vmem:[#allocation9 + $0x2d8] sm:$0xff] }
 0xd77   :  { %13504 = vst [vmem:[#allocation39_spill] sm:$0xff] %v10886_v52  ;;  %5231 = vtanh.f32 %v10886_v52 }
 0xd84   :  { %v5232_v22 = vpop.eup %5231 }
 0xd85   :  { %v10889_v62 = vmul.f32 %v5232_v22, %v5230_v0  ;;  %v6263_v0 = vld [vmem:[#allocation9 + $0x2c0] sm:$0xff]  ;;  %v6264_v22 = vld [vmem:[#allocation9 + $0x2d0] sm:$0xff] }
 0xd87   :  { %4165 = vmatmul.mubr.f32.vlgmr.msra.gmra.mxu0 %v10889_v62  ;;  %4236 = vmatmul.mubr.f32.vlgmr.msra.gmra.mxu1 %v10889_v62 }
 0xd88   :  { %4272 = vmatpush1.msra.mxu0 %v6247_v40  ;;  %4343 = vmatpush1.msra.mxu1 %v6248_v4  ;;  %v6265_v40 = vld [vmem:[#allocation9 + $0x288] sm:$0xff]  ;;  %v6266_v4 = vld [vmem:[#allocation9 + $0x298] sm:$0xff] }
 0xd89   :  { %4273 = vmatprep.subr.mxu0 %v6249_v5  ;;  %4344 = vmatprep.subr.mxu1 %v6250_v49  ;;  %v6267_v5 = vld [vmem:[#allocation9 + $0x280] sm:$0xff]  ;;  %v6268_v49 = vld [vmem:[#allocation9 + $0x290] sm:$0xff] }
 0xd8a   :  { %4274 = vmatpush1.msra.mxu0 %v6251_v54  ;;  %4345 = vmatpush1.msra.mxu1 %v6252_v41  ;;  %v6269_v54 = vld [vmem:[#allocation9 + $0x248] sm:$0xff]  ;;  %v6270_v41 = vld [vmem:[#allocation9 + $0x258] sm:$0xff] }
 0xd8b   :  { %4275 = vmatprep.subr.mxu0 %v6253_v58  ;;  %4346 = vmatprep.subr.mxu1 %v6254_v53  ;;  %v6271_v58 = vld [vmem:[#allocation9 + $0x240] sm:$0xff]  ;;  %v6272_v53 = vld [vmem:[#allocation9 + $0x250] sm:$0xff] }
 0xd8c   :  { %4276 = vmatpush1.msra.mxu0 %v6255_v24  ;;  %4347 = vmatpush1.msra.mxu1 %v6256_v12  ;;  %v6273_v24 = vld [vmem:[#allocation9 + $0x208] sm:$0xff]  ;;  %v6274_v12 = vld [vmem:[#allocation9 + $0x218] sm:$0xff] }
 0xd8d   :  { %4277 = vmatprep.subr.mxu0 %v6257_v32  ;;  %4348 = vmatprep.subr.mxu1 %v6258_v60  ;;  %v6275_v32 = vld [vmem:[#allocation9 + $0x200] sm:$0xff]  ;;  %v6276_v60 = vld [vmem:[#allocation9 + $0x210] sm:$0xff] }
 0xd8e   :  { %4278 = vmatpush1.msra.mxu0 %v6259_v29  ;;  %4349 = vmatpush1.msra.mxu1 %v6260_v39  ;;  %v6277_v29 = vld [vmem:[#allocation9 + $0x1c8] sm:$0xff]  ;;  %v6278_v39 = vld [vmem:[#allocation9 + $0x1d8] sm:$0xff] }
 0xd8f   :  { %4279 = vmatprep.subr.mxu0 %v6261_v10  ;;  %4350 = vmatprep.subr.mxu1 %v6262_v57  ;;  %v6279_v10 = vld [vmem:[#allocation9 + $0x1c0] sm:$0xff]  ;;  %v6280_v57 = vld [vmem:[#allocation9 + $0x1d0] sm:$0xff] }
 0xd90   :  { %4280 = vmatpush1.msra.mxu0 %v6263_v0  ;;  %4351 = vmatpush1.msra.mxu1 %v6264_v22  ;;  %v6281_v0 = vld [vmem:[#allocation9 + $0x188] sm:$0xff]  ;;  %v6282_v22 = vld [vmem:[#allocation9 + $0x198] sm:$0xff] }
 0xd91   :  { %4281 = vmatprep.subr.mxu0 %v6265_v40  ;;  %4352 = vmatprep.subr.mxu1 %v6266_v4  ;;  %v6283_v40 = vld [vmem:[#allocation9 + $0x180] sm:$0xff]  ;;  %v6284_v4 = vld [vmem:[#allocation9 + $0x190] sm:$0xff] }
 0xd92   :  { %4282 = vmatpush1.msra.mxu0 %v6267_v5  ;;  %4353 = vmatpush1.msra.mxu1 %v6268_v49  ;;  %v6285_v5 = vld [vmem:[#allocation9 + $0x148] sm:$0xff]  ;;  %v6286_v49 = vld [vmem:[#allocation9 + $0x158] sm:$0xff] }
 0xd93   :  { %4283 = vmatprep.subr.mxu0 %v6269_v54  ;;  %4354 = vmatprep.subr.mxu1 %v6270_v41  ;;  %v6287_v54 = vld [vmem:[#allocation9 + $0x140] sm:$0xff]  ;;  %v6288_v41 = vld [vmem:[#allocation9 + $0x150] sm:$0xff] }
 0xd94   :  { %4284 = vmatpush1.msra.mxu0 %v6271_v58  ;;  %4355 = vmatpush1.msra.mxu1 %v6272_v53  ;;  %v6289_v58 = vld [vmem:[#allocation9 + $0x108] sm:$0xff]  ;;  %v6290_v53 = vld [vmem:[#allocation9 + $0x118] sm:$0xff] }
 0xd95   :  { %4285 = vmatprep.subr.mxu0 %v6273_v24  ;;  %4356 = vmatprep.subr.mxu1 %v6274_v12  ;;  %v6291_v24 = vld [vmem:[#allocation9 + $0x100] sm:$0xff]  ;;  %v6292_v12 = vld [vmem:[#allocation9 + $0x110] sm:$0xff] }
 0xd96   :  { %4286 = vmatpush1.msra.mxu0 %v6275_v32  ;;  %4357 = vmatpush1.msra.mxu1 %v6276_v60  ;;  %v6293_v32 = vld [vmem:[#allocation9 + $0xc8] sm:$0xff]  ;;  %v6294_v60 = vld [vmem:[#allocation9 + $0xd8] sm:$0xff] }
 0xd97   :  { %4287 = vmatprep.subr.mxu0 %v6277_v29  ;;  %4358 = vmatprep.subr.mxu1 %v6278_v39  ;;  %v6295_v29 = vld [vmem:[#allocation9 + $0xc0] sm:$0xff]  ;;  %v6296_v39 = vld [vmem:[#allocation9 + $0xd0] sm:$0xff] }
 0xd98   :  { %4288 = vmatpush1.msra.mxu0 %v6279_v10  ;;  %4359 = vmatpush1.msra.mxu1 %v6280_v57  ;;  %v6297_v10 = vld [vmem:[#allocation9 + $0x88] sm:$0xff]  ;;  %v6298_v57 = vld [vmem:[#allocation9 + $0x98] sm:$0xff] }
 0xd99   :  { %4289 = vmatprep.subr.mxu0 %v6281_v0  ;;  %4360 = vmatprep.subr.mxu1 %v6282_v22  ;;  %v6299_v0 = vld [vmem:[#allocation9 + $0x80] sm:$0xff]  ;;  %v6300_v22 = vld [vmem:[#allocation9 + $0x90] sm:$0xff] }
 0xd9a   :  { %4290 = vmatpush1.msra.mxu0 %v6283_v40  ;;  %4361 = vmatpush1.msra.mxu1 %v6284_v4  ;;  %v6301_v40 = vld [vmem:[#allocation9 + $0x48] sm:$0xff]  ;;  %v6302_v4 = vld [vmem:[#allocation9 + $0x58] sm:$0xff] }
 0xd9b   :  { %4291 = vmatprep.subr.mxu0 %v6285_v5  ;;  %4362 = vmatprep.subr.mxu1 %v6286_v49  ;;  %v6303_v5 = vld [vmem:[#allocation9 + $0x40] sm:$0xff]  ;;  %v6304_v49 = vld [vmem:[#allocation9 + $0x50] sm:$0xff] }
 0xd9c   :  { %4292 = vmatpush1.msra.mxu0 %v6287_v54  ;;  %4363 = vmatpush1.msra.mxu1 %v6288_v41  ;;  %v6305_v54 = vld [vmem:[#allocation9 + $0x8] sm:$0xff]  ;;  %v6306_v41 = vld [vmem:[#allocation9 + $0x18] sm:$0xff] }
 0xd9d   :  { %4293 = vmatprep.subr.mxu0 %v6289_v58  ;;  %4364 = vmatprep.subr.mxu1 %v6290_v53  ;;  %v6307_v58 = vld [vmem:[#allocation9] sm:$0xff]  ;;  %v6308_v53 = vld [vmem:[#allocation9 + $0x10] sm:$0xff] }
 0xd9e   :  { %4294 = vmatpush1.msra.mxu0 %v6291_v24  ;;  %4365 = vmatpush1.msra.mxu1 %v6292_v12  ;;  %v6309_v24 = vld [vmem:[#allocation9 + $0x7c8] sm:$0xff]  ;;  %v6310_v12 = vld [vmem:[#allocation9 + $0x7d8] sm:$0xff] }
 0xd9f   :  { %4295 = vmatprep.subr.mxu0 %v6293_v32  ;;  %4366 = vmatprep.subr.mxu1 %v6294_v60  ;;  %v6311_v32 = vld [vmem:[#allocation9 + $0x7c0] sm:$0xff]  ;;  %v6312_v60 = vld [vmem:[#allocation9 + $0x7d0] sm:$0xff] }
 0xda0   :  { %4296 = vmatpush1.msra.mxu0 %v6295_v29  ;;  %4367 = vmatpush1.msra.mxu1 %v6296_v39  ;;  %v6313_v29 = vld [vmem:[#allocation9 + $0x788] sm:$0xff]  ;;  %v6314_v39 = vld [vmem:[#allocation9 + $0x798] sm:$0xff] }
 0xda1   :  { %4297 = vmatprep.subr.mxu0 %v6297_v10  ;;  %4368 = vmatprep.subr.mxu1 %v6298_v57  ;;  %v6315_v10 = vld [vmem:[#allocation9 + $0x780] sm:$0xff]  ;;  %v6316_v57 = vld [vmem:[#allocation9 + $0x790] sm:$0xff] }
 0xda2   :  { %4298 = vmatpush1.msra.mxu0 %v6299_v0  ;;  %4369 = vmatpush1.msra.mxu1 %v6300_v22  ;;  %v6317_v0 = vld [vmem:[#allocation9 + $0x748] sm:$0xff]  ;;  %v6318_v22 = vld [vmem:[#allocation9 + $0x758] sm:$0xff] }
 0xda3   :  { %4299 = vmatprep.subr.mxu0 %v6301_v40  ;;  %4370 = vmatprep.subr.mxu1 %v6302_v4  ;;  %v6319_v40 = vld [vmem:[#allocation9 + $0x740] sm:$0xff]  ;;  %v6320_v4 = vld [vmem:[#allocation9 + $0x750] sm:$0xff] }
 0xda4   :  { %4300 = vmatpush1.msra.mxu0 %v6303_v5  ;;  %4371 = vmatpush1.msra.mxu1 %v6304_v49  ;;  %v6321_v5 = vld [vmem:[#allocation9 + $0x708] sm:$0xff]  ;;  %v6322_v49 = vld [vmem:[#allocation9 + $0x718] sm:$0xff] }
 0xda5   :  { %4301 = vmatprep.subr.mxu0 %v6305_v54  ;;  %4372 = vmatprep.subr.mxu1 %v6306_v41  ;;  %v6323_v54 = vld [vmem:[#allocation9 + $0x700] sm:$0xff]  ;;  %v6324_v41 = vld [vmem:[#allocation9 + $0x710] sm:$0xff] }
 0xda6   :  { %4302 = vmatpush1.msra.mxu0 %v6307_v58  ;;  %4373 = vmatpush1.msra.mxu1 %v6308_v53  ;;  %v6325_v58 = vld [vmem:[#allocation9 + $0x6c8] sm:$0xff]  ;;  %v6326_v53 = vld [vmem:[#allocation9 + $0x6d8] sm:$0xff] }
 0xda7   :  { %4303 = vmatprep.subr.mxu0 %v6309_v24  ;;  %4374 = vmatprep.subr.mxu1 %v6310_v12  ;;  %v6327_v24 = vld [vmem:[#allocation9 + $0x6c0] sm:$0xff]  ;;  %v6328_v12 = vld [vmem:[#allocation9 + $0x6d0] sm:$0xff] }
 0xda8   :  { %4304 = vmatpush2.msra.mxu0 %v6311_v32  ;;  %4375 = vmatpush2.msra.mxu1 %v6312_v60  ;;  %v6329_v32 = vld [vmem:[#allocation9 + $0x688] sm:$0xff]  ;;  %v6330_v60 = vld [vmem:[#allocation9 + $0x698] sm:$0xff] }
 0xda9   :  { %4305 = vmatprep.subr.mxu0 %v6313_v29  ;;  %4376 = vmatprep.subr.mxu1 %v6314_v39  ;;  %v6331_v29 = vld [vmem:[#allocation9 + $0x680] sm:$0xff]  ;;  %v6332_v39 = vld [vmem:[#allocation9 + $0x690] sm:$0xff] }
 0xdaa   :  { %4306 = vmatpush2.msra.mxu0 %v6315_v10  ;;  %4377 = vmatpush2.msra.mxu1 %v6316_v57  ;;  %v6333_v10 = vld [vmem:[#allocation9 + $0x648] sm:$0xff]  ;;  %v6334_v57 = vld [vmem:[#allocation9 + $0x658] sm:$0xff] }
 0xdab   :  { %4307 = vmatprep.subr.mxu0 %v6317_v0  ;;  %4378 = vmatprep.subr.mxu1 %v6318_v22  ;;  %v6335_v0 = vld [vmem:[#allocation9 + $0x640] sm:$0xff]  ;;  %v6336_v22 = vld [vmem:[#allocation9 + $0x650] sm:$0xff] }
 0xdac   :  { %4308 = vmatpush2.msra.mxu0 %v6319_v40  ;;  %4379 = vmatpush2.msra.mxu1 %v6320_v4  ;;  %v6337_v40 = vld [vmem:[#allocation9 + $0x608] sm:$0xff]  ;;  %v6338_v4 = vld [vmem:[#allocation9 + $0x618] sm:$0xff] }
 0xdad   :  { %4309 = vmatprep.subr.mxu0 %v6321_v5  ;;  %4380 = vmatprep.subr.mxu1 %v6322_v49  ;;  %v6339_v5 = vld [vmem:[#allocation9 + $0x600] sm:$0xff]  ;;  %v6340_v49 = vld [vmem:[#allocation9 + $0x610] sm:$0xff] }
 0xdae   :  { %4310 = vmatpush2.msra.mxu0 %v6323_v54  ;;  %4381 = vmatpush2.msra.mxu1 %v6324_v41  ;;  %v6341_v54 = vld [vmem:[#allocation9 + $0x5c8] sm:$0xff]  ;;  %v6342_v41 = vld [vmem:[#allocation9 + $0x5d8] sm:$0xff] }
 0xdaf   :  { %4311 = vmatprep.subr.mxu0 %v6325_v58  ;;  %4382 = vmatprep.subr.mxu1 %v6326_v53  ;;  %v6343_v58 = vld [vmem:[#allocation9 + $0x5c0] sm:$0xff]  ;;  %v6344_v53 = vld [vmem:[#allocation9 + $0x5d0] sm:$0xff] }
 0xdb0   :  { %4312 = vmatpush2.msra.mxu0 %v6327_v24  ;;  %4383 = vmatpush2.msra.mxu1 %v6328_v12  ;;  %v6345_v24 = vld [vmem:[#allocation9 + $0x588] sm:$0xff]  ;;  %v6346_v12 = vld [vmem:[#allocation9 + $0x598] sm:$0xff] }
 0xdb1   :  { %4313 = vmatprep.subr.mxu0 %v6329_v32  ;;  %4384 = vmatprep.subr.mxu1 %v6330_v60  ;;  %v6347_v32 = vld [vmem:[#allocation9 + $0x580] sm:$0xff]  ;;  %v6348_v60 = vld [vmem:[#allocation9 + $0x590] sm:$0xff] }
 0xdb2   :  { %4314 = vmatpush2.msra.mxu0 %v6331_v29  ;;  %4385 = vmatpush2.msra.mxu1 %v6332_v39  ;;  %v6349_v29 = vld [vmem:[#allocation9 + $0x548] sm:$0xff]  ;;  %v6350_v39 = vld [vmem:[#allocation9 + $0x558] sm:$0xff] }
 0xdb3   :  { %4315 = vmatprep.subr.mxu0 %v6333_v10  ;;  %4386 = vmatprep.subr.mxu1 %v6334_v57  ;;  %v6351_v10 = vld [vmem:[#allocation9 + $0x540] sm:$0xff]  ;;  %v6352_v57 = vld [vmem:[#allocation9 + $0x550] sm:$0xff] }
 0xdb4   :  { %4316 = vmatpush2.msra.mxu0 %v6335_v0  ;;  %4387 = vmatpush2.msra.mxu1 %v6336_v22  ;;  %v6353_v0 = vld [vmem:[#allocation9 + $0x508] sm:$0xff]  ;;  %v6354_v22 = vld [vmem:[#allocation9 + $0x518] sm:$0xff] }
 0xdb5   :  { %4317 = vmatprep.subr.mxu0 %v6337_v40  ;;  %4388 = vmatprep.subr.mxu1 %v6338_v4  ;;  %v6355_v40 = vld [vmem:[#allocation9 + $0x500] sm:$0xff]  ;;  %v6356_v4 = vld [vmem:[#allocation9 + $0x510] sm:$0xff] }
 0xdb6   :  { %4318 = vmatpush2.msra.mxu0 %v6339_v5  ;;  %4389 = vmatpush2.msra.mxu1 %v6340_v49  ;;  %v6357_v5 = vld [vmem:[#allocation9 + $0x4c8] sm:$0xff]  ;;  %v6358_v49 = vld [vmem:[#allocation9 + $0x4d8] sm:$0xff] }
 0xdb7   :  { %4319 = vmatprep.subr.mxu0 %v6341_v54  ;;  %4390 = vmatprep.subr.mxu1 %v6342_v41  ;;  %v6359_v54 = vld [vmem:[#allocation9 + $0x4c0] sm:$0xff]  ;;  %v6360_v41 = vld [vmem:[#allocation9 + $0x4d0] sm:$0xff] }
 0xdb8   :  { %4320 = vmatpush2.msra.mxu0 %v6343_v58  ;;  %4391 = vmatpush2.msra.mxu1 %v6344_v53  ;;  %v6361_v58 = vld [vmem:[#allocation9 + $0x488] sm:$0xff]  ;;  %v6362_v53 = vld [vmem:[#allocation9 + $0x498] sm:$0xff] }
 0xdb9   :  { %4321 = vmatprep.subr.mxu0 %v6345_v24  ;;  %4392 = vmatprep.subr.mxu1 %v6346_v12  ;;  %v6363_v24 = vld [vmem:[#allocation9 + $0x480] sm:$0xff]  ;;  %v6364_v12 = vld [vmem:[#allocation9 + $0x490] sm:$0xff] }
 0xdba   :  { %4322 = vmatpush2.msra.mxu0 %v6347_v32  ;;  %4393 = vmatpush2.msra.mxu1 %v6348_v60  ;;  %v6365_v32 = vld [vmem:[#allocation9 + $0x448] sm:$0xff]  ;;  %v6366_v60 = vld [vmem:[#allocation9 + $0x458] sm:$0xff] }
 0xdbb   :  { %4323 = vmatprep.subr.mxu0 %v6349_v29  ;;  %4394 = vmatprep.subr.mxu1 %v6350_v39  ;;  %v6367_v29 = vld [vmem:[#allocation9 + $0x440] sm:$0xff]  ;;  %v6368_v39 = vld [vmem:[#allocation9 + $0x450] sm:$0xff] }
 0xdbc   :  { %4324 = vmatpush2.msra.mxu0 %v6351_v10  ;;  %4395 = vmatpush2.msra.mxu1 %v6352_v57  ;;  %v6369_v10 = vld [vmem:[#allocation9 + $0x408] sm:$0xff]  ;;  %v6370_v57 = vld [vmem:[#allocation9 + $0x418] sm:$0xff] }
 0xdbd   :  { %4325 = vmatprep.subr.mxu0 %v6353_v0  ;;  %4396 = vmatprep.subr.mxu1 %v6354_v22  ;;  %v6371_v0 = vld [vmem:[#allocation9 + $0x400] sm:$0xff]  ;;  %v6372_v22 = vld [vmem:[#allocation9 + $0x410] sm:$0xff] }
 0xdbe   :  { %4326 = vmatpush2.msra.mxu0 %v6355_v40  ;;  %4397 = vmatpush2.msra.mxu1 %v6356_v4  ;;  %v6373_v40 = vld [vmem:[#allocation9 + $0x3e8] sm:$0xff]  ;;  %v6374_v4 = vld [vmem:[#allocation9 + $0x3f8] sm:$0xff] }
 0xdbf   :  { %4327 = vmatprep.subr.mxu0 %v6357_v5  ;;  %4398 = vmatprep.subr.mxu1 %v6358_v49  ;;  %v3961_v5 = vpop.f32.mrf.mxu0  ;;  %v4032_v49 = vpop.f32.mrf.mxu1 }
 0xdc0   :  { %4328 = vmatpush2.msra.mxu0 %v6359_v54  ;;  %4399 = vmatpush2.msra.mxu1 %v6360_v41 }
 0xdc1   :  { %4329 = vmatprep.subr.mxu0 %v6361_v58  ;;  %4400 = vmatprep.subr.mxu1 %v6362_v53  ;;  %v3963_v54 = vpop.f32.mrf.mxu0  ;;  %v4034_v58 = vpop.f32.mrf.mxu1 }
 0xdc2   :  { %4330 = vmatpush2.msra.mxu0 %v6363_v24  ;;  %4401 = vmatpush2.msra.mxu1 %v6364_v12 }
 0xdc3   :  { %4331 = vmatprep.subr.mxu0 %v6365_v32  ;;  %4402 = vmatprep.subr.mxu1 %v6366_v60 }
 0xdc4   :  { %4332 = vmatpush2.msra.mxu0 %v6367_v29  ;;  %4403 = vmatpush2.msra.mxu1 %v6368_v39 }
 0xdc5   :  { %4333 = vmatprep.subr.mxu0 %v6369_v10  ;;  %4404 = vmatprep.subr.mxu1 %v6370_v57 }
 0xdc6   :  { %4334 = vmatpush2.msra.mxu0 %v6371_v0  ;;  %4405 = vmatpush2.msra.mxu1 %v6372_v22 }
 0xdc7   :  { %4413 = vmatprep.subr.mxu0 %v6373_v40  ;;  %4484 = vmatprep.subr.mxu1 %v6374_v4 }
 0xe47   :  { %v4166_v41 = vpop.f32.mrf.mxu0  ;;  %v4237_v32 = vpop.f32.mrf.mxu1 }
 0xe48   :  { %v4167_v53 = vadd.f32 %v4166_v41, %v3961_v5  ;;  %v4238_v40 = vadd.f32 %v4237_v32, %v4032_v49 }
 0xe49   :  { %v4168_v24 = vpop.f32.mrf.mxu0  ;;  %v4239_v57 = vpop.f32.mrf.mxu1 }
 0xe4a   :  { %v4242_v12 = vadd.f32 %v4167_v53, %v7280_v1  ;;  %v4169_v60 = vadd.f32 %v4168_v24, %v3963_v54  ;;  %v4240_v0 = vadd.f32 %v4239_v57, %v4034_v58  ;;  %v4244_v5 = vadd.f32 %v4238_v40, %v7295_v56  ;;  %v6376_v57 = vld [vmem:[#allocation9 + $0x3f0] sm:$0xff] }
 0xe4b   :  { %v6380_v40 = vld [vmem:[#allocation9 + $0x3b0] sm:$0xff] }
 0xe4c   :  { %v4952_v29 = vmul.f32 -1.442695, %v4242_v12  ;;  %v4243_v39 = vadd.f32 %v4169_v60, %v7284_v2  ;;  %v4245_v22 = vadd.f32 %v4240_v0, %v7290_v55  ;;  %v6378_v0 = vld [vmem:[#allocation9 + $0x3b8] sm:$0xff] }
 0xe4e   :  { %5233 = vpow2.f32 %v4952_v29  ;;  %v4953_v10 = vmul.f32 -1.442695, %v4243_v39  ;;  %v4954_v4 = vmul.f32 -1.442695, %v4245_v22  ;;  %v6379_v22 = vld [vmem:[#allocation9 + $0x3a0] sm:$0xff] }
 0xe50   :  { %5235 = vpow2.f32 %v4953_v10 }
 0xe51   :  { %5237 = vpow2.f32 %v4954_v4  ;;  %v6381_v4 = vld [vmem:[#allocation9 + $0x368] sm:$0xff] }
 0xe5b   :  { %v5234_v52 = vpop.eup %5233 }
 0xe5c   :  { %v4249_v41 = vadd.f32 1.0, %v5234_v52 }
 0xe5d   :  { %v5236_v23 = vpop.eup %5235 }
 0xe5e   :  { %5239 = vrcp.f32 %v4249_v41  ;;  %v4255_v54 = vadd.f32 1.0, %v5236_v23  ;;  %v5238_v53 = vpop.eup %5237  ;;  %v6375_v23 = vld [vmem:[#allocation9 + $0x3e0] sm:$0xff] }
 0xe5f   :  { %5241 = vtanh.f32 %v4244_v5  ;;  %v4262_v29 = vadd.f32 1.0, %v5238_v53  ;;  %v6382_v5 = vld [vmem:[#allocation9 + $0x378] sm:$0xff]  ;;  %v6383_v41 = vld [vmem:[#allocation9 + $0x360] sm:$0xff]  ;;  %v6385_v53 = vld [vmem:[#allocation9 + $0x328] sm:$0xff] }
 0xe60   :  { %5243 = vrcp.f32 %v4255_v54  ;;  %v6384_v54 = vld [vmem:[#allocation9 + $0x370] sm:$0xff] }
 0xe61   :  { %5245 = vrcp.f32 %v4262_v29  ;;  %v6389_v29 = vld [vmem:[#allocation9 + $0x2e8] sm:$0xff] }
 0xe6b   :  { %v5240_v24 = vpop.eup %5239 }
 0xe6c   :  { %v5242_v12 = vpop.eup %5241 }
 0xe6d   :  { %v5244_v60 = vpop.eup %5243  ;;  %v4266_v58 = vmul.f32 %v5242_v12, %v5240_v24  ;;  %v6386_v24 = vld [vmem:[#allocation9 + $0x338] sm:$0xff]  ;;  %v6387_v12 = vld [vmem:[#allocation9 + $0x320] sm:$0xff] }
 0xe6e   :  { %v4265_v39 = vmul.f32 %v5244_v60, %v10559_v36  ;;  %v5246_v52 = vpop.eup %5245  ;;  %v6377_v36 = vld [vmem:[#allocation9 + $0x3a8] sm:$0xff]  ;;  %v6388_v60 = vld [vmem:[#allocation9 + $0x330] sm:$0xff] }
 0xe70   :  { %v10898_v49 = vadd.f32 %v4266_v58, %v4265_v39  ;;  %v6390_v58 = vld [vmem:[#allocation9 + $0x2f8] sm:$0xff]  ;;  %v6391_v39 = vld [vmem:[#allocation9 + $0x2e0] sm:$0xff] }
 0xe72   :  { %5247 = vtanh.f32 %v10898_v49 }
 0xe7f   :  { %v5248_v32 = vpop.eup %5247 }
 0xe80   :  { %v4269_v10 = vmul.f32 %v5248_v32, %v5246_v52  ;;  %v6392_v52 = vld [vmem:[#allocation9 + $0x2f0] sm:$0xff]  ;;  %v6393_v32 = vld [vmem:[#allocation9 + $0x2a8] sm:$0xff] }
 0xe82   :  { %4270 = vst [vmem:[#allocation3 + $0x6] sm:$0x1] %v4269_v10  ;;  %4335 = vmatprep.mubr.f32.mxu0 %v4269_v10  ;;  %4406 = vmatprep.mubr.f32.mxu1 %v4269_v10 }
 0xe83   :  { %4336 = vmatmul.mubr.f32.vlgmr.msra.gmra.mxu0 %v10889_v62  ;;  %4407 = vmatmul.mubr.f32.vlgmr.msra.gmra.mxu1 %v10889_v62 }
 0xe84   :  { %4414 = vmatpush1.msra.mxu0 %v6375_v23  ;;  %4485 = vmatpush1.msra.mxu1 %v6376_v57  ;;  %v6395_v23 = vld [vmem:[#allocation9 + $0x2a0] sm:$0xff]  ;;  %v6396_v57 = vld [vmem:[#allocation9 + $0x2b0] sm:$0xff] }
 0xe85   :  { %4415 = vmatprep.subr.mxu0 %v6377_v36  ;;  %4477 = vmatprep.mubr.f32.mxu0 %v4269_v10  ;;  %v6397_v36 = vld [vmem:[#allocation9 + $0x268] sm:$0xff] }
 0xe86   :  { %4486 = vmatprep.subr.mxu1 %v6378_v0  ;;  %4548 = vmatprep.mubr.f32.mxu1 %v4269_v10  ;;  %v6394_v10 = vld [vmem:[#allocation9 + $0x2b8] sm:$0xff] }
 0xe87   :  { %4416 = vmatpush1.msra.mxu0 %v6379_v22  ;;  %4487 = vmatpush1.msra.mxu1 %v6380_v40  ;;  %v6398_v0 = vld [vmem:[#allocation9 + $0x278] sm:$0xff]  ;;  %v6399_v22 = vld [vmem:[#allocation9 + $0x260] sm:$0xff]  ;;  %v6400_v40 = vld [vmem:[#allocation9 + $0x270] sm:$0xff] }
 0xe88   :  { %4417 = vmatprep.subr.mxu0 %v6381_v4  ;;  %4488 = vmatprep.subr.mxu1 %v6382_v5  ;;  %v6401_v4 = vld [vmem:[#allocation9 + $0x228] sm:$0xff]  ;;  %v6402_v5 = vld [vmem:[#allocation9 + $0x238] sm:$0xff] }
 0xe89   :  { %4418 = vmatpush1.msra.mxu0 %v6383_v41  ;;  %4489 = vmatpush1.msra.mxu1 %v6384_v54  ;;  %v6403_v41 = vld [vmem:[#allocation9 + $0x220] sm:$0xff]  ;;  %v6404_v54 = vld [vmem:[#allocation9 + $0x230] sm:$0xff] }
 0xe8a   :  { %4419 = vmatprep.subr.mxu0 %v6385_v53  ;;  %4490 = vmatprep.subr.mxu1 %v6386_v24  ;;  %v6405_v53 = vld [vmem:[#allocation9 + $0x1e8] sm:$0xff]  ;;  %v6406_v24 = vld [vmem:[#allocation9 + $0x1f8] sm:$0xff] }
 0xe8b   :  { %4420 = vmatpush1.msra.mxu0 %v6387_v12  ;;  %4491 = vmatpush1.msra.mxu1 %v6388_v60  ;;  %v6407_v12 = vld [vmem:[#allocation9 + $0x1e0] sm:$0xff]  ;;  %v6408_v60 = vld [vmem:[#allocation9 + $0x1f0] sm:$0xff] }
 0xe8c   :  { %4421 = vmatprep.subr.mxu0 %v6389_v29  ;;  %4492 = vmatprep.subr.mxu1 %v6390_v58  ;;  %v6409_v29 = vld [vmem:[#allocation9 + $0x1a8] sm:$0xff]  ;;  %v6410_v58 = vld [vmem:[#allocation9 + $0x1b8] sm:$0xff] }
 0xe8d   :  { %4422 = vmatpush1.msra.mxu0 %v6391_v39  ;;  %4493 = vmatpush1.msra.mxu1 %v6392_v52  ;;  %v6411_v39 = vld [vmem:[#allocation9 + $0x1a0] sm:$0xff]  ;;  %v6412_v52 = vld [vmem:[#allocation9 + $0x1b0] sm:$0xff] }
 0xe8e   :  { %4423 = vmatprep.subr.mxu0 %v6393_v32  ;;  %4494 = vmatprep.subr.mxu1 %v6394_v10  ;;  %v6413_v32 = vld [vmem:[#allocation9 + $0x168] sm:$0xff]  ;;  %v6414_v10 = vld [vmem:[#allocation9 + $0x178] sm:$0xff] }
 0xe8f   :  { %4424 = vmatpush1.msra.mxu0 %v6395_v23  ;;  %4495 = vmatpush1.msra.mxu1 %v6396_v57  ;;  %v6415_v23 = vld [vmem:[#allocation9 + $0x160] sm:$0xff]  ;;  %v6416_v57 = vld [vmem:[#allocation9 + $0x170] sm:$0xff] }
 0xe90   :  { %4425 = vmatprep.subr.mxu0 %v6397_v36  ;;  %4496 = vmatprep.subr.mxu1 %v6398_v0  ;;  %v6417_v36 = vld [vmem:[#allocation9 + $0x128] sm:$0xff]  ;;  %v6418_v0 = vld [vmem:[#allocation9 + $0x138] sm:$0xff] }
 0xe91   :  { %4426 = vmatpush1.msra.mxu0 %v6399_v22  ;;  %4497 = vmatpush1.msra.mxu1 %v6400_v40  ;;  %v6419_v22 = vld [vmem:[#allocation9 + $0x120] sm:$0xff]  ;;  %v6420_v40 = vld [vmem:[#allocation9 + $0x130] sm:$0xff] }
 0xe92   :  { %4427 = vmatprep.subr.mxu0 %v6401_v4  ;;  %4498 = vmatprep.subr.mxu1 %v6402_v5  ;;  %v6421_v4 = vld [vmem:[#allocation9 + $0xe8] sm:$0xff]  ;;  %v6422_v5 = vld [vmem:[#allocation9 + $0xf8] sm:$0xff] }
 0xe93   :  { %4428 = vmatpush1.msra.mxu0 %v6403_v41  ;;  %4499 = vmatpush1.msra.mxu1 %v6404_v54  ;;  %v6423_v41 = vld [vmem:[#allocation9 + $0xe0] sm:$0xff]  ;;  %v6424_v54 = vld [vmem:[#allocation9 + $0xf0] sm:$0xff] }
 0xe94   :  { %4429 = vmatprep.subr.mxu0 %v6405_v53  ;;  %4500 = vmatprep.subr.mxu1 %v6406_v24  ;;  %v6425_v53 = vld [vmem:[#allocation9 + $0xa8] sm:$0xff]  ;;  %v6426_v24 = vld [vmem:[#allocation9 + $0xb8] sm:$0xff] }
 0xe95   :  { %4430 = vmatpush1.msra.mxu0 %v6407_v12  ;;  %4501 = vmatpush1.msra.mxu1 %v6408_v60  ;;  %v6427_v12 = vld [vmem:[#allocation9 + $0xa0] sm:$0xff]  ;;  %v6428_v60 = vld [vmem:[#allocation9 + $0xb0] sm:$0xff] }
 0xe96   :  { %4431 = vmatprep.subr.mxu0 %v6409_v29  ;;  %4502 = vmatprep.subr.mxu1 %v6410_v58  ;;  %v6429_v29 = vld [vmem:[#allocation9 + $0x68] sm:$0xff]  ;;  %v6430_v58 = vld [vmem:[#allocation9 + $0x78] sm:$0xff] }
 0xe97   :  { %4432 = vmatpush1.msra.mxu0 %v6411_v39  ;;  %4503 = vmatpush1.msra.mxu1 %v6412_v52  ;;  %v6431_v39 = vld [vmem:[#allocation9 + $0x60] sm:$0xff]  ;;  %v6432_v52 = vld [vmem:[#allocation9 + $0x70] sm:$0xff] }
 0xe98   :  { %4433 = vmatprep.subr.mxu0 %v6413_v32  ;;  %4504 = vmatprep.subr.mxu1 %v6414_v10  ;;  %v6433_v32 = vld [vmem:[#allocation9 + $0x28] sm:$0xff]  ;;  %v6434_v10 = vld [vmem:[#allocation9 + $0x38] sm:$0xff] }
 0xe99   :  { %4434 = vmatpush1.msra.mxu0 %v6415_v23  ;;  %4505 = vmatpush1.msra.mxu1 %v6416_v57  ;;  %v6435_v23 = vld [vmem:[#allocation9 + $0x20] sm:$0xff]  ;;  %v6436_v57 = vld [vmem:[#allocation9 + $0x30] sm:$0xff] }
 0xe9a   :  { %4435 = vmatprep.subr.mxu0 %v6417_v36  ;;  %4506 = vmatprep.subr.mxu1 %v6418_v0  ;;  %v6437_v36 = vld [vmem:[#allocation9 + $0x7e8] sm:$0xff]  ;;  %v6438_v0 = vld [vmem:[#allocation9 + $0x7f8] sm:$0xff] }
 0xe9b   :  { %4436 = vmatpush1.msra.mxu0 %v6419_v22  ;;  %4507 = vmatpush1.msra.mxu1 %v6420_v40  ;;  %v6439_v22 = vld [vmem:[#allocation9 + $0x7e0] sm:$0xff]  ;;  %v6440_v40 = vld [vmem:[#allocation9 + $0x7f0] sm:$0xff] }
 0xe9c   :  { %4437 = vmatprep.subr.mxu0 %v6421_v4  ;;  %4508 = vmatprep.subr.mxu1 %v6422_v5  ;;  %v6441_v4 = vld [vmem:[#allocation9 + $0x7a8] sm:$0xff]  ;;  %v6442_v5 = vld [vmem:[#allocation9 + $0x7b8] sm:$0xff] }
 0xe9d   :  { %4438 = vmatpush1.msra.mxu0 %v6423_v41  ;;  %4509 = vmatpush1.msra.mxu1 %v6424_v54  ;;  %v6443_v41 = vld [vmem:[#allocation9 + $0x7a0] sm:$0xff]  ;;  %v6444_v54 = vld [vmem:[#allocation9 + $0x7b0] sm:$0xff] }
 0xe9e   :  { %4439 = vmatprep.subr.mxu0 %v6425_v53  ;;  %4510 = vmatprep.subr.mxu1 %v6426_v24  ;;  %v6445_v53 = vld [vmem:[#allocation9 + $0x768] sm:$0xff]  ;;  %v6446_v24 = vld [vmem:[#allocation9 + $0x778] sm:$0xff] }
 0xe9f   :  { %4440 = vmatpush1.msra.mxu0 %v6427_v12  ;;  %4511 = vmatpush1.msra.mxu1 %v6428_v60  ;;  %v6447_v12 = vld [vmem:[#allocation9 + $0x760] sm:$0xff]  ;;  %v6448_v60 = vld [vmem:[#allocation9 + $0x770] sm:$0xff] }
 0xea0   :  { %4441 = vmatprep.subr.mxu0 %v6429_v29  ;;  %4512 = vmatprep.subr.mxu1 %v6430_v58  ;;  %v6449_v29 = vld [vmem:[#allocation9 + $0x728] sm:$0xff]  ;;  %v6450_v58 = vld [vmem:[#allocation9 + $0x738] sm:$0xff] }
 0xea1   :  { %4442 = vmatpush1.msra.mxu0 %v6431_v39  ;;  %4513 = vmatpush1.msra.mxu1 %v6432_v52  ;;  %v6451_v39 = vld [vmem:[#allocation9 + $0x720] sm:$0xff]  ;;  %v6452_v52 = vld [vmem:[#allocation9 + $0x730] sm:$0xff] }
 0xea2   :  { %4443 = vmatprep.subr.mxu0 %v6433_v32  ;;  %4514 = vmatprep.subr.mxu1 %v6434_v10  ;;  %v6453_v32 = vld [vmem:[#allocation9 + $0x6e8] sm:$0xff]  ;;  %v6454_v10 = vld [vmem:[#allocation9 + $0x6f8] sm:$0xff] }
 0xea3   :  { %4444 = vmatpush1.msra.mxu0 %v6435_v23  ;;  %4515 = vmatpush1.msra.mxu1 %v6436_v57  ;;  %v6455_v23 = vld [vmem:[#allocation9 + $0x6e0] sm:$0xff]  ;;  %v6456_v57 = vld [vmem:[#allocation9 + $0x6f0] sm:$0xff] }
 0xea4   :  { %4445 = vmatprep.subr.mxu0 %v6437_v36  ;;  %4516 = vmatprep.subr.mxu1 %v6438_v0  ;;  %v6457_v36 = vld [vmem:[#allocation9 + $0x6a8] sm:$0xff]  ;;  %v6458_v0 = vld [vmem:[#allocation9 + $0x6b8] sm:$0xff] }
 0xea5   :  { %4446 = vmatpush2.msra.mxu0 %v6439_v22  ;;  %4517 = vmatpush2.msra.mxu1 %v6440_v40  ;;  %v6459_v22 = vld [vmem:[#allocation9 + $0x6a0] sm:$0xff]  ;;  %v6460_v40 = vld [vmem:[#allocation9 + $0x6b0] sm:$0xff] }
 0xea6   :  { %4447 = vmatprep.subr.mxu0 %v6441_v4  ;;  %4518 = vmatprep.subr.mxu1 %v6442_v5  ;;  %v6461_v4 = vld [vmem:[#allocation9 + $0x668] sm:$0xff]  ;;  %v6462_v5 = vld [vmem:[#allocation9 + $0x678] sm:$0xff] }
 0xea7   :  { %4448 = vmatpush2.msra.mxu0 %v6443_v41  ;;  %4519 = vmatpush2.msra.mxu1 %v6444_v54  ;;  %v6463_v41 = vld [vmem:[#allocation9 + $0x660] sm:$0xff]  ;;  %v6464_v54 = vld [vmem:[#allocation9 + $0x670] sm:$0xff] }
 0xea8   :  { %4449 = vmatprep.subr.mxu0 %v6445_v53  ;;  %4520 = vmatprep.subr.mxu1 %v6446_v24  ;;  %v6465_v53 = vld [vmem:[#allocation9 + $0x628] sm:$0xff]  ;;  %v6466_v24 = vld [vmem:[#allocation9 + $0x638] sm:$0xff] }
 0xea9   :  { %4450 = vmatpush2.msra.mxu0 %v6447_v12  ;;  %4521 = vmatpush2.msra.mxu1 %v6448_v60  ;;  %v6467_v12 = vld [vmem:[#allocation9 + $0x620] sm:$0xff]  ;;  %v6468_v60 = vld [vmem:[#allocation9 + $0x630] sm:$0xff] }
 0xeaa   :  { %4451 = vmatprep.subr.mxu0 %v6449_v29  ;;  %4522 = vmatprep.subr.mxu1 %v6450_v58  ;;  %v6469_v29 = vld [vmem:[#allocation9 + $0x5e8] sm:$0xff]  ;;  %v6470_v58 = vld [vmem:[#allocation9 + $0x5f8] sm:$0xff] }
 0xeab   :  { %4452 = vmatpush2.msra.mxu0 %v6451_v39  ;;  %4523 = vmatpush2.msra.mxu1 %v6452_v52  ;;  %v6471_v39 = vld [vmem:[#allocation9 + $0x5e0] sm:$0xff]  ;;  %v6472_v52 = vld [vmem:[#allocation9 + $0x5f0] sm:$0xff] }
 0xeac   :  { %4453 = vmatprep.subr.mxu0 %v6453_v32  ;;  %4524 = vmatprep.subr.mxu1 %v6454_v10  ;;  %v6473_v32 = vld [vmem:[#allocation9 + $0x5a8] sm:$0xff]  ;;  %v6474_v10 = vld [vmem:[#allocation9 + $0x5b8] sm:$0xff] }
 0xead   :  { %4454 = vmatpush2.msra.mxu0 %v6455_v23  ;;  %4525 = vmatpush2.msra.mxu1 %v6456_v57  ;;  %v6475_v23 = vld [vmem:[#allocation9 + $0x5a0] sm:$0xff]  ;;  %v6476_v57 = vld [vmem:[#allocation9 + $0x5b0] sm:$0xff] }
 0xeae   :  { %4455 = vmatprep.subr.mxu0 %v6457_v36  ;;  %4526 = vmatprep.subr.mxu1 %v6458_v0  ;;  %v6477_v36 = vld [vmem:[#allocation9 + $0x568] sm:$0xff]  ;;  %v6478_v0 = vld [vmem:[#allocation9 + $0x578] sm:$0xff] }
 0xeaf   :  { %4456 = vmatpush2.msra.mxu0 %v6459_v22  ;;  %4527 = vmatpush2.msra.mxu1 %v6460_v40  ;;  %v6479_v22 = vld [vmem:[#allocation9 + $0x560] sm:$0xff]  ;;  %v6480_v40 = vld [vmem:[#allocation9 + $0x570] sm:$0xff] }
 0xeb0   :  { %4457 = vmatprep.subr.mxu0 %v6461_v4  ;;  %4528 = vmatprep.subr.mxu1 %v6462_v5  ;;  %v6481_v4 = vld [vmem:[#allocation9 + $0x528] sm:$0xff]  ;;  %v6482_v5 = vld [vmem:[#allocation9 + $0x538] sm:$0xff] }
 0xeb1   :  { %4458 = vmatpush2.msra.mxu0 %v6463_v41  ;;  %4529 = vmatpush2.msra.mxu1 %v6464_v54  ;;  %v6483_v41 = vld [vmem:[#allocation9 + $0x520] sm:$0xff]  ;;  %v6484_v54 = vld [vmem:[#allocation9 + $0x530] sm:$0xff] }
 0xeb2   :  { %4459 = vmatprep.subr.mxu0 %v6465_v53  ;;  %4530 = vmatprep.subr.mxu1 %v6466_v24  ;;  %v6485_v53 = vld [vmem:[#allocation9 + $0x4e8] sm:$0xff]  ;;  %v6486_v24 = vld [vmem:[#allocation9 + $0x4f8] sm:$0xff] }
 0xeb3   :  { %4460 = vmatpush2.msra.mxu0 %v6467_v12  ;;  %4531 = vmatpush2.msra.mxu1 %v6468_v60  ;;  %v6487_v12 = vld [vmem:[#allocation9 + $0x4e0] sm:$0xff]  ;;  %v6488_v60 = vld [vmem:[#allocation9 + $0x4f0] sm:$0xff] }
 0xeb4   :  { %4461 = vmatprep.subr.mxu0 %v6469_v29  ;;  %4532 = vmatprep.subr.mxu1 %v6470_v58  ;;  %v6489_v29 = vld [vmem:[#allocation9 + $0x4a8] sm:$0xff]  ;;  %v6490_v58 = vld [vmem:[#allocation9 + $0x4b8] sm:$0xff] }
 0xeb5   :  { %4462 = vmatpush2.msra.mxu0 %v6471_v39  ;;  %4533 = vmatpush2.msra.mxu1 %v6472_v52  ;;  %v6491_v39 = vld [vmem:[#allocation9 + $0x4a0] sm:$0xff]  ;;  %v6492_v52 = vld [vmem:[#allocation9 + $0x4b0] sm:$0xff] }
 0xeb6   :  { %4463 = vmatprep.subr.mxu0 %v6473_v32  ;;  %4534 = vmatprep.subr.mxu1 %v6474_v10  ;;  %v6493_v32 = vld [vmem:[#allocation9 + $0x468] sm:$0xff]  ;;  %v6494_v10 = vld [vmem:[#allocation9 + $0x478] sm:$0xff] }
 0xeb7   :  { %4464 = vmatpush2.msra.mxu0 %v6475_v23  ;;  %4535 = vmatpush2.msra.mxu1 %v6476_v57  ;;  %v6495_v23 = vld [vmem:[#allocation9 + $0x460] sm:$0xff]  ;;  %v6496_v57 = vld [vmem:[#allocation9 + $0x470] sm:$0xff] }
 0xeb8   :  { %4465 = vmatprep.subr.mxu0 %v6477_v36  ;;  %4536 = vmatprep.subr.mxu1 %v6478_v0  ;;  %v6497_v36 = vld [vmem:[#allocation9 + $0x428] sm:$0xff]  ;;  %v6498_v0 = vld [vmem:[#allocation9 + $0x438] sm:$0xff] }
 0xeb9   :  { %4466 = vmatpush2.msra.mxu0 %v6479_v22  ;;  %4537 = vmatpush2.msra.mxu1 %v6480_v40  ;;  %v6499_v22 = vld [vmem:[#allocation9 + $0x420] sm:$0xff]  ;;  %v6500_v40 = vld [vmem:[#allocation9 + $0x430] sm:$0xff] }
 0xeba   :  { %4467 = vmatprep.subr.mxu0 %v6481_v4  ;;  %4538 = vmatprep.subr.mxu1 %v6482_v5  ;;  %v6501_v4 = vld [vmem:[#allocation7 + $0x1e8] sm:$0xff]  ;;  %v6502_v5 = vld [vmem:[#allocation7 + $0x1f8] sm:$0xff] }
 0xebb   :  { %4468 = vmatpush2.msra.mxu0 %v6483_v41  ;;  %4539 = vmatpush2.msra.mxu1 %v6484_v54 }
 0xebc   :  { %4469 = vmatprep.subr.mxu0 %v6485_v53  ;;  %4540 = vmatprep.subr.mxu1 %v6486_v24 }
 0xebd   :  { %4470 = vmatpush2.msra.mxu0 %v6487_v12  ;;  %4541 = vmatpush2.msra.mxu1 %v6488_v60 }
 0xebe   :  { %4471 = vmatprep.subr.mxu0 %v6489_v29  ;;  %4542 = vmatprep.subr.mxu1 %v6490_v58 }
 0xebf   :  { %4472 = vmatpush2.msra.mxu0 %v6491_v39  ;;  %4543 = vmatpush2.msra.mxu1 %v6492_v52 }
 0xec0   :  { %4473 = vmatprep.subr.mxu0 %v6493_v32  ;;  %4544 = vmatprep.subr.mxu1 %v6494_v10 }
 0xec1   :  { %4474 = vmatpush2.msra.mxu0 %v6495_v23  ;;  %4545 = vmatpush2.msra.mxu1 %v6496_v57 }
 0xec2   :  { %4475 = vmatprep.subr.mxu0 %v6497_v36  ;;  %4546 = vmatprep.subr.mxu1 %v6498_v0  ;;  %v13531_v36 = vld [vmem:[#allocation39_spill] sm:$0xff] }
 0xec3   :  { %4476 = vmatpush2.msra.mxu0 %v6499_v22  ;;  %4547 = vmatpush2.msra.mxu1 %v6500_v40 }
 0xec4   :  { %4478 = vmatmul.mubr.f32.vlgmr.msra.gmra.mxu0 %v10889_v62  ;;  %4549 = vmatmul.mubr.f32.vlgmr.msra.gmra.mxu1 %v10889_v62 }
 0xec5   :  { %4618 = vmatprep.subr.mxu0 %v6501_v4  ;;  %4689 = vmatprep.subr.mxu1 %v6502_v5 }
 0xec6   :  { %4619 = vmatpush1.msra.mxu0 %v10694_v3  ;;  %4690 = vmatpush1.msra.mxu1 %v10697_v33  ;;  %v13505_v3 = vld [vmem:[#allocation14_spill] sm:$0xff]  ;;  %v13506_v33 = vld [vmem:[#allocation15_spill] sm:$0xff] }
 0xec7   :  { %4620 = vmatprep.subr.mxu0 %v10700_v59  ;;  %4691 = vmatprep.subr.mxu1 %v10703_v9  ;;  %v13507_v59 = vld [vmem:[#allocation16_spill] sm:$0xff]  ;;  %v13508_v9 = vld [vmem:[#allocation17_spill] sm:$0xff] }
 0xec8   :  { %4621 = vmatpush1.msra.mxu0 %v10706_v8  ;;  %4692 = vmatpush1.msra.mxu1 %v10709_v13  ;;  %v13509_v8 = vld [vmem:[#allocation18_spill] sm:$0xff]  ;;  %v13510_v13 = vld [vmem:[#allocation19_spill] sm:$0xff] }
 0xec9   :  { %4622 = vmatprep.subr.mxu0 %v10712_v35  ;;  %4693 = vmatprep.subr.mxu1 %v10715_v7  ;;  %v13511_v35 = vld [vmem:[#allocation20_spill] sm:$0xff]  ;;  %v13512_v7 = vld [vmem:[#allocation21_spill] sm:$0xff] }
 0xeca   :  { %4623 = vmatpush1.msra.mxu0 %v10718_v37  ;;  %4694 = vmatpush1.msra.mxu1 %v10721_v34  ;;  %v13513_v37 = vld [vmem:[#allocation22_spill] sm:$0xff]  ;;  %v13514_v34 = vld [vmem:[#allocation23_spill] sm:$0xff] }
 0xecb   :  { %4624 = vmatprep.subr.mxu0 %v10724_v63  ;;  %4695 = vmatprep.subr.mxu1 %v10727_v25  ;;  %v13515_v63 = vld [vmem:[#allocation24_spill] sm:$0xff]  ;;  %v13516_v25 = vld [vmem:[#allocation25_spill] sm:$0xff] }
 0xecc   :  { %4625 = vmatpush1.msra.mxu0 %v10730_v38  ;;  %4696 = vmatpush1.msra.mxu1 %v10733_v6  ;;  %v13517_v38 = vld [vmem:[#allocation26_spill] sm:$0xff]  ;;  %v13518_v6 = vld [vmem:[#allocation27_spill] sm:$0xff] }
 0xecd   :  { %4626 = vmatprep.subr.mxu0 %v10736_v61  ;;  %4697 = vmatprep.subr.mxu1 %v10739_v31  ;;  %v13519_v61 = vld [vmem:[#allocation28_spill] sm:$0xff]  ;;  %v13520_v31 = vld [vmem:[#allocation29_spill] sm:$0xff] }
 0xece   :  { %4627 = vmatpush1.msra.mxu0 %v10742_v42  ;;  %4698 = vmatpush1.msra.mxu1 %v10745_v43  ;;  %v13521_v42 = vld [vmem:[#allocation30_spill] sm:$0xff]  ;;  %v13522_v43 = vld [vmem:[#allocation31_spill] sm:$0xff] }
 0xecf   :  { %4628 = vmatprep.subr.mxu0 %v10748_v44  ;;  %4699 = vmatprep.subr.mxu1 %v10751_v45  ;;  %v13523_v44 = vld [vmem:[#allocation32_spill] sm:$0xff]  ;;  %v13524_v45 = vld [vmem:[#allocation33_spill] sm:$0xff] }
 0xed0   :  { %4629 = vmatpush1.msra.mxu0 %v10754_v46  ;;  %4700 = vmatpush1.msra.mxu1 %v10757_v47  ;;  %v13525_v46 = vld [vmem:[#allocation34_spill] sm:$0xff]  ;;  %v13526_v47 = vld [vmem:[#allocation35_spill] sm:$0xff] }
 0xed1   :  { %4630 = vmatprep.subr.mxu0 %v10760_v48  ;;  %4701 = vmatprep.subr.mxu1 %v10763_v50  ;;  %v13527_v48 = vld [vmem:[#allocation36_spill] sm:$0xff]  ;;  %v13528_v50 = vmov 0.0  }
 0xed2   :  { %4631 = vmatpush1.msra.mxu0 %v10766_v51  ;;  %4702 = vmatpush1.msra.mxu1 %v10769_v11  ;;  %v13529_v51 = vld [vmem:[#allocation38_spill] sm:$0xff] }
 0xed3   :  { %4632 = vmatprep.subr.mxu0 %v10772_v14  ;;  %4703 = vmatprep.subr.mxu1 %v10775_v15 }
 0xed4   :  { %4633 = vmatpush1.msra.mxu0 %v10778_v16  ;;  %4704 = vmatpush1.msra.mxu1 %v10781_v17 }
 0xed5   :  { %4634 = vmatprep.subr.mxu0 %v10784_v18  ;;  %4705 = vmatprep.subr.mxu1 %v10787_v19  ;;  %v13530_v19 = vld [vmem:[#allocation37_spill] sm:$0xff] }
 0xed6   :  { %4635 = vmatpush1.msra.mxu0 %v10790_v20  ;;  %4706 = vmatpush1.msra.mxu1 %v10793_v21 }
 0xed7   :  { %4636 = vmatprep.subr.mxu0 %v10796_v26  ;;  %4707 = vmatprep.subr.mxu1 %v10799_v27 }
 0xed8   :  { %4637 = vmatpush1.msra.mxu0 %v10802_v28  ;;  %4708 = vmatpush1.msra.mxu1 %v10805_v30  ;;  %v4556_v28 = vld [vmem:[#allocation2 + $0x7] ss:$8 sm:$0xf] }
 0xed9   :  { %4638 = vmatprep.subr.mxu0 %v13505_v3  ;;  %4709 = vmatprep.subr.mxu1 %v13506_v33  ;;  %v4805_v33 = vld [vmem:[%s11058_s6 + $0x78] sm:$0xff] }
 0xeda   :  { %4639 = vmatpush1.msra.mxu0 %v13507_v59  ;;  %4710 = vmatpush1.msra.mxu1 %v13508_v9  ;;  %v4804_v59 = vld [vmem:[%s11058_s6 + $0x70] sm:$0xff]  ;;  %v4803_v9 = vld [vmem:[%s11058_s6 + $0x68] sm:$0xff] }
 0xedb   :  { %4640 = vmatprep.subr.mxu0 %v13509_v8  ;;  %4711 = vmatprep.subr.mxu1 %v13510_v13  ;;  %v4802_v8 = vld [vmem:[%s11058_s6 + $0x60] sm:$0xff]  ;;  %v4801_v13 = vld [vmem:[%s11058_s6 + $0x58] sm:$0xff] }
 0xedc   :  { %4641 = vmatpush1.msra.mxu0 %v13511_v35  ;;  %4712 = vmatpush1.msra.mxu1 %v13512_v7  ;;  %v4800_v35 = vld [vmem:[%s11058_s6 + $0x50] sm:$0xff]  ;;  %v4799_v7 = vld [vmem:[%s11058_s6 + $0x48] sm:$0xff] }
 0xedd   :  { %4642 = vmatprep.subr.mxu0 %v13513_v37  ;;  %4713 = vmatprep.subr.mxu1 %v13514_v34  ;;  %v4798_v37 = vld [vmem:[%s11058_s6 + $0x40] sm:$0xff]  ;;  %v4797_v34 = vld [vmem:[%s11058_s6 + $0x38] sm:$0xff] }
 0xede   :  { %4643 = vmatpush1.msra.mxu0 %v13515_v63  ;;  %4714 = vmatpush1.msra.mxu1 %v13516_v25  ;;  %v4796_v63 = vld [vmem:[%s11058_s6 + $0x30] sm:$0xff]  ;;  %v4795_v25 = vld [vmem:[%s11058_s6 + $0x28] sm:$0xff] }
 0xedf   :  { %4644 = vmatprep.subr.mxu0 %v13517_v38  ;;  %4715 = vmatprep.subr.mxu1 %v13518_v6  ;;  %v4794_v38 = vld [vmem:[%s11058_s6 + $0x20] sm:$0xff]  ;;  %v4793_v6 = vld [vmem:[%s11058_s6 + $0x18] sm:$0xff] }
 0xee0   :  { %4645 = vmatpush1.msra.mxu0 %v13519_v61  ;;  %4716 = vmatpush1.msra.mxu1 %v13520_v31  ;;  %v4792_v61 = vld [vmem:[%s11058_s6 + $0x10] sm:$0xff]  ;;  %v4791_v31 = vld [vmem:[%s11058_s6 + $0x8] sm:$0xff] }
 0xee1   :  { %4646 = vmatprep.subr.mxu0 %v13521_v42  ;;  %4717 = vmatprep.subr.mxu1 %v13522_v43  ;;  %v4790_v42 = vld [vmem:[%s11058_s6] sm:$0xff] }
 0xee2   :  { %4647 = vmatpush1.msra.mxu0 %v13523_v44  ;;  %4718 = vmatpush1.msra.mxu1 %v13524_v45 }
 0xee3   :  { %4648 = vmatprep.subr.mxu0 %v13525_v46  ;;  %4719 = vmatprep.subr.mxu1 %v13526_v47 }
 0xee4   :  { %4649 = vmatpush1.msra.mxu0 %v13527_v48  ;;  %4682 = vmatprep.mubr.f32.mxu0 %v13528_v50 }
 0xee5   :  { %4720 = vmatpush1.msra.mxu1 %v13529_v51  ;;  %4753 = vmatprep.mubr.f32.mxu1 %v13528_v50 }
 0xee6   :  { %4979 = vmatprep.subr.mxu0 %v13528_v50 }
 0xf43   :  { %v4337_v11 = vpop.f32.mrf.mxu0  ;;  %v4408_v14 = vpop.f32.mrf.mxu1 }
 0xf45   :  { %v4339_v15 = vpop.f32.mrf.mxu0  ;;  %v4410_v16 = vpop.f32.mrf.mxu1 }
 0xf46   :  { %v4561_v17 = vcombine.low %v4337_v11, %v4339_v15  ;;  %v4562_v18 = vcombine.low %v4408_v14, %v4410_v16 }
 0xf48   :  { %v4569_v20 = vrot.slane %v4561_v17, %v13530_v19  ;;  %v4576_v21 = vrot.slane %v4562_v18, %v13530_v19 }
 0xf4a   :  { %v4577_v26 = vcombine.low %v4569_v20, %v4576_v21 }
 0xf4c   :  { %v4584_v27 = vrot.slane %v4577_v26, %v13530_v19 }
 0xf4e   :  { %v4586_v30 = vadd.f32 %v4584_v27, %v4556_v28 }
 0xf50   :  { %v4955_v62 = vmul.f32 -1.442695, %v4586_v30  ;;  %v4594_v41 = vrot.slane %v4586_v30, 1  ;;  %v4605_v53 = vrot.slane %v4586_v30, 3  ;;  %v4602_v60 = vrot.slane %v4586_v30, 2 }
 0xf52   :  { %5249 = vpow2.f32 %v4955_v62  ;;  %v4956_v54 = vmul.f32 -1.442695, %v4594_v41  ;;  %v4957_v24 = vmul.f32 -1.442695, %v4605_v53 }
 0xf54   :  { %5251 = vpow2.f32 %v4956_v54 }
 0xf55   :  { %5253 = vpow2.f32 %v4957_v24 }
 0xf5f   :  { %v5250_v12 = vpop.eup %5249 }
 0xf60   :  { %v4590_v29 = vadd.f32 1.0, %v5250_v12 }
 0xf61   :  { %v5252_v58 = vpop.eup %5251 }
 0xf62   :  { %5255 = vrcp.f32 %v4590_v29  ;;  %v4599_v39 = vadd.f32 1.0, %v5252_v58  ;;  %v5254_v52 = vpop.eup %5253 }
 0xf63   :  { %5257 = vtanh.f32 %v4602_v60  ;;  %v4610_v57 = vadd.f32 1.0, %v5254_v52  ;;  %v4961_v52 = vld [vmem:[%s11059_s7] ss:$0 sm:$0xff]  ;;  %s4903_s7 = sshll.u32 %s6599_s29, 4  ;;  %s4904_s7 = int_to_ptr.vmem [resolvable:$true] %s4903_s7 }
 0xf64   :  { %5259 = vrcp.f32 %v4599_v39  ;;  %s6563_s30 = scalar_lea.vmem %s4904_s7, 128  ;;  %p6568_p2 = scmp.lt.s32.totalorder %s4904_s7, %s4904_s7 }
 0xf65   :  { %5261 = vrcp.f32 %v4610_v57  ;;  %p6564_p1 = scmp.ne.s32.totalorder %s4904_s7, %s6563_s30  ;;  %p6569_p3 = scmp.lt.s32.totalorder %s6563_s30, %s6563_s30 }
 0xf67   :  { %p6570_p4 = por %p6569_p3, %p6568_p2 }
 0xf69   :  { %p6571_p5 = pnand %p6570_p4, %p6564_p1 }
 0xf6f   :  { %v5256_v32 = vpop.eup %5255 }
 0xf70   :  { %v5258_v10 = vpop.eup %5257 }
 0xf71   :  { %v5260_v23 = vpop.eup %5259  ;;  %v4614_v22 = vmul.f32 %v5258_v10, %v5256_v32 }
 0xf72   :  { %v4613_v0 = vmul.f32 %v5260_v23, %v13531_v36  ;;  %v5262_v4 = vpop.eup %5261 }
 0xf74   :  { %v4615_v40 = vadd.f32 %v4614_v22, %v4613_v0 }
 0xf76   :  { %5263 = vtanh.f32 %v4615_v40 }
 0xf83   :  { %v5264_v5 = vpop.eup %5263 }
 0xf84   :  { %v4617_v3 = vmul.f32 %v5264_v5, %v5262_v4  ;;  %v4479_v43 = vpop.f32.mrf.mxu0  ;;  %v4550_v44 = vpop.f32.mrf.mxu1 }
 0xf86   :  { %4683 = vmatmul.mubr.f32.vlgmr.msra.gmra.mxu0 %v4617_v3  ;;  %4754 = vmatmul.mubr.f32.vlgmr.msra.gmra.mxu1 %v4617_v3  ;;  %v4481_v45 = vpop.f32.mrf.mxu0  ;;  %v4552_v47 = vpop.f32.mrf.mxu1 }
 0xf87   :  { %4980 = vmatpush3.msra.mxu0 %v4805_v33  ;;  %5011 = vmatprep.mubr.msk.f32.mxu0 %vm6598_vm0, %v13528_v50 }
 0xf88   :  { %4981 = vmatprep.subr.mxu0 %v13528_v50 }
 0xf89   :  { %4982 = vmatpush3.msra.mxu0 %v4804_v59 }
 0xf8a   :  { %4983 = vmatprep.subr.mxu0 %v13528_v50 }
 0xf8b   :  { %4984 = vmatpush3.msra.mxu0 %v4803_v9 }
 0xf8c   :  { %4985 = vmatprep.subr.mxu0 %v13528_v50 }
 0xf8d   :  { %4986 = vmatpush3.msra.mxu0 %v4802_v8 }
 0xf8e   :  { %4987 = vmatprep.subr.mxu0 %v13528_v50 }
 0xf8f   :  { %4988 = vmatpush3.msra.mxu0 %v4801_v13 }
 0xf90   :  { %4989 = vmatprep.subr.mxu0 %v13528_v50 }
 0xf91   :  { %4990 = vmatpush3.msra.mxu0 %v4800_v35 }
 0xf92   :  { %4991 = vmatprep.subr.mxu0 %v13528_v50 }
 0xf93   :  { %4992 = vmatpush3.msra.mxu0 %v4799_v7 }
 0xf94   :  { %4993 = vmatprep.subr.mxu0 %v13528_v50 }
 0xf95   :  { %4994 = vmatpush3.msra.mxu0 %v4798_v37 }
 0xf96   :  { %4995 = vmatprep.subr.mxu0 %v13528_v50 }
 0xf97   :  { %4996 = vmatpush3.msra.mxu0 %v4797_v34 }
 0xf98   :  { %4997 = vmatprep.subr.mxu0 %v13528_v50 }
 0xf99   :  { %4998 = vmatpush3.msra.mxu0 %v4796_v63 }
 0xf9a   :  { %4999 = vmatprep.subr.mxu0 %v13528_v50 }
 0xf9b   :  { %5000 = vmatpush3.msra.mxu0 %v4795_v25 }
 0xf9c   :  { %5001 = vmatprep.subr.mxu0 %v13528_v50 }
 0xf9d   :  { %5002 = vmatpush3.msra.mxu0 %v4794_v38 }
 0xf9e   :  { %5003 = vmatprep.subr.mxu0 %v13528_v50 }
 0xf9f   :  { %5004 = vmatpush3.msra.mxu0 %v4793_v6 }
 0xfa0   :  { %5005 = vmatprep.subr.mxu0 %v13528_v50 }
 0xfa1   :  { %5006 = vmatpush3.msra.mxu0 %v4792_v61 }
 0xfa2   :  { %5007 = vmatprep.subr.mxu0 %v13528_v50 }
 0xfa3   :  { %5008 = vmatpush3.msra.mxu0 %v4791_v31 }
 0xfa4   :  { %5009 = vmatprep.subr.mxu0 %v13528_v50 }
 0xfa5   :  { %5010 = vmatpush3.msra.mxu0 %v4790_v42 }
0x1046   :  { %v4684_v46 = vpop.f32.mrf.mxu0  ;;  %v4755_v14 = vpop.f32.mrf.mxu1 }
0x1047   :  { %v4685_v48 = vadd.f32 %v4684_v46, %v4479_v43  ;;  %v4756_v21 = vadd.f32 %v4755_v14, %v4550_v44 }
0x1048   :  { %v4686_v51 = vpop.f32.mrf.mxu0  ;;  %v4757_v19 = vpop.f32.mrf.mxu1 }
0x1049   :  { %v4760_v11 = vadd.f32 %v4685_v48, %v7280_v1  ;;  %v4687_v15 = vadd.f32 %v4686_v51, %v4481_v45  ;;  %v4758_v50 = vadd.f32 %v4757_v19, %v4552_v47  ;;  %v4762_v28 = vadd.f32 %v4756_v21, %v7295_v56 }
0x104b   :  { %v4958_v16 = vmul.f32 -1.442695, %v4760_v11  ;;  %v4761_v17 = vadd.f32 %v4687_v15, %v7284_v2  ;;  %v4763_v20 = vadd.f32 %v4758_v50, %v7290_v55 }
0x104d   :  { %5265 = vpow2.f32 %v4958_v16  ;;  %v4959_v18 = vmul.f32 -1.442695, %v4761_v17  ;;  %v4960_v26 = vmul.f32 -1.442695, %v4763_v20 }
0x104f   :  { %5267 = vpow2.f32 %v4959_v18 }
0x1050   :  { %5269 = vpow2.f32 %v4960_v26 }
0x105a   :  { %v5266_v27 = vpop.eup %5265 }
0x105b   :  { %v4767_v30 = vadd.f32 1.0, %v5266_v27 }
0x105c   :  { %v5268_v62 = vpop.eup %5267 }
0x105d   :  { %5271 = vrcp.f32 %v4767_v30  ;;  %v4773_v1 = vadd.f32 1.0, %v5268_v62  ;;  %v5270_v2 = vpop.eup %5269 }
0x105e   :  { %5273 = vtanh.f32 %v4762_v28  ;;  %v4780_v24 = vadd.f32 1.0, %v5270_v2 }
0x105f   :  { %5275 = vrcp.f32 %v4773_v1 }
0x1060   :  { %5277 = vrcp.f32 %v4780_v24 }
0x106a   :  { %v5272_v41 = vpop.eup %5271 }
0x106b   :  { %v5274_v54 = vpop.eup %5273 }
0x106c   :  { %v5276_v53 = vpop.eup %5275  ;;  %v4784_v12 = vmul.f32 %v5274_v54, %v5272_v41 }
0x106d   :  { %v4783_v55 = vmul.f32 %v5276_v53, %v10898_v49  ;;  %v5278_v29 = vpop.eup %5277 }
0x106f   :  { %v4785_v60 = vadd.f32 %v4784_v12, %v4783_v55 }
0x1071   :  { %5279 = vtanh.f32 %v4785_v60 }
0x107e   :  { %v5280_v56 = vpop.eup %5279 }
0x107f   :  { %v4787_v58 = vmul.f32 %v5280_v56, %v5278_v29 }
0x1081   :  { %4788 = vst [vmem:[#allocation3 + $0x7] sm:$0x1] %v4787_v58 }
0x1088   :  { %v4789_v39 = vld [vmem:[#allocation3] sm:$0xff] }
0x1089   :  { %5012 = vmatmul.mubr.f32.vlgmr.msra.gmra.mxu0 %v4789_v39 }
0x1149   :  { %v4879_v32 = vpop.f32.mrf.mxu0 }
0x114a   :  { %v4880_v10 = vadd.f32 %v4961_v52, %v4879_v32 }
0x114b   :  { %v5013_v23 = vpop.f32.mrf.mxu0 }
0x114c   :  { %v4884_v57 = vsel %vm4883_vm1, %v4880_v10, -inf }
0x114d   :  { %4885 = vmax.xlane.f32.xlu0 %v4884_v57 }
0x11d6   :  { %v4886_v49 = vpop.xlane.xlu0 %4885 }
0x11d7   :  { %v4887_v36 = vsub.f32 %v4880_v10, %v4886_v49 }
0x11d9   :  { %v4888_v0 = vmul.f32 1.442695, %v4887_v36 }
0x11db   :  { %5281 = vpow2.f32 %v4888_v0 }
0x11e8   :  { %v5282_v22 = vpop.eup %5281 }
0x11e9   :  { %v4890_v40 = vsel %vm4883_vm1, %v5282_v22, 0.0 }
0x11ea   :  { %4891 = vadd.xlane.f32.xlu0 %v4890_v40 }
0x1273   :  { %v4892_v4 = vpop.xlane.xlu0 %4891 }
0x1274   :  { %5283 = vlog2.f32 %v4892_v4 }
0x1281   :  { %v5284_v5 = vpop.eup %5283 }
0x1282   :  { %v4894_v3 = vmul.f32 0.6931472, %v5284_v5 }
0x1284   :  { %v4895_v33 = vsub.f32 %v4887_v36, %v4894_v3 }
0x1286   :  { %4896 = vst.msk [vmem:[#allocation10] sm:$0xff] %vm4883_vm1, %v4895_v33 }
0x1287   :  { %6574 = shalt.err (!%p6571_p5)
}
0x1288   :  { %4906 = dma.vmem_to_hbm [thread:$0]  %s4904_s7, 128, %s11060_s8, [#allocation6]  }
0x1289   :  { %6587 = dma.done.wait [#allocation6], 128  }
0x128a   :  { %6588 = vsyncadd [#allocation6], 4294967168 }
0x128b   :  { %4910 = vsyncpa [#allocation5], 1 }
0x128c   :  { %4911 = vsyncpa [#allocation8], 1 }
0x128d   :  { %4912 = vsyncpa [#allocation6], 1 }

</bundles_post_ra>
